<compile_context>
chip_gen: v7x
topology: tpu7x:2x2x1
jax: 0.10.0
libtpu: 0.0.40
codegen_flags: <defaults>
</compile_context>

<pallas_src>
import math

import numpy as np
import jax
import jax.numpy as jnp
from jax import lax
from jax.experimental import pallas as pl
from jax.experimental.pallas import tpu as pltpu

_BIG = 1e30  # large finite "infinity" for the (min,+) scans


def _make_kernel(Nb, T, Tb, K, Lout, n_shift):
    """Builds the Pallas kernel body for fixed static shapes."""
    L = K * Tb
    f32 = jnp.float32

    def kernel(x_ref, xcc_ref, bflat_ref, b2_ref, tri_ref, shifts_ref,
               fills_ref, bt_ref, log_ref, cc_ref, d_scratch, cc_scratch):
        # ---- 1. squared-euclidean cost matrix, all samples x all classes ----
        x = x_ref[...]                                         # (T*Nb, C)
        x2 = jnp.sum(x * x, axis=1, keepdims=True)             # (T*Nb, 1)
        g = lax.dot_general(x, bflat_ref[...], (((1,), (1,)), ((), ())),
                            preferred_element_type=f32)        # (T*Nb, K*Tb)
        d_scratch[...] = jnp.maximum(x2 + b2_ref[...] - 2.0 * g, 0.0)

        def shift_right(v, idx):
            # Within-class lane shift via a block-diagonal 0/1 matmul; lanes with
            # no source get 0 from the matmul and +_BIG from the fill vector.
            sh = jnp.dot(v, shifts_ref[idx], preferred_element_type=f32)
            return sh + fills_ref[idx]

        def cumsum_blocks(v):                                  # per-class prefix sum
            return jnp.dot(v, tri_ref[...], preferred_element_type=f32)

        # ---- 2. DTW dynamic program, serial over T, batched over (Nb, K) ----
        # acc[i,j] = D[i,j] + min(acc[i-1,j], acc[i,j-1], acc[i-1,j-1]); each row
        # is solved in closed form via a prefix-sum + prefix-min (min,+) scan.
        prev0 = cumsum_blocks(d_scratch[pl.ds(0, Nb), :])      # row 0 = cumsum

        def row_body(i, prev):
            r0 = pl.multiple_of(i * Nb, Nb)
            d = d_scratch[pl.ds(r0, Nb), :]                    # (Nb, K*Tb)
            s_inc = cumsum_blocks(d)                           # inclusive prefix sum
            p_exc = s_inc - d                                  # exclusive prefix sum
            m = jnp.minimum(prev, shift_right(prev, 0))        # min(prev[j], prev[j-1])
            w = m - p_exc
            for idx in range(n_shift):                         # Hillis-Steele prefix-min
                w = jnp.minimum(w, shift_right(w, idx))
            return s_inc + w

        prev = lax.fori_loop(1, T, row_body, prev0,
                             unroll=True if T <= 64 else 8)

        # DTW distance sits at lane (k*Tb + Tb - 1); extract with a 0/1 matmul.
        sel = (lax.broadcasted_iota(jnp.int32, (L, K), 0)
               == lax.broadcasted_iota(jnp.int32, (L, K), 1) * Tb + (Tb - 1)
               ).astype(f32)
        dtw = jnp.dot(prev, sel, preferred_element_type=f32)   # (Nb, K)
        log_ref[...] = jnp.log(jnp.maximum(dtw, 1e-30))        # guard log(0)

        # ---- 3. per-channel max full cross-correlation (shift-accumulate) ---
        # cc[l, n, k, c] = sum_s x_pad[n, l+s, c] * b[k, s, c]; rows = (lag, sample),
        # lanes = (class, channel).  Tb pure-VPU FMA steps, then a max over lags.
        cc_scratch[...] = jnp.zeros_like(cc_scratch)
        for s in range(Tb):                                    # static, Tb small
            xs = xcc_ref[pl.ds(s * Nb, Lout * Nb), :]          # (Lout*Nb, K*C)
            cc_scratch[...] += xs * bt_ref[pl.ds(s, 1), :]
        cc_max = cc_scratch[pl.ds(0, Nb), :]
        for l in range(1, Lout):                               # max over all lags
            cc_max = jnp.maximum(cc_max, cc_scratch[pl.ds(l * Nb, Nb), :])
        cc_ref[...] = cc_max                                   # (Nb, K*C)

    return kernel


def unknown_detector_distances(x_ntc, barycenters, *, block_n=8):
    """Per sample: log DTW (sqeuclidean) distance to each barycenter and the
    per-channel max full-mode cross-correlation with each barycenter."""
    N, T, C = x_ntc.shape
    K, Tb, Cb = barycenters.shape
    assert Cb == C and Tb >= 2 and T >= 1

    Nb = int(block_n)
    assert Nb % 8 == 0, "block_n must be a multiple of the sublane size (8)"
    nblocks = pl.cdiv(N, Nb)
    N_pad = nblocks * Nb
    L = K * Tb
    KC = K * C
    Lout = T + Tb - 1                 # number of full-mode lags
    Tpad = T + 2 * (Tb - 1)           # zero-padded time length for the cc

    f32 = jnp.float32
    x = x_ntc.astype(f32)
    if N_pad != N:
        x = jnp.concatenate([x, jnp.zeros((N_pad - N, T, C), f32)], axis=0)

    # DTW input: rows ordered (block, time, sample-within-block).
    x_dtw = (x.reshape(nblocks, Nb, T, C)
              .transpose(0, 2, 1, 3)
              .reshape(nblocks * T * Nb, C))

    # Cross-correlation input: zero-padded in time, channels tiled K times
    # (lane index k*C + c), same (block, time, sample) row ordering.
    x_pad = jnp.pad(x, ((0, 0), (Tb - 1, Tb - 1), (0, 0)))
    x_cc = (jnp.tile(x_pad, (1, 1, K))
            .reshape(nblocks, Nb, Tpad, KC)
            .transpose(0, 2, 1, 3)
            .reshape(nblocks * Tpad * Nb, KC))

    bc = barycenters.astype(f32)
    b_flat = bc.reshape(L, C)                                  # (K*Tb, C)
    b2 = jnp.sum(b_flat * b_flat, axis=1)[None, :]             # (1, K*Tb)
    bt = jnp.transpose(bc, (1, 0, 2)).reshape(Tb, KC)          # bt[s, k*C+c] = b[k,s,c]

    # Host-built block-diagonal prefix-sum / shift matrices + fill vectors.
    idx = np.arange(L)
    blk = idx // Tb
    off = idx % Tb
    same = blk[:, None] == blk[None, :]
    tri = (same & (off[:, None] <= off[None, :])).astype(np.float32)
    shift_amts = []
    a = 1
    while a < Tb:
        shift_amts.append(a)
        a *= 2
    shifts = np.stack(
        [(same & (off[None, :] - off[:, None] == amt)).astype(np.float32)
         for amt in shift_amts], axis=0)                       # (S, L, L)
    fills = np.stack(
        [np.where(off < amt, _BIG, 0.0).astype(np.float32)[None, :]
         for amt in shift_amts], axis=0)                       # (S, 1, L)
    n_shift = len(shift_amts)
    assert shift_amts[0] == 1

    kernel = _make_kernel(Nb, T, Tb, K, Lout, n_shift)

    grid_spec = pltpu.PrefetchScalarGridSpec(
        num_scalar_prefetch=0,
        grid=(nblocks,),
        in_specs=[
            pl.BlockSpec((T * Nb, C), lambda g: (g, 0)),          # x (DTW)
            pl.BlockSpec((Tpad * Nb, KC), lambda g: (g, 0)),      # x (cross-corr)
            pl.BlockSpec((L, C), lambda g: (0, 0)),               # barycenters, flat
            pl.BlockSpec((1, L), lambda g: (0, 0)),               # ||b||^2
            pl.BlockSpec((L, L), lambda g: (0, 0)),               # block-diag prefix-sum
            pl.BlockSpec((n_shift, L, L), lambda g: (0, 0, 0)),   # block-diag shifts
            pl.BlockSpec((n_shift, 1, L), lambda g: (0, 0, 0)),   # +BIG fill vectors
            pl.BlockSpec((Tb, KC), lambda g: (0, 0)),             # b laid out (s, k*C+c)
        ],
        out_specs=[
            pl.BlockSpec((Nb, K), lambda g: (g, 0)),              # log DTW
            pl.BlockSpec((Nb, KC), lambda g: (g, 0)),             # max cross-corr
        ],
        scratch_shapes=[
            pltpu.VMEM((T * Nb, L), jnp.float32),                 # cost matrix D
            pltpu.VMEM((Lout * Nb, KC), jnp.float32),             # cc accumulator
        ],
    )

    log_dtw, cc_max = pl.pallas_call(
        kernel,
        out_shape=(
            jax.ShapeDtypeStruct((N_pad, K), jnp.float32),
            jax.ShapeDtypeStruct((N_pad, KC), jnp.float32),
        ),
        grid_spec=grid_spec,
        compiler_params=pltpu.CompilerParams(
            dimension_semantics=("parallel",)),                   # independent batch blocks
    )(x_dtw, x_cc, b_flat, b2,
      jnp.asarray(tri), jnp.asarray(shifts), jnp.asarray(fills), bt)

    return log_dtw[:N, :], cc_max[:N, :].reshape(N, K, C)


def unknown_detector_forward(x_nct, preds, barycenters, top_distances, bottom_cc,
                             *, block_n=8):
    """JAX equivalent of UnknownDetector.forward.

    x_nct: (N, C, T) float, preds: (N,) int.
    Returns preds with samples flagged unknown set to num_class (=K).
    """
    num_class = barycenters.shape[0]
    x_ntc = jnp.transpose(x_nct, (0, 2, 1)).astype(jnp.float32)
    log_dtw, cc_max = unknown_detector_distances(x_ntc, barycenters,
                                                 block_n=block_n)

    # unknown_detector: ALL log-DTW distances strictly above per-class thresholds.
    dtw_unknown = jnp.all(log_dtw > top_distances[None, :], axis=1)
    # cc_unknown_detector: for EVERY class, some channel's max cross-correlation
    # is NOT strictly above the per-class/channel floor.
    class_fails = jnp.any(cc_max <= bottom_cc[None, :, :], axis=2)
    cc_unknown = jnp.all(class_fails, axis=1)

    unknown = jnp.logical_or(cc_unknown, dtw_unknown)
    return jnp.where(unknown, num_class, preds)


def _reference_distances(x_ntc, barycenters):
    """Pure numpy reference (explicit DTW DP + np.correlate)."""
    x = np.asarray(x_ntc, dtype=np.float64)
    bc = np.asarray(barycenters, dtype=np.float64)
    N, T, C = x.shape
    K, Tb, _ = bc.shape
    logd = np.zeros((N, K))
    ccm = np.zeros((N, K, C))
    for n in range(N):
        for k in range(K):
            D = ((x[n][:, None, :] - bc[k][None, :, :]) ** 2).sum(-1)
            acc = np.zeros((T, Tb))
            acc[0, 0] = D[0, 0]
            for j in range(1, Tb):
                acc[0, j] = D[0, j] + acc[0, j - 1]
            for i in range(1, T):
                acc[i, 0] = D[i, 0] + acc[i - 1, 0]
                for j in range(1, Tb):
                    acc[i, j] = D[i, j] + min(acc[i - 1, j], acc[i, j - 1],
                                              acc[i - 1, j - 1])
            logd[n, k] = math.log(acc[-1, -1])
            for ch in range(C):
                ccm[n, k, ch] = np.correlate(x[n][:, ch], bc[k][:, ch],
                                             mode="full").max()
    return logd, ccm


if __name__ == "__main__":
    key = jax.random.PRNGKey(0)
    k_x, k_bc, k_top, k_cc, k_pred = jax.random.split(key, 5)

    N, C, T = 2, 4, 16        # batch, channels, time (PyTorch-style NCT input)
    num_class = 3             # cfg.dataset.num_class - 1
    Tb = 16                   # barycenter length

    x = jax.random.normal(k_x, (N, C, T), dtype=jnp.float32)
    # Synthetic, deterministic stand-ins for the .npy / .pkl derived parameters:
    barycenters = jax.random.normal(k_bc, (num_class, Tb, C), dtype=jnp.float32)
    top_distances = jax.random.uniform(k_top, (num_class,), dtype=jnp.float32,
                                       minval=4.0, maxval=5.5)
    bottom_cc = 0.5 * jax.random.normal(k_cc, (num_class, C), dtype=jnp.float32)
    preds = jax.random.randint(k_pred, (N,), 0, num_class)

    new_preds = unknown_detector_forward(x, preds, barycenters,
                                         top_distances, bottom_cc)
    new_preds = jax.block_until_ready(new_preds)

    # Verify the kernel's hot-path outputs against a pure-numpy reference.
    x_ntc = jnp.transpose(x, (0, 2, 1))
    log_dtw, cc_max = unknown_detector_distances(x_ntc, barycenters)
    log_dtw, cc_max = jax.block_until_ready((log_dtw, cc_max))
    ref_log, ref_cc = _reference_distances(np.asarray(x_ntc), np.asarray(barycenters))
    np.testing.assert_allclose(np.asarray(log_dtw), ref_log, rtol=2e-3, atol=2e-3)
    np.testing.assert_allclose(np.asarray(cc_max), ref_cc, rtol=2e-3, atol=2e-3)

    print("KERNEL_OK")
</pallas_src>

<mosaic_0001>
module attributes {stable_mosaic.version = 11 : i64} {
  func.func @kernel(%arg0: i32, %arg1: memref<128x4xf32, #tpu.memory_space<vmem>>, %arg2: memref<368x12xf32, #tpu.memory_space<vmem>>, %arg3: memref<48x4xf32, #tpu.memory_space<vmem>>, %arg4: memref<1x48xf32, #tpu.memory_space<vmem>>, %arg5: memref<48x48xf32, #tpu.memory_space<vmem>>, %arg6: memref<4x48x48xf32, #tpu.memory_space<vmem>>, %arg7: memref<4x1x48xf32, #tpu.memory_space<vmem>>, %arg8: memref<16x12xf32, #tpu.memory_space<vmem>>, %arg9: memref<8x3xf32, #tpu.memory_space<vmem>>, %arg10: memref<8x12xf32, #tpu.memory_space<vmem>>, %arg11: memref<128x48xf32, #tpu.memory_space<vmem>>, %arg12: memref<248x12xf32, #tpu.memory_space<vmem>>) attributes {dimension_semantics = [#tpu.dimension_semantics<parallel>], iteration_bounds = array<i64: 1>, scalar_prefetch = 0 : i64, scratch_operands = 2 : i64, tpu.core_type = #tpu.core_type<tc>, window_params = [{transform_indices = @transform_0, window_bounds = array<i64: 128, 4>}, {transform_indices = @transform_1, window_bounds = array<i64: 368, 12>}, {pipeline_mode = #tpu.pipeline_mode<synchronous>, transform_indices = @transform_2, window_bounds = array<i64: 48, 4>}, {pipeline_mode = #tpu.pipeline_mode<synchronous>, transform_indices = @transform_3, window_bounds = array<i64: 1, 48>}, {pipeline_mode = #tpu.pipeline_mode<synchronous>, transform_indices = @transform_4, window_bounds = array<i64: 48, 48>}, {pipeline_mode = #tpu.pipeline_mode<synchronous>, transform_indices = @transform_5, window_bounds = array<i64: 4, 48, 48>}, {pipeline_mode = #tpu.pipeline_mode<synchronous>, transform_indices = @transform_6, window_bounds = array<i64: 4, 1, 48>}, {pipeline_mode = #tpu.pipeline_mode<synchronous>, transform_indices = @transform_7, window_bounds = array<i64: 16, 12>}, {transform_indices = @transform_8, window_bounds = array<i64: 8, 3>}, {transform_indices = @transform_9, window_bounds = array<i64: 8, 12>}]} {
    %c0 = arith.constant 0 : index
    %c0_0 = arith.constant 0 : index
    %0 = vector.load %arg1[%c0, %c0_0] : memref<128x4xf32, #tpu.memory_space<vmem>>, vector<128x4xf32>
    %1 = arith.mulf %0, %0 : vector<128x4xf32>
    %cst = arith.constant dense<0.000000e+00> : vector<128xf32>
    %2 = vector.multi_reduction <add>, %1, %cst [1] : vector<128x4xf32> to vector<128xf32>
    %3 = vector.shape_cast %2 : vector<128xf32> to vector<128x1xf32>
    %c0_1 = arith.constant 0 : index
    %c0_2 = arith.constant 0 : index
    %4 = vector.load %arg3[%c0_1, %c0_2] : memref<48x4xf32, #tpu.memory_space<vmem>>, vector<48x4xf32>
    %cst_3 = arith.constant dense<0.000000e+00> : vector<128x48xf32>
    %5 = tpu.matmul %0, %4, %cst_3 {dimension_numbers = #tpu.dot_dimension_numbers<[1], [1], [0], [0], [0, 0, 1, 0], [], []>} : vector<128x4xf32>, vector<48x4xf32>, vector<128x48xf32> -> vector<128x48xf32>
    %c0_4 = arith.constant 0 : index
    %c0_5 = arith.constant 0 : index
    %6 = vector.load %arg4[%c0_4, %c0_5] : memref<1x48xf32, #tpu.memory_space<vmem>>, vector<1x48xf32>
    %7 = vector.broadcast %3 : vector<128x1xf32> to vector<128x48xf32>
    %8 = vector.broadcast %6 : vector<1x48xf32> to vector<128x48xf32>
    %9 = arith.addf %7, %8 : vector<128x48xf32>
    %cst_6 = arith.constant 2.000000e+00 : f32
    %10 = vector.broadcast %cst_6 : f32 to vector<128x48xf32>
    %11 = arith.mulf %10, %5 : vector<128x48xf32>
    %12 = arith.subf %9, %11 : vector<128x48xf32>
    %cst_7 = arith.constant 0.000000e+00 : f32
    %13 = vector.broadcast %cst_7 : f32 to vector<128x48xf32>
    %14 = arith.maximumf %12, %13 : vector<128x48xf32>
    %c0_8 = arith.constant 0 : index
    %c0_9 = arith.constant 0 : index
    %15 = vector.load %arg11[%c0_8, %c0_9] : memref<128x48xf32, #tpu.memory_space<vmem>>, vector<128x48xf32>
    tpu.vector_store %arg11[%c0_8, %c0_9], %14 {strides = array<i32>} : memref<128x48xf32, #tpu.memory_space<vmem>>, vector<128x48xf32>,
    %c0_10 = arith.constant 0 : index
    %c0_11 = arith.constant 0 : index
    %16 = vector.load %arg11[%c0_10, %c0_11] : memref<128x48xf32, #tpu.memory_space<vmem>>, vector<8x48xf32>
    %c0_12 = arith.constant 0 : index
    %c0_13 = arith.constant 0 : index
    %17 = vector.load %arg5[%c0_12, %c0_13] : memref<48x48xf32, #tpu.memory_space<vmem>>, vector<48x48xf32>
    %cst_14 = arith.constant dense<0.000000e+00> : vector<8x48xf32>
    %18 = tpu.matmul %16, %17, %cst_14 {dimension_numbers = #tpu.dot_dimension_numbers<[1], [0], [0], [1], [0, 0, 1, 1], [], []>} : vector<8x48xf32>, vector<48x48xf32>, vector<8x48xf32> -> vector<8x48xf32>
    %c1_i32 = arith.constant 1 : i32
    %c8_i32 = arith.constant 8 : i32
    %19 = arith.muli %c1_i32, %c8_i32 : i32
    %20 = tpu.assume_multiple %19, 8 : i32
    %21 = arith.index_cast %20 : i32 to index
    %c0_15 = arith.constant 0 : index
    %22 = vector.load %arg11[%21, %c0_15] : memref<128x48xf32, #tpu.memory_space<vmem>>, vector<8x48xf32>
    %c0_16 = arith.constant 0 : index
    %c0_17 = arith.constant 0 : index
    %23 = vector.load %arg5[%c0_16, %c0_17] : memref<48x48xf32, #tpu.memory_space<vmem>>, vector<48x48xf32>
    %cst_18 = arith.constant dense<0.000000e+00> : vector<8x48xf32>
    %24 = tpu.matmul %22, %23, %cst_18 {dimension_numbers = #tpu.dot_dimension_numbers<[1], [0], [0], [1], [0, 0, 1, 1], [], []>} : vector<8x48xf32>, vector<48x48xf32>, vector<8x48xf32> -> vector<8x48xf32>
    %25 = arith.subf %24, %22 : vector<8x48xf32>
    %c0_19 = arith.constant 0 : index
    %c0_20 = arith.constant 0 : index
    %c0_21 = arith.constant 0 : index
    %26 = vector.load %arg6[%c0_19, %c0_20, %c0_21] : memref<4x48x48xf32, #tpu.memory_space<vmem>>, vector<1x48x48xf32>
    %27 = vector.shape_cast %26 : vector<1x48x48xf32> to vector<48x48xf32>
    %cst_22 = arith.constant dense<0.000000e+00> : vector<8x48xf32>
    %28 = tpu.matmul %18, %27, %cst_22 {dimension_numbers = #tpu.dot_dimension_numbers<[1], [0], [0], [1], [0, 0, 1, 1], [], []>} : vector<8x48xf32>, vector<48x48xf32>, vector<8x48xf32> -> vector<8x48xf32>
    %c0_23 = arith.constant 0 : index
    %c0_24 = arith.constant 0 : index
    %c0_25 = arith.constant 0 : index
    %29 = vector.load %arg7[%c0_23, %c0_24, %c0_25] : memref<4x1x48xf32, #tpu.memory_space<vmem>>, vector<1x1x48xf32>
    %30 = vector.shape_cast %29 : vector<1x1x48xf32> to vector<1x48xf32>
    %31 = vector.broadcast %30 : vector<1x48xf32> to vector<8x48xf32>
    %32 = arith.addf %28, %31 : vector<8x48xf32>
    %33 = arith.minimumf %18, %32 : vector<8x48xf32>
    %34 = arith.subf %33, %25 : vector<8x48xf32>
    %c0_26 = arith.constant 0 : index
    %c0_27 = arith.constant 0 : index
    %c0_28 = arith.constant 0 : index
    %35 = vector.load %arg6[%c0_26, %c0_27, %c0_28] : memref<4x48x48xf32, #tpu.memory_space<vmem>>, vector<1x48x48xf32>
    %36 = vector.shape_cast %35 : vector<1x48x48xf32> to vector<48x48xf32>
    %cst_29 = arith.constant dense<0.000000e+00> : vector<8x48xf32>
    %37 = tpu.matmul %34, %36, %cst_29 {dimension_numbers = #tpu.dot_dimension_numbers<[1], [0], [0], [1], [0, 0, 1, 1], [], []>} : vector<8x48xf32>, vector<48x48xf32>, vector<8x48xf32> -> vector<8x48xf32>
    %c0_30 = arith.constant 0 : index
    %c0_31 = arith.constant 0 : index
    %c0_32 = arith.constant 0 : index
    %38 = vector.load %arg7[%c0_30, %c0_31, %c0_32] : memref<4x1x48xf32, #tpu.memory_space<vmem>>, vector<1x1x48xf32>
    %39 = vector.shape_cast %38 : vector<1x1x48xf32> to vector<1x48xf32>
    %40 = vector.broadcast %39 : vector<1x48xf32> to vector<8x48xf32>
    %41 = arith.addf %37, %40 : vector<8x48xf32>
    %42 = arith.minimumf %34, %41 : vector<8x48xf32>
    %c1 = arith.constant 1 : index
    %c0_33 = arith.constant 0 : index
    %c0_34 = arith.constant 0 : index
    %43 = vector.load %arg6[%c1, %c0_33, %c0_34] : memref<4x48x48xf32, #tpu.memory_space<vmem>>, vector<1x48x48xf32>
    %44 = vector.shape_cast %43 : vector<1x48x48xf32> to vector<48x48xf32>
    %cst_35 = arith.constant dense<0.000000e+00> : vector<8x48xf32>
    %45 = tpu.matmul %42, %44, %cst_35 {dimension_numbers = #tpu.dot_dimension_numbers<[1], [0], [0], [1], [0, 0, 1, 1], [], []>} : vector<8x48xf32>, vector<48x48xf32>, vector<8x48xf32> -> vector<8x48xf32>
    %c1_36 = arith.constant 1 : index
    %c0_37 = arith.constant 0 : index
    %c0_38 = arith.constant 0 : index
    %46 = vector.load %arg7[%c1_36, %c0_37, %c0_38] : memref<4x1x48xf32, #tpu.memory_space<vmem>>, vector<1x1x48xf32>
    %47 = vector.shape_cast %46 : vector<1x1x48xf32> to vector<1x48xf32>
    %48 = vector.broadcast %47 : vector<1x48xf32> to vector<8x48xf32>
    %49 = arith.addf %45, %48 : vector<8x48xf32>
    %50 = arith.minimumf %42, %49 : vector<8x48xf32>
    %c2 = arith.constant 2 : index
    %c0_39 = arith.constant 0 : index
    %c0_40 = arith.constant 0 : index
    %51 = vector.load %arg6[%c2, %c0_39, %c0_40] : memref<4x48x48xf32, #tpu.memory_space<vmem>>, vector<1x48x48xf32>
    %52 = vector.shape_cast %51 : vector<1x48x48xf32> to vector<48x48xf32>
    %cst_41 = arith.constant dense<0.000000e+00> : vector<8x48xf32>
    %53 = tpu.matmul %50, %52, %cst_41 {dimension_numbers = #tpu.dot_dimension_numbers<[1], [0], [0], [1], [0, 0, 1, 1], [], []>} : vector<8x48xf32>, vector<48x48xf32>, vector<8x48xf32> -> vector<8x48xf32>
    %c2_42 = arith.constant 2 : index
    %c0_43 = arith.constant 0 : index
    %c0_44 = arith.constant 0 : index
    %54 = vector.load %arg7[%c2_42, %c0_43, %c0_44] : memref<4x1x48xf32, #tpu.memory_space<vmem>>, vector<1x1x48xf32>
    %55 = vector.shape_cast %54 : vector<1x1x48xf32> to vector<1x48xf32>
    %56 = vector.broadcast %55 : vector<1x48xf32> to vector<8x48xf32>
    %57 = arith.addf %53, %56 : vector<8x48xf32>
    %58 = arith.minimumf %50, %57 : vector<8x48xf32>
    %c3 = arith.constant 3 : index
    %c0_45 = arith.constant 0 : index
    %c0_46 = arith.constant 0 : index
    %59 = vector.load %arg6[%c3, %c0_45, %c0_46] : memref<4x48x48xf32, #tpu.memory_space<vmem>>, vector<1x48x48xf32>
    %60 = vector.shape_cast %59 : vector<1x48x48xf32> to vector<48x48xf32>
    %cst_47 = arith.constant dense<0.000000e+00> : vector<8x48xf32>
    %61 = tpu.matmul %58, %60, %cst_47 {dimension_numbers = #tpu.dot_dimension_numbers<[1], [0], [0], [1], [0, 0, 1, 1], [], []>} : vector<8x48xf32>, vector<48x48xf32>, vector<8x48xf32> -> vector<8x48xf32>
    %c3_48 = arith.constant 3 : index
    %c0_49 = arith.constant 0 : index
    %c0_50 = arith.constant 0 : index
    %62 = vector.load %arg7[%c3_48, %c0_49, %c0_50] : memref<4x1x48xf32, #tpu.memory_space<vmem>>, vector<1x1x48xf32>
    %63 = vector.shape_cast %62 : vector<1x1x48xf32> to vector<1x48xf32>
    %64 = vector.broadcast %63 : vector<1x48xf32> to vector<8x48xf32>
    %65 = arith.addf %61, %64 : vector<8x48xf32>
    %66 = arith.minimumf %58, %65 : vector<8x48xf32>
    %67 = arith.addf %24, %66 : vector<8x48xf32>
    %c2_i32 = arith.constant 2 : i32
    %c8_i32_51 = arith.constant 8 : i32
    %68 = arith.muli %c2_i32, %c8_i32_51 : i32
    %69 = tpu.assume_multiple %68, 8 : i32
    %70 = arith.index_cast %69 : i32 to index
    %c0_52 = arith.constant 0 : index
    %71 = vector.load %arg11[%70, %c0_52] : memref<128x48xf32, #tpu.memory_space<vmem>>, vector<8x48xf32>
    %c0_53 = arith.constant 0 : index
    %c0_54 = arith.constant 0 : index
    %72 = vector.load %arg5[%c0_53, %c0_54] : memref<48x48xf32, #tpu.memory_space<vmem>>, vector<48x48xf32>
    %cst_55 = arith.constant dense<0.000000e+00> : vector<8x48xf32>
    %73 = tpu.matmul %71, %72, %cst_55 {dimension_numbers = #tpu.dot_dimension_numbers<[1], [0], [0], [1], [0, 0, 1, 1], [], []>} : vector<8x48xf32>, vector<48x48xf32>, vector<8x48xf32> -> vector<8x48xf32>
    %74 = arith.subf %73, %71 : vector<8x48xf32>
    %c0_56 = arith.constant 0 : index
    %c0_57 = arith.constant 0 : index
    %c0_58 = arith.constant 0 : index
    %75 = vector.load %arg6[%c0_56, %c0_57, %c0_58] : memref<4x48x48xf32, #tpu.memory_space<vmem>>, vector<1x48x48xf32>
    %76 = vector.shape_cast %75 : vector<1x48x48xf32> to vector<48x48xf32>
    %cst_59 = arith.constant dense<0.000000e+00> : vector<8x48xf32>
    %77 = tpu.matmul %67, %76, %cst_59 {dimension_numbers = #tpu.dot_dimension_numbers<[1], [0], [0], [1], [0, 0, 1, 1], [], []>} : vector<8x48xf32>, vector<48x48xf32>, vector<8x48xf32> -> vector<8x48xf32>
    %c0_60 = arith.constant 0 : index
    %c0_61 = arith.constant 0 : index
    %c0_62 = arith.constant 0 : index
    %78 = vector.load %arg7[%c0_60, %c0_61, %c0_62] : memref<4x1x48xf32, #tpu.memory_space<vmem>>, vector<1x1x48xf32>
    %79 = vector.shape_cast %78 : vector<1x1x48xf32> to vector<1x48xf32>
    %80 = vector.broadcast %79 : vector<1x48xf32> to vector<8x48xf32>
    %81 = arith.addf %77, %80 : vector<8x48xf32>
    %82 = arith.minimumf %67, %81 : vector<8x48xf32>
    %83 = arith.subf %82, %74 : vector<8x48xf32>
    %c0_63 = arith.constant 0 : index
    %c0_64 = arith.constant 0 : index
    %c0_65 = arith.constant 0 : index
    %84 = vector.load %arg6[%c0_63, %c0_64, %c0_65] : memref<4x48x48xf32, #tpu.memory_space<vmem>>, vector<1x48x48xf32>
    %85 = vector.shape_cast %84 : vector<1x48x48xf32> to vector<48x48xf32>
    %cst_66 = arith.constant dense<0.000000e+00> : vector<8x48xf32>
    %86 = tpu.matmul %83, %85, %cst_66 {dimension_numbers = #tpu.dot_dimension_numbers<[1], [0], [0], [1], [0, 0, 1, 1], [], []>} : vector<8x48xf32>, vector<48x48xf32>, vector<8x48xf32> -> vector<8x48xf32>
    %c0_67 = arith.constant 0 : index
    %c0_68 = arith.constant 0 : index
    %c0_69 = arith.constant 0 : index
    %87 = vector.load %arg7[%c0_67, %c0_68, %c0_69] : memref<4x1x48xf32, #tpu.memory_space<vmem>>, vector<1x1x48xf32>
    %88 = vector.shape_cast %87 : vector<1x1x48xf32> to vector<1x48xf32>
    %89 = vector.broadcast %88 : vector<1x48xf32> to vector<8x48xf32>
    %90 = arith.addf %86, %89 : vector<8x48xf32>
    %91 = arith.minimumf %83, %90 : vector<8x48xf32>
    %c1_70 = arith.constant 1 : index
    %c0_71 = arith.constant 0 : index
    %c0_72 = arith.constant 0 : index
    %92 = vector.load %arg6[%c1_70, %c0_71, %c0_72] : memref<4x48x48xf32, #tpu.memory_space<vmem>>, vector<1x48x48xf32>
    %93 = vector.shape_cast %92 : vector<1x48x48xf32> to vector<48x48xf32>
    %cst_73 = arith.constant dense<0.000000e+00> : vector<8x48xf32>
    %94 = tpu.matmul %91, %93, %cst_73 {dimension_numbers = #tpu.dot_dimension_numbers<[1], [0], [0], [1], [0, 0, 1, 1], [], []>} : vector<8x48xf32>, vector<48x48xf32>, vector<8x48xf32> -> vector<8x48xf32>
    %c1_74 = arith.constant 1 : index
    %c0_75 = arith.constant 0 : index
    %c0_76 = arith.constant 0 : index
    %95 = vector.load %arg7[%c1_74, %c0_75, %c0_76] : memref<4x1x48xf32, #tpu.memory_space<vmem>>, vector<1x1x48xf32>
    %96 = vector.shape_cast %95 : vector<1x1x48xf32> to vector<1x48xf32>
    %97 = vector.broadcast %96 : vector<1x48xf32> to vector<8x48xf32>
    %98 = arith.addf %94, %97 : vector<8x48xf32>
    %99 = arith.minimumf %91, %98 : vector<8x48xf32>
    %c2_77 = arith.constant 2 : index
    %c0_78 = arith.constant 0 : index
    %c0_79 = arith.constant 0 : index
    %100 = vector.load %arg6[%c2_77, %c0_78, %c0_79] : memref<4x48x48xf32, #tpu.memory_space<vmem>>, vector<1x48x48xf32>
    %101 = vector.shape_cast %100 : vector<1x48x48xf32> to vector<48x48xf32>
    %cst_80 = arith.constant dense<0.000000e+00> : vector<8x48xf32>
    %102 = tpu.matmul %99, %101, %cst_80 {dimension_numbers = #tpu.dot_dimension_numbers<[1], [0], [0], [1], [0, 0, 1, 1], [], []>} : vector<8x48xf32>, vector<48x48xf32>, vector<8x48xf32> -> vector<8x48xf32>
    %c2_81 = arith.constant 2 : index
    %c0_82 = arith.constant 0 : index
    %c0_83 = arith.constant 0 : index
    %103 = vector.load %arg7[%c2_81, %c0_82, %c0_83] : memref<4x1x48xf32, #tpu.memory_space<vmem>>, vector<1x1x48xf32>
    %104 = vector.shape_cast %103 : vector<1x1x48xf32> to vector<1x48xf32>
    %105 = vector.broadcast %104 : vector<1x48xf32> to vector<8x48xf32>
    %106 = arith.addf %102, %105 : vector<8x48xf32>
    %107 = arith.minimumf %99, %106 : vector<8x48xf32>
    %c3_84 = arith.constant 3 : index
    %c0_85 = arith.constant 0 : index
    %c0_86 = arith.constant 0 : index
    %108 = vector.load %arg6[%c3_84, %c0_85, %c0_86] : memref<4x48x48xf32, #tpu.memory_space<vmem>>, vector<1x48x48xf32>
    %109 = vector.shape_cast %108 : vector<1x48x48xf32> to vector<48x48xf32>
    %cst_87 = arith.constant dense<0.000000e+00> : vector<8x48xf32>
    %110 = tpu.matmul %107, %109, %cst_87 {dimension_numbers = #tpu.dot_dimension_numbers<[1], [0], [0], [1], [0, 0, 1, 1], [], []>} : vector<8x48xf32>, vector<48x48xf32>, vector<8x48xf32> -> vector<8x48xf32>
    %c3_88 = arith.constant 3 : index
    %c0_89 = arith.constant 0 : index
    %c0_90 = arith.constant 0 : index
    %111 = vector.load %arg7[%c3_88, %c0_89, %c0_90] : memref<4x1x48xf32, #tpu.memory_space<vmem>>, vector<1x1x48xf32>
    %112 = vector.shape_cast %111 : vector<1x1x48xf32> to vector<1x48xf32>
    %113 = vector.broadcast %112 : vector<1x48xf32> to vector<8x48xf32>
    %114 = arith.addf %110, %113 : vector<8x48xf32>
    %115 = arith.minimumf %107, %114 : vector<8x48xf32>
    %116 = arith.addf %73, %115 : vector<8x48xf32>
    %c3_i32 = arith.constant 3 : i32
    %c8_i32_91 = arith.constant 8 : i32
    %117 = arith.muli %c3_i32, %c8_i32_91 : i32
    %118 = tpu.assume_multiple %117, 8 : i32
    %119 = arith.index_cast %118 : i32 to index
    %c0_92 = arith.constant 0 : index
    %120 = vector.load %arg11[%119, %c0_92] : memref<128x48xf32, #tpu.memory_space<vmem>>, vector<8x48xf32>
    %c0_93 = arith.constant 0 : index
    %c0_94 = arith.constant 0 : index
    %121 = vector.load %arg5[%c0_93, %c0_94] : memref<48x48xf32, #tpu.memory_space<vmem>>, vector<48x48xf32>
    %cst_95 = arith.constant dense<0.000000e+00> : vector<8x48xf32>
    %122 = tpu.matmul %120, %121, %cst_95 {dimension_numbers = #tpu.dot_dimension_numbers<[1], [0], [0], [1], [0, 0, 1, 1], [], []>} : vector<8x48xf32>, vector<48x48xf32>, vector<8x48xf32> -> vector<8x48xf32>
    %123 = arith.subf %122, %120 : vector<8x48xf32>
    %c0_96 = arith.constant 0 : index
    %c0_97 = arith.constant 0 : index
    %c0_98 = arith.constant 0 : index
    %124 = vector.load %arg6[%c0_96, %c0_97, %c0_98] : memref<4x48x48xf32, #tpu.memory_space<vmem>>, vector<1x48x48xf32>
    %125 = vector.shape_cast %124 : vector<1x48x48xf32> to vector<48x48xf32>
    %cst_99 = arith.constant dense<0.000000e+00> : vector<8x48xf32>
    %126 = tpu.matmul %116, %125, %cst_99 {dimension_numbers = #tpu.dot_dimension_numbers<[1], [0], [0], [1], [0, 0, 1, 1], [], []>} : vector<8x48xf32>, vector<48x48xf32>, vector<8x48xf32> -> vector<8x48xf32>
    %c0_100 = arith.constant 0 : index
    %c0_101 = arith.constant 0 : index
    %c0_102 = arith.constant 0 : index
    %127 = vector.load %arg7[%c0_100, %c0_101, %c0_102] : memref<4x1x48xf32, #tpu.memory_space<vmem>>, vector<1x1x48xf32>
    %128 = vector.shape_cast %127 : vector<1x1x48xf32> to vector<1x48xf32>
    %129 = vector.broadcast %128 : vector<1x48xf32> to vector<8x48xf32>
    %130 = arith.addf %126, %129 : vector<8x48xf32>
    %131 = arith.minimumf %116, %130 : vector<8x48xf32>
    %132 = arith.subf %131, %123 : vector<8x48xf32>
    %c0_103 = arith.constant 0 : index
    %c0_104 = arith.constant 0 : index
    %c0_105 = arith.constant 0 : index
    %133 = vector.load %arg6[%c0_103, %c0_104, %c0_105] : memref<4x48x48xf32, #tpu.memory_space<vmem>>, vector<1x48x48xf32>
    %134 = vector.shape_cast %133 : vector<1x48x48xf32> to vector<48x48xf32>
    %cst_106 = arith.constant dense<0.000000e+00> : vector<8x48xf32>
    %135 = tpu.matmul %132, %134, %cst_106 {dimension_numbers = #tpu.dot_dimension_numbers<[1], [0], [0], [1], [0, 0, 1, 1], [], []>} : vector<8x48xf32>, vector<48x48xf32>, vector<8x48xf32> -> vector<8x48xf32>
    %c0_107 = arith.constant 0 : index
    %c0_108 = arith.constant 0 : index
    %c0_109 = arith.constant 0 : index
    %136 = vector.load %arg7[%c0_107, %c0_108, %c0_109] : memref<4x1x48xf32, #tpu.memory_space<vmem>>, vector<1x1x48xf32>
    %137 = vector.shape_cast %136 : vector<1x1x48xf32> to vector<1x48xf32>
    %138 = vector.broadcast %137 : vector<1x48xf32> to vector<8x48xf32>
    %139 = arith.addf %135, %138 : vector<8x48xf32>
    %140 = arith.minimumf %132, %139 : vector<8x48xf32>
    %c1_110 = arith.constant 1 : index
    %c0_111 = arith.constant 0 : index
    %c0_112 = arith.constant 0 : index
    %141 = vector.load %arg6[%c1_110, %c0_111, %c0_112] : memref<4x48x48xf32, #tpu.memory_space<vmem>>, vector<1x48x48xf32>
    %142 = vector.shape_cast %141 : vector<1x48x48xf32> to vector<48x48xf32>
    %cst_113 = arith.constant dense<0.000000e+00> : vector<8x48xf32>
    %143 = tpu.matmul %140, %142, %cst_113 {dimension_numbers = #tpu.dot_dimension_numbers<[1], [0], [0], [1], [0, 0, 1, 1], [], []>} : vector<8x48xf32>, vector<48x48xf32>, vector<8x48xf32> -> vector<8x48xf32>
    %c1_114 = arith.constant 1 : index
    %c0_115 = arith.constant 0 : index
    %c0_116 = arith.constant 0 : index
    %144 = vector.load %arg7[%c1_114, %c0_115, %c0_116] : memref<4x1x48xf32, #tpu.memory_space<vmem>>, vector<1x1x48xf32>
    %145 = vector.shape_cast %144 : vector<1x1x48xf32> to vector<1x48xf32>
    %146 = vector.broadcast %145 : vector<1x48xf32> to vector<8x48xf32>
    %147 = arith.addf %143, %146 : vector<8x48xf32>
    %148 = arith.minimumf %140, %147 : vector<8x48xf32>
    %c2_117 = arith.constant 2 : index
    %c0_118 = arith.constant 0 : index
    %c0_119 = arith.constant 0 : index
    %149 = vector.load %arg6[%c2_117, %c0_118, %c0_119] : memref<4x48x48xf32, #tpu.memory_space<vmem>>, vector<1x48x48xf32>
    %150 = vector.shape_cast %149 : vector<1x48x48xf32> to vector<48x48xf32>
    %cst_120 = arith.constant dense<0.000000e+00> : vector<8x48xf32>
    %151 = tpu.matmul %148, %150, %cst_120 {dimension_numbers = #tpu.dot_dimension_numbers<[1], [0], [0], [1], [0, 0, 1, 1], [], []>} : vector<8x48xf32>, vector<48x48xf32>, vector<8x48xf32> -> vector<8x48xf32>
    %c2_121 = arith.constant 2 : index
    %c0_122 = arith.constant 0 : index
    %c0_123 = arith.constant 0 : index
    %152 = vector.load %arg7[%c2_121, %c0_122, %c0_123] : memref<4x1x48xf32, #tpu.memory_space<vmem>>, vector<1x1x48xf32>
    %153 = vector.shape_cast %152 : vector<1x1x48xf32> to vector<1x48xf32>
    %154 = vector.broadcast %153 : vector<1x48xf32> to vector<8x48xf32>
    %155 = arith.addf %151, %154 : vector<8x48xf32>
    %156 = arith.minimumf %148, %155 : vector<8x48xf32>
    %c3_124 = arith.constant 3 : index
    %c0_125 = arith.constant 0 : index
    %c0_126 = arith.constant 0 : index
    %157 = vector.load %arg6[%c3_124, %c0_125, %c0_126] : memref<4x48x48xf32, #tpu.memory_space<vmem>>, vector<1x48x48xf32>
    %158 = vector.shape_cast %157 : vector<1x48x48xf32> to vector<48x48xf32>
    %cst_127 = arith.constant dense<0.000000e+00> : vector<8x48xf32>
    %159 = tpu.matmul %156, %158, %cst_127 {dimension_numbers = #tpu.dot_dimension_numbers<[1], [0], [0], [1], [0, 0, 1, 1], [], []>} : vector<8x48xf32>, vector<48x48xf32>, vector<8x48xf32> -> vector<8x48xf32>
    %c3_128 = arith.constant 3 : index
    %c0_129 = arith.constant 0 : index
    %c0_130 = arith.constant 0 : index
    %160 = vector.load %arg7[%c3_128, %c0_129, %c0_130] : memref<4x1x48xf32, #tpu.memory_space<vmem>>, vector<1x1x48xf32>
    %161 = vector.shape_cast %160 : vector<1x1x48xf32> to vector<1x48xf32>
    %162 = vector.broadcast %161 : vector<1x48xf32> to vector<8x48xf32>
    %163 = arith.addf %159, %162 : vector<8x48xf32>
    %164 = arith.minimumf %156, %163 : vector<8x48xf32>
    %165 = arith.addf %122, %164 : vector<8x48xf32>
    %c4_i32 = arith.constant 4 : i32
    %c8_i32_131 = arith.constant 8 : i32
    %166 = arith.muli %c4_i32, %c8_i32_131 : i32
    %167 = tpu.assume_multiple %166, 8 : i32
    %168 = arith.index_cast %167 : i32 to index
    %c0_132 = arith.constant 0 : index
    %169 = vector.load %arg11[%168, %c0_132] : memref<128x48xf32, #tpu.memory_space<vmem>>, vector<8x48xf32>
    %c0_133 = arith.constant 0 : index
    %c0_134 = arith.constant 0 : index
    %170 = vector.load %arg5[%c0_133, %c0_134] : memref<48x48xf32, #tpu.memory_space<vmem>>, vector<48x48xf32>
    %cst_135 = arith.constant dense<0.000000e+00> : vector<8x48xf32>
    %171 = tpu.matmul %169, %170, %cst_135 {dimension_numbers = #tpu.dot_dimension_numbers<[1], [0], [0], [1], [0, 0, 1, 1], [], []>} : vector<8x48xf32>, vector<48x48xf32>, vector<8x48xf32> -> vector<8x48xf32>
    %172 = arith.subf %171, %169 : vector<8x48xf32>
    %c0_136 = arith.constant 0 : index
    %c0_137 = arith.constant 0 : index
    %c0_138 = arith.constant 0 : index
    %173 = vector.load %arg6[%c0_136, %c0_137, %c0_138] : memref<4x48x48xf32, #tpu.memory_space<vmem>>, vector<1x48x48xf32>
    %174 = vector.shape_cast %173 : vector<1x48x48xf32> to vector<48x48xf32>
    %cst_139 = arith.constant dense<0.000000e+00> : vector<8x48xf32>
    %175 = tpu.matmul %165, %174, %cst_139 {dimension_numbers = #tpu.dot_dimension_numbers<[1], [0], [0], [1], [0, 0, 1, 1], [], []>} : vector<8x48xf32>, vector<48x48xf32>, vector<8x48xf32> -> vector<8x48xf32>
    %c0_140 = arith.constant 0 : index
    %c0_141 = arith.constant 0 : index
    %c0_142 = arith.constant 0 : index
    %176 = vector.load %arg7[%c0_140, %c0_141, %c0_142] : memref<4x1x48xf32, #tpu.memory_space<vmem>>, vector<1x1x48xf32>
    %177 = vector.shape_cast %176 : vector<1x1x48xf32> to vector<1x48xf32>
    %178 = vector.broadcast %177 : vector<1x48xf32> to vector<8x48xf32>
    %179 = arith.addf %175, %178 : vector<8x48xf32>
    %180 = arith.minimumf %165, %179 : vector<8x48xf32>
    %181 = arith.subf %180, %172 : vector<8x48xf32>
    %c0_143 = arith.constant 0 : index
    %c0_144 = arith.constant 0 : index
    %c0_145 = arith.constant 0 : index
    %182 = vector.load %arg6[%c0_143, %c0_144, %c0_145] : memref<4x48x48xf32, #tpu.memory_space<vmem>>, vector<1x48x48xf32>
    %183 = vector.shape_cast %182 : vector<1x48x48xf32> to vector<48x48xf32>
    %cst_146 = arith.constant dense<0.000000e+00> : vector<8x48xf32>
    %184 = tpu.matmul %181, %183, %cst_146 {dimension_numbers = #tpu.dot_dimension_numbers<[1], [0], [0], [1], [0, 0, 1, 1], [], []>} : vector<8x48xf32>, vector<48x48xf32>, vector<8x48xf32> -> vector<8x48xf32>
    %c0_147 = arith.constant 0 : index
    %c0_148 = arith.constant 0 : index
    %c0_149 = arith.constant 0 : index
    %185 = vector.load %arg7[%c0_147, %c0_148, %c0_149] : memref<4x1x48xf32, #tpu.memory_space<vmem>>, vector<1x1x48xf32>
    %186 = vector.shape_cast %185 : vector<1x1x48xf32> to vector<1x48xf32>
    %187 = vector.broadcast %186 : vector<1x48xf32> to vector<8x48xf32>
    %188 = arith.addf %184, %187 : vector<8x48xf32>
    %189 = arith.minimumf %181, %188 : vector<8x48xf32>
    %c1_150 = arith.constant 1 : index
    %c0_151 = arith.constant 0 : index
    %c0_152 = arith.constant 0 : index
    %190 = vector.load %arg6[%c1_150, %c0_151, %c0_152] : memref<4x48x48xf32, #tpu.memory_space<vmem>>, vector<1x48x48xf32>
    %191 = vector.shape_cast %190 : vector<1x48x48xf32> to vector<48x48xf32>
    %cst_153 = arith.constant dense<0.000000e+00> : vector<8x48xf32>
    %192 = tpu.matmul %189, %191, %cst_153 {dimension_numbers = #tpu.dot_dimension_numbers<[1], [0], [0], [1], [0, 0, 1, 1], [], []>} : vector<8x48xf32>, vector<48x48xf32>, vector<8x48xf32> -> vector<8x48xf32>
    %c1_154 = arith.constant 1 : index
    %c0_155 = arith.constant 0 : index
    %c0_156 = arith.constant 0 : index
    %193 = vector.load %arg7[%c1_154, %c0_155, %c0_156] : memref<4x1x48xf32, #tpu.memory_space<vmem>>, vector<1x1x48xf32>
    %194 = vector.shape_cast %193 : vector<1x1x48xf32> to vector<1x48xf32>
    %195 = vector.broadcast %194 : vector<1x48xf32> to vector<8x48xf32>
    %196 = arith.addf %192, %195 : vector<8x48xf32>
    %197 = arith.minimumf %189, %196 : vector<8x48xf32>
    %c2_157 = arith.constant 2 : index
    %c0_158 = arith.constant 0 : index
    %c0_159 = arith.constant 0 : index
    %198 = vector.load %arg6[%c2_157, %c0_158, %c0_159] : memref<4x48x48xf32, #tpu.memory_space<vmem>>, vector<1x48x48xf32>
    %199 = vector.shape_cast %198 : vector<1x48x48xf32> to vector<48x48xf32>
    %cst_160 = arith.constant dense<0.000000e+00> : vector<8x48xf32>
    %200 = tpu.matmul %197, %199, %cst_160 {dimension_numbers = #tpu.dot_dimension_numbers<[1], [0], [0], [1], [0, 0, 1, 1], [], []>} : vector<8x48xf32>, vector<48x48xf32>, vector<8x48xf32> -> vector<8x48xf32>
    %c2_161 = arith.constant 2 : index
    %c0_162 = arith.constant 0 : index
    %c0_163 = arith.constant 0 : index
    %201 = vector.load %arg7[%c2_161, %c0_162, %c0_163] : memref<4x1x48xf32, #tpu.memory_space<vmem>>, vector<1x1x48xf32>
    %202 = vector.shape_cast %201 : vector<1x1x48xf32> to vector<1x48xf32>
    %203 = vector.broadcast %202 : vector<1x48xf32> to vector<8x48xf32>
    %204 = arith.addf %200, %203 : vector<8x48xf32>
    %205 = arith.minimumf %197, %204 : vector<8x48xf32>
    %c3_164 = arith.constant 3 : index
    %c0_165 = arith.constant 0 : index
    %c0_166 = arith.constant 0 : index
    %206 = vector.load %arg6[%c3_164, %c0_165, %c0_166] : memref<4x48x48xf32, #tpu.memory_space<vmem>>, vector<1x48x48xf32>
    %207 = vector.shape_cast %206 : vector<1x48x48xf32> to vector<48x48xf32>
    %cst_167 = arith.constant dense<0.000000e+00> : vector<8x48xf32>
    %208 = tpu.matmul %205, %207, %cst_167 {dimension_numbers = #tpu.dot_dimension_numbers<[1], [0], [0], [1], [0, 0, 1, 1], [], []>} : vector<8x48xf32>, vector<48x48xf32>, vector<8x48xf32> -> vector<8x48xf32>
    %c3_168 = arith.constant 3 : index
    %c0_169 = arith.constant 0 : index
    %c0_170 = arith.constant 0 : index
    %209 = vector.load %arg7[%c3_168, %c0_169, %c0_170] : memref<4x1x48xf32, #tpu.memory_space<vmem>>, vector<1x1x48xf32>
    %210 = vector.shape_cast %209 : vector<1x1x48xf32> to vector<1x48xf32>
    %211 = vector.broadcast %210 : vector<1x48xf32> to vector<8x48xf32>
    %212 = arith.addf %208, %211 : vector<8x48xf32>
    %213 = arith.minimumf %205, %212 : vector<8x48xf32>
    %214 = arith.addf %171, %213 : vector<8x48xf32>
    %c5_i32 = arith.constant 5 : i32
    %c8_i32_171 = arith.constant 8 : i32
    %215 = arith.muli %c5_i32, %c8_i32_171 : i32
    %216 = tpu.assume_multiple %215, 8 : i32
    %217 = arith.index_cast %216 : i32 to index
    %c0_172 = arith.constant 0 : index
    %218 = vector.load %arg11[%217, %c0_172] : memref<128x48xf32, #tpu.memory_space<vmem>>, vector<8x48xf32>
    %c0_173 = arith.constant 0 : index
    %c0_174 = arith.constant 0 : index
    %219 = vector.load %arg5[%c0_173, %c0_174] : memref<48x48xf32, #tpu.memory_space<vmem>>, vector<48x48xf32>
    %cst_175 = arith.constant dense<0.000000e+00> : vector<8x48xf32>
    %220 = tpu.matmul %218, %219, %cst_175 {dimension_numbers = #tpu.dot_dimension_numbers<[1], [0], [0], [1], [0, 0, 1, 1], [], []>} : vector<8x48xf32>, vector<48x48xf32>, vector<8x48xf32> -> vector<8x48xf32>
    %221 = arith.subf %220, %218 : vector<8x48xf32>
    %c0_176 = arith.constant 0 : index
    %c0_177 = arith.constant 0 : index
    %c0_178 = arith.constant 0 : index
    %222 = vector.load %arg6[%c0_176, %c0_177, %c0_178] : memref<4x48x48xf32, #tpu.memory_space<vmem>>, vector<1x48x48xf32>
    %223 = vector.shape_cast %222 : vector<1x48x48xf32> to vector<48x48xf32>
    %cst_179 = arith.constant dense<0.000000e+00> : vector<8x48xf32>
    %224 = tpu.matmul %214, %223, %cst_179 {dimension_numbers = #tpu.dot_dimension_numbers<[1], [0], [0], [1], [0, 0, 1, 1], [], []>} : vector<8x48xf32>, vector<48x48xf32>, vector<8x48xf32> -> vector<8x48xf32>
    %c0_180 = arith.constant 0 : index
    %c0_181 = arith.constant 0 : index
    %c0_182 = arith.constant 0 : index
    %225 = vector.load %arg7[%c0_180, %c0_181, %c0_182] : memref<4x1x48xf32, #tpu.memory_space<vmem>>, vector<1x1x48xf32>
    %226 = vector.shape_cast %225 : vector<1x1x48xf32> to vector<1x48xf32>
    %227 = vector.broadcast %226 : vector<1x48xf32> to vector<8x48xf32>
    %228 = arith.addf %224, %227 : vector<8x48xf32>
    %229 = arith.minimumf %214, %228 : vector<8x48xf32>
    %230 = arith.subf %229, %221 : vector<8x48xf32>
    %c0_183 = arith.constant 0 : index
    %c0_184 = arith.constant 0 : index
    %c0_185 = arith.constant 0 : index
    %231 = vector.load %arg6[%c0_183, %c0_184, %c0_185] : memref<4x48x48xf32, #tpu.memory_space<vmem>>, vector<1x48x48xf32>
    %232 = vector.shape_cast %231 : vector<1x48x48xf32> to vector<48x48xf32>
    %cst_186 = arith.constant dense<0.000000e+00> : vector<8x48xf32>
    %233 = tpu.matmul %230, %232, %cst_186 {dimension_numbers = #tpu.dot_dimension_numbers<[1], [0], [0], [1], [0, 0, 1, 1], [], []>} : vector<8x48xf32>, vector<48x48xf32>, vector<8x48xf32> -> vector<8x48xf32>
    %c0_187 = arith.constant 0 : index
    %c0_188 = arith.constant 0 : index
    %c0_189 = arith.constant 0 : index
    %234 = vector.load %arg7[%c0_187, %c0_188, %c0_189] : memref<4x1x48xf32, #tpu.memory_space<vmem>>, vector<1x1x48xf32>
    %235 = vector.shape_cast %234 : vector<1x1x48xf32> to vector<1x48xf32>
    %236 = vector.broadcast %235 : vector<1x48xf32> to vector<8x48xf32>
    %237 = arith.addf %233, %236 : vector<8x48xf32>
    %238 = arith.minimumf %230, %237 : vector<8x48xf32>
    %c1_190 = arith.constant 1 : index
    %c0_191 = arith.constant 0 : index
    %c0_192 = arith.constant 0 : index
    %239 = vector.load %arg6[%c1_190, %c0_191, %c0_192] : memref<4x48x48xf32, #tpu.memory_space<vmem>>, vector<1x48x48xf32>
    %240 = vector.shape_cast %239 : vector<1x48x48xf32> to vector<48x48xf32>
    %cst_193 = arith.constant dense<0.000000e+00> : vector<8x48xf32>
    %241 = tpu.matmul %238, %240, %cst_193 {dimension_numbers = #tpu.dot_dimension_numbers<[1], [0], [0], [1], [0, 0, 1, 1], [], []>} : vector<8x48xf32>, vector<48x48xf32>, vector<8x48xf32> -> vector<8x48xf32>
    %c1_194 = arith.constant 1 : index
    %c0_195 = arith.constant 0 : index
    %c0_196 = arith.constant 0 : index
    %242 = vector.load %arg7[%c1_194, %c0_195, %c0_196] : memref<4x1x48xf32, #tpu.memory_space<vmem>>, vector<1x1x48xf32>
    %243 = vector.shape_cast %242 : vector<1x1x48xf32> to vector<1x48xf32>
    %244 = vector.broadcast %243 : vector<1x48xf32> to vector<8x48xf32>
    %245 = arith.addf %241, %244 : vector<8x48xf32>
    %246 = arith.minimumf %238, %245 : vector<8x48xf32>
    %c2_197 = arith.constant 2 : index
    %c0_198 = arith.constant 0 : index
    %c0_199 = arith.constant 0 : index
    %247 = vector.load %arg6[%c2_197, %c0_198, %c0_199] : memref<4x48x48xf32, #tpu.memory_space<vmem>>, vector<1x48x48xf32>
    %248 = vector.shape_cast %247 : vector<1x48x48xf32> to vector<48x48xf32>
    %cst_200 = arith.constant dense<0.000000e+00> : vector<8x48xf32>
    %249 = tpu.matmul %246, %248, %cst_200 {dimension_numbers = #tpu.dot_dimension_numbers<[1], [0], [0], [1], [0, 0, 1, 1], [], []>} : vector<8x48xf32>, vector<48x48xf32>, vector<8x48xf32> -> vector<8x48xf32>
    %c2_201 = arith.constant 2 : index
    %c0_202 = arith.constant 0 : index
    %c0_203 = arith.constant 0 : index
    %250 = vector.load %arg7[%c2_201, %c0_202, %c0_203] : memref<4x1x48xf32, #tpu.memory_space<vmem>>, vector<1x1x48xf32>
    %251 = vector.shape_cast %250 : vector<1x1x48xf32> to vector<1x48xf32>
    %252 = vector.broadcast %251 : vector<1x48xf32> to vector<8x48xf32>
    %253 = arith.addf %249, %252 : vector<8x48xf32>
    %254 = arith.minimumf %246, %253 : vector<8x48xf32>
    %c3_204 = arith.constant 3 : index
    %c0_205 = arith.constant 0 : index
    %c0_206 = arith.constant 0 : index
    %255 = vector.load %arg6[%c3_204, %c0_205, %c0_206] : memref<4x48x48xf32, #tpu.memory_space<vmem>>, vector<1x48x48xf32>
    %256 = vector.shape_cast %255 : vector<1x48x48xf32> to vector<48x48xf32>
    %cst_207 = arith.constant dense<0.000000e+00> : vector<8x48xf32>
    %257 = tpu.matmul %254, %256, %cst_207 {dimension_numbers = #tpu.dot_dimension_numbers<[1], [0], [0], [1], [0, 0, 1, 1], [], []>} : vector<8x48xf32>, vector<48x48xf32>, vector<8x48xf32> -> vector<8x48xf32>
    %c3_208 = arith.constant 3 : index
    %c0_209 = arith.constant 0 : index
    %c0_210 = arith.constant 0 : index
    %258 = vector.load %arg7[%c3_208, %c0_209, %c0_210] : memref<4x1x48xf32, #tpu.memory_space<vmem>>, vector<1x1x48xf32>
    %259 = vector.shape_cast %258 : vector<1x1x48xf32> to vector<1x48xf32>
    %260 = vector.broadcast %259 : vector<1x48xf32> to vector<8x48xf32>
    %261 = arith.addf %257, %260 : vector<8x48xf32>
    %262 = arith.minimumf %254, %261 : vector<8x48xf32>
    %263 = arith.addf %220, %262 : vector<8x48xf32>
    %c6_i32 = arith.constant 6 : i32
    %c8_i32_211 = arith.constant 8 : i32
    %264 = arith.muli %c6_i32, %c8_i32_211 : i32
    %265 = tpu.assume_multiple %264, 8 : i32
    %266 = arith.index_cast %265 : i32 to index
    %c0_212 = arith.constant 0 : index
    %267 = vector.load %arg11[%266, %c0_212] : memref<128x48xf32, #tpu.memory_space<vmem>>, vector<8x48xf32>
    %c0_213 = arith.constant 0 : index
    %c0_214 = arith.constant 0 : index
    %268 = vector.load %arg5[%c0_213, %c0_214] : memref<48x48xf32, #tpu.memory_space<vmem>>, vector<48x48xf32>
    %cst_215 = arith.constant dense<0.000000e+00> : vector<8x48xf32>
    %269 = tpu.matmul %267, %268, %cst_215 {dimension_numbers = #tpu.dot_dimension_numbers<[1], [0], [0], [1], [0, 0, 1, 1], [], []>} : vector<8x48xf32>, vector<48x48xf32>, vector<8x48xf32> -> vector<8x48xf32>
    %270 = arith.subf %269, %267 : vector<8x48xf32>
    %c0_216 = arith.constant 0 : index
    %c0_217 = arith.constant 0 : index
    %c0_218 = arith.constant 0 : index
    %271 = vector.load %arg6[%c0_216, %c0_217, %c0_218] : memref<4x48x48xf32, #tpu.memory_space<vmem>>, vector<1x48x48xf32>
    %272 = vector.shape_cast %271 : vector<1x48x48xf32> to vector<48x48xf32>
    %cst_219 = arith.constant dense<0.000000e+00> : vector<8x48xf32>
    %273 = tpu.matmul %263, %272, %cst_219 {dimension_numbers = #tpu.dot_dimension_numbers<[1], [0], [0], [1], [0, 0, 1, 1], [], []>} : vector<8x48xf32>, vector<48x48xf32>, vector<8x48xf32> -> vector<8x48xf32>
    %c0_220 = arith.constant 0 : index
    %c0_221 = arith.constant 0 : index
    %c0_222 = arith.constant 0 : index
    %274 = vector.load %arg7[%c0_220, %c0_221, %c0_222] : memref<4x1x48xf32, #tpu.memory_space<vmem>>, vector<1x1x48xf32>
    %275 = vector.shape_cast %274 : vector<1x1x48xf32> to vector<1x48xf32>
    %276 = vector.broadcast %275 : vector<1x48xf32> to vector<8x48xf32>
    %277 = arith.addf %273, %276 : vector<8x48xf32>
    %278 = arith.minimumf %263, %277 : vector<8x48xf32>
    %279 = arith.subf %278, %270 : vector<8x48xf32>
    %c0_223 = arith.constant 0 : index
    %c0_224 = arith.constant 0 : index
    %c0_225 = arith.constant 0 : index
    %280 = vector.load %arg6[%c0_223, %c0_224, %c0_225] : memref<4x48x48xf32, #tpu.memory_space<vmem>>, vector<1x48x48xf32>
    %281 = vector.shape_cast %280 : vector<1x48x48xf32> to vector<48x48xf32>
    %cst_226 = arith.constant dense<0.000000e+00> : vector<8x48xf32>
    %282 = tpu.matmul %279, %281, %cst_226 {dimension_numbers = #tpu.dot_dimension_numbers<[1], [0], [0], [1], [0, 0, 1, 1], [], []>} : vector<8x48xf32>, vector<48x48xf32>, vector<8x48xf32> -> vector<8x48xf32>
    %c0_227 = arith.constant 0 : index
    %c0_228 = arith.constant 0 : index
    %c0_229 = arith.constant 0 : index
    %283 = vector.load %arg7[%c0_227, %c0_228, %c0_229] : memref<4x1x48xf32, #tpu.memory_space<vmem>>, vector<1x1x48xf32>
    %284 = vector.shape_cast %283 : vector<1x1x48xf32> to vector<1x48xf32>
    %285 = vector.broadcast %284 : vector<1x48xf32> to vector<8x48xf32>
    %286 = arith.addf %282, %285 : vector<8x48xf32>
    %287 = arith.minimumf %279, %286 : vector<8x48xf32>
    %c1_230 = arith.constant 1 : index
    %c0_231 = arith.constant 0 : index
    %c0_232 = arith.constant 0 : index
    %288 = vector.load %arg6[%c1_230, %c0_231, %c0_232] : memref<4x48x48xf32, #tpu.memory_space<vmem>>, vector<1x48x48xf32>
    %289 = vector.shape_cast %288 : vector<1x48x48xf32> to vector<48x48xf32>
    %cst_233 = arith.constant dense<0.000000e+00> : vector<8x48xf32>
    %290 = tpu.matmul %287, %289, %cst_233 {dimension_numbers = #tpu.dot_dimension_numbers<[1], [0], [0], [1], [0, 0, 1, 1], [], []>} : vector<8x48xf32>, vector<48x48xf32>, vector<8x48xf32> -> vector<8x48xf32>
    %c1_234 = arith.constant 1 : index
    %c0_235 = arith.constant 0 : index
    %c0_236 = arith.constant 0 : index
    %291 = vector.load %arg7[%c1_234, %c0_235, %c0_236] : memref<4x1x48xf32, #tpu.memory_space<vmem>>, vector<1x1x48xf32>
    %292 = vector.shape_cast %291 : vector<1x1x48xf32> to vector<1x48xf32>
    %293 = vector.broadcast %292 : vector<1x48xf32> to vector<8x48xf32>
    %294 = arith.addf %290, %293 : vector<8x48xf32>
    %295 = arith.minimumf %287, %294 : vector<8x48xf32>
    %c2_237 = arith.constant 2 : index
    %c0_238 = arith.constant 0 : index
    %c0_239 = arith.constant 0 : index
    %296 = vector.load %arg6[%c2_237, %c0_238, %c0_239] : memref<4x48x48xf32, #tpu.memory_space<vmem>>, vector<1x48x48xf32>
    %297 = vector.shape_cast %296 : vector<1x48x48xf32> to vector<48x48xf32>
    %cst_240 = arith.constant dense<0.000000e+00> : vector<8x48xf32>
    %298 = tpu.matmul %295, %297, %cst_240 {dimension_numbers = #tpu.dot_dimension_numbers<[1], [0], [0], [1], [0, 0, 1, 1], [], []>} : vector<8x48xf32>, vector<48x48xf32>, vector<8x48xf32> -> vector<8x48xf32>
    %c2_241 = arith.constant 2 : index
    %c0_242 = arith.constant 0 : index
    %c0_243 = arith.constant 0 : index
    %299 = vector.load %arg7[%c2_241, %c0_242, %c0_243] : memref<4x1x48xf32, #tpu.memory_space<vmem>>, vector<1x1x48xf32>
    %300 = vector.shape_cast %299 : vector<1x1x48xf32> to vector<1x48xf32>
    %301 = vector.broadcast %300 : vector<1x48xf32> to vector<8x48xf32>
    %302 = arith.addf %298, %301 : vector<8x48xf32>
    %303 = arith.minimumf %295, %302 : vector<8x48xf32>
    %c3_244 = arith.constant 3 : index
    %c0_245 = arith.constant 0 : index
    %c0_246 = arith.constant 0 : index
    %304 = vector.load %arg6[%c3_244, %c0_245, %c0_246] : memref<4x48x48xf32, #tpu.memory_space<vmem>>, vector<1x48x48xf32>
    %305 = vector.shape_cast %304 : vector<1x48x48xf32> to vector<48x48xf32>
    %cst_247 = arith.constant dense<0.000000e+00> : vector<8x48xf32>
    %306 = tpu.matmul %303, %305, %cst_247 {dimension_numbers = #tpu.dot_dimension_numbers<[1], [0], [0], [1], [0, 0, 1, 1], [], []>} : vector<8x48xf32>, vector<48x48xf32>, vector<8x48xf32> -> vector<8x48xf32>
    %c3_248 = arith.constant 3 : index
    %c0_249 = arith.constant 0 : index
    %c0_250 = arith.constant 0 : index
    %307 = vector.load %arg7[%c3_248, %c0_249, %c0_250] : memref<4x1x48xf32, #tpu.memory_space<vmem>>, vector<1x1x48xf32>
    %308 = vector.shape_cast %307 : vector<1x1x48xf32> to vector<1x48xf32>
    %309 = vector.broadcast %308 : vector<1x48xf32> to vector<8x48xf32>
    %310 = arith.addf %306, %309 : vector<8x48xf32>
    %311 = arith.minimumf %303, %310 : vector<8x48xf32>
    %312 = arith.addf %269, %311 : vector<8x48xf32>
    %c7_i32 = arith.constant 7 : i32
    %c8_i32_251 = arith.constant 8 : i32
    %313 = arith.muli %c7_i32, %c8_i32_251 : i32
    %314 = tpu.assume_multiple %313, 8 : i32
    %315 = arith.index_cast %314 : i32 to index
    %c0_252 = arith.constant 0 : index
    %316 = vector.load %arg11[%315, %c0_252] : memref<128x48xf32, #tpu.memory_space<vmem>>, vector<8x48xf32>
    %c0_253 = arith.constant 0 : index
    %c0_254 = arith.constant 0 : index
    %317 = vector.load %arg5[%c0_253, %c0_254] : memref<48x48xf32, #tpu.memory_space<vmem>>, vector<48x48xf32>
    %cst_255 = arith.constant dense<0.000000e+00> : vector<8x48xf32>
    %318 = tpu.matmul %316, %317, %cst_255 {dimension_numbers = #tpu.dot_dimension_numbers<[1], [0], [0], [1], [0, 0, 1, 1], [], []>} : vector<8x48xf32>, vector<48x48xf32>, vector<8x48xf32> -> vector<8x48xf32>
    %319 = arith.subf %318, %316 : vector<8x48xf32>
    %c0_256 = arith.constant 0 : index
    %c0_257 = arith.constant 0 : index
    %c0_258 = arith.constant 0 : index
    %320 = vector.load %arg6[%c0_256, %c0_257, %c0_258] : memref<4x48x48xf32, #tpu.memory_space<vmem>>, vector<1x48x48xf32>
    %321 = vector.shape_cast %320 : vector<1x48x48xf32> to vector<48x48xf32>
    %cst_259 = arith.constant dense<0.000000e+00> : vector<8x48xf32>
    %322 = tpu.matmul %312, %321, %cst_259 {dimension_numbers = #tpu.dot_dimension_numbers<[1], [0], [0], [1], [0, 0, 1, 1], [], []>} : vector<8x48xf32>, vector<48x48xf32>, vector<8x48xf32> -> vector<8x48xf32>
    %c0_260 = arith.constant 0 : index
    %c0_261 = arith.constant 0 : index
    %c0_262 = arith.constant 0 : index
    %323 = vector.load %arg7[%c0_260, %c0_261, %c0_262] : memref<4x1x48xf32, #tpu.memory_space<vmem>>, vector<1x1x48xf32>
    %324 = vector.shape_cast %323 : vector<1x1x48xf32> to vector<1x48xf32>
    %325 = vector.broadcast %324 : vector<1x48xf32> to vector<8x48xf32>
    %326 = arith.addf %322, %325 : vector<8x48xf32>
    %327 = arith.minimumf %312, %326 : vector<8x48xf32>
    %328 = arith.subf %327, %319 : vector<8x48xf32>
    %c0_263 = arith.constant 0 : index
    %c0_264 = arith.constant 0 : index
    %c0_265 = arith.constant 0 : index
    %329 = vector.load %arg6[%c0_263, %c0_264, %c0_265] : memref<4x48x48xf32, #tpu.memory_space<vmem>>, vector<1x48x48xf32>
    %330 = vector.shape_cast %329 : vector<1x48x48xf32> to vector<48x48xf32>
    %cst_266 = arith.constant dense<0.000000e+00> : vector<8x48xf32>
    %331 = tpu.matmul %328, %330, %cst_266 {dimension_numbers = #tpu.dot_dimension_numbers<[1], [0], [0], [1], [0, 0, 1, 1], [], []>} : vector<8x48xf32>, vector<48x48xf32>, vector<8x48xf32> -> vector<8x48xf32>
    %c0_267 = arith.constant 0 : index
    %c0_268 = arith.constant 0 : index
    %c0_269 = arith.constant 0 : index
    %332 = vector.load %arg7[%c0_267, %c0_268, %c0_269] : memref<4x1x48xf32, #tpu.memory_space<vmem>>, vector<1x1x48xf32>
    %333 = vector.shape_cast %332 : vector<1x1x48xf32> to vector<1x48xf32>
    %334 = vector.broadcast %333 : vector<1x48xf32> to vector<8x48xf32>
    %335 = arith.addf %331, %334 : vector<8x48xf32>
    %336 = arith.minimumf %328, %335 : vector<8x48xf32>
    %c1_270 = arith.constant 1 : index
    %c0_271 = arith.constant 0 : index
    %c0_272 = arith.constant 0 : index
    %337 = vector.load %arg6[%c1_270, %c0_271, %c0_272] : memref<4x48x48xf32, #tpu.memory_space<vmem>>, vector<1x48x48xf32>
    %338 = vector.shape_cast %337 : vector<1x48x48xf32> to vector<48x48xf32>
    %cst_273 = arith.constant dense<0.000000e+00> : vector<8x48xf32>
    %339 = tpu.matmul %336, %338, %cst_273 {dimension_numbers = #tpu.dot_dimension_numbers<[1], [0], [0], [1], [0, 0, 1, 1], [], []>} : vector<8x48xf32>, vector<48x48xf32>, vector<8x48xf32> -> vector<8x48xf32>
    %c1_274 = arith.constant 1 : index
    %c0_275 = arith.constant 0 : index
    %c0_276 = arith.constant 0 : index
    %340 = vector.load %arg7[%c1_274, %c0_275, %c0_276] : memref<4x1x48xf32, #tpu.memory_space<vmem>>, vector<1x1x48xf32>
    %341 = vector.shape_cast %340 : vector<1x1x48xf32> to vector<1x48xf32>
    %342 = vector.broadcast %341 : vector<1x48xf32> to vector<8x48xf32>
    %343 = arith.addf %339, %342 : vector<8x48xf32>
    %344 = arith.minimumf %336, %343 : vector<8x48xf32>
    %c2_277 = arith.constant 2 : index
    %c0_278 = arith.constant 0 : index
    %c0_279 = arith.constant 0 : index
    %345 = vector.load %arg6[%c2_277, %c0_278, %c0_279] : memref<4x48x48xf32, #tpu.memory_space<vmem>>, vector<1x48x48xf32>
    %346 = vector.shape_cast %345 : vector<1x48x48xf32> to vector<48x48xf32>
    %cst_280 = arith.constant dense<0.000000e+00> : vector<8x48xf32>
    %347 = tpu.matmul %344, %346, %cst_280 {dimension_numbers = #tpu.dot_dimension_numbers<[1], [0], [0], [1], [0, 0, 1, 1], [], []>} : vector<8x48xf32>, vector<48x48xf32>, vector<8x48xf32> -> vector<8x48xf32>
    %c2_281 = arith.constant 2 : index
    %c0_282 = arith.constant 0 : index
    %c0_283 = arith.constant 0 : index
    %348 = vector.load %arg7[%c2_281, %c0_282, %c0_283] : memref<4x1x48xf32, #tpu.memory_space<vmem>>, vector<1x1x48xf32>
    %349 = vector.shape_cast %348 : vector<1x1x48xf32> to vector<1x48xf32>
    %350 = vector.broadcast %349 : vector<1x48xf32> to vector<8x48xf32>
    %351 = arith.addf %347, %350 : vector<8x48xf32>
    %352 = arith.minimumf %344, %351 : vector<8x48xf32>
    %c3_284 = arith.constant 3 : index
    %c0_285 = arith.constant 0 : index
    %c0_286 = arith.constant 0 : index
    %353 = vector.load %arg6[%c3_284, %c0_285, %c0_286] : memref<4x48x48xf32, #tpu.memory_space<vmem>>, vector<1x48x48xf32>
    %354 = vector.shape_cast %353 : vector<1x48x48xf32> to vector<48x48xf32>
    %cst_287 = arith.constant dense<0.000000e+00> : vector<8x48xf32>
    %355 = tpu.matmul %352, %354, %cst_287 {dimension_numbers = #tpu.dot_dimension_numbers<[1], [0], [0], [1], [0, 0, 1, 1], [], []>} : vector<8x48xf32>, vector<48x48xf32>, vector<8x48xf32> -> vector<8x48xf32>
    %c3_288 = arith.constant 3 : index
    %c0_289 = arith.constant 0 : index
    %c0_290 = arith.constant 0 : index
    %356 = vector.load %arg7[%c3_288, %c0_289, %c0_290] : memref<4x1x48xf32, #tpu.memory_space<vmem>>, vector<1x1x48xf32>
    %357 = vector.shape_cast %356 : vector<1x1x48xf32> to vector<1x48xf32>
    %358 = vector.broadcast %357 : vector<1x48xf32> to vector<8x48xf32>
    %359 = arith.addf %355, %358 : vector<8x48xf32>
    %360 = arith.minimumf %352, %359 : vector<8x48xf32>
    %361 = arith.addf %318, %360 : vector<8x48xf32>
    %c8_i32_291 = arith.constant 8 : i32
    %c8_i32_292 = arith.constant 8 : i32
    %362 = arith.muli %c8_i32_291, %c8_i32_292 : i32
    %363 = tpu.assume_multiple %362, 8 : i32
    %364 = arith.index_cast %363 : i32 to index
    %c0_293 = arith.constant 0 : index
    %365 = vector.load %arg11[%364, %c0_293] : memref<128x48xf32, #tpu.memory_space<vmem>>, vector<8x48xf32>
    %c0_294 = arith.constant 0 : index
    %c0_295 = arith.constant 0 : index
    %366 = vector.load %arg5[%c0_294, %c0_295] : memref<48x48xf32, #tpu.memory_space<vmem>>, vector<48x48xf32>
    %cst_296 = arith.constant dense<0.000000e+00> : vector<8x48xf32>
    %367 = tpu.matmul %365, %366, %cst_296 {dimension_numbers = #tpu.dot_dimension_numbers<[1], [0], [0], [1], [0, 0, 1, 1], [], []>} : vector<8x48xf32>, vector<48x48xf32>, vector<8x48xf32> -> vector<8x48xf32>
    %368 = arith.subf %367, %365 : vector<8x48xf32>
    %c0_297 = arith.constant 0 : index
    %c0_298 = arith.constant 0 : index
    %c0_299 = arith.constant 0 : index
    %369 = vector.load %arg6[%c0_297, %c0_298, %c0_299] : memref<4x48x48xf32, #tpu.memory_space<vmem>>, vector<1x48x48xf32>
    %370 = vector.shape_cast %369 : vector<1x48x48xf32> to vector<48x48xf32>
    %cst_300 = arith.constant dense<0.000000e+00> : vector<8x48xf32>
    %371 = tpu.matmul %361, %370, %cst_300 {dimension_numbers = #tpu.dot_dimension_numbers<[1], [0], [0], [1], [0, 0, 1, 1], [], []>} : vector<8x48xf32>, vector<48x48xf32>, vector<8x48xf32> -> vector<8x48xf32>
    %c0_301 = arith.constant 0 : index
    %c0_302 = arith.constant 0 : index
    %c0_303 = arith.constant 0 : index
    %372 = vector.load %arg7[%c0_301, %c0_302, %c0_303] : memref<4x1x48xf32, #tpu.memory_space<vmem>>, vector<1x1x48xf32>
    %373 = vector.shape_cast %372 : vector<1x1x48xf32> to vector<1x48xf32>
    %374 = vector.broadcast %373 : vector<1x48xf32> to vector<8x48xf32>
    %375 = arith.addf %371, %374 : vector<8x48xf32>
    %376 = arith.minimumf %361, %375 : vector<8x48xf32>
    %377 = arith.subf %376, %368 : vector<8x48xf32>
    %c0_304 = arith.constant 0 : index
    %c0_305 = arith.constant 0 : index
    %c0_306 = arith.constant 0 : index
    %378 = vector.load %arg6[%c0_304, %c0_305, %c0_306] : memref<4x48x48xf32, #tpu.memory_space<vmem>>, vector<1x48x48xf32>
    %379 = vector.shape_cast %378 : vector<1x48x48xf32> to vector<48x48xf32>
    %cst_307 = arith.constant dense<0.000000e+00> : vector<8x48xf32>
    %380 = tpu.matmul %377, %379, %cst_307 {dimension_numbers = #tpu.dot_dimension_numbers<[1], [0], [0], [1], [0, 0, 1, 1], [], []>} : vector<8x48xf32>, vector<48x48xf32>, vector<8x48xf32> -> vector<8x48xf32>
    %c0_308 = arith.constant 0 : index
    %c0_309 = arith.constant 0 : index
    %c0_310 = arith.constant 0 : index
    %381 = vector.load %arg7[%c0_308, %c0_309, %c0_310] : memref<4x1x48xf32, #tpu.memory_space<vmem>>, vector<1x1x48xf32>
    %382 = vector.shape_cast %381 : vector<1x1x48xf32> to vector<1x48xf32>
    %383 = vector.broadcast %382 : vector<1x48xf32> to vector<8x48xf32>
    %384 = arith.addf %380, %383 : vector<8x48xf32>
    %385 = arith.minimumf %377, %384 : vector<8x48xf32>
    %c1_311 = arith.constant 1 : index
    %c0_312 = arith.constant 0 : index
    %c0_313 = arith.constant 0 : index
    %386 = vector.load %arg6[%c1_311, %c0_312, %c0_313] : memref<4x48x48xf32, #tpu.memory_space<vmem>>, vector<1x48x48xf32>
    %387 = vector.shape_cast %386 : vector<1x48x48xf32> to vector<48x48xf32>
    %cst_314 = arith.constant dense<0.000000e+00> : vector<8x48xf32>
    %388 = tpu.matmul %385, %387, %cst_314 {dimension_numbers = #tpu.dot_dimension_numbers<[1], [0], [0], [1], [0, 0, 1, 1], [], []>} : vector<8x48xf32>, vector<48x48xf32>, vector<8x48xf32> -> vector<8x48xf32>
    %c1_315 = arith.constant 1 : index
    %c0_316 = arith.constant 0 : index
    %c0_317 = arith.constant 0 : index
    %389 = vector.load %arg7[%c1_315, %c0_316, %c0_317] : memref<4x1x48xf32, #tpu.memory_space<vmem>>, vector<1x1x48xf32>
    %390 = vector.shape_cast %389 : vector<1x1x48xf32> to vector<1x48xf32>
    %391 = vector.broadcast %390 : vector<1x48xf32> to vector<8x48xf32>
    %392 = arith.addf %388, %391 : vector<8x48xf32>
    %393 = arith.minimumf %385, %392 : vector<8x48xf32>
    %c2_318 = arith.constant 2 : index
    %c0_319 = arith.constant 0 : index
    %c0_320 = arith.constant 0 : index
    %394 = vector.load %arg6[%c2_318, %c0_319, %c0_320] : memref<4x48x48xf32, #tpu.memory_space<vmem>>, vector<1x48x48xf32>
    %395 = vector.shape_cast %394 : vector<1x48x48xf32> to vector<48x48xf32>
    %cst_321 = arith.constant dense<0.000000e+00> : vector<8x48xf32>
    %396 = tpu.matmul %393, %395, %cst_321 {dimension_numbers = #tpu.dot_dimension_numbers<[1], [0], [0], [1], [0, 0, 1, 1], [], []>} : vector<8x48xf32>, vector<48x48xf32>, vector<8x48xf32> -> vector<8x48xf32>
    %c2_322 = arith.constant 2 : index
    %c0_323 = arith.constant 0 : index
    %c0_324 = arith.constant 0 : index
    %397 = vector.load %arg7[%c2_322, %c0_323, %c0_324] : memref<4x1x48xf32, #tpu.memory_space<vmem>>, vector<1x1x48xf32>
    %398 = vector.shape_cast %397 : vector<1x1x48xf32> to vector<1x48xf32>
    %399 = vector.broadcast %398 : vector<1x48xf32> to vector<8x48xf32>
    %400 = arith.addf %396, %399 : vector<8x48xf32>
    %401 = arith.minimumf %393, %400 : vector<8x48xf32>
    %c3_325 = arith.constant 3 : index
    %c0_326 = arith.constant 0 : index
    %c0_327 = arith.constant 0 : index
    %402 = vector.load %arg6[%c3_325, %c0_326, %c0_327] : memref<4x48x48xf32, #tpu.memory_space<vmem>>, vector<1x48x48xf32>
    %403 = vector.shape_cast %402 : vector<1x48x48xf32> to vector<48x48xf32>
    %cst_328 = arith.constant dense<0.000000e+00> : vector<8x48xf32>
    %404 = tpu.matmul %401, %403, %cst_328 {dimension_numbers = #tpu.dot_dimension_numbers<[1], [0], [0], [1], [0, 0, 1, 1], [], []>} : vector<8x48xf32>, vector<48x48xf32>, vector<8x48xf32> -> vector<8x48xf32>
    %c3_329 = arith.constant 3 : index
    %c0_330 = arith.constant 0 : index
    %c0_331 = arith.constant 0 : index
    %405 = vector.load %arg7[%c3_329, %c0_330, %c0_331] : memref<4x1x48xf32, #tpu.memory_space<vmem>>, vector<1x1x48xf32>
    %406 = vector.shape_cast %405 : vector<1x1x48xf32> to vector<1x48xf32>
    %407 = vector.broadcast %406 : vector<1x48xf32> to vector<8x48xf32>
    %408 = arith.addf %404, %407 : vector<8x48xf32>
    %409 = arith.minimumf %401, %408 : vector<8x48xf32>
    %410 = arith.addf %367, %409 : vector<8x48xf32>
    %c9_i32 = arith.constant 9 : i32
    %c8_i32_332 = arith.constant 8 : i32
    %411 = arith.muli %c9_i32, %c8_i32_332 : i32
    %412 = tpu.assume_multiple %411, 8 : i32
    %413 = arith.index_cast %412 : i32 to index
    %c0_333 = arith.constant 0 : index
    %414 = vector.load %arg11[%413, %c0_333] : memref<128x48xf32, #tpu.memory_space<vmem>>, vector<8x48xf32>
    %c0_334 = arith.constant 0 : index
    %c0_335 = arith.constant 0 : index
    %415 = vector.load %arg5[%c0_334, %c0_335] : memref<48x48xf32, #tpu.memory_space<vmem>>, vector<48x48xf32>
    %cst_336 = arith.constant dense<0.000000e+00> : vector<8x48xf32>
    %416 = tpu.matmul %414, %415, %cst_336 {dimension_numbers = #tpu.dot_dimension_numbers<[1], [0], [0], [1], [0, 0, 1, 1], [], []>} : vector<8x48xf32>, vector<48x48xf32>, vector<8x48xf32> -> vector<8x48xf32>
    %417 = arith.subf %416, %414 : vector<8x48xf32>
    %c0_337 = arith.constant 0 : index
    %c0_338 = arith.constant 0 : index
    %c0_339 = arith.constant 0 : index
    %418 = vector.load %arg6[%c0_337, %c0_338, %c0_339] : memref<4x48x48xf32, #tpu.memory_space<vmem>>, vector<1x48x48xf32>
    %419 = vector.shape_cast %418 : vector<1x48x48xf32> to vector<48x48xf32>
    %cst_340 = arith.constant dense<0.000000e+00> : vector<8x48xf32>
    %420 = tpu.matmul %410, %419, %cst_340 {dimension_numbers = #tpu.dot_dimension_numbers<[1], [0], [0], [1], [0, 0, 1, 1], [], []>} : vector<8x48xf32>, vector<48x48xf32>, vector<8x48xf32> -> vector<8x48xf32>
    %c0_341 = arith.constant 0 : index
    %c0_342 = arith.constant 0 : index
    %c0_343 = arith.constant 0 : index
    %421 = vector.load %arg7[%c0_341, %c0_342, %c0_343] : memref<4x1x48xf32, #tpu.memory_space<vmem>>, vector<1x1x48xf32>
    %422 = vector.shape_cast %421 : vector<1x1x48xf32> to vector<1x48xf32>
    %423 = vector.broadcast %422 : vector<1x48xf32> to vector<8x48xf32>
    %424 = arith.addf %420, %423 : vector<8x48xf32>
    %425 = arith.minimumf %410, %424 : vector<8x48xf32>
    %426 = arith.subf %425, %417 : vector<8x48xf32>
    %c0_344 = arith.constant 0 : index
    %c0_345 = arith.constant 0 : index
    %c0_346 = arith.constant 0 : index
    %427 = vector.load %arg6[%c0_344, %c0_345, %c0_346] : memref<4x48x48xf32, #tpu.memory_space<vmem>>, vector<1x48x48xf32>
    %428 = vector.shape_cast %427 : vector<1x48x48xf32> to vector<48x48xf32>
    %cst_347 = arith.constant dense<0.000000e+00> : vector<8x48xf32>
    %429 = tpu.matmul %426, %428, %cst_347 {dimension_numbers = #tpu.dot_dimension_numbers<[1], [0], [0], [1], [0, 0, 1, 1], [], []>} : vector<8x48xf32>, vector<48x48xf32>, vector<8x48xf32> -> vector<8x48xf32>
    %c0_348 = arith.constant 0 : index
    %c0_349 = arith.constant 0 : index
    %c0_350 = arith.constant 0 : index
    %430 = vector.load %arg7[%c0_348, %c0_349, %c0_350] : memref<4x1x48xf32, #tpu.memory_space<vmem>>, vector<1x1x48xf32>
    %431 = vector.shape_cast %430 : vector<1x1x48xf32> to vector<1x48xf32>
    %432 = vector.broadcast %431 : vector<1x48xf32> to vector<8x48xf32>
    %433 = arith.addf %429, %432 : vector<8x48xf32>
    %434 = arith.minimumf %426, %433 : vector<8x48xf32>
    %c1_351 = arith.constant 1 : index
    %c0_352 = arith.constant 0 : index
    %c0_353 = arith.constant 0 : index
    %435 = vector.load %arg6[%c1_351, %c0_352, %c0_353] : memref<4x48x48xf32, #tpu.memory_space<vmem>>, vector<1x48x48xf32>
    %436 = vector.shape_cast %435 : vector<1x48x48xf32> to vector<48x48xf32>
    %cst_354 = arith.constant dense<0.000000e+00> : vector<8x48xf32>
    %437 = tpu.matmul %434, %436, %cst_354 {dimension_numbers = #tpu.dot_dimension_numbers<[1], [0], [0], [1], [0, 0, 1, 1], [], []>} : vector<8x48xf32>, vector<48x48xf32>, vector<8x48xf32> -> vector<8x48xf32>
    %c1_355 = arith.constant 1 : index
    %c0_356 = arith.constant 0 : index
    %c0_357 = arith.constant 0 : index
    %438 = vector.load %arg7[%c1_355, %c0_356, %c0_357] : memref<4x1x48xf32, #tpu.memory_space<vmem>>, vector<1x1x48xf32>
    %439 = vector.shape_cast %438 : vector<1x1x48xf32> to vector<1x48xf32>
    %440 = vector.broadcast %439 : vector<1x48xf32> to vector<8x48xf32>
    %441 = arith.addf %437, %440 : vector<8x48xf32>
    %442 = arith.minimumf %434, %441 : vector<8x48xf32>
    %c2_358 = arith.constant 2 : index
    %c0_359 = arith.constant 0 : index
    %c0_360 = arith.constant 0 : index
    %443 = vector.load %arg6[%c2_358, %c0_359, %c0_360] : memref<4x48x48xf32, #tpu.memory_space<vmem>>, vector<1x48x48xf32>
    %444 = vector.shape_cast %443 : vector<1x48x48xf32> to vector<48x48xf32>
    %cst_361 = arith.constant dense<0.000000e+00> : vector<8x48xf32>
    %445 = tpu.matmul %442, %444, %cst_361 {dimension_numbers = #tpu.dot_dimension_numbers<[1], [0], [0], [1], [0, 0, 1, 1], [], []>} : vector<8x48xf32>, vector<48x48xf32>, vector<8x48xf32> -> vector<8x48xf32>
    %c2_362 = arith.constant 2 : index
    %c0_363 = arith.constant 0 : index
    %c0_364 = arith.constant 0 : index
    %446 = vector.load %arg7[%c2_362, %c0_363, %c0_364] : memref<4x1x48xf32, #tpu.memory_space<vmem>>, vector<1x1x48xf32>
    %447 = vector.shape_cast %446 : vector<1x1x48xf32> to vector<1x48xf32>
    %448 = vector.broadcast %447 : vector<1x48xf32> to vector<8x48xf32>
    %449 = arith.addf %445, %448 : vector<8x48xf32>
    %450 = arith.minimumf %442, %449 : vector<8x48xf32>
    %c3_365 = arith.constant 3 : index
    %c0_366 = arith.constant 0 : index
    %c0_367 = arith.constant 0 : index
    %451 = vector.load %arg6[%c3_365, %c0_366, %c0_367] : memref<4x48x48xf32, #tpu.memory_space<vmem>>, vector<1x48x48xf32>
    %452 = vector.shape_cast %451 : vector<1x48x48xf32> to vector<48x48xf32>
    %cst_368 = arith.constant dense<0.000000e+00> : vector<8x48xf32>
    %453 = tpu.matmul %450, %452, %cst_368 {dimension_numbers = #tpu.dot_dimension_numbers<[1], [0], [0], [1], [0, 0, 1, 1], [], []>} : vector<8x48xf32>, vector<48x48xf32>, vector<8x48xf32> -> vector<8x48xf32>
    %c3_369 = arith.constant 3 : index
    %c0_370 = arith.constant 0 : index
    %c0_371 = arith.constant 0 : index
    %454 = vector.load %arg7[%c3_369, %c0_370, %c0_371] : memref<4x1x48xf32, #tpu.memory_space<vmem>>, vector<1x1x48xf32>
    %455 = vector.shape_cast %454 : vector<1x1x48xf32> to vector<1x48xf32>
    %456 = vector.broadcast %455 : vector<1x48xf32> to vector<8x48xf32>
    %457 = arith.addf %453, %456 : vector<8x48xf32>
    %458 = arith.minimumf %450, %457 : vector<8x48xf32>
    %459 = arith.addf %416, %458 : vector<8x48xf32>
    %c10_i32 = arith.constant 10 : i32
    %c8_i32_372 = arith.constant 8 : i32
    %460 = arith.muli %c10_i32, %c8_i32_372 : i32
    %461 = tpu.assume_multiple %460, 8 : i32
    %462 = arith.index_cast %461 : i32 to index
    %c0_373 = arith.constant 0 : index
    %463 = vector.load %arg11[%462, %c0_373] : memref<128x48xf32, #tpu.memory_space<vmem>>, vector<8x48xf32>
    %c0_374 = arith.constant 0 : index
    %c0_375 = arith.constant 0 : index
    %464 = vector.load %arg5[%c0_374, %c0_375] : memref<48x48xf32, #tpu.memory_space<vmem>>, vector<48x48xf32>
    %cst_376 = arith.constant dense<0.000000e+00> : vector<8x48xf32>
    %465 = tpu.matmul %463, %464, %cst_376 {dimension_numbers = #tpu.dot_dimension_numbers<[1], [0], [0], [1], [0, 0, 1, 1], [], []>} : vector<8x48xf32>, vector<48x48xf32>, vector<8x48xf32> -> vector<8x48xf32>
    %466 = arith.subf %465, %463 : vector<8x48xf32>
    %c0_377 = arith.constant 0 : index
    %c0_378 = arith.constant 0 : index
    %c0_379 = arith.constant 0 : index
    %467 = vector.load %arg6[%c0_377, %c0_378, %c0_379] : memref<4x48x48xf32, #tpu.memory_space<vmem>>, vector<1x48x48xf32>
    %468 = vector.shape_cast %467 : vector<1x48x48xf32> to vector<48x48xf32>
    %cst_380 = arith.constant dense<0.000000e+00> : vector<8x48xf32>
    %469 = tpu.matmul %459, %468, %cst_380 {dimension_numbers = #tpu.dot_dimension_numbers<[1], [0], [0], [1], [0, 0, 1, 1], [], []>} : vector<8x48xf32>, vector<48x48xf32>, vector<8x48xf32> -> vector<8x48xf32>
    %c0_381 = arith.constant 0 : index
    %c0_382 = arith.constant 0 : index
    %c0_383 = arith.constant 0 : index
    %470 = vector.load %arg7[%c0_381, %c0_382, %c0_383] : memref<4x1x48xf32, #tpu.memory_space<vmem>>, vector<1x1x48xf32>
    %471 = vector.shape_cast %470 : vector<1x1x48xf32> to vector<1x48xf32>
    %472 = vector.broadcast %471 : vector<1x48xf32> to vector<8x48xf32>
    %473 = arith.addf %469, %472 : vector<8x48xf32>
    %474 = arith.minimumf %459, %473 : vector<8x48xf32>
    %475 = arith.subf %474, %466 : vector<8x48xf32>
    %c0_384 = arith.constant 0 : index
    %c0_385 = arith.constant 0 : index
    %c0_386 = arith.constant 0 : index
    %476 = vector.load %arg6[%c0_384, %c0_385, %c0_386] : memref<4x48x48xf32, #tpu.memory_space<vmem>>, vector<1x48x48xf32>
    %477 = vector.shape_cast %476 : vector<1x48x48xf32> to vector<48x48xf32>
    %cst_387 = arith.constant dense<0.000000e+00> : vector<8x48xf32>
    %478 = tpu.matmul %475, %477, %cst_387 {dimension_numbers = #tpu.dot_dimension_numbers<[1], [0], [0], [1], [0, 0, 1, 1], [], []>} : vector<8x48xf32>, vector<48x48xf32>, vector<8x48xf32> -> vector<8x48xf32>
    %c0_388 = arith.constant 0 : index
    %c0_389 = arith.constant 0 : index
    %c0_390 = arith.constant 0 : index
    %479 = vector.load %arg7[%c0_388, %c0_389, %c0_390] : memref<4x1x48xf32, #tpu.memory_space<vmem>>, vector<1x1x48xf32>
    %480 = vector.shape_cast %479 : vector<1x1x48xf32> to vector<1x48xf32>
    %481 = vector.broadcast %480 : vector<1x48xf32> to vector<8x48xf32>
    %482 = arith.addf %478, %481 : vector<8x48xf32>
    %483 = arith.minimumf %475, %482 : vector<8x48xf32>
    %c1_391 = arith.constant 1 : index
    %c0_392 = arith.constant 0 : index
    %c0_393 = arith.constant 0 : index
    %484 = vector.load %arg6[%c1_391, %c0_392, %c0_393] : memref<4x48x48xf32, #tpu.memory_space<vmem>>, vector<1x48x48xf32>
    %485 = vector.shape_cast %484 : vector<1x48x48xf32> to vector<48x48xf32>
    %cst_394 = arith.constant dense<0.000000e+00> : vector<8x48xf32>
    %486 = tpu.matmul %483, %485, %cst_394 {dimension_numbers = #tpu.dot_dimension_numbers<[1], [0], [0], [1], [0, 0, 1, 1], [], []>} : vector<8x48xf32>, vector<48x48xf32>, vector<8x48xf32> -> vector<8x48xf32>
    %c1_395 = arith.constant 1 : index
    %c0_396 = arith.constant 0 : index
    %c0_397 = arith.constant 0 : index
    %487 = vector.load %arg7[%c1_395, %c0_396, %c0_397] : memref<4x1x48xf32, #tpu.memory_space<vmem>>, vector<1x1x48xf32>
    %488 = vector.shape_cast %487 : vector<1x1x48xf32> to vector<1x48xf32>
    %489 = vector.broadcast %488 : vector<1x48xf32> to vector<8x48xf32>
    %490 = arith.addf %486, %489 : vector<8x48xf32>
    %491 = arith.minimumf %483, %490 : vector<8x48xf32>
    %c2_398 = arith.constant 2 : index
    %c0_399 = arith.constant 0 : index
    %c0_400 = arith.constant 0 : index
    %492 = vector.load %arg6[%c2_398, %c0_399, %c0_400] : memref<4x48x48xf32, #tpu.memory_space<vmem>>, vector<1x48x48xf32>
    %493 = vector.shape_cast %492 : vector<1x48x48xf32> to vector<48x48xf32>
    %cst_401 = arith.constant dense<0.000000e+00> : vector<8x48xf32>
    %494 = tpu.matmul %491, %493, %cst_401 {dimension_numbers = #tpu.dot_dimension_numbers<[1], [0], [0], [1], [0, 0, 1, 1], [], []>} : vector<8x48xf32>, vector<48x48xf32>, vector<8x48xf32> -> vector<8x48xf32>
    %c2_402 = arith.constant 2 : index
    %c0_403 = arith.constant 0 : index
    %c0_404 = arith.constant 0 : index
    %495 = vector.load %arg7[%c2_402, %c0_403, %c0_404] : memref<4x1x48xf32, #tpu.memory_space<vmem>>, vector<1x1x48xf32>
    %496 = vector.shape_cast %495 : vector<1x1x48xf32> to vector<1x48xf32>
    %497 = vector.broadcast %496 : vector<1x48xf32> to vector<8x48xf32>
    %498 = arith.addf %494, %497 : vector<8x48xf32>
    %499 = arith.minimumf %491, %498 : vector<8x48xf32>
    %c3_405 = arith.constant 3 : index
    %c0_406 = arith.constant 0 : index
    %c0_407 = arith.constant 0 : index
    %500 = vector.load %arg6[%c3_405, %c0_406, %c0_407] : memref<4x48x48xf32, #tpu.memory_space<vmem>>, vector<1x48x48xf32>
    %501 = vector.shape_cast %500 : vector<1x48x48xf32> to vector<48x48xf32>
    %cst_408 = arith.constant dense<0.000000e+00> : vector<8x48xf32>
    %502 = tpu.matmul %499, %501, %cst_408 {dimension_numbers = #tpu.dot_dimension_numbers<[1], [0], [0], [1], [0, 0, 1, 1], [], []>} : vector<8x48xf32>, vector<48x48xf32>, vector<8x48xf32> -> vector<8x48xf32>
    %c3_409 = arith.constant 3 : index
    %c0_410 = arith.constant 0 : index
    %c0_411 = arith.constant 0 : index
    %503 = vector.load %arg7[%c3_409, %c0_410, %c0_411] : memref<4x1x48xf32, #tpu.memory_space<vmem>>, vector<1x1x48xf32>
    %504 = vector.shape_cast %503 : vector<1x1x48xf32> to vector<1x48xf32>
    %505 = vector.broadcast %504 : vector<1x48xf32> to vector<8x48xf32>
    %506 = arith.addf %502, %505 : vector<8x48xf32>
    %507 = arith.minimumf %499, %506 : vector<8x48xf32>
    %508 = arith.addf %465, %507 : vector<8x48xf32>
    %c11_i32 = arith.constant 11 : i32
    %c8_i32_412 = arith.constant 8 : i32
    %509 = arith.muli %c11_i32, %c8_i32_412 : i32
    %510 = tpu.assume_multiple %509, 8 : i32
    %511 = arith.index_cast %510 : i32 to index
    %c0_413 = arith.constant 0 : index
    %512 = vector.load %arg11[%511, %c0_413] : memref<128x48xf32, #tpu.memory_space<vmem>>, vector<8x48xf32>
    %c0_414 = arith.constant 0 : index
    %c0_415 = arith.constant 0 : index
    %513 = vector.load %arg5[%c0_414, %c0_415] : memref<48x48xf32, #tpu.memory_space<vmem>>, vector<48x48xf32>
    %cst_416 = arith.constant dense<0.000000e+00> : vector<8x48xf32>
    %514 = tpu.matmul %512, %513, %cst_416 {dimension_numbers = #tpu.dot_dimension_numbers<[1], [0], [0], [1], [0, 0, 1, 1], [], []>} : vector<8x48xf32>, vector<48x48xf32>, vector<8x48xf32> -> vector<8x48xf32>
    %515 = arith.subf %514, %512 : vector<8x48xf32>
    %c0_417 = arith.constant 0 : index
    %c0_418 = arith.constant 0 : index
    %c0_419 = arith.constant 0 : index
    %516 = vector.load %arg6[%c0_417, %c0_418, %c0_419] : memref<4x48x48xf32, #tpu.memory_space<vmem>>, vector<1x48x48xf32>
    %517 = vector.shape_cast %516 : vector<1x48x48xf32> to vector<48x48xf32>
    %cst_420 = arith.constant dense<0.000000e+00> : vector<8x48xf32>
    %518 = tpu.matmul %508, %517, %cst_420 {dimension_numbers = #tpu.dot_dimension_numbers<[1], [0], [0], [1], [0, 0, 1, 1], [], []>} : vector<8x48xf32>, vector<48x48xf32>, vector<8x48xf32> -> vector<8x48xf32>
    %c0_421 = arith.constant 0 : index
    %c0_422 = arith.constant 0 : index
    %c0_423 = arith.constant 0 : index
    %519 = vector.load %arg7[%c0_421, %c0_422, %c0_423] : memref<4x1x48xf32, #tpu.memory_space<vmem>>, vector<1x1x48xf32>
    %520 = vector.shape_cast %519 : vector<1x1x48xf32> to vector<1x48xf32>
    %521 = vector.broadcast %520 : vector<1x48xf32> to vector<8x48xf32>
    %522 = arith.addf %518, %521 : vector<8x48xf32>
    %523 = arith.minimumf %508, %522 : vector<8x48xf32>
    %524 = arith.subf %523, %515 : vector<8x48xf32>
    %c0_424 = arith.constant 0 : index
    %c0_425 = arith.constant 0 : index
    %c0_426 = arith.constant 0 : index
    %525 = vector.load %arg6[%c0_424, %c0_425, %c0_426] : memref<4x48x48xf32, #tpu.memory_space<vmem>>, vector<1x48x48xf32>
    %526 = vector.shape_cast %525 : vector<1x48x48xf32> to vector<48x48xf32>
    %cst_427 = arith.constant dense<0.000000e+00> : vector<8x48xf32>
    %527 = tpu.matmul %524, %526, %cst_427 {dimension_numbers = #tpu.dot_dimension_numbers<[1], [0], [0], [1], [0, 0, 1, 1], [], []>} : vector<8x48xf32>, vector<48x48xf32>, vector<8x48xf32> -> vector<8x48xf32>
    %c0_428 = arith.constant 0 : index
    %c0_429 = arith.constant 0 : index
    %c0_430 = arith.constant 0 : index
    %528 = vector.load %arg7[%c0_428, %c0_429, %c0_430] : memref<4x1x48xf32, #tpu.memory_space<vmem>>, vector<1x1x48xf32>
    %529 = vector.shape_cast %528 : vector<1x1x48xf32> to vector<1x48xf32>
    %530 = vector.broadcast %529 : vector<1x48xf32> to vector<8x48xf32>
    %531 = arith.addf %527, %530 : vector<8x48xf32>
    %532 = arith.minimumf %524, %531 : vector<8x48xf32>
    %c1_431 = arith.constant 1 : index
    %c0_432 = arith.constant 0 : index
    %c0_433 = arith.constant 0 : index
    %533 = vector.load %arg6[%c1_431, %c0_432, %c0_433] : memref<4x48x48xf32, #tpu.memory_space<vmem>>, vector<1x48x48xf32>
    %534 = vector.shape_cast %533 : vector<1x48x48xf32> to vector<48x48xf32>
    %cst_434 = arith.constant dense<0.000000e+00> : vector<8x48xf32>
    %535 = tpu.matmul %532, %534, %cst_434 {dimension_numbers = #tpu.dot_dimension_numbers<[1], [0], [0], [1], [0, 0, 1, 1], [], []>} : vector<8x48xf32>, vector<48x48xf32>, vector<8x48xf32> -> vector<8x48xf32>
    %c1_435 = arith.constant 1 : index
    %c0_436 = arith.constant 0 : index
    %c0_437 = arith.constant 0 : index
    %536 = vector.load %arg7[%c1_435, %c0_436, %c0_437] : memref<4x1x48xf32, #tpu.memory_space<vmem>>, vector<1x1x48xf32>
    %537 = vector.shape_cast %536 : vector<1x1x48xf32> to vector<1x48xf32>
    %538 = vector.broadcast %537 : vector<1x48xf32> to vector<8x48xf32>
    %539 = arith.addf %535, %538 : vector<8x48xf32>
    %540 = arith.minimumf %532, %539 : vector<8x48xf32>
    %c2_438 = arith.constant 2 : index
    %c0_439 = arith.constant 0 : index
    %c0_440 = arith.constant 0 : index
    %541 = vector.load %arg6[%c2_438, %c0_439, %c0_440] : memref<4x48x48xf32, #tpu.memory_space<vmem>>, vector<1x48x48xf32>
    %542 = vector.shape_cast %541 : vector<1x48x48xf32> to vector<48x48xf32>
    %cst_441 = arith.constant dense<0.000000e+00> : vector<8x48xf32>
    %543 = tpu.matmul %540, %542, %cst_441 {dimension_numbers = #tpu.dot_dimension_numbers<[1], [0], [0], [1], [0, 0, 1, 1], [], []>} : vector<8x48xf32>, vector<48x48xf32>, vector<8x48xf32> -> vector<8x48xf32>
    %c2_442 = arith.constant 2 : index
    %c0_443 = arith.constant 0 : index
    %c0_444 = arith.constant 0 : index
    %544 = vector.load %arg7[%c2_442, %c0_443, %c0_444] : memref<4x1x48xf32, #tpu.memory_space<vmem>>, vector<1x1x48xf32>
    %545 = vector.shape_cast %544 : vector<1x1x48xf32> to vector<1x48xf32>
    %546 = vector.broadcast %545 : vector<1x48xf32> to vector<8x48xf32>
    %547 = arith.addf %543, %546 : vector<8x48xf32>
    %548 = arith.minimumf %540, %547 : vector<8x48xf32>
    %c3_445 = arith.constant 3 : index
    %c0_446 = arith.constant 0 : index
    %c0_447 = arith.constant 0 : index
    %549 = vector.load %arg6[%c3_445, %c0_446, %c0_447] : memref<4x48x48xf32, #tpu.memory_space<vmem>>, vector<1x48x48xf32>
    %550 = vector.shape_cast %549 : vector<1x48x48xf32> to vector<48x48xf32>
    %cst_448 = arith.constant dense<0.000000e+00> : vector<8x48xf32>
    %551 = tpu.matmul %548, %550, %cst_448 {dimension_numbers = #tpu.dot_dimension_numbers<[1], [0], [0], [1], [0, 0, 1, 1], [], []>} : vector<8x48xf32>, vector<48x48xf32>, vector<8x48xf32> -> vector<8x48xf32>
    %c3_449 = arith.constant 3 : index
    %c0_450 = arith.constant 0 : index
    %c0_451 = arith.constant 0 : index
    %552 = vector.load %arg7[%c3_449, %c0_450, %c0_451] : memref<4x1x48xf32, #tpu.memory_space<vmem>>, vector<1x1x48xf32>
    %553 = vector.shape_cast %552 : vector<1x1x48xf32> to vector<1x48xf32>
    %554 = vector.broadcast %553 : vector<1x48xf32> to vector<8x48xf32>
    %555 = arith.addf %551, %554 : vector<8x48xf32>
    %556 = arith.minimumf %548, %555 : vector<8x48xf32>
    %557 = arith.addf %514, %556 : vector<8x48xf32>
    %c12_i32 = arith.constant 12 : i32
    %c8_i32_452 = arith.constant 8 : i32
    %558 = arith.muli %c12_i32, %c8_i32_452 : i32
    %559 = tpu.assume_multiple %558, 8 : i32
    %560 = arith.index_cast %559 : i32 to index
    %c0_453 = arith.constant 0 : index
    %561 = vector.load %arg11[%560, %c0_453] : memref<128x48xf32, #tpu.memory_space<vmem>>, vector<8x48xf32>
    %c0_454 = arith.constant 0 : index
    %c0_455 = arith.constant 0 : index
    %562 = vector.load %arg5[%c0_454, %c0_455] : memref<48x48xf32, #tpu.memory_space<vmem>>, vector<48x48xf32>
    %cst_456 = arith.constant dense<0.000000e+00> : vector<8x48xf32>
    %563 = tpu.matmul %561, %562, %cst_456 {dimension_numbers = #tpu.dot_dimension_numbers<[1], [0], [0], [1], [0, 0, 1, 1], [], []>} : vector<8x48xf32>, vector<48x48xf32>, vector<8x48xf32> -> vector<8x48xf32>
    %564 = arith.subf %563, %561 : vector<8x48xf32>
    %c0_457 = arith.constant 0 : index
    %c0_458 = arith.constant 0 : index
    %c0_459 = arith.constant 0 : index
    %565 = vector.load %arg6[%c0_457, %c0_458, %c0_459] : memref<4x48x48xf32, #tpu.memory_space<vmem>>, vector<1x48x48xf32>
    %566 = vector.shape_cast %565 : vector<1x48x48xf32> to vector<48x48xf32>
    %cst_460 = arith.constant dense<0.000000e+00> : vector<8x48xf32>
    %567 = tpu.matmul %557, %566, %cst_460 {dimension_numbers = #tpu.dot_dimension_numbers<[1], [0], [0], [1], [0, 0, 1, 1], [], []>} : vector<8x48xf32>, vector<48x48xf32>, vector<8x48xf32> -> vector<8x48xf32>
    %c0_461 = arith.constant 0 : index
    %c0_462 = arith.constant 0 : index
    %c0_463 = arith.constant 0 : index
    %568 = vector.load %arg7[%c0_461, %c0_462, %c0_463] : memref<4x1x48xf32, #tpu.memory_space<vmem>>, vector<1x1x48xf32>
    %569 = vector.shape_cast %568 : vector<1x1x48xf32> to vector<1x48xf32>
    %570 = vector.broadcast %569 : vector<1x48xf32> to vector<8x48xf32>
    %571 = arith.addf %567, %570 : vector<8x48xf32>
    %572 = arith.minimumf %557, %571 : vector<8x48xf32>
    %573 = arith.subf %572, %564 : vector<8x48xf32>
    %c0_464 = arith.constant 0 : index
    %c0_465 = arith.constant 0 : index
    %c0_466 = arith.constant 0 : index
    %574 = vector.load %arg6[%c0_464, %c0_465, %c0_466] : memref<4x48x48xf32, #tpu.memory_space<vmem>>, vector<1x48x48xf32>
    %575 = vector.shape_cast %574 : vector<1x48x48xf32> to vector<48x48xf32>
    %cst_467 = arith.constant dense<0.000000e+00> : vector<8x48xf32>
    %576 = tpu.matmul %573, %575, %cst_467 {dimension_numbers = #tpu.dot_dimension_numbers<[1], [0], [0], [1], [0, 0, 1, 1], [], []>} : vector<8x48xf32>, vector<48x48xf32>, vector<8x48xf32> -> vector<8x48xf32>
    %c0_468 = arith.constant 0 : index
    %c0_469 = arith.constant 0 : index
    %c0_470 = arith.constant 0 : index
    %577 = vector.load %arg7[%c0_468, %c0_469, %c0_470] : memref<4x1x48xf32, #tpu.memory_space<vmem>>, vector<1x1x48xf32>
    %578 = vector.shape_cast %577 : vector<1x1x48xf32> to vector<1x48xf32>
    %579 = vector.broadcast %578 : vector<1x48xf32> to vector<8x48xf32>
    %580 = arith.addf %576, %579 : vector<8x48xf32>
    %581 = arith.minimumf %573, %580 : vector<8x48xf32>
    %c1_471 = arith.constant 1 : index
    %c0_472 = arith.constant 0 : index
    %c0_473 = arith.constant 0 : index
    %582 = vector.load %arg6[%c1_471, %c0_472, %c0_473] : memref<4x48x48xf32, #tpu.memory_space<vmem>>, vector<1x48x48xf32>
    %583 = vector.shape_cast %582 : vector<1x48x48xf32> to vector<48x48xf32>
    %cst_474 = arith.constant dense<0.000000e+00> : vector<8x48xf32>
    %584 = tpu.matmul %581, %583, %cst_474 {dimension_numbers = #tpu.dot_dimension_numbers<[1], [0], [0], [1], [0, 0, 1, 1], [], []>} : vector<8x48xf32>, vector<48x48xf32>, vector<8x48xf32> -> vector<8x48xf32>
    %c1_475 = arith.constant 1 : index
    %c0_476 = arith.constant 0 : index
    %c0_477 = arith.constant 0 : index
    %585 = vector.load %arg7[%c1_475, %c0_476, %c0_477] : memref<4x1x48xf32, #tpu.memory_space<vmem>>, vector<1x1x48xf32>
    %586 = vector.shape_cast %585 : vector<1x1x48xf32> to vector<1x48xf32>
    %587 = vector.broadcast %586 : vector<1x48xf32> to vector<8x48xf32>
    %588 = arith.addf %584, %587 : vector<8x48xf32>
    %589 = arith.minimumf %581, %588 : vector<8x48xf32>
    %c2_478 = arith.constant 2 : index
    %c0_479 = arith.constant 0 : index
    %c0_480 = arith.constant 0 : index
    %590 = vector.load %arg6[%c2_478, %c0_479, %c0_480] : memref<4x48x48xf32, #tpu.memory_space<vmem>>, vector<1x48x48xf32>
    %591 = vector.shape_cast %590 : vector<1x48x48xf32> to vector<48x48xf32>
    %cst_481 = arith.constant dense<0.000000e+00> : vector<8x48xf32>
    %592 = tpu.matmul %589, %591, %cst_481 {dimension_numbers = #tpu.dot_dimension_numbers<[1], [0], [0], [1], [0, 0, 1, 1], [], []>} : vector<8x48xf32>, vector<48x48xf32>, vector<8x48xf32> -> vector<8x48xf32>
    %c2_482 = arith.constant 2 : index
    %c0_483 = arith.constant 0 : index
    %c0_484 = arith.constant 0 : index
    %593 = vector.load %arg7[%c2_482, %c0_483, %c0_484] : memref<4x1x48xf32, #tpu.memory_space<vmem>>, vector<1x1x48xf32>
    %594 = vector.shape_cast %593 : vector<1x1x48xf32> to vector<1x48xf32>
    %595 = vector.broadcast %594 : vector<1x48xf32> to vector<8x48xf32>
    %596 = arith.addf %592, %595 : vector<8x48xf32>
    %597 = arith.minimumf %589, %596 : vector<8x48xf32>
    %c3_485 = arith.constant 3 : index
    %c0_486 = arith.constant 0 : index
    %c0_487 = arith.constant 0 : index
    %598 = vector.load %arg6[%c3_485, %c0_486, %c0_487] : memref<4x48x48xf32, #tpu.memory_space<vmem>>, vector<1x48x48xf32>
    %599 = vector.shape_cast %598 : vector<1x48x48xf32> to vector<48x48xf32>
    %cst_488 = arith.constant dense<0.000000e+00> : vector<8x48xf32>
    %600 = tpu.matmul %597, %599, %cst_488 {dimension_numbers = #tpu.dot_dimension_numbers<[1], [0], [0], [1], [0, 0, 1, 1], [], []>} : vector<8x48xf32>, vector<48x48xf32>, vector<8x48xf32> -> vector<8x48xf32>
    %c3_489 = arith.constant 3 : index
    %c0_490 = arith.constant 0 : index
    %c0_491 = arith.constant 0 : index
    %601 = vector.load %arg7[%c3_489, %c0_490, %c0_491] : memref<4x1x48xf32, #tpu.memory_space<vmem>>, vector<1x1x48xf32>
    %602 = vector.shape_cast %601 : vector<1x1x48xf32> to vector<1x48xf32>
    %603 = vector.broadcast %602 : vector<1x48xf32> to vector<8x48xf32>
    %604 = arith.addf %600, %603 : vector<8x48xf32>
    %605 = arith.minimumf %597, %604 : vector<8x48xf32>
    %606 = arith.addf %563, %605 : vector<8x48xf32>
    %c13_i32 = arith.constant 13 : i32
    %c8_i32_492 = arith.constant 8 : i32
    %607 = arith.muli %c13_i32, %c8_i32_492 : i32
    %608 = tpu.assume_multiple %607, 8 : i32
    %609 = arith.index_cast %608 : i32 to index
    %c0_493 = arith.constant 0 : index
    %610 = vector.load %arg11[%609, %c0_493] : memref<128x48xf32, #tpu.memory_space<vmem>>, vector<8x48xf32>
    %c0_494 = arith.constant 0 : index
    %c0_495 = arith.constant 0 : index
    %611 = vector.load %arg5[%c0_494, %c0_495] : memref<48x48xf32, #tpu.memory_space<vmem>>, vector<48x48xf32>
    %cst_496 = arith.constant dense<0.000000e+00> : vector<8x48xf32>
    %612 = tpu.matmul %610, %611, %cst_496 {dimension_numbers = #tpu.dot_dimension_numbers<[1], [0], [0], [1], [0, 0, 1, 1], [], []>} : vector<8x48xf32>, vector<48x48xf32>, vector<8x48xf32> -> vector<8x48xf32>
    %613 = arith.subf %612, %610 : vector<8x48xf32>
    %c0_497 = arith.constant 0 : index
    %c0_498 = arith.constant 0 : index
    %c0_499 = arith.constant 0 : index
    %614 = vector.load %arg6[%c0_497, %c0_498, %c0_499] : memref<4x48x48xf32, #tpu.memory_space<vmem>>, vector<1x48x48xf32>
    %615 = vector.shape_cast %614 : vector<1x48x48xf32> to vector<48x48xf32>
    %cst_500 = arith.constant dense<0.000000e+00> : vector<8x48xf32>
    %616 = tpu.matmul %606, %615, %cst_500 {dimension_numbers = #tpu.dot_dimension_numbers<[1], [0], [0], [1], [0, 0, 1, 1], [], []>} : vector<8x48xf32>, vector<48x48xf32>, vector<8x48xf32> -> vector<8x48xf32>
    %c0_501 = arith.constant 0 : index
    %c0_502 = arith.constant 0 : index
    %c0_503 = arith.constant 0 : index
    %617 = vector.load %arg7[%c0_501, %c0_502, %c0_503] : memref<4x1x48xf32, #tpu.memory_space<vmem>>, vector<1x1x48xf32>
    %618 = vector.shape_cast %617 : vector<1x1x48xf32> to vector<1x48xf32>
    %619 = vector.broadcast %618 : vector<1x48xf32> to vector<8x48xf32>
    %620 = arith.addf %616, %619 : vector<8x48xf32>
    %621 = arith.minimumf %606, %620 : vector<8x48xf32>
    %622 = arith.subf %621, %613 : vector<8x48xf32>
    %c0_504 = arith.constant 0 : index
    %c0_505 = arith.constant 0 : index
    %c0_506 = arith.constant 0 : index
    %623 = vector.load %arg6[%c0_504, %c0_505, %c0_506] : memref<4x48x48xf32, #tpu.memory_space<vmem>>, vector<1x48x48xf32>
    %624 = vector.shape_cast %623 : vector<1x48x48xf32> to vector<48x48xf32>
    %cst_507 = arith.constant dense<0.000000e+00> : vector<8x48xf32>
    %625 = tpu.matmul %622, %624, %cst_507 {dimension_numbers = #tpu.dot_dimension_numbers<[1], [0], [0], [1], [0, 0, 1, 1], [], []>} : vector<8x48xf32>, vector<48x48xf32>, vector<8x48xf32> -> vector<8x48xf32>
    %c0_508 = arith.constant 0 : index
    %c0_509 = arith.constant 0 : index
    %c0_510 = arith.constant 0 : index
    %626 = vector.load %arg7[%c0_508, %c0_509, %c0_510] : memref<4x1x48xf32, #tpu.memory_space<vmem>>, vector<1x1x48xf32>
    %627 = vector.shape_cast %626 : vector<1x1x48xf32> to vector<1x48xf32>
    %628 = vector.broadcast %627 : vector<1x48xf32> to vector<8x48xf32>
    %629 = arith.addf %625, %628 : vector<8x48xf32>
    %630 = arith.minimumf %622, %629 : vector<8x48xf32>
    %c1_511 = arith.constant 1 : index
    %c0_512 = arith.constant 0 : index
    %c0_513 = arith.constant 0 : index
    %631 = vector.load %arg6[%c1_511, %c0_512, %c0_513] : memref<4x48x48xf32, #tpu.memory_space<vmem>>, vector<1x48x48xf32>
    %632 = vector.shape_cast %631 : vector<1x48x48xf32> to vector<48x48xf32>
    %cst_514 = arith.constant dense<0.000000e+00> : vector<8x48xf32>
    %633 = tpu.matmul %630, %632, %cst_514 {dimension_numbers = #tpu.dot_dimension_numbers<[1], [0], [0], [1], [0, 0, 1, 1], [], []>} : vector<8x48xf32>, vector<48x48xf32>, vector<8x48xf32> -> vector<8x48xf32>
    %c1_515 = arith.constant 1 : index
    %c0_516 = arith.constant 0 : index
    %c0_517 = arith.constant 0 : index
    %634 = vector.load %arg7[%c1_515, %c0_516, %c0_517] : memref<4x1x48xf32, #tpu.memory_space<vmem>>, vector<1x1x48xf32>
    %635 = vector.shape_cast %634 : vector<1x1x48xf32> to vector<1x48xf32>
    %636 = vector.broadcast %635 : vector<1x48xf32> to vector<8x48xf32>
    %637 = arith.addf %633, %636 : vector<8x48xf32>
    %638 = arith.minimumf %630, %637 : vector<8x48xf32>
    %c2_518 = arith.constant 2 : index
    %c0_519 = arith.constant 0 : index
    %c0_520 = arith.constant 0 : index
    %639 = vector.load %arg6[%c2_518, %c0_519, %c0_520] : memref<4x48x48xf32, #tpu.memory_space<vmem>>, vector<1x48x48xf32>
    %640 = vector.shape_cast %639 : vector<1x48x48xf32> to vector<48x48xf32>
    %cst_521 = arith.constant dense<0.000000e+00> : vector<8x48xf32>
    %641 = tpu.matmul %638, %640, %cst_521 {dimension_numbers = #tpu.dot_dimension_numbers<[1], [0], [0], [1], [0, 0, 1, 1], [], []>} : vector<8x48xf32>, vector<48x48xf32>, vector<8x48xf32> -> vector<8x48xf32>
    %c2_522 = arith.constant 2 : index
    %c0_523 = arith.constant 0 : index
    %c0_524 = arith.constant 0 : index
    %642 = vector.load %arg7[%c2_522, %c0_523, %c0_524] : memref<4x1x48xf32, #tpu.memory_space<vmem>>, vector<1x1x48xf32>
    %643 = vector.shape_cast %642 : vector<1x1x48xf32> to vector<1x48xf32>
    %644 = vector.broadcast %643 : vector<1x48xf32> to vector<8x48xf32>
    %645 = arith.addf %641, %644 : vector<8x48xf32>
    %646 = arith.minimumf %638, %645 : vector<8x48xf32>
    %c3_525 = arith.constant 3 : index
    %c0_526 = arith.constant 0 : index
    %c0_527 = arith.constant 0 : index
    %647 = vector.load %arg6[%c3_525, %c0_526, %c0_527] : memref<4x48x48xf32, #tpu.memory_space<vmem>>, vector<1x48x48xf32>
    %648 = vector.shape_cast %647 : vector<1x48x48xf32> to vector<48x48xf32>
    %cst_528 = arith.constant dense<0.000000e+00> : vector<8x48xf32>
    %649 = tpu.matmul %646, %648, %cst_528 {dimension_numbers = #tpu.dot_dimension_numbers<[1], [0], [0], [1], [0, 0, 1, 1], [], []>} : vector<8x48xf32>, vector<48x48xf32>, vector<8x48xf32> -> vector<8x48xf32>
    %c3_529 = arith.constant 3 : index
    %c0_530 = arith.constant 0 : index
    %c0_531 = arith.constant 0 : index
    %650 = vector.load %arg7[%c3_529, %c0_530, %c0_531] : memref<4x1x48xf32, #tpu.memory_space<vmem>>, vector<1x1x48xf32>
    %651 = vector.shape_cast %650 : vector<1x1x48xf32> to vector<1x48xf32>
    %652 = vector.broadcast %651 : vector<1x48xf32> to vector<8x48xf32>
    %653 = arith.addf %649, %652 : vector<8x48xf32>
    %654 = arith.minimumf %646, %653 : vector<8x48xf32>
    %655 = arith.addf %612, %654 : vector<8x48xf32>
    %c14_i32 = arith.constant 14 : i32
    %c8_i32_532 = arith.constant 8 : i32
    %656 = arith.muli %c14_i32, %c8_i32_532 : i32
    %657 = tpu.assume_multiple %656, 8 : i32
    %658 = arith.index_cast %657 : i32 to index
    %c0_533 = arith.constant 0 : index
    %659 = vector.load %arg11[%658, %c0_533] : memref<128x48xf32, #tpu.memory_space<vmem>>, vector<8x48xf32>
    %c0_534 = arith.constant 0 : index
    %c0_535 = arith.constant 0 : index
    %660 = vector.load %arg5[%c0_534, %c0_535] : memref<48x48xf32, #tpu.memory_space<vmem>>, vector<48x48xf32>
    %cst_536 = arith.constant dense<0.000000e+00> : vector<8x48xf32>
    %661 = tpu.matmul %659, %660, %cst_536 {dimension_numbers = #tpu.dot_dimension_numbers<[1], [0], [0], [1], [0, 0, 1, 1], [], []>} : vector<8x48xf32>, vector<48x48xf32>, vector<8x48xf32> -> vector<8x48xf32>
    %662 = arith.subf %661, %659 : vector<8x48xf32>
    %c0_537 = arith.constant 0 : index
    %c0_538 = arith.constant 0 : index
    %c0_539 = arith.constant 0 : index
    %663 = vector.load %arg6[%c0_537, %c0_538, %c0_539] : memref<4x48x48xf32, #tpu.memory_space<vmem>>, vector<1x48x48xf32>
    %664 = vector.shape_cast %663 : vector<1x48x48xf32> to vector<48x48xf32>
    %cst_540 = arith.constant dense<0.000000e+00> : vector<8x48xf32>
    %665 = tpu.matmul %655, %664, %cst_540 {dimension_numbers = #tpu.dot_dimension_numbers<[1], [0], [0], [1], [0, 0, 1, 1], [], []>} : vector<8x48xf32>, vector<48x48xf32>, vector<8x48xf32> -> vector<8x48xf32>
    %c0_541 = arith.constant 0 : index
    %c0_542 = arith.constant 0 : index
    %c0_543 = arith.constant 0 : index
    %666 = vector.load %arg7[%c0_541, %c0_542, %c0_543] : memref<4x1x48xf32, #tpu.memory_space<vmem>>, vector<1x1x48xf32>
    %667 = vector.shape_cast %666 : vector<1x1x48xf32> to vector<1x48xf32>
    %668 = vector.broadcast %667 : vector<1x48xf32> to vector<8x48xf32>
    %669 = arith.addf %665, %668 : vector<8x48xf32>
    %670 = arith.minimumf %655, %669 : vector<8x48xf32>
    %671 = arith.subf %670, %662 : vector<8x48xf32>
    %c0_544 = arith.constant 0 : index
    %c0_545 = arith.constant 0 : index
    %c0_546 = arith.constant 0 : index
    %672 = vector.load %arg6[%c0_544, %c0_545, %c0_546] : memref<4x48x48xf32, #tpu.memory_space<vmem>>, vector<1x48x48xf32>
    %673 = vector.shape_cast %672 : vector<1x48x48xf32> to vector<48x48xf32>
    %cst_547 = arith.constant dense<0.000000e+00> : vector<8x48xf32>
    %674 = tpu.matmul %671, %673, %cst_547 {dimension_numbers = #tpu.dot_dimension_numbers<[1], [0], [0], [1], [0, 0, 1, 1], [], []>} : vector<8x48xf32>, vector<48x48xf32>, vector<8x48xf32> -> vector<8x48xf32>
    %c0_548 = arith.constant 0 : index
    %c0_549 = arith.constant 0 : index
    %c0_550 = arith.constant 0 : index
    %675 = vector.load %arg7[%c0_548, %c0_549, %c0_550] : memref<4x1x48xf32, #tpu.memory_space<vmem>>, vector<1x1x48xf32>
    %676 = vector.shape_cast %675 : vector<1x1x48xf32> to vector<1x48xf32>
    %677 = vector.broadcast %676 : vector<1x48xf32> to vector<8x48xf32>
    %678 = arith.addf %674, %677 : vector<8x48xf32>
    %679 = arith.minimumf %671, %678 : vector<8x48xf32>
    %c1_551 = arith.constant 1 : index
    %c0_552 = arith.constant 0 : index
    %c0_553 = arith.constant 0 : index
    %680 = vector.load %arg6[%c1_551, %c0_552, %c0_553] : memref<4x48x48xf32, #tpu.memory_space<vmem>>, vector<1x48x48xf32>
    %681 = vector.shape_cast %680 : vector<1x48x48xf32> to vector<48x48xf32>
    %cst_554 = arith.constant dense<0.000000e+00> : vector<8x48xf32>
    %682 = tpu.matmul %679, %681, %cst_554 {dimension_numbers = #tpu.dot_dimension_numbers<[1], [0], [0], [1], [0, 0, 1, 1], [], []>} : vector<8x48xf32>, vector<48x48xf32>, vector<8x48xf32> -> vector<8x48xf32>
    %c1_555 = arith.constant 1 : index
    %c0_556 = arith.constant 0 : index
    %c0_557 = arith.constant 0 : index
    %683 = vector.load %arg7[%c1_555, %c0_556, %c0_557] : memref<4x1x48xf32, #tpu.memory_space<vmem>>, vector<1x1x48xf32>
    %684 = vector.shape_cast %683 : vector<1x1x48xf32> to vector<1x48xf32>
    %685 = vector.broadcast %684 : vector<1x48xf32> to vector<8x48xf32>
    %686 = arith.addf %682, %685 : vector<8x48xf32>
    %687 = arith.minimumf %679, %686 : vector<8x48xf32>
    %c2_558 = arith.constant 2 : index
    %c0_559 = arith.constant 0 : index
    %c0_560 = arith.constant 0 : index
    %688 = vector.load %arg6[%c2_558, %c0_559, %c0_560] : memref<4x48x48xf32, #tpu.memory_space<vmem>>, vector<1x48x48xf32>
    %689 = vector.shape_cast %688 : vector<1x48x48xf32> to vector<48x48xf32>
    %cst_561 = arith.constant dense<0.000000e+00> : vector<8x48xf32>
    %690 = tpu.matmul %687, %689, %cst_561 {dimension_numbers = #tpu.dot_dimension_numbers<[1], [0], [0], [1], [0, 0, 1, 1], [], []>} : vector<8x48xf32>, vector<48x48xf32>, vector<8x48xf32> -> vector<8x48xf32>
    %c2_562 = arith.constant 2 : index
    %c0_563 = arith.constant 0 : index
    %c0_564 = arith.constant 0 : index
    %691 = vector.load %arg7[%c2_562, %c0_563, %c0_564] : memref<4x1x48xf32, #tpu.memory_space<vmem>>, vector<1x1x48xf32>
    %692 = vector.shape_cast %691 : vector<1x1x48xf32> to vector<1x48xf32>
    %693 = vector.broadcast %692 : vector<1x48xf32> to vector<8x48xf32>
    %694 = arith.addf %690, %693 : vector<8x48xf32>
    %695 = arith.minimumf %687, %694 : vector<8x48xf32>
    %c3_565 = arith.constant 3 : index
    %c0_566 = arith.constant 0 : index
    %c0_567 = arith.constant 0 : index
    %696 = vector.load %arg6[%c3_565, %c0_566, %c0_567] : memref<4x48x48xf32, #tpu.memory_space<vmem>>, vector<1x48x48xf32>
    %697 = vector.shape_cast %696 : vector<1x48x48xf32> to vector<48x48xf32>
    %cst_568 = arith.constant dense<0.000000e+00> : vector<8x48xf32>
    %698 = tpu.matmul %695, %697, %cst_568 {dimension_numbers = #tpu.dot_dimension_numbers<[1], [0], [0], [1], [0, 0, 1, 1], [], []>} : vector<8x48xf32>, vector<48x48xf32>, vector<8x48xf32> -> vector<8x48xf32>
    %c3_569 = arith.constant 3 : index
    %c0_570 = arith.constant 0 : index
    %c0_571 = arith.constant 0 : index
    %699 = vector.load %arg7[%c3_569, %c0_570, %c0_571] : memref<4x1x48xf32, #tpu.memory_space<vmem>>, vector<1x1x48xf32>
    %700 = vector.shape_cast %699 : vector<1x1x48xf32> to vector<1x48xf32>
    %701 = vector.broadcast %700 : vector<1x48xf32> to vector<8x48xf32>
    %702 = arith.addf %698, %701 : vector<8x48xf32>
    %703 = arith.minimumf %695, %702 : vector<8x48xf32>
    %704 = arith.addf %661, %703 : vector<8x48xf32>
    %c15_i32 = arith.constant 15 : i32
    %c8_i32_572 = arith.constant 8 : i32
    %705 = arith.muli %c15_i32, %c8_i32_572 : i32
    %706 = tpu.assume_multiple %705, 8 : i32
    %707 = arith.index_cast %706 : i32 to index
    %c0_573 = arith.constant 0 : index
    %708 = vector.load %arg11[%707, %c0_573] : memref<128x48xf32, #tpu.memory_space<vmem>>, vector<8x48xf32>
    %c0_574 = arith.constant 0 : index
    %c0_575 = arith.constant 0 : index
    %709 = vector.load %arg5[%c0_574, %c0_575] : memref<48x48xf32, #tpu.memory_space<vmem>>, vector<48x48xf32>
    %cst_576 = arith.constant dense<0.000000e+00> : vector<8x48xf32>
    %710 = tpu.matmul %708, %709, %cst_576 {dimension_numbers = #tpu.dot_dimension_numbers<[1], [0], [0], [1], [0, 0, 1, 1], [], []>} : vector<8x48xf32>, vector<48x48xf32>, vector<8x48xf32> -> vector<8x48xf32>
    %711 = arith.subf %710, %708 : vector<8x48xf32>
    %c0_577 = arith.constant 0 : index
    %c0_578 = arith.constant 0 : index
    %c0_579 = arith.constant 0 : index
    %712 = vector.load %arg6[%c0_577, %c0_578, %c0_579] : memref<4x48x48xf32, #tpu.memory_space<vmem>>, vector<1x48x48xf32>
    %713 = vector.shape_cast %712 : vector<1x48x48xf32> to vector<48x48xf32>
    %cst_580 = arith.constant dense<0.000000e+00> : vector<8x48xf32>
    %714 = tpu.matmul %704, %713, %cst_580 {dimension_numbers = #tpu.dot_dimension_numbers<[1], [0], [0], [1], [0, 0, 1, 1], [], []>} : vector<8x48xf32>, vector<48x48xf32>, vector<8x48xf32> -> vector<8x48xf32>
    %c0_581 = arith.constant 0 : index
    %c0_582 = arith.constant 0 : index
    %c0_583 = arith.constant 0 : index
    %715 = vector.load %arg7[%c0_581, %c0_582, %c0_583] : memref<4x1x48xf32, #tpu.memory_space<vmem>>, vector<1x1x48xf32>
    %716 = vector.shape_cast %715 : vector<1x1x48xf32> to vector<1x48xf32>
    %717 = vector.broadcast %716 : vector<1x48xf32> to vector<8x48xf32>
    %718 = arith.addf %714, %717 : vector<8x48xf32>
    %719 = arith.minimumf %704, %718 : vector<8x48xf32>
    %720 = arith.subf %719, %711 : vector<8x48xf32>
    %c0_584 = arith.constant 0 : index
    %c0_585 = arith.constant 0 : index
    %c0_586 = arith.constant 0 : index
    %721 = vector.load %arg6[%c0_584, %c0_585, %c0_586] : memref<4x48x48xf32, #tpu.memory_space<vmem>>, vector<1x48x48xf32>
    %722 = vector.shape_cast %721 : vector<1x48x48xf32> to vector<48x48xf32>
    %cst_587 = arith.constant dense<0.000000e+00> : vector<8x48xf32>
    %723 = tpu.matmul %720, %722, %cst_587 {dimension_numbers = #tpu.dot_dimension_numbers<[1], [0], [0], [1], [0, 0, 1, 1], [], []>} : vector<8x48xf32>, vector<48x48xf32>, vector<8x48xf32> -> vector<8x48xf32>
    %c0_588 = arith.constant 0 : index
    %c0_589 = arith.constant 0 : index
    %c0_590 = arith.constant 0 : index
    %724 = vector.load %arg7[%c0_588, %c0_589, %c0_590] : memref<4x1x48xf32, #tpu.memory_space<vmem>>, vector<1x1x48xf32>
    %725 = vector.shape_cast %724 : vector<1x1x48xf32> to vector<1x48xf32>
    %726 = vector.broadcast %725 : vector<1x48xf32> to vector<8x48xf32>
    %727 = arith.addf %723, %726 : vector<8x48xf32>
    %728 = arith.minimumf %720, %727 : vector<8x48xf32>
    %c1_591 = arith.constant 1 : index
    %c0_592 = arith.constant 0 : index
    %c0_593 = arith.constant 0 : index
    %729 = vector.load %arg6[%c1_591, %c0_592, %c0_593] : memref<4x48x48xf32, #tpu.memory_space<vmem>>, vector<1x48x48xf32>
    %730 = vector.shape_cast %729 : vector<1x48x48xf32> to vector<48x48xf32>
    %cst_594 = arith.constant dense<0.000000e+00> : vector<8x48xf32>
    %731 = tpu.matmul %728, %730, %cst_594 {dimension_numbers = #tpu.dot_dimension_numbers<[1], [0], [0], [1], [0, 0, 1, 1], [], []>} : vector<8x48xf32>, vector<48x48xf32>, vector<8x48xf32> -> vector<8x48xf32>
    %c1_595 = arith.constant 1 : index
    %c0_596 = arith.constant 0 : index
    %c0_597 = arith.constant 0 : index
    %732 = vector.load %arg7[%c1_595, %c0_596, %c0_597] : memref<4x1x48xf32, #tpu.memory_space<vmem>>, vector<1x1x48xf32>
    %733 = vector.shape_cast %732 : vector<1x1x48xf32> to vector<1x48xf32>
    %734 = vector.broadcast %733 : vector<1x48xf32> to vector<8x48xf32>
    %735 = arith.addf %731, %734 : vector<8x48xf32>
    %736 = arith.minimumf %728, %735 : vector<8x48xf32>
    %c2_598 = arith.constant 2 : index
    %c0_599 = arith.constant 0 : index
    %c0_600 = arith.constant 0 : index
    %737 = vector.load %arg6[%c2_598, %c0_599, %c0_600] : memref<4x48x48xf32, #tpu.memory_space<vmem>>, vector<1x48x48xf32>
    %738 = vector.shape_cast %737 : vector<1x48x48xf32> to vector<48x48xf32>
    %cst_601 = arith.constant dense<0.000000e+00> : vector<8x48xf32>
    %739 = tpu.matmul %736, %738, %cst_601 {dimension_numbers = #tpu.dot_dimension_numbers<[1], [0], [0], [1], [0, 0, 1, 1], [], []>} : vector<8x48xf32>, vector<48x48xf32>, vector<8x48xf32> -> vector<8x48xf32>
    %c2_602 = arith.constant 2 : index
    %c0_603 = arith.constant 0 : index
    %c0_604 = arith.constant 0 : index
    %740 = vector.load %arg7[%c2_602, %c0_603, %c0_604] : memref<4x1x48xf32, #tpu.memory_space<vmem>>, vector<1x1x48xf32>
    %741 = vector.shape_cast %740 : vector<1x1x48xf32> to vector<1x48xf32>
    %742 = vector.broadcast %741 : vector<1x48xf32> to vector<8x48xf32>
    %743 = arith.addf %739, %742 : vector<8x48xf32>
    %744 = arith.minimumf %736, %743 : vector<8x48xf32>
    %c3_605 = arith.constant 3 : index
    %c0_606 = arith.constant 0 : index
    %c0_607 = arith.constant 0 : index
    %745 = vector.load %arg6[%c3_605, %c0_606, %c0_607] : memref<4x48x48xf32, #tpu.memory_space<vmem>>, vector<1x48x48xf32>
    %746 = vector.shape_cast %745 : vector<1x48x48xf32> to vector<48x48xf32>
    %cst_608 = arith.constant dense<0.000000e+00> : vector<8x48xf32>
    %747 = tpu.matmul %744, %746, %cst_608 {dimension_numbers = #tpu.dot_dimension_numbers<[1], [0], [0], [1], [0, 0, 1, 1], [], []>} : vector<8x48xf32>, vector<48x48xf32>, vector<8x48xf32> -> vector<8x48xf32>
    %c3_609 = arith.constant 3 : index
    %c0_610 = arith.constant 0 : index
    %c0_611 = arith.constant 0 : index
    %748 = vector.load %arg7[%c3_609, %c0_610, %c0_611] : memref<4x1x48xf32, #tpu.memory_space<vmem>>, vector<1x1x48xf32>
    %749 = vector.shape_cast %748 : vector<1x1x48xf32> to vector<1x48xf32>
    %750 = vector.broadcast %749 : vector<1x48xf32> to vector<8x48xf32>
    %751 = arith.addf %747, %750 : vector<8x48xf32>
    %752 = arith.minimumf %744, %751 : vector<8x48xf32>
    %753 = arith.addf %710, %752 : vector<8x48xf32>
    %c15_i32_612 = arith.constant 15 : i32
    %754 = tpu.iota {dimensions = array<i32: 0>} : vector<48x3xi32>
    %755 = tpu.iota {dimensions = array<i32: 1>} : vector<48x3xi32>
    %c16_i32 = arith.constant 16 : i32
    %756 = vector.broadcast %c16_i32 : i32 to vector<48x3xi32>
    %757 = arith.muli %755, %756 : vector<48x3xi32>
    %c15_i32_613 = arith.constant 15 : i32
    %758 = vector.broadcast %c15_i32_613 : i32 to vector<48x3xi32>
    %759 = arith.addi %757, %758 : vector<48x3xi32>
    %760 = arith.cmpi eq, %754, %759 : vector<48x3xi32>
    %761 = arith.extui %760 : vector<48x3xi1> to vector<48x3xi32>
    %762 = arith.sitofp %761 : vector<48x3xi32> to vector<48x3xf32>
    %cst_614 = arith.constant dense<0.000000e+00> : vector<8x3xf32>
    %763 = tpu.matmul %753, %762, %cst_614 {dimension_numbers = #tpu.dot_dimension_numbers<[1], [0], [0], [1], [0, 0, 1, 1], [], []>} : vector<8x48xf32>, vector<48x3xf32>, vector<8x3xf32> -> vector<8x3xf32>
    %cst_615 = arith.constant 1.000000e-30 : f32
    %764 = vector.broadcast %cst_615 : f32 to vector<8x3xf32>
    %765 = arith.maximumf %763, %764 : vector<8x3xf32>
    %766 = math.log %765 : vector<8x3xf32>
    %c0_616 = arith.constant 0 : index
    %c0_617 = arith.constant 0 : index
    %767 = vector.load %arg9[%c0_616, %c0_617] : memref<8x3xf32, #tpu.memory_space<vmem>>, vector<8x3xf32>
    tpu.vector_store %arg9[%c0_616, %c0_617], %766 {strides = array<i32>} : memref<8x3xf32, #tpu.memory_space<vmem>>, vector<8x3xf32>,
    %cst_618 = arith.constant 0.000000e+00 : f32
    %768 = vector.broadcast %cst_618 : f32 to vector<248x12xf32>
    %c0_619 = arith.constant 0 : index
    %c0_620 = arith.constant 0 : index
    %769 = vector.load %arg12[%c0_619, %c0_620] : memref<248x12xf32, #tpu.memory_space<vmem>>, vector<248x12xf32>
    tpu.vector_store %arg12[%c0_619, %c0_620], %768 {strides = array<i32>} : memref<248x12xf32, #tpu.memory_space<vmem>>, vector<248x12xf32>,
    %c0_621 = arith.constant 0 : index
    %c0_622 = arith.constant 0 : index
    %770 = vector.load %arg2[%c0_621, %c0_622] : memref<368x12xf32, #tpu.memory_space<vmem>>, vector<248x12xf32>
    %c0_623 = arith.constant 0 : index
    %c0_624 = arith.constant 0 : index
    %771 = vector.load %arg12[%c0_623, %c0_624] : memref<248x12xf32, #tpu.memory_space<vmem>>, vector<248x12xf32>
    %c0_625 = arith.constant 0 : index
    %c0_626 = arith.constant 0 : index
    %772 = vector.load %arg8[%c0_625, %c0_626] : memref<16x12xf32, #tpu.memory_space<vmem>>, vector<1x12xf32>
    %773 = vector.broadcast %772 : vector<1x12xf32> to vector<248x12xf32>
    %774 = arith.mulf %770, %773 : vector<248x12xf32>
    %775 = arith.addf %771, %774 : vector<248x12xf32>
    %c0_627 = arith.constant 0 : index
    %c0_628 = arith.constant 0 : index
    %776 = vector.load %arg12[%c0_627, %c0_628] : memref<248x12xf32, #tpu.memory_space<vmem>>, vector<248x12xf32>
    tpu.vector_store %arg12[%c0_627, %c0_628], %775 {strides = array<i32>} : memref<248x12xf32, #tpu.memory_space<vmem>>, vector<248x12xf32>,
    %c8 = arith.constant 8 : index
    %c0_629 = arith.constant 0 : index
    %777 = vector.load %arg2[%c8, %c0_629] : memref<368x12xf32, #tpu.memory_space<vmem>>, vector<248x12xf32>
    %c0_630 = arith.constant 0 : index
    %c0_631 = arith.constant 0 : index
    %778 = vector.load %arg12[%c0_630, %c0_631] : memref<248x12xf32, #tpu.memory_space<vmem>>, vector<248x12xf32>
    %c1_632 = arith.constant 1 : index
    %c0_633 = arith.constant 0 : index
    %779 = vector.load %arg8[%c1_632, %c0_633] : memref<16x12xf32, #tpu.memory_space<vmem>>, vector<1x12xf32>
    %780 = vector.broadcast %779 : vector<1x12xf32> to vector<248x12xf32>
    %781 = arith.mulf %777, %780 : vector<248x12xf32>
    %782 = arith.addf %778, %781 : vector<248x12xf32>
    %c0_634 = arith.constant 0 : index
    %c0_635 = arith.constant 0 : index
    %783 = vector.load %arg12[%c0_634, %c0_635] : memref<248x12xf32, #tpu.memory_space<vmem>>, vector<248x12xf32>
    tpu.vector_store %arg12[%c0_634, %c0_635], %782 {strides = array<i32>} : memref<248x12xf32, #tpu.memory_space<vmem>>, vector<248x12xf32>,
    %c16 = arith.constant 16 : index
    %c0_636 = arith.constant 0 : index
    %784 = vector.load %arg2[%c16, %c0_636] : memref<368x12xf32, #tpu.memory_space<vmem>>, vector<248x12xf32>
    %c0_637 = arith.constant 0 : index
    %c0_638 = arith.constant 0 : index
    %785 = vector.load %arg12[%c0_637, %c0_638] : memref<248x12xf32, #tpu.memory_space<vmem>>, vector<248x12xf32>
    %c2_639 = arith.constant 2 : index
    %c0_640 = arith.constant 0 : index
    %786 = vector.load %arg8[%c2_639, %c0_640] : memref<16x12xf32, #tpu.memory_space<vmem>>, vector<1x12xf32>
    %787 = vector.broadcast %786 : vector<1x12xf32> to vector<248x12xf32>
    %788 = arith.mulf %784, %787 : vector<248x12xf32>
    %789 = arith.addf %785, %788 : vector<248x12xf32>
    %c0_641 = arith.constant 0 : index
    %c0_642 = arith.constant 0 : index
    %790 = vector.load %arg12[%c0_641, %c0_642] : memref<248x12xf32, #tpu.memory_space<vmem>>, vector<248x12xf32>
    tpu.vector_store %arg12[%c0_641, %c0_642], %789 {strides = array<i32>} : memref<248x12xf32, #tpu.memory_space<vmem>>, vector<248x12xf32>,
    %c24 = arith.constant 24 : index
    %c0_643 = arith.constant 0 : index
    %791 = vector.load %arg2[%c24, %c0_643] : memref<368x12xf32, #tpu.memory_space<vmem>>, vector<248x12xf32>
    %c0_644 = arith.constant 0 : index
    %c0_645 = arith.constant 0 : index
    %792 = vector.load %arg12[%c0_644, %c0_645] : memref<248x12xf32, #tpu.memory_space<vmem>>, vector<248x12xf32>
    %c3_646 = arith.constant 3 : index
    %c0_647 = arith.constant 0 : index
    %793 = vector.load %arg8[%c3_646, %c0_647] : memref<16x12xf32, #tpu.memory_space<vmem>>, vector<1x12xf32>
    %794 = vector.broadcast %793 : vector<1x12xf32> to vector<248x12xf32>
    %795 = arith.mulf %791, %794 : vector<248x12xf32>
    %796 = arith.addf %792, %795 : vector<248x12xf32>
    %c0_648 = arith.constant 0 : index
    %c0_649 = arith.constant 0 : index
    %797 = vector.load %arg12[%c0_648, %c0_649] : memref<248x12xf32, #tpu.memory_space<vmem>>, vector<248x12xf32>
    tpu.vector_store %arg12[%c0_648, %c0_649], %796 {strides = array<i32>} : memref<248x12xf32, #tpu.memory_space<vmem>>, vector<248x12xf32>,
    %c32 = arith.constant 32 : index
    %c0_650 = arith.constant 0 : index
    %798 = vector.load %arg2[%c32, %c0_650] : memref<368x12xf32, #tpu.memory_space<vmem>>, vector<248x12xf32>
    %c0_651 = arith.constant 0 : index
    %c0_652 = arith.constant 0 : index
    %799 = vector.load %arg12[%c0_651, %c0_652] : memref<248x12xf32, #tpu.memory_space<vmem>>, vector<248x12xf32>
    %c4 = arith.constant 4 : index
    %c0_653 = arith.constant 0 : index
    %800 = vector.load %arg8[%c4, %c0_653] : memref<16x12xf32, #tpu.memory_space<vmem>>, vector<1x12xf32>
    %801 = vector.broadcast %800 : vector<1x12xf32> to vector<248x12xf32>
    %802 = arith.mulf %798, %801 : vector<248x12xf32>
    %803 = arith.addf %799, %802 : vector<248x12xf32>
    %c0_654 = arith.constant 0 : index
    %c0_655 = arith.constant 0 : index
    %804 = vector.load %arg12[%c0_654, %c0_655] : memref<248x12xf32, #tpu.memory_space<vmem>>, vector<248x12xf32>
    tpu.vector_store %arg12[%c0_654, %c0_655], %803 {strides = array<i32>} : memref<248x12xf32, #tpu.memory_space<vmem>>, vector<248x12xf32>,
    %c40 = arith.constant 40 : index
    %c0_656 = arith.constant 0 : index
    %805 = vector.load %arg2[%c40, %c0_656] : memref<368x12xf32, #tpu.memory_space<vmem>>, vector<248x12xf32>
    %c0_657 = arith.constant 0 : index
    %c0_658 = arith.constant 0 : index
    %806 = vector.load %arg12[%c0_657, %c0_658] : memref<248x12xf32, #tpu.memory_space<vmem>>, vector<248x12xf32>
    %c5 = arith.constant 5 : index
    %c0_659 = arith.constant 0 : index
    %807 = vector.load %arg8[%c5, %c0_659] : memref<16x12xf32, #tpu.memory_space<vmem>>, vector<1x12xf32>
    %808 = vector.broadcast %807 : vector<1x12xf32> to vector<248x12xf32>
    %809 = arith.mulf %805, %808 : vector<248x12xf32>
    %810 = arith.addf %806, %809 : vector<248x12xf32>
    %c0_660 = arith.constant 0 : index
    %c0_661 = arith.constant 0 : index
    %811 = vector.load %arg12[%c0_660, %c0_661] : memref<248x12xf32, #tpu.memory_space<vmem>>, vector<248x12xf32>
    tpu.vector_store %arg12[%c0_660, %c0_661], %810 {strides = array<i32>} : memref<248x12xf32, #tpu.memory_space<vmem>>, vector<248x12xf32>,
    %c48 = arith.constant 48 : index
    %c0_662 = arith.constant 0 : index
    %812 = vector.load %arg2[%c48, %c0_662] : memref<368x12xf32, #tpu.memory_space<vmem>>, vector<248x12xf32>
    %c0_663 = arith.constant 0 : index
    %c0_664 = arith.constant 0 : index
    %813 = vector.load %arg12[%c0_663, %c0_664] : memref<248x12xf32, #tpu.memory_space<vmem>>, vector<248x12xf32>
    %c6 = arith.constant 6 : index
    %c0_665 = arith.constant 0 : index
    %814 = vector.load %arg8[%c6, %c0_665] : memref<16x12xf32, #tpu.memory_space<vmem>>, vector<1x12xf32>
    %815 = vector.broadcast %814 : vector<1x12xf32> to vector<248x12xf32>
    %816 = arith.mulf %812, %815 : vector<248x12xf32>
    %817 = arith.addf %813, %816 : vector<248x12xf32>
    %c0_666 = arith.constant 0 : index
    %c0_667 = arith.constant 0 : index
    %818 = vector.load %arg12[%c0_666, %c0_667] : memref<248x12xf32, #tpu.memory_space<vmem>>, vector<248x12xf32>
    tpu.vector_store %arg12[%c0_666, %c0_667], %817 {strides = array<i32>} : memref<248x12xf32, #tpu.memory_space<vmem>>, vector<248x12xf32>,
    %c56 = arith.constant 56 : index
    %c0_668 = arith.constant 0 : index
    %819 = vector.load %arg2[%c56, %c0_668] : memref<368x12xf32, #tpu.memory_space<vmem>>, vector<248x12xf32>
    %c0_669 = arith.constant 0 : index
    %c0_670 = arith.constant 0 : index
    %820 = vector.load %arg12[%c0_669, %c0_670] : memref<248x12xf32, #tpu.memory_space<vmem>>, vector<248x12xf32>
    %c7 = arith.constant 7 : index
    %c0_671 = arith.constant 0 : index
    %821 = vector.load %arg8[%c7, %c0_671] : memref<16x12xf32, #tpu.memory_space<vmem>>, vector<1x12xf32>
    %822 = vector.broadcast %821 : vector<1x12xf32> to vector<248x12xf32>
    %823 = arith.mulf %819, %822 : vector<248x12xf32>
    %824 = arith.addf %820, %823 : vector<248x12xf32>
    %c0_672 = arith.constant 0 : index
    %c0_673 = arith.constant 0 : index
    %825 = vector.load %arg12[%c0_672, %c0_673] : memref<248x12xf32, #tpu.memory_space<vmem>>, vector<248x12xf32>
    tpu.vector_store %arg12[%c0_672, %c0_673], %824 {strides = array<i32>} : memref<248x12xf32, #tpu.memory_space<vmem>>, vector<248x12xf32>,
    %c64 = arith.constant 64 : index
    %c0_674 = arith.constant 0 : index
    %826 = vector.load %arg2[%c64, %c0_674] : memref<368x12xf32, #tpu.memory_space<vmem>>, vector<248x12xf32>
    %c0_675 = arith.constant 0 : index
    %c0_676 = arith.constant 0 : index
    %827 = vector.load %arg12[%c0_675, %c0_676] : memref<248x12xf32, #tpu.memory_space<vmem>>, vector<248x12xf32>
    %c8_677 = arith.constant 8 : index
    %c0_678 = arith.constant 0 : index
    %828 = vector.load %arg8[%c8_677, %c0_678] : memref<16x12xf32, #tpu.memory_space<vmem>>, vector<1x12xf32>
    %829 = vector.broadcast %828 : vector<1x12xf32> to vector<248x12xf32>
    %830 = arith.mulf %826, %829 : vector<248x12xf32>
    %831 = arith.addf %827, %830 : vector<248x12xf32>
    %c0_679 = arith.constant 0 : index
    %c0_680 = arith.constant 0 : index
    %832 = vector.load %arg12[%c0_679, %c0_680] : memref<248x12xf32, #tpu.memory_space<vmem>>, vector<248x12xf32>
    tpu.vector_store %arg12[%c0_679, %c0_680], %831 {strides = array<i32>} : memref<248x12xf32, #tpu.memory_space<vmem>>, vector<248x12xf32>,
    %c72 = arith.constant 72 : index
    %c0_681 = arith.constant 0 : index
    %833 = vector.load %arg2[%c72, %c0_681] : memref<368x12xf32, #tpu.memory_space<vmem>>, vector<248x12xf32>
    %c0_682 = arith.constant 0 : index
    %c0_683 = arith.constant 0 : index
    %834 = vector.load %arg12[%c0_682, %c0_683] : memref<248x12xf32, #tpu.memory_space<vmem>>, vector<248x12xf32>
    %c9 = arith.constant 9 : index
    %c0_684 = arith.constant 0 : index
    %835 = vector.load %arg8[%c9, %c0_684] : memref<16x12xf32, #tpu.memory_space<vmem>>, vector<1x12xf32>
    %836 = vector.broadcast %835 : vector<1x12xf32> to vector<248x12xf32>
    %837 = arith.mulf %833, %836 : vector<248x12xf32>
    %838 = arith.addf %834, %837 : vector<248x12xf32>
    %c0_685 = arith.constant 0 : index
    %c0_686 = arith.constant 0 : index
    %839 = vector.load %arg12[%c0_685, %c0_686] : memref<248x12xf32, #tpu.memory_space<vmem>>, vector<248x12xf32>
    tpu.vector_store %arg12[%c0_685, %c0_686], %838 {strides = array<i32>} : memref<248x12xf32, #tpu.memory_space<vmem>>, vector<248x12xf32>,
    %c80 = arith.constant 80 : index
    %c0_687 = arith.constant 0 : index
    %840 = vector.load %arg2[%c80, %c0_687] : memref<368x12xf32, #tpu.memory_space<vmem>>, vector<248x12xf32>
    %c0_688 = arith.constant 0 : index
    %c0_689 = arith.constant 0 : index
    %841 = vector.load %arg12[%c0_688, %c0_689] : memref<248x12xf32, #tpu.memory_space<vmem>>, vector<248x12xf32>
    %c10 = arith.constant 10 : index
    %c0_690 = arith.constant 0 : index
    %842 = vector.load %arg8[%c10, %c0_690] : memref<16x12xf32, #tpu.memory_space<vmem>>, vector<1x12xf32>
    %843 = vector.broadcast %842 : vector<1x12xf32> to vector<248x12xf32>
    %844 = arith.mulf %840, %843 : vector<248x12xf32>
    %845 = arith.addf %841, %844 : vector<248x12xf32>
    %c0_691 = arith.constant 0 : index
    %c0_692 = arith.constant 0 : index
    %846 = vector.load %arg12[%c0_691, %c0_692] : memref<248x12xf32, #tpu.memory_space<vmem>>, vector<248x12xf32>
    tpu.vector_store %arg12[%c0_691, %c0_692], %845 {strides = array<i32>} : memref<248x12xf32, #tpu.memory_space<vmem>>, vector<248x12xf32>,
    %c88 = arith.constant 88 : index
    %c0_693 = arith.constant 0 : index
    %847 = vector.load %arg2[%c88, %c0_693] : memref<368x12xf32, #tpu.memory_space<vmem>>, vector<248x12xf32>
    %c0_694 = arith.constant 0 : index
    %c0_695 = arith.constant 0 : index
    %848 = vector.load %arg12[%c0_694, %c0_695] : memref<248x12xf32, #tpu.memory_space<vmem>>, vector<248x12xf32>
    %c11 = arith.constant 11 : index
    %c0_696 = arith.constant 0 : index
    %849 = vector.load %arg8[%c11, %c0_696] : memref<16x12xf32, #tpu.memory_space<vmem>>, vector<1x12xf32>
    %850 = vector.broadcast %849 : vector<1x12xf32> to vector<248x12xf32>
    %851 = arith.mulf %847, %850 : vector<248x12xf32>
    %852 = arith.addf %848, %851 : vector<248x12xf32>
    %c0_697 = arith.constant 0 : index
    %c0_698 = arith.constant 0 : index
    %853 = vector.load %arg12[%c0_697, %c0_698] : memref<248x12xf32, #tpu.memory_space<vmem>>, vector<248x12xf32>
    tpu.vector_store %arg12[%c0_697, %c0_698], %852 {strides = array<i32>} : memref<248x12xf32, #tpu.memory_space<vmem>>, vector<248x12xf32>,
    %c96 = arith.constant 96 : index
    %c0_699 = arith.constant 0 : index
    %854 = vector.load %arg2[%c96, %c0_699] : memref<368x12xf32, #tpu.memory_space<vmem>>, vector<248x12xf32>
    %c0_700 = arith.constant 0 : index
    %c0_701 = arith.constant 0 : index
    %855 = vector.load %arg12[%c0_700, %c0_701] : memref<248x12xf32, #tpu.memory_space<vmem>>, vector<248x12xf32>
    %c12 = arith.constant 12 : index
    %c0_702 = arith.constant 0 : index
    %856 = vector.load %arg8[%c12, %c0_702] : memref<16x12xf32, #tpu.memory_space<vmem>>, vector<1x12xf32>
    %857 = vector.broadcast %856 : vector<1x12xf32> to vector<248x12xf32>
    %858 = arith.mulf %854, %857 : vector<248x12xf32>
    %859 = arith.addf %855, %858 : vector<248x12xf32>
    %c0_703 = arith.constant 0 : index
    %c0_704 = arith.constant 0 : index
    %860 = vector.load %arg12[%c0_703, %c0_704] : memref<248x12xf32, #tpu.memory_space<vmem>>, vector<248x12xf32>
    tpu.vector_store %arg12[%c0_703, %c0_704], %859 {strides = array<i32>} : memref<248x12xf32, #tpu.memory_space<vmem>>, vector<248x12xf32>,
    %c104 = arith.constant 104 : index
    %c0_705 = arith.constant 0 : index
    %861 = vector.load %arg2[%c104, %c0_705] : memref<368x12xf32, #tpu.memory_space<vmem>>, vector<248x12xf32>
    %c0_706 = arith.constant 0 : index
    %c0_707 = arith.constant 0 : index
    %862 = vector.load %arg12[%c0_706, %c0_707] : memref<248x12xf32, #tpu.memory_space<vmem>>, vector<248x12xf32>
    %c13 = arith.constant 13 : index
    %c0_708 = arith.constant 0 : index
    %863 = vector.load %arg8[%c13, %c0_708] : memref<16x12xf32, #tpu.memory_space<vmem>>, vector<1x12xf32>
    %864 = vector.broadcast %863 : vector<1x12xf32> to vector<248x12xf32>
    %865 = arith.mulf %861, %864 : vector<248x12xf32>
    %866 = arith.addf %862, %865 : vector<248x12xf32>
    %c0_709 = arith.constant 0 : index
    %c0_710 = arith.constant 0 : index
    %867 = vector.load %arg12[%c0_709, %c0_710] : memref<248x12xf32, #tpu.memory_space<vmem>>, vector<248x12xf32>
    tpu.vector_store %arg12[%c0_709, %c0_710], %866 {strides = array<i32>} : memref<248x12xf32, #tpu.memory_space<vmem>>, vector<248x12xf32>,
    %c112 = arith.constant 112 : index
    %c0_711 = arith.constant 0 : index
    %868 = vector.load %arg2[%c112, %c0_711] : memref<368x12xf32, #tpu.memory_space<vmem>>, vector<248x12xf32>
    %c0_712 = arith.constant 0 : index
    %c0_713 = arith.constant 0 : index
    %869 = vector.load %arg12[%c0_712, %c0_713] : memref<248x12xf32, #tpu.memory_space<vmem>>, vector<248x12xf32>
    %c14 = arith.constant 14 : index
    %c0_714 = arith.constant 0 : index
    %870 = vector.load %arg8[%c14, %c0_714] : memref<16x12xf32, #tpu.memory_space<vmem>>, vector<1x12xf32>
    %871 = vector.broadcast %870 : vector<1x12xf32> to vector<248x12xf32>
    %872 = arith.mulf %868, %871 : vector<248x12xf32>
    %873 = arith.addf %869, %872 : vector<248x12xf32>
    %c0_715 = arith.constant 0 : index
    %c0_716 = arith.constant 0 : index
    %874 = vector.load %arg12[%c0_715, %c0_716] : memref<248x12xf32, #tpu.memory_space<vmem>>, vector<248x12xf32>
    tpu.vector_store %arg12[%c0_715, %c0_716], %873 {strides = array<i32>} : memref<248x12xf32, #tpu.memory_space<vmem>>, vector<248x12xf32>,
    %c120 = arith.constant 120 : index
    %c0_717 = arith.constant 0 : index
    %875 = vector.load %arg2[%c120, %c0_717] : memref<368x12xf32, #tpu.memory_space<vmem>>, vector<248x12xf32>
    %c0_718 = arith.constant 0 : index
    %c0_719 = arith.constant 0 : index
    %876 = vector.load %arg12[%c0_718, %c0_719] : memref<248x12xf32, #tpu.memory_space<vmem>>, vector<248x12xf32>
    %c15 = arith.constant 15 : index
    %c0_720 = arith.constant 0 : index
    %877 = vector.load %arg8[%c15, %c0_720] : memref<16x12xf32, #tpu.memory_space<vmem>>, vector<1x12xf32>
    %878 = vector.broadcast %877 : vector<1x12xf32> to vector<248x12xf32>
    %879 = arith.mulf %875, %878 : vector<248x12xf32>
    %880 = arith.addf %876, %879 : vector<248x12xf32>
    %c0_721 = arith.constant 0 : index
    %c0_722 = arith.constant 0 : index
    %881 = vector.load %arg12[%c0_721, %c0_722] : memref<248x12xf32, #tpu.memory_space<vmem>>, vector<248x12xf32>
    tpu.vector_store %arg12[%c0_721, %c0_722], %880 {strides = array<i32>} : memref<248x12xf32, #tpu.memory_space<vmem>>, vector<248x12xf32>,
    %c0_723 = arith.constant 0 : index
    %c0_724 = arith.constant 0 : index
    %882 = vector.load %arg12[%c0_723, %c0_724] : memref<248x12xf32, #tpu.memory_space<vmem>>, vector<8x12xf32>
    %c8_725 = arith.constant 8 : index
    %c0_726 = arith.constant 0 : index
    %883 = vector.load %arg12[%c8_725, %c0_726] : memref<248x12xf32, #tpu.memory_space<vmem>>, vector<8x12xf32>
    %884 = arith.maximumf %882, %883 : vector<8x12xf32>
    %c16_727 = arith.constant 16 : index
    %c0_728 = arith.constant 0 : index
    %885 = vector.load %arg12[%c16_727, %c0_728] : memref<248x12xf32, #tpu.memory_space<vmem>>, vector<8x12xf32>
    %886 = arith.maximumf %884, %885 : vector<8x12xf32>
    %c24_729 = arith.constant 24 : index
    %c0_730 = arith.constant 0 : index
    %887 = vector.load %arg12[%c24_729, %c0_730] : memref<248x12xf32, #tpu.memory_space<vmem>>, vector<8x12xf32>
    %888 = arith.maximumf %886, %887 : vector<8x12xf32>
    %c32_731 = arith.constant 32 : index
    %c0_732 = arith.constant 0 : index
    %889 = vector.load %arg12[%c32_731, %c0_732] : memref<248x12xf32, #tpu.memory_space<vmem>>, vector<8x12xf32>
    %890 = arith.maximumf %888, %889 : vector<8x12xf32>
    %c40_733 = arith.constant 40 : index
    %c0_734 = arith.constant 0 : index
    %891 = vector.load %arg12[%c40_733, %c0_734] : memref<248x12xf32, #tpu.memory_space<vmem>>, vector<8x12xf32>
    %892 = arith.maximumf %890, %891 : vector<8x12xf32>
    %c48_735 = arith.constant 48 : index
    %c0_736 = arith.constant 0 : index
    %893 = vector.load %arg12[%c48_735, %c0_736] : memref<248x12xf32, #tpu.memory_space<vmem>>, vector<8x12xf32>
    %894 = arith.maximumf %892, %893 : vector<8x12xf32>
    %c56_737 = arith.constant 56 : index
    %c0_738 = arith.constant 0 : index
    %895 = vector.load %arg12[%c56_737, %c0_738] : memref<248x12xf32, #tpu.memory_space<vmem>>, vector<8x12xf32>
    %896 = arith.maximumf %894, %895 : vector<8x12xf32>
    %c64_739 = arith.constant 64 : index
    %c0_740 = arith.constant 0 : index
    %897 = vector.load %arg12[%c64_739, %c0_740] : memref<248x12xf32, #tpu.memory_space<vmem>>, vector<8x12xf32>
    %898 = arith.maximumf %896, %897 : vector<8x12xf32>
    %c72_741 = arith.constant 72 : index
    %c0_742 = arith.constant 0 : index
    %899 = vector.load %arg12[%c72_741, %c0_742] : memref<248x12xf32, #tpu.memory_space<vmem>>, vector<8x12xf32>
    %900 = arith.maximumf %898, %899 : vector<8x12xf32>
    %c80_743 = arith.constant 80 : index
    %c0_744 = arith.constant 0 : index
    %901 = vector.load %arg12[%c80_743, %c0_744] : memref<248x12xf32, #tpu.memory_space<vmem>>, vector<8x12xf32>
    %902 = arith.maximumf %900, %901 : vector<8x12xf32>
    %c88_745 = arith.constant 88 : index
    %c0_746 = arith.constant 0 : index
    %903 = vector.load %arg12[%c88_745, %c0_746] : memref<248x12xf32, #tpu.memory_space<vmem>>, vector<8x12xf32>
    %904 = arith.maximumf %902, %903 : vector<8x12xf32>
    %c96_747 = arith.constant 96 : index
    %c0_748 = arith.constant 0 : index
    %905 = vector.load %arg12[%c96_747, %c0_748] : memref<248x12xf32, #tpu.memory_space<vmem>>, vector<8x12xf32>
    %906 = arith.maximumf %904, %905 : vector<8x12xf32>
    %c104_749 = arith.constant 104 : index
    %c0_750 = arith.constant 0 : index
    %907 = vector.load %arg12[%c104_749, %c0_750] : memref<248x12xf32, #tpu.memory_space<vmem>>, vector<8x12xf32>
    %908 = arith.maximumf %906, %907 : vector<8x12xf32>
    %c112_751 = arith.constant 112 : index
    %c0_752 = arith.constant 0 : index
    %909 = vector.load %arg12[%c112_751, %c0_752] : memref<248x12xf32, #tpu.memory_space<vmem>>, vector<8x12xf32>
    %910 = arith.maximumf %908, %909 : vector<8x12xf32>
    %c120_753 = arith.constant 120 : index
    %c0_754 = arith.constant 0 : index
    %911 = vector.load %arg12[%c120_753, %c0_754] : memref<248x12xf32, #tpu.memory_space<vmem>>, vector<8x12xf32>
    %912 = arith.maximumf %910, %911 : vector<8x12xf32>
    %c128 = arith.constant 128 : index
    %c0_755 = arith.constant 0 : index
    %913 = vector.load %arg12[%c128, %c0_755] : memref<248x12xf32, #tpu.memory_space<vmem>>, vector<8x12xf32>
    %914 = arith.maximumf %912, %913 : vector<8x12xf32>
    %c136 = arith.constant 136 : index
    %c0_756 = arith.constant 0 : index
    %915 = vector.load %arg12[%c136, %c0_756] : memref<248x12xf32, #tpu.memory_space<vmem>>, vector<8x12xf32>
    %916 = arith.maximumf %914, %915 : vector<8x12xf32>
    %c144 = arith.constant 144 : index
    %c0_757 = arith.constant 0 : index
    %917 = vector.load %arg12[%c144, %c0_757] : memref<248x12xf32, #tpu.memory_space<vmem>>, vector<8x12xf32>
    %918 = arith.maximumf %916, %917 : vector<8x12xf32>
    %c152 = arith.constant 152 : index
    %c0_758 = arith.constant 0 : index
    %919 = vector.load %arg12[%c152, %c0_758] : memref<248x12xf32, #tpu.memory_space<vmem>>, vector<8x12xf32>
    %920 = arith.maximumf %918, %919 : vector<8x12xf32>
    %c160 = arith.constant 160 : index
    %c0_759 = arith.constant 0 : index
    %921 = vector.load %arg12[%c160, %c0_759] : memref<248x12xf32, #tpu.memory_space<vmem>>, vector<8x12xf32>
    %922 = arith.maximumf %920, %921 : vector<8x12xf32>
    %c168 = arith.constant 168 : index
    %c0_760 = arith.constant 0 : index
    %923 = vector.load %arg12[%c168, %c0_760] : memref<248x12xf32, #tpu.memory_space<vmem>>, vector<8x12xf32>
    %924 = arith.maximumf %922, %923 : vector<8x12xf32>
    %c176 = arith.constant 176 : index
    %c0_761 = arith.constant 0 : index
    %925 = vector.load %arg12[%c176, %c0_761] : memref<248x12xf32, #tpu.memory_space<vmem>>, vector<8x12xf32>
    %926 = arith.maximumf %924, %925 : vector<8x12xf32>
    %c184 = arith.constant 184 : index
    %c0_762 = arith.constant 0 : index
    %927 = vector.load %arg12[%c184, %c0_762] : memref<248x12xf32, #tpu.memory_space<vmem>>, vector<8x12xf32>
    %928 = arith.maximumf %926, %927 : vector<8x12xf32>
    %c192 = arith.constant 192 : index
    %c0_763 = arith.constant 0 : index
    %929 = vector.load %arg12[%c192, %c0_763] : memref<248x12xf32, #tpu.memory_space<vmem>>, vector<8x12xf32>
    %930 = arith.maximumf %928, %929 : vector<8x12xf32>
    %c200 = arith.constant 200 : index
    %c0_764 = arith.constant 0 : index
    %931 = vector.load %arg12[%c200, %c0_764] : memref<248x12xf32, #tpu.memory_space<vmem>>, vector<8x12xf32>
    %932 = arith.maximumf %930, %931 : vector<8x12xf32>
    %c208 = arith.constant 208 : index
    %c0_765 = arith.constant 0 : index
    %933 = vector.load %arg12[%c208, %c0_765] : memref<248x12xf32, #tpu.memory_space<vmem>>, vector<8x12xf32>
    %934 = arith.maximumf %932, %933 : vector<8x12xf32>
    %c216 = arith.constant 216 : index
    %c0_766 = arith.constant 0 : index
    %935 = vector.load %arg12[%c216, %c0_766] : memref<248x12xf32, #tpu.memory_space<vmem>>, vector<8x12xf32>
    %936 = arith.maximumf %934, %935 : vector<8x12xf32>
    %c224 = arith.constant 224 : index
    %c0_767 = arith.constant 0 : index
    %937 = vector.load %arg12[%c224, %c0_767] : memref<248x12xf32, #tpu.memory_space<vmem>>, vector<8x12xf32>
    %938 = arith.maximumf %936, %937 : vector<8x12xf32>
    %c232 = arith.constant 232 : index
    %c0_768 = arith.constant 0 : index
    %939 = vector.load %arg12[%c232, %c0_768] : memref<248x12xf32, #tpu.memory_space<vmem>>, vector<8x12xf32>
    %940 = arith.maximumf %938, %939 : vector<8x12xf32>
    %c240 = arith.constant 240 : index
    %c0_769 = arith.constant 0 : index
    %941 = vector.load %arg12[%c240, %c0_769] : memref<248x12xf32, #tpu.memory_space<vmem>>, vector<8x12xf32>
    %942 = arith.maximumf %940, %941 : vector<8x12xf32>
    %c0_770 = arith.constant 0 : index
    %c0_771 = arith.constant 0 : index
    %943 = vector.load %arg10[%c0_770, %c0_771] : memref<8x12xf32, #tpu.memory_space<vmem>>, vector<8x12xf32>
    tpu.vector_store %arg10[%c0_770, %c0_771], %942 {strides = array<i32>} : memref<8x12xf32, #tpu.memory_space<vmem>>, vector<8x12xf32>,
    return
  }
  func.func @transform_0(%arg0: i32) -> (i32, i32) {
    %c0_i32 = arith.constant 0 : i32
    %c0_i32_0 = arith.constant 0 : i32
    return %arg0, %c0_i32 : i32, i32
  }
  func.func @transform_1(%arg0: i32) -> (i32, i32) {
    %c0_i32 = arith.constant 0 : i32
    %c0_i32_0 = arith.constant 0 : i32
    return %arg0, %c0_i32 : i32, i32
  }
  func.func @transform_2(%arg0: i32) -> (i32, i32) {
    %c0_i32 = arith.constant 0 : i32
    %c0_i32_0 = arith.constant 0 : i32
    %c0_i32_1 = arith.constant 0 : i32
    return %c0_i32, %c0_i32_0 : i32, i32
  }
  func.func @transform_3(%arg0: i32) -> (i32, i32) {
    %c0_i32 = arith.constant 0 : i32
    %c0_i32_0 = arith.constant 0 : i32
    %c0_i32_1 = arith.constant 0 : i32
    return %c0_i32, %c0_i32_0 : i32, i32
  }
  func.func @transform_4(%arg0: i32) -> (i32, i32) {
    %c0_i32 = arith.constant 0 : i32
    %c0_i32_0 = arith.constant 0 : i32
    %c0_i32_1 = arith.constant 0 : i32
    return %c0_i32, %c0_i32_0 : i32, i32
  }
  func.func @transform_5(%arg0: i32) -> (i32, i32, i32) {
    %c0_i32 = arith.constant 0 : i32
    %c0_i32_0 = arith.constant 0 : i32
    %c0_i32_1 = arith.constant 0 : i32
    %c0_i32_2 = arith.constant 0 : i32
    return %c0_i32, %c0_i32_0, %c0_i32_1 : i32, i32, i32
  }
  func.func @transform_6(%arg0: i32) -> (i32, i32, i32) {
    %c0_i32 = arith.constant 0 : i32
    %c0_i32_0 = arith.constant 0 : i32
    %c0_i32_1 = arith.constant 0 : i32
    %c0_i32_2 = arith.constant 0 : i32
    return %c0_i32, %c0_i32_0, %c0_i32_1 : i32, i32, i32
  }
  func.func @transform_7(%arg0: i32) -> (i32, i32) {
    %c0_i32 = arith.constant 0 : i32
    %c0_i32_0 = arith.constant 0 : i32
    %c0_i32_1 = arith.constant 0 : i32
    return %c0_i32, %c0_i32_0 : i32, i32
  }
  func.func @transform_8(%arg0: i32) -> (i32, i32) {
    %c0_i32 = arith.constant 0 : i32
    %c0_i32_0 = arith.constant 0 : i32
    return %arg0, %c0_i32 : i32, i32
  }
  func.func @transform_9(%arg0: i32) -> (i32, i32) {
    %c0_i32 = arith.constant 0 : i32
    %c0_i32_0 = arith.constant 0 : i32
    return %arg0, %c0_i32 : i32, i32
  }
}

</mosaic_0001>

<bundles_post_ra>
// kernel: tpu_custom_call.1
= control target key start
LH: loop header
LB: loop body
LE: loop exit
PB: predicated region body
PF: predicated region fallthrough
CT: control target
= control target key end

     0   :  { %vm64_vm0 = vcmask 31744   ;;  %s17390_s0 = inlined_call_operand.vmem [shape: f32[128,4], index: 0, kind: input, shape index: {}]   ;;  %s17391_s1 = inlined_call_operand.vmem [shape: f32[368,12], index: 1, kind: input, shape index: {}]   ;;  %s17392_s2 = inlined_call_operand.vmem [shape: f32[48,4], index: 2, kind: input, shape index: {}]   ;;  %s17393_s3 = inlined_call_operand.vmem [shape: f32[1,48], index: 3, kind: input, shape index: {}]   ;;  %s17394_s4 = inlined_call_operand.vmem [shape: f32[48,48], index: 4, kind: input, shape index: {}]   ;;  %s17395_s5 = inlined_call_operand.vmem [shape: f32[4,48,48], index: 5, kind: input, shape index: {}]   ;;  %s17396_s6 = inlined_call_operand.vmem [shape: f32[4,1,48], index: 6, kind: input, shape index: {}]   ;;  %s17397_s7 = inlined_call_operand.vmem [shape: f32[16,12], index: 7, kind: input, shape index: {}]   ;;  %s17398_s8 = inlined_call_operand.vmem [shape: f32[8,3], index: 8, kind: output, shape index: {0}]   ;;  %s17399_s9 = inlined_call_operand.hbm [shape: f32[8,12], index: 9, kind: output, shape index: {1}]  }
   0x1   :  { %v113_v0 = vld [vmem:[%s17392_s2] sm:$0xff]  ;;  %v114_v1 = vld [vmem:[%s17392_s2 + $0x8] sm:$0xff]  ;;  %v115_v2 = vld [vmem:[%s17392_s2 + $0x10] sm:$0xff] }
   0x2   :  { %v12305_v3 = vpack.c.bf16 %v114_v1, %v113_v0  ;;  %vm13256_vm1 = vmpackc.low %vm64_vm0, %vm64_vm0  ;;  %v116_v5 = vld [vmem:[%s17392_s2 + $0x18] sm:$0xff]  ;;  %v32_v7 = vld [vmem:[%s17390_s0] sm:$0xff] }
   0x3   :  { %v12311_v6 = vpack.c.bf16 %v116_v5, %v115_v2  ;;  %v33_v8 = vld [vmem:[%s17390_s0 + $0x8] sm:$0xff]  ;;  %v48_v9 = vmul.f32 %v32_v7, %v32_v7  ;;  %10901 = vmatprep.mubr.msk.f32.mxu0 %vm64_vm0, %v32_v7 }
   0x4   :  { %12307 = vmatprep.subr.msk.bf16.mxu0 %vm13256_vm1, %v12305_v3  ;;  %v49_v10 = vmul.f32 %v33_v8, %v33_v8 }
   0x5   :  { %15 = vsyncpa [#allocation5], 0  ;;  %12310 = vmatpush3.bf16.xpose.msk.msra.mxu0 %vm13256_vm1, %v12305_v3  ;;  %v65_v11 = vsel %vm64_vm0, %v48_v9, 0.0  ;;  %v117_v12 = vld [vmem:[%s17392_s2 + $0x20] sm:$0xff]  ;;  %v118_v13 = vld [vmem:[%s17392_s2 + $0x28] sm:$0xff]  ;;  %v13190_v19 = vmov 0.0|0.0  }
   0x6   :  { %12313 = vmatprep.subr.msk.bf16.mxu0 %vm13256_vm1, %v12311_v6  ;;  %66 = vadd.xlane.f32.xlu0 %v65_v11  ;;  %v68_v14 = vsel %vm64_vm0, %v49_v10, 0.0  ;;  %v12317_v15 = vpack.c.bf16 %v118_v13, %v117_v12  ;;  %v419_v16 = vld [vmem:[%s17394_s4] sm:$0xff]  ;;  %v420_v17 = vld [vmem:[%s17394_s4 + $0x8] sm:$0xff]  ;;  %v421_v20 = vld [vmem:[%s17394_s4 + $0x10] sm:$0xff]  ;;  %vm13191_vm2 = vmmov 0   ;;  %v13192_v26 = vmov 0.0  }
   0x7   :  { %v13297_v18 = vpack.c.bf16 %v420_v17, %v419_v16  ;;  %12323 = vmatprep.subr.bf16.mxu1 %v13190_v19  ;;  %v422_v21 = vld [vmem:[%s17394_s4 + $0x18] sm:$0xff]  ;;  %v423_v23 = vld [vmem:[%s17394_s4 + $0x20] sm:$0xff]  ;;  %v424_v24 = vld [vmem:[%s17394_s4 + $0x28] sm:$0xff]  ;;  %10937 = vmatprep.mubr.msk.f32.mxu1 %vm13191_vm2, %v13192_v26  ;;  %vm401_vm3 = vcmask 392192   ;;  %vm7383_vm13 = vcmask 97280  }
   0x8   :  { %v13309_v22 = vpack.c.bf16 %v422_v21, %v421_v20  ;;  %v13319_v25 = vpack.c.bf16 %v424_v24, %v423_v23  ;;  %v13328_v28 = vld [vmem:[%s17393_s3] ss:$0 sm:$0xff]  ;;  %v575_v42 = vld [vmem:[%s17395_s5 + $0x8] sm:$0xff]  ;;  %v576_v44 = vld [vmem:[%s17395_s5 + $0x10] sm:$0xff]  ;;  %7384 = vst.msk [vmem:[#allocation3] sm:$0xff] %vm7383_vm13, %v13192_v26 }
   0x9   :  { %12325 = vmatpush3.bf16.msra.mxu1 %v13297_v18  ;;  %v574_v41 = vld [vmem:[%s17395_s5] sm:$0xff]  ;;  %v577_v45 = vld [vmem:[%s17395_s5 + $0x18] sm:$0xff]  ;;  %v579_v49 = vld [vmem:[%s17395_s5 + $0x28] sm:$0xff]  ;;  %7385 = vst.msk [vmem:[#allocation3 + $0x8] sm:$0xff] %vm7383_vm13, %v13192_v26 }
   0xa   :  { %69 = vadd.xlane.f32.xlu0 %v68_v14  ;;  %12326 = vmatprep.subr.bf16.mxu1 %v13190_v19  ;;  %v13348_v43 = vpack.c.bf16 %v575_v42, %v574_v41  ;;  %v13362_v47 = vpack.c.bf16 %v577_v45, %v576_v44  ;;  %v578_v48 = vld [vmem:[%s17395_s5 + $0x20] sm:$0xff]  ;;  %v10083_v55 = vld [vmem:[%s17395_s5 + $0x30] sm:$0xff]  ;;  %v10084_v56 = vld [vmem:[%s17395_s5 + $0x38] sm:$0xff]  ;;  %7386 = vst.msk [vmem:[#allocation3 + $0x10] sm:$0xff] %vm7383_vm13, %v13192_v26 }
   0xb   :  { %v13374_v50 = vpack.c.bf16 %v579_v49, %v578_v48  ;;  %v34_v57 = vld [vmem:[%s17390_s0 + $0x10] sm:$0xff]  ;;  %v13402_v58 = vpack.c.bf16 %v10084_v56, %v10083_v55  ;;  %v35_v59 = vld [vmem:[%s17390_s0 + $0x18] sm:$0xff]  ;;  %v36_v60 = vld [vmem:[%s17390_s0 + $0x20] sm:$0xff]  ;;  %7387 = vst.msk [vmem:[#allocation3 + $0x18] sm:$0xff] %vm7383_vm13, %v13192_v26 }
   0xc   :  { %v10085_v61 = vld [vmem:[%s17395_s5 + $0x40] sm:$0xff]  ;;  %v37_v62 = vld [vmem:[%s17390_s0 + $0x28] sm:$0xff]  ;;  %v38_v0 = vld [vmem:[%s17390_s0 + $0x30] sm:$0xff]  ;;  %v50_v24 = vmul.f32 %v34_v57, %v34_v57  ;;  %7388 = vst.msk [vmem:[#allocation3 + $0x20] sm:$0xff] %vm7383_vm13, %v13192_v26 }
   0xd   :  { %12316 = vmatpush3.bf16.xpose.msk.msra.mxu0 %vm13256_vm1, %v12311_v6  ;;  %12328 = vmatpush3.bf16.msra.mxu1 %v13309_v22  ;;  %v10086_v63 = vld [vmem:[%s17395_s5 + $0x48] sm:$0xff]  ;;  %v10087_v2 = vld [vmem:[%s17395_s5 + $0x50] sm:$0xff]  ;;  %v10088_v3 = vld [vmem:[%s17395_s5 + $0x58] sm:$0xff]  ;;  %7389 = vst.msk [vmem:[#allocation3 + $0x28] sm:$0xff] %vm7383_vm13, %v13192_v26 }
   0xe   :  { %12319 = vmatprep.subr.msk.bf16.mxu0 %vm13256_vm1, %v12317_v15  ;;  %12329 = vmatprep.subr.bf16.mxu1 %v13190_v19  ;;  %v13427_v1 = vpack.c.bf16 %v10086_v63, %v10085_v61  ;;  %v39_v4 = vld [vmem:[%s17390_s0 + $0x38] sm:$0xff]  ;;  %v13441_v5 = vpack.c.bf16 %v10088_v3, %v10087_v2  ;;  %v40_v6 = vld [vmem:[%s17390_s0 + $0x40] sm:$0xff]  ;;  %v41_v7 = vld [vmem:[%s17390_s0 + $0x48] sm:$0xff]  ;;  %7390 = vst.msk [vmem:[#allocation3 + $0x30] sm:$0xff] %vm7383_vm13, %v13192_v26 }
   0xf   :  { %v43_v9 = vld [vmem:[%s17390_s0 + $0x58] sm:$0xff]  ;;  %v44_v10 = vld [vmem:[%s17390_s0 + $0x60] sm:$0xff]  ;;  %v45_v11 = vld [vmem:[%s17390_s0 + $0x68] sm:$0xff]  ;;  %v57_v42 = vmul.f32 %v41_v7, %v41_v7  ;;  %7391 = vst.msk [vmem:[#allocation3 + $0x38] sm:$0xff] %vm7383_vm13, %v13192_v26 }
  0x10   :  { %v46_v12 = vld [vmem:[%s17390_s0 + $0x70] sm:$0xff]  ;;  %v47_v13 = vld [vmem:[%s17390_s0 + $0x78] sm:$0xff]  ;;  %v13484_v14 = vld [vmem:[%s17396_s6] ss:$0 sm:$0xff]  ;;  %v60_v45 = vmul.f32 %v44_v10, %v44_v10  ;;  %v59_v48 = vmul.f32 %v43_v9, %v43_v9  ;;  %v61_v55 = vmul.f32 %v45_v11, %v45_v11  ;;  %7392 = vst.msk [vmem:[#allocation3 + $0x40] sm:$0xff] %vm7383_vm13, %v13192_v26 }
  0x11   :  { %12331 = vmatpush3.bf16.msra.mxu1 %v13319_v25  ;;  %7393 = vst.msk [vmem:[#allocation3 + $0x48] sm:$0xff] %vm7383_vm13, %v13192_v26  ;;  %7394 = vst.msk [vmem:[#allocation3 + $0x50] sm:$0xff] %vm7383_vm13, %v13192_v26 }
  0x12   :  { %12332 = vmatprep.subr.bf16.mxu1 %v13190_v19  ;;  %v101_v49 = vsel %vm64_vm0, %v60_v45, 0.0  ;;  %7395 = vst.msk [vmem:[#allocation3 + $0x58] sm:$0xff] %vm7383_vm13, %v13192_v26  ;;  %7396 = vst.msk [vmem:[#allocation3 + $0x60] sm:$0xff] %vm7383_vm13, %v13192_v26 }
  0x13   :  { %7397 = vst.msk [vmem:[#allocation3 + $0x68] sm:$0xff] %vm7383_vm13, %v13192_v26  ;;  %7398 = vst.msk [vmem:[#allocation3 + $0x70] sm:$0xff] %vm7383_vm13, %v13192_v26 }
  0x14   :  { %7399 = vst.msk [vmem:[#allocation3 + $0x78] sm:$0xff] %vm7383_vm13, %v13192_v26  ;;  %7400 = vst.msk [vmem:[#allocation3 + $0x80] sm:$0xff] %vm7383_vm13, %v13192_v26 }
  0x15   :  { %12322 = vmatpush3.bf16.xpose.msk.msra.mxu0 %vm13256_vm1, %v12317_v15  ;;  %7401 = vst.msk [vmem:[#allocation3 + $0x88] sm:$0xff] %vm7383_vm13, %v13192_v26  ;;  %7402 = vst.msk [vmem:[#allocation3 + $0x90] sm:$0xff] %vm7383_vm13, %v13192_v26 }
  0x16   :  { %12359 = vmatprep.subr.bf16.mxu0 %v13190_v19  ;;  %7403 = vst.msk [vmem:[#allocation3 + $0x98] sm:$0xff] %vm7383_vm13, %v13192_v26  ;;  %7404 = vst.msk [vmem:[#allocation3 + $0xa0] sm:$0xff] %vm7383_vm13, %v13192_v26 }
  0x17   :  { %7405 = vst.msk [vmem:[#allocation3 + $0xa8] sm:$0xff] %vm7383_vm13, %v13192_v26  ;;  %7406 = vst.msk [vmem:[#allocation3 + $0xb0] sm:$0xff] %vm7383_vm13, %v13192_v26 }
  0x18   :  { %7407 = vst.msk [vmem:[#allocation3 + $0xb8] sm:$0xff] %vm7383_vm13, %v13192_v26  ;;  %7408 = vst.msk [vmem:[#allocation3 + $0xc0] sm:$0xff] %vm7383_vm13, %v13192_v26 }
  0x19   :  { %7409 = vst.msk [vmem:[#allocation3 + $0xc8] sm:$0xff] %vm7383_vm13, %v13192_v26  ;;  %7410 = vst.msk [vmem:[#allocation3 + $0xd0] sm:$0xff] %vm7383_vm13, %v13192_v26 }
  0x1a   :  { %7411 = vst.msk [vmem:[#allocation3 + $0xd8] sm:$0xff] %vm7383_vm13, %v13192_v26  ;;  %7412 = vst.msk [vmem:[#allocation3 + $0xe0] sm:$0xff] %vm7383_vm13, %v13192_v26 }
  0x1b   :  { %7413 = vst.msk [vmem:[#allocation3 + $0xe8] sm:$0xff] %vm7383_vm13, %v13192_v26  ;;  %7414 = vst.msk [vmem:[#allocation3 + $0xf0] sm:$0xff] %vm7383_vm13, %v13192_v26 }
  0x1c   :  { %10902 = vmatmul.mubr.msk.f32.vlgmr.msra.gmra.mrb[0].mxu0 %vm64_vm0, %v33_v8  ;;  %v42_v8 = vld [vmem:[%s17390_s0 + $0x50] sm:$0xff] }
  0x1d   :  { %10904 = vmatprep.mubr.msk.f32.mxu0 %vm64_vm0, %v34_v57  ;;  %12361 = vmatpush3.bf16.msra.mxu0 %v13402_v58  ;;  %v104_v57 = vsel %vm64_vm0, %v61_v55, 0.0 }
  0x1e   :  { %12362 = vmatprep.subr.bf16.mxu0 %v13190_v19 }
  0x20   :  { %10905 = vmatmul.mubr.msk.f32.gmra.mrb[2].mxu0 %vm64_vm0, %v35_v59 }
  0x21   :  { %10907 = vmatprep.mubr.msk.f32.mxu0 %vm64_vm0, %v36_v60  ;;  %12364 = vmatpush3.bf16.msra.mxu0 %v13427_v1 }
  0x22   :  { %12365 = vmatprep.subr.bf16.mxu0 %v13190_v19 }
  0x24   :  { %10908 = vmatmul.mubr.msk.f32.gmra.mrb[4].mxu0 %vm64_vm0, %v37_v62 }
  0x25   :  { %10910 = vmatprep.mubr.msk.f32.mxu0 %vm64_vm0, %v38_v0  ;;  %12367 = vmatpush3.bf16.msra.mxu0 %v13441_v5 }
  0x26   :  { %12377 = vmatprep.subr.bf16.mxu0 %v13190_v19 }
  0x28   :  { %10911 = vmatmul.mubr.msk.f32.gmra.mrb[6].mxu0 %vm64_vm0, %v39_v4 }
  0x29   :  { %10913 = vmatprep.mubr.msk.f32.mxu0 %vm64_vm0, %v40_v6 }
  0x2c   :  { %10914 = vmatmul.mubr.msk.f32.gmra.mrb[8].mxu0 %vm64_vm0, %v41_v7 }
  0x2d   :  { %10916 = vmatprep.mubr.msk.f32.mxu0 %vm64_vm0, %v42_v8 }
  0x30   :  { %10917 = vmatmul.mubr.msk.f32.gmra.mrb[10].mxu0 %vm64_vm0, %v43_v9 }
  0x31   :  { %10919 = vmatprep.mubr.msk.f32.mxu0 %vm64_vm0, %v44_v10  ;;  %v10092_v10 = vld [vmem:[%s17395_s5 + $0x60] sm:$0xff] }
  0x34   :  { %10920 = vmatmul.mubr.msk.f32.gmra.mrb[12].mxu0 %vm64_vm0, %v45_v11  ;;  %v10093_v11 = vld [vmem:[%s17395_s5 + $0x68] sm:$0xff] }
  0x35   :  { %10922 = vmatprep.mubr.msk.f32.mxu0 %vm64_vm0, %v46_v12 }
  0x38   :  { %10923 = vmatmul.mubr.msk.f32.gmra.mrb[14].mxu0 %vm64_vm0, %v47_v13 }
  0x39   :  { %10997 = vmatprep.mubr.msk.f32.mxu0 %vm13191_vm2, %v13192_v26 }
  0x93   :  { %v67_v27 = vpop.xlane.xlu0 %66 }
  0x94   :  { %v337_v31 = vadd.f32 %v13328_v28, %v67_v27  ;;  %v51_v27 = vmul.f32 %v35_v59, %v35_v59  ;;  %v63_v59 = vmul.f32 %v47_v13, %v47_v13 }
  0x96   :  { %v110_v61 = vsel %vm64_vm0, %v63_v59, 0.0 }
  0x97   :  { %v70_v29 = vpop.xlane.xlu0 %69 }
  0x98   :  { %v338_v30 = vadd.f32 %v13328_v28, %v70_v29  ;;  %v52_v29 = vmul.f32 %v36_v60, %v36_v60 }
  0xef   :  { %v10903_v32 = vpop.f32.mrb[0].mxu0 }
  0xf0   :  { %v354_v33 = vmul.f32 2.0, %v10903_v32  ;;  %v251_v34 = vpop.f32.mrb[1].mxu0  ;;  %v77_v32 = vsel %vm64_vm0, %v52_v29, 0.0 }
  0xf1   :  { %v353_v35 = vmul.f32 2.0, %v251_v34  ;;  %78 = vadd.xlane.f32.xlu0 %v77_v32  ;;  %v53_v34 = vmul.f32 %v37_v62, %v37_v62 }
  0xf2   :  { %v370_v36 = vsub.f32 %v338_v30, %v354_v33  ;;  %v54_v30 = vmul.f32 %v38_v0, %v38_v0  ;;  %v74_v33 = vsel %vm64_vm0, %v51_v27, 0.0 }
  0xf3   :  { %v369_v37 = vsub.f32 %v337_v31, %v353_v35  ;;  %v71_v31 = vsel %vm64_vm0, %v50_v24, 0.0 }
  0xf4   :  { %v386_v38 = vmax.f32 %v370_v36, 0.0  ;;  %72 = vadd.xlane.f32.xlu1 %v71_v31  ;;  %v83_v35 = vsel %vm64_vm0, %v54_v30, 0.0  ;;  %v56_v36 = vmul.f32 %v40_v6, %v40_v6 }
  0xf5   :  { %v385_v39 = vmax.f32 %v369_v37, 0.0  ;;  %84 = vadd.xlane.f32.xlu0 %v83_v35  ;;  %v80_v37 = vsel %vm64_vm0, %v53_v34, 0.0 }
  0xf6   :  { %403 = vst.msk [vmem:[#allocation2 + $0x8] sm:$0xff] %vm401_vm3, %v386_v38  ;;  %v55_v38 = vmul.f32 %v39_v4, %v39_v4 }
  0xf7   :  { %402 = vst.msk [vmem:[#allocation2] sm:$0xff] %vm401_vm3, %v385_v39  ;;  %v89_v39 = vsel %vm64_vm0, %v56_v36, 0.0 }
  0xf8   :  { %75 = vadd.xlane.f32.xlu1 %v74_v33  ;;  %v86_v41 = vsel %vm64_vm0, %v55_v38, 0.0 }
  0xf9   :  { %90 = vadd.xlane.f32.xlu0 %v89_v39 }
  0xfc   :  { %81 = vadd.xlane.f32.xlu1 %v80_v37 }
  0xfd   :  { %v13357_v46 = vld [vmem:[#allocation2 + $0x8] sm:$0xff] }
  0xfe   :  { %v418_v40 = vld [vmem:[#allocation2] sm:$0xff] }
  0xff   :  { %10938 = vmatmul.mubr.msk.f32.vlgmr.msra.gmra.mrb[0].mxu1 %vm401_vm3, %v418_v40  ;;  %v58_v40 = vmul.f32 %v42_v8, %v42_v8 }
 0x100   :  { %12334 = vmatpush3.bf16.msra.mxu1 %v13297_v18  ;;  %10952 = vmatprep.mubr.msk.f32.mxu1 %vm13191_vm2, %v13192_v26 }
 0x101   :  { %12335 = vmatprep.subr.bf16.mxu1 %v13190_v19  ;;  %v95_v44 = vsel %vm64_vm0, %v58_v40, 0.0  ;;  %87 = vadd.xlane.f32.xlu1 %v86_v41 }
 0x102   :  { %96 = vadd.xlane.f32.xlu0 %v95_v44 }
 0x104   :  { %12337 = vmatpush3.bf16.msra.mxu1 %v13309_v22 }
 0x105   :  { %12338 = vmatprep.subr.bf16.mxu1 %v13190_v19 }
 0x106   :  { %102 = vadd.xlane.f32.xlu0 %v101_v49 }
 0x108   :  { %12340 = vmatpush3.bf16.msra.mxu1 %v13319_v25 }
 0x109   :  { %12341 = vmatprep.subr.bf16.mxu1 %v13190_v19 }
 0x10b   :  { %10953 = vmatmul.mubr.msk.f32.vlgmr.msra.gmra.mrb[2].mxu1 %vm401_vm3, %v13357_v46 }
 0x10c   :  { %12343 = vmatpush3.bf16.msra.mxu1 %v13348_v43  ;;  %10967 = vmatprep.mubr.msk.f32.mxu1 %vm13191_vm2, %v13192_v26 }
 0x10d   :  { %12344 = vmatprep.subr.bf16.mxu1 %v13190_v19 }
 0x110   :  { %12346 = vmatpush3.bf16.msra.mxu1 %v13362_v47 }
 0x111   :  { %12347 = vmatprep.subr.bf16.mxu1 %v13190_v19 }
 0x114   :  { %12349 = vmatpush3.bf16.msra.mxu1 %v13374_v50 }
 0x115   :  { %12350 = vmatprep.subr.bf16.mxu1 %v13190_v19 }
 0x17e   :  { %v79_v33 = vpop.xlane.xlu0 %78 }
 0x17f   :  { %v341_v35 = vadd.f32 %v13328_v28, %v79_v33 }
 0x181   :  { %v73_v32 = vpop.xlane.xlu1 %72 }
 0x182   :  { %v339_v34 = vadd.f32 %v13328_v28, %v73_v32  ;;  %v85_v40 = vpop.xlane.xlu0 %84 }
 0x183   :  { %v343_v45 = vadd.f32 %v13328_v28, %v85_v40 }
 0x1d2   :  { %v13379_v51 = vpop.f32.mrb[0].mxu1 }
 0x1d3   :  { %v10939_v52 = vpop.f32.mrb[1].mxu1  ;;  %10968 = vmatmul.mubr.msk.f32.vlgmr.msra.gmra.mrb[4].mxu1 %vm401_vm3, %v13379_v51 }
 0x1d4   :  { %12352 = vmatpush3.bf16.msra.mxu1 %v13348_v43  ;;  %10982 = vmatprep.mubr.msk.f32.mxu1 %vm13191_vm2, %v13192_v26  ;;  %v10906_v52 = vpop.f32.mrb[2].mxu0 }
 0x1d5   :  { %12353 = vmatprep.subr.bf16.mxu1 %v13190_v19  ;;  %v261_v60 = vpop.f32.mrb[3].mxu0  ;;  %v356_v36 = vmul.f32 2.0, %v10906_v52 }
 0x1d6   :  { %v10909_v62 = vpop.f32.mrb[4].mxu0  ;;  %v355_v30 = vmul.f32 2.0, %v261_v60 }
 0x1d7   :  { %v271_v63 = vpop.f32.mrb[5].mxu0 }
 0x1d8   :  { %12355 = vmatpush3.bf16.msra.mxu1 %v13362_v47  ;;  %v10912_v0 = vpop.f32.mrb[6].mxu0  ;;  %v357_v31 = vmul.f32 2.0, %v271_v63  ;;  %v371_v37 = vsub.f32 %v339_v34, %v355_v30 }
 0x1d9   :  { %12356 = vmatprep.subr.bf16.mxu1 %v13190_v19  ;;  %v281_v2 = vpop.f32.mrb[7].mxu0 }
 0x1da   :  { %v13510_v3 = vpop.f32.mrb[8].mxu0  ;;  %v373_v38 = vsub.f32 %v341_v35, %v357_v31  ;;  %v359_v39 = vmul.f32 2.0, %v281_v2 }
 0x1db   :  { %v291_v4 = vpop.f32.mrb[9].mxu0 }
 0x1dc   :  { %12358 = vmatpush3.bf16.msra.mxu1 %v13374_v50  ;;  %v13512_v6 = vpop.f32.mrb[10].mxu0  ;;  %v389_v44 = vmax.f32 %v373_v38, 0.0  ;;  %v375_v49 = vsub.f32 %v343_v45, %v359_v39 }
 0x1dd   :  { %12368 = vmatprep.subr.bf16.mxu1 %v13190_v19  ;;  %v301_v7 = vpop.f32.mrb[11].mxu0 }
 0x1de   :  { %v13391_v53 = vpop.f32.mrb[2].mxu1  ;;  %v13514_v8 = vpop.f32.mrb[12].mxu0  ;;  %406 = vst.msk [vmem:[#allocation2 + $0x20] sm:$0xff] %vm401_vm3, %v389_v44 }
 0x1df   :  { %v10954_v54 = vpop.f32.mrb[3].mxu1  ;;  %v573_v20 = vsub.f32 %v13391_v53, %v13357_v46  ;;  %v92_v46 = vsel %vm64_vm0, %v57_v42, 0.0  ;;  %v13516_v9 = vpop.f32.mrb[13].mxu0  ;;  %v387_v42 = vmax.f32 %v371_v37, 0.0  ;;  %v366_v44 = vmul.f32 2.0, %v13514_v8 }
 0x1e0   :  { %93 = vadd.xlane.f32.xlu1 %v92_v46  ;;  %v98_v54 = vsel %vm64_vm0, %v59_v48, 0.0  ;;  %v13526_v13 = vpop.f32.mrb[14].mxu0  ;;  %v358_v48 = vmul.f32 2.0, %v10909_v62  ;;  %v363_v62 = vmul.f32 2.0, %v301_v7 }
 0x1e1   :  { %404 = vst.msk [vmem:[#allocation2 + $0x10] sm:$0xff] %vm401_vm3, %v387_v42 }
 0x1e4   :  { %99 = vadd.xlane.f32.xlu1 %v98_v54  ;;  %v91_v54 = vpop.xlane.xlu0 %90 }
 0x1e5   :  { %v345_v59 = vadd.f32 %v13328_v28, %v91_v54 }
 0x1e8   :  { %105 = vadd.xlane.f32.xlu1 %v104_v57  ;;  %v391_v57 = vmax.f32 %v375_v49, 0.0 }
 0x1ea   :  { %408 = vst.msk [vmem:[#allocation2 + $0x30] sm:$0xff] %vm401_vm3, %v391_v57  ;;  %v10096_v57 = vld [vmem:[%s17395_s5 + $0x80] sm:$0xff] }
 0x1ec   :  { %111 = vadd.xlane.f32.xlu1 %v110_v61  ;;  %v360_v61 = vmul.f32 2.0, %v10912_v0 }
 0x2a6   :  { %v656_v15 = vpop.f32.mrb[4].mxu1 }
 0x2a7   :  { %v657_v16 = vadd.f32 %v13484_v14, %v656_v15  ;;  %v10969_v17 = vpop.f32.mrb[5].mxu1  ;;  %v13529_v15 = vpop.f32.mrb[15].mxu0 }
 0x2a8   :  { %v10095_v17 = vld [vmem:[%s17395_s5 + $0x78] sm:$0xff]  ;;  %v367_v37 = vmul.f32 2.0, %v13529_v15 }
 0x2a9   :  { %v660_v21 = vmin.f32 %v13379_v51, %v657_v16  ;;  %v62_v51 = vmul.f32 %v46_v12, %v46_v12  ;;  %v13524_v12 = vpack.c.bf16 %v10093_v11, %v10092_v10  ;;  %v10094_v16 = vld [vmem:[%s17395_s5 + $0x70] sm:$0xff]  ;;  %v97_v10 = vpop.xlane.xlu0 %96 }
 0x2ab   :  { %v13490_v23 = vsub.f32 %v660_v21, %v573_v20  ;;  %v107_v56 = vsel %vm64_vm0, %v62_v51, 0.0  ;;  %v13538_v20 = vpack.c.bf16 %v10095_v17, %v10094_v16  ;;  %v361_v51 = vmul.f32 2.0, %v291_v4 }
 0x2ac   :  { %108 = vadd.xlane.f32.xlu0 %v107_v56  ;;  %v347_v17 = vadd.f32 %v13328_v28, %v97_v10  ;;  %v13617_v10 = vld [vmem:[%s17396_s6 + $0x1] ss:$0 sm:$0xff] }
 0x2ad   :  { %10983 = vmatmul.mubr.msk.f32.vlgmr.msra.gmra.mrb[6].mxu1 %vm401_vm3, %v13490_v23  ;;  %v377_v63 = vsub.f32 %v345_v59, %v361_v51  ;;  %v103_v7 = vpop.xlane.xlu0 %102  ;;  %v368_v51 = vmul.f32 2.0, %v13526_v13  ;;  %v10097_v13 = vld [vmem:[%s17395_s5 + $0x88] sm:$0xff] }
 0x2ae   :  { %11012 = vmatprep.mubr.msk.f32.mxu1 %vm13191_vm2, %v13192_v26  ;;  %12370 = vmatpush3.bf16.msra.mxu1 %v13524_v12  ;;  %v379_v0 = vsub.f32 %v347_v17, %v363_v62  ;;  %v349_v34 = vadd.f32 %v13328_v28, %v103_v7  ;;  %v13590_v59 = vpack.c.bf16 %v10097_v13, %v10096_v57  ;;  %v10104_v62 = vld [vmem:[%s17395_s5 + $0xa8] sm:$0xff] }
 0x2af   :  { %12371 = vmatprep.subr.bf16.mxu1 %v13190_v19  ;;  %v393_v16 = vmax.f32 %v377_v63, 0.0 }
 0x2b0   :  { %v395_v33 = vmax.f32 %v379_v0, 0.0 }
 0x2b1   :  { %410 = vst.msk [vmem:[#allocation2 + $0x40] sm:$0xff] %vm401_vm3, %v393_v16 }
 0x2b2   :  { %12373 = vmatpush3.bf16.msra.mxu1 %v13538_v20  ;;  %412 = vst.msk [vmem:[#allocation2 + $0x50] sm:$0xff] %vm401_vm3, %v395_v33 }
 0x2b3   :  { %12374 = vmatprep.subr.bf16.mxu1 %v13190_v19 }
 0x2b6   :  { %12376 = vmatpush3.bf16.msra.mxu1 %v13590_v59 }
 0x2b7   :  { %12386 = vmatprep.subr.bf16.mxu1 %v13190_v19 }
 0x380   :  { %v731_v21 = vpop.f32.mrb[6].mxu1 }
 0x381   :  { %v732_v24 = vadd.f32 %v13484_v14, %v731_v21  ;;  %v10984_v27 = vpop.f32.mrb[7].mxu1 }
 0x382   :  { %v365_v27 = vmul.f32 2.0, %v13516_v9  ;;  %v109_v9 = vpop.xlane.xlu0 %108 }
 0x383   :  { %v13544_v29 = vmin.f32 %v13490_v23, %v732_v24  ;;  %v76_v23 = vpop.xlane.xlu1 %75  ;;  %v362_v24 = vmul.f32 2.0, %v13510_v3 }
 0x384   :  { %v340_v41 = vadd.f32 %v13328_v28, %v76_v23  ;;  %v381_v3 = vsub.f32 %v349_v34, %v365_v27  ;;  %v13652_v27 = vld [vmem:[%s17396_s6 + $0x2] ss:$0 sm:$0xff] }
 0x385   :  { %10998 = vmatmul.mubr.msk.f32.vlgmr.msra.gmra.mrb[16].mxu0 %vm401_vm3, %v13544_v29 }
 0x386   :  { %11027 = vmatprep.mubr.msk.f32.mxu0 %vm13191_vm2, %v13192_v26  ;;  %v372_v46 = vsub.f32 %v340_v41, %v356_v36  ;;  %v364_v36 = vmul.f32 2.0, %v13512_v6  ;;  %v397_v40 = vmax.f32 %v381_v3, 0.0  ;;  %v351_v41 = vadd.f32 %v13328_v28, %v109_v9 }
 0x387   :  { %v82_v52 = vpop.xlane.xlu1 %81 }
 0x388   :  { %v388_v55 = vmax.f32 %v372_v46, 0.0  ;;  %v342_v56 = vadd.f32 %v13328_v28, %v82_v52  ;;  %414 = vst.msk [vmem:[#allocation2 + $0x60] sm:$0xff] %vm401_vm3, %v397_v40  ;;  %v383_v6 = vsub.f32 %v351_v41, %v367_v37 }
 0x38a   :  { %405 = vst.msk [vmem:[#allocation2 + $0x18] sm:$0xff] %vm401_vm3, %v388_v55  ;;  %v374_v60 = vsub.f32 %v342_v56, %v358_v48  ;;  %v399_v48 = vmax.f32 %v383_v6, 0.0 }
 0x38b   :  { %v88_v2 = vpop.xlane.xlu1 %87 }
 0x38c   :  { %v390_v11 = vmax.f32 %v374_v60, 0.0  ;;  %v344_v4 = vadd.f32 %v13328_v28, %v88_v2  ;;  %416 = vst.msk [vmem:[#allocation2 + $0x70] sm:$0xff] %vm401_vm3, %v399_v48  ;;  %v10102_v60 = vld [vmem:[%s17395_s5 + $0x98] sm:$0xff] }
 0x38e   :  { %407 = vst.msk [vmem:[#allocation2 + $0x28] sm:$0xff] %vm401_vm3, %v390_v11  ;;  %v376_v21 = vsub.f32 %v344_v4, %v360_v61  ;;  %v10103_v61 = vld [vmem:[%s17395_s5 + $0xa0] sm:$0xff] }
 0x38f   :  { %v94_v30 = vpop.xlane.xlu1 %93  ;;  %v13609_v2 = vpack.c.bf16 %v10104_v62, %v10103_v61 }
 0x390   :  { %v392_v31 = vmax.f32 %v376_v21, 0.0  ;;  %v346_v32 = vadd.f32 %v13328_v28, %v94_v30  ;;  %v1005_v21 = vld [vmem:[#allocation2 + $0x10] sm:$0xff] }
 0x392   :  { %409 = vst.msk [vmem:[#allocation2 + $0x38] sm:$0xff] %vm401_vm3, %v392_v31  ;;  %v378_v35 = vsub.f32 %v346_v32, %v362_v24  ;;  %v10106_v24 = vld [vmem:[%s17395_s5 + $0xb8] sm:$0xff] }
 0x393   :  { %v100_v38 = vpop.xlane.xlu1 %99 }
 0x394   :  { %v394_v39 = vmax.f32 %v378_v35, 0.0  ;;  %v348_v23 = vadd.f32 %v13328_v28, %v100_v38  ;;  %v13669_v35 = vld [vmem:[%s17396_s6 + $0x3] ss:$0 sm:$0xff] }
 0x396   :  { %411 = vst.msk [vmem:[#allocation2 + $0x48] sm:$0xff] %vm401_vm3, %v394_v39  ;;  %v380_v42 = vsub.f32 %v348_v23, %v364_v36 }
 0x397   :  { %v106_v45 = vpop.xlane.xlu1 %105 }
 0x398   :  { %v396_v46 = vmax.f32 %v380_v42, 0.0  ;;  %v350_v15 = vadd.f32 %v13328_v28, %v106_v45 }
 0x39a   :  { %413 = vst.msk [vmem:[#allocation2 + $0x58] sm:$0xff] %vm401_vm3, %v396_v46  ;;  %v382_v49 = vsub.f32 %v350_v15, %v366_v44 }
 0x39b   :  { %v112_v52 = vpop.xlane.xlu1 %111 }
 0x39c   :  { %v398_v54 = vmax.f32 %v382_v49, 0.0  ;;  %v352_v55 = vadd.f32 %v13328_v28, %v112_v52  ;;  %v10101_v28 = vld [vmem:[%s17395_s5 + $0x90] sm:$0xff]  ;;  %v1453_v52 = vld [vmem:[#allocation2 + $0x18] sm:$0xff] }
 0x39d   :  { %v13603_v63 = vpack.c.bf16 %v10102_v60, %v10101_v28 }
 0x39e   :  { %415 = vst.msk [vmem:[#allocation2 + $0x68] sm:$0xff] %vm401_vm3, %v398_v54  ;;  %v384_v8 = vsub.f32 %v352_v55, %v368_v51 }
 0x39f   :  { %12379 = vmatpush3.bf16.msra.mxu0 %v13603_v63 }
 0x3a0   :  { %v400_v56 = vmax.f32 %v384_v8, 0.0  ;;  %12380 = vmatprep.subr.bf16.mxu0 %v13190_v19 }
 0x3a2   :  { %417 = vst.msk [vmem:[#allocation2 + $0x78] sm:$0xff] %vm401_vm3, %v400_v56 }
 0x3a3   :  { %12382 = vmatpush3.bf16.msra.mxu0 %v13609_v2 }
 0x3a4   :  { %12383 = vmatprep.subr.bf16.mxu0 %v13190_v19 }
 0x458   :  { %v820_v11 = vpop.f32.mrb[16].mxu0 }
 0x459   :  { %v821_v4 = vadd.f32 %v13617_v10, %v820_v11  ;;  %v10999_v16 = vpop.f32.mrb[17].mxu0 }
 0x45b   :  { %v824_v17 = vmin.f32 %v13544_v29, %v821_v4  ;;  %v10105_v29 = vld [vmem:[%s17395_s5 + $0xb0] sm:$0xff] }
 0x45c   :  { %v13645_v0 = vpack.c.bf16 %v10106_v24, %v10105_v29 }
 0x45d   :  { %11013 = vmatmul.mubr.msk.f32.vlgmr.msra.gmra.mrb[8].mxu1 %vm401_vm3, %v824_v17 }
 0x45e   :  { %12388 = vmatpush3.bf16.msra.mxu1 %v13297_v18  ;;  %11042 = vmatprep.mubr.msk.f32.mxu1 %vm13191_vm2, %v13192_v26 }
 0x45f   :  { %12389 = vmatprep.subr.bf16.mxu1 %v13190_v19  ;;  %12385 = vmatpush3.bf16.msra.mxu0 %v13645_v0 }
 0x460   :  { %12395 = vmatprep.subr.bf16.mxu0 %v13190_v19 }
 0x462   :  { %12391 = vmatpush3.bf16.msra.mxu1 %v13309_v22 }
 0x463   :  { %12392 = vmatprep.subr.bf16.mxu1 %v13190_v19 }
 0x466   :  { %12394 = vmatpush3.bf16.msra.mxu1 %v13319_v25 }
 0x467   :  { %12404 = vmatprep.subr.bf16.mxu1 %v13190_v19 }
 0x469   :  { %11043 = vmatmul.mubr.msk.f32.vlgmr.msra.gmra.mrb[10].mxu1 %vm401_vm3, %v1005_v21 }
 0x46a   :  { %12406 = vmatpush3.bf16.msra.mxu1 %v13348_v43  ;;  %11072 = vmatprep.mubr.msk.f32.mxu1 %vm13191_vm2, %v13192_v26 }
 0x46b   :  { %12407 = vmatprep.subr.bf16.mxu1 %v13190_v19 }
 0x46e   :  { %12409 = vmatpush3.bf16.msra.mxu1 %v13362_v47 }
 0x46f   :  { %12410 = vmatprep.subr.bf16.mxu1 %v13190_v19 }
 0x472   :  { %12412 = vmatpush3.bf16.msra.mxu1 %v13374_v50 }
 0x473   :  { %12422 = vmatprep.subr.bf16.mxu1 %v13190_v19 }
 0x530   :  { %v909_v30 = vpop.f32.mrb[8].mxu1 }
 0x531   :  { %v910_v7 = vadd.f32 %v13652_v27, %v909_v30  ;;  %v11014_v31 = vpop.f32.mrb[9].mxu1 }
 0x533   :  { %v913_v32 = vmin.f32 %v824_v17, %v910_v7 }
 0x535   :  { %11028 = vmatmul.mubr.msk.f32.vlgmr.msra.gmra.mrb[18].mxu0 %vm401_vm3, %v913_v32 }
 0x536   :  { %12397 = vmatpush3.bf16.msra.mxu0 %v13348_v43  ;;  %11057 = vmatprep.mubr.msk.f32.mxu0 %vm13191_vm2, %v13192_v26 }
 0x537   :  { %12398 = vmatprep.subr.bf16.mxu0 %v13190_v19 }
 0x53a   :  { %12400 = vmatpush3.bf16.msra.mxu0 %v13362_v47 }
 0x53b   :  { %12401 = vmatprep.subr.bf16.mxu0 %v13190_v19 }
 0x53c   :  { %v13662_v33 = vpop.f32.mrb[10].mxu1 }
 0x53d   :  { %v11044_v34 = vpop.f32.mrb[11].mxu1  ;;  %v1079_v40 = vsub.f32 %v13662_v33, %v1005_v21 }
 0x53e   :  { %12403 = vmatpush3.bf16.msra.mxu0 %v13374_v50 }
 0x53f   :  { %12413 = vmatprep.subr.bf16.mxu0 %v13190_v19 }
 0x608   :  { %v998_v36 = vpop.f32.mrb[18].mxu0 }
 0x609   :  { %v999_v3 = vadd.f32 %v13669_v35, %v998_v36  ;;  %v11029_v37 = vpop.f32.mrb[19].mxu0 }
 0x60a   :  { %v1901_v37 = vld [vmem:[#allocation2 + $0x20] sm:$0xff] }
 0x60b   :  { %v1002_v38 = vmin.f32 %v913_v32, %v999_v3 }
 0x60d   :  { %v1003_v9 = vadd.f32 %v1002_v38, %v13391_v53 }
 0x60f   :  { %11058 = vmatmul.mubr.msk.f32.vlgmr.msra.gmra.mrb[20].mxu0 %vm401_vm3, %v1003_v9 }
 0x610   :  { %12415 = vmatpush3.bf16.msra.mxu0 %v13402_v58  ;;  %11087 = vmatprep.mubr.msk.f32.mxu0 %vm13191_vm2, %v13192_v26 }
 0x611   :  { %12416 = vmatprep.subr.bf16.mxu0 %v13190_v19 }
 0x614   :  { %12418 = vmatpush3.bf16.msra.mxu0 %v13427_v1 }
 0x615   :  { %12419 = vmatprep.subr.bf16.mxu0 %v13190_v19 }
 0x618   :  { %12421 = vmatpush3.bf16.msra.mxu0 %v13441_v5 }
 0x619   :  { %12431 = vmatprep.subr.bf16.mxu0 %v13190_v19 }
 0x6e2   :  { %v1149_v39 = vpop.f32.mrb[20].mxu0 }
 0x6e3   :  { %v1150_v53 = vadd.f32 %v13484_v14, %v1149_v39  ;;  %v11059_v23 = vpop.f32.mrb[21].mxu0 }
 0x6e5   :  { %v1153_v41 = vmin.f32 %v1003_v9, %v1150_v53 }
 0x6e7   :  { %v1154_v42 = vsub.f32 %v1153_v41, %v1079_v40 }
 0x6e9   :  { %11073 = vmatmul.mubr.msk.f32.vlgmr.msra.gmra.mrb[12].mxu1 %vm401_vm3, %v1154_v42 }
 0x6ea   :  { %12424 = vmatpush3.bf16.msra.mxu1 %v13524_v12  ;;  %11102 = vmatprep.mubr.msk.f32.mxu1 %vm13191_vm2, %v13192_v26 }
 0x6eb   :  { %12425 = vmatprep.subr.bf16.mxu1 %v13190_v19 }
 0x6ee   :  { %12427 = vmatpush3.bf16.msra.mxu1 %v13538_v20 }
 0x6ef   :  { %12428 = vmatprep.subr.bf16.mxu1 %v13190_v19 }
 0x6f2   :  { %12430 = vmatpush3.bf16.msra.mxu1 %v13590_v59 }
 0x6f3   :  { %12440 = vmatprep.subr.bf16.mxu1 %v13190_v19 }
 0x7bc   :  { %v1224_v44 = vpop.f32.mrb[12].mxu1 }
 0x7bd   :  { %v1225_v6 = vadd.f32 %v13484_v14, %v1224_v44  ;;  %v11074_v45 = vpop.f32.mrb[13].mxu1 }
 0x7bf   :  { %v1228_v46 = vmin.f32 %v1154_v42, %v1225_v6 }
 0x7c1   :  { %11088 = vmatmul.mubr.msk.f32.vlgmr.msra.gmra.mrb[22].mxu0 %vm401_vm3, %v1228_v46 }
 0x7c2   :  { %12433 = vmatpush3.bf16.msra.mxu0 %v13603_v63  ;;  %11117 = vmatprep.mubr.msk.f32.mxu0 %vm13191_vm2, %v13192_v26 }
 0x7c3   :  { %12434 = vmatprep.subr.bf16.mxu0 %v13190_v19 }
 0x7c6   :  { %12436 = vmatpush3.bf16.msra.mxu0 %v13609_v2 }
 0x7c7   :  { %12437 = vmatprep.subr.bf16.mxu0 %v13190_v19 }
 0x7ca   :  { %12439 = vmatpush3.bf16.msra.mxu0 %v13645_v0 }
 0x7cb   :  { %12449 = vmatprep.subr.bf16.mxu0 %v13190_v19 }
 0x894   :  { %v1298_v15 = vpop.f32.mrb[22].mxu0 }
 0x895   :  { %v1299_v48 = vadd.f32 %v13617_v10, %v1298_v15  ;;  %v11089_v49 = vpop.f32.mrb[23].mxu0 }
 0x897   :  { %v1302_v51 = vmin.f32 %v1228_v46, %v1299_v48 }
 0x899   :  { %11103 = vmatmul.mubr.msk.f32.vlgmr.msra.gmra.mrb[14].mxu1 %vm401_vm3, %v1302_v51 }
 0x89a   :  { %12442 = vmatpush3.bf16.msra.mxu1 %v13297_v18  ;;  %11132 = vmatprep.mubr.msk.f32.mxu1 %vm13191_vm2, %v13192_v26 }
 0x89b   :  { %12443 = vmatprep.subr.bf16.mxu1 %v13190_v19 }
 0x89e   :  { %12445 = vmatpush3.bf16.msra.mxu1 %v13309_v22 }
 0x89f   :  { %12446 = vmatprep.subr.bf16.mxu1 %v13190_v19 }
 0x8a2   :  { %12448 = vmatpush3.bf16.msra.mxu1 %v13319_v25 }
 0x8a3   :  { %12458 = vmatprep.subr.bf16.mxu1 %v13190_v19 }
 0x8a5   :  { %11133 = vmatmul.mubr.msk.f32.vlgmr.msra.gmra.mrb[16].mxu1 %vm401_vm3, %v1453_v52 }
 0x8a6   :  { %12460 = vmatpush3.bf16.msra.mxu1 %v13348_v43  ;;  %11162 = vmatprep.mubr.msk.f32.mxu1 %vm13191_vm2, %v13192_v26 }
 0x8a7   :  { %12461 = vmatprep.subr.bf16.mxu1 %v13190_v19 }
 0x8aa   :  { %12463 = vmatpush3.bf16.msra.mxu1 %v13362_v47 }
 0x8ab   :  { %12464 = vmatprep.subr.bf16.mxu1 %v13190_v19 }
 0x8ae   :  { %12466 = vmatpush3.bf16.msra.mxu1 %v13374_v50 }
 0x8af   :  { %12476 = vmatprep.subr.bf16.mxu1 %v13190_v19 }
 0x96c   :  { %v1372_v54 = vpop.f32.mrb[14].mxu1 }
 0x96d   :  { %v1373_v55 = vadd.f32 %v13652_v27, %v1372_v54  ;;  %v11104_v8 = vpop.f32.mrb[15].mxu1 }
 0x96f   :  { %v1376_v56 = vmin.f32 %v1302_v51, %v1373_v55 }
 0x971   :  { %11118 = vmatmul.mubr.msk.f32.vlgmr.msra.gmra.mrb[24].mxu0 %vm401_vm3, %v1376_v56 }
 0x972   :  { %12451 = vmatpush3.bf16.msra.mxu0 %v13348_v43  ;;  %11147 = vmatprep.mubr.msk.f32.mxu0 %vm13191_vm2, %v13192_v26 }
 0x973   :  { %12452 = vmatprep.subr.bf16.mxu0 %v13190_v19 }
 0x976   :  { %12454 = vmatpush3.bf16.msra.mxu0 %v13362_v47 }
 0x977   :  { %12455 = vmatprep.subr.bf16.mxu0 %v13190_v19 }
 0x978   :  { %v13730_v57 = vpop.f32.mrb[16].mxu1 }
 0x979   :  { %v11134_v13 = vpop.f32.mrb[17].mxu1  ;;  %v1527_v21 = vsub.f32 %v13730_v57, %v1453_v52 }
 0x97a   :  { %12457 = vmatpush3.bf16.msra.mxu0 %v13374_v50 }
 0x97b   :  { %12467 = vmatprep.subr.bf16.mxu0 %v13190_v19 }
 0xa44   :  { %v1446_v28 = vpop.f32.mrb[24].mxu0 }
 0xa45   :  { %v1447_v60 = vadd.f32 %v13669_v35, %v1446_v28  ;;  %v11119_v61 = vpop.f32.mrb[25].mxu0 }
 0xa46   :  { %v2349_v61 = vld [vmem:[#allocation2 + $0x28] sm:$0xff] }
 0xa47   :  { %v1450_v62 = vmin.f32 %v1376_v56, %v1447_v60 }
 0xa49   :  { %v1451_v11 = vadd.f32 %v1450_v62, %v13662_v33 }
 0xa4b   :  { %11148 = vmatmul.mubr.msk.f32.vlgmr.msra.gmra.mrb[26].mxu0 %vm401_vm3, %v1451_v11 }
 0xa4c   :  { %12469 = vmatpush3.bf16.msra.mxu0 %v13402_v58  ;;  %11177 = vmatprep.mubr.msk.f32.mxu0 %vm13191_vm2, %v13192_v26 }
 0xa4d   :  { %12470 = vmatprep.subr.bf16.mxu0 %v13190_v19 }
 0xa50   :  { %12472 = vmatpush3.bf16.msra.mxu0 %v13427_v1 }
 0xa51   :  { %12473 = vmatprep.subr.bf16.mxu0 %v13190_v19 }
 0xa54   :  { %12475 = vmatpush3.bf16.msra.mxu0 %v13441_v5 }
 0xa55   :  { %12485 = vmatprep.subr.bf16.mxu0 %v13190_v19 }
 0xb1e   :  { %v1597_v4 = vpop.f32.mrb[26].mxu0 }
 0xb1f   :  { %v1598_v16 = vadd.f32 %v13484_v14, %v1597_v4  ;;  %v11149_v17 = vpop.f32.mrb[27].mxu0 }
 0xb21   :  { %v1601_v29 = vmin.f32 %v1451_v11, %v1598_v16 }
 0xb23   :  { %v1602_v24 = vsub.f32 %v1601_v29, %v1527_v21 }
 0xb25   :  { %11163 = vmatmul.mubr.msk.f32.vlgmr.msra.gmra.mrb[18].mxu1 %vm401_vm3, %v1602_v24 }
 0xb26   :  { %12478 = vmatpush3.bf16.msra.mxu1 %v13524_v12  ;;  %11192 = vmatprep.mubr.msk.f32.mxu1 %vm13191_vm2, %v13192_v26 }
 0xb27   :  { %12479 = vmatprep.subr.bf16.mxu1 %v13190_v19 }
 0xb2a   :  { %12481 = vmatpush3.bf16.msra.mxu1 %v13538_v20 }
 0xb2b   :  { %12482 = vmatprep.subr.bf16.mxu1 %v13190_v19 }
 0xb2e   :  { %12484 = vmatpush3.bf16.msra.mxu1 %v13590_v59 }
 0xb2f   :  { %12494 = vmatprep.subr.bf16.mxu1 %v13190_v19 }
 0xbf8   :  { %v1672_v30 = vpop.f32.mrb[18].mxu1 }
 0xbf9   :  { %v1673_v7 = vadd.f32 %v13484_v14, %v1672_v30  ;;  %v11164_v31 = vpop.f32.mrb[19].mxu1 }
 0xbfb   :  { %v1676_v32 = vmin.f32 %v1602_v24, %v1673_v7 }
 0xbfd   :  { %11178 = vmatmul.mubr.msk.f32.vlgmr.msra.gmra.mrb[28].mxu0 %vm401_vm3, %v1676_v32 }
 0xbfe   :  { %12487 = vmatpush3.bf16.msra.mxu0 %v13603_v63  ;;  %11207 = vmatprep.mubr.msk.f32.mxu0 %vm13191_vm2, %v13192_v26 }
 0xbff   :  { %12488 = vmatprep.subr.bf16.mxu0 %v13190_v19 }
 0xc02   :  { %12490 = vmatpush3.bf16.msra.mxu0 %v13609_v2 }
 0xc03   :  { %12491 = vmatprep.subr.bf16.mxu0 %v13190_v19 }
 0xc06   :  { %12493 = vmatpush3.bf16.msra.mxu0 %v13645_v0 }
 0xc07   :  { %12503 = vmatprep.subr.bf16.mxu0 %v13190_v19 }
 0xcd0   :  { %v1746_v33 = vpop.f32.mrb[28].mxu0 }
 0xcd1   :  { %v1747_v34 = vadd.f32 %v13617_v10, %v1746_v33  ;;  %v11179_v36 = vpop.f32.mrb[29].mxu0 }
 0xcd3   :  { %v1750_v3 = vmin.f32 %v1676_v32, %v1747_v34 }
 0xcd5   :  { %11193 = vmatmul.mubr.msk.f32.vlgmr.msra.gmra.mrb[20].mxu1 %vm401_vm3, %v1750_v3 }
 0xcd6   :  { %12496 = vmatpush3.bf16.msra.mxu1 %v13297_v18  ;;  %11222 = vmatprep.mubr.msk.f32.mxu1 %vm13191_vm2, %v13192_v26 }
 0xcd7   :  { %12497 = vmatprep.subr.bf16.mxu1 %v13190_v19 }
 0xcda   :  { %12499 = vmatpush3.bf16.msra.mxu1 %v13309_v22 }
 0xcdb   :  { %12500 = vmatprep.subr.bf16.mxu1 %v13190_v19 }
 0xcde   :  { %12502 = vmatpush3.bf16.msra.mxu1 %v13319_v25 }
 0xcdf   :  { %12512 = vmatprep.subr.bf16.mxu1 %v13190_v19 }
 0xce1   :  { %11223 = vmatmul.mubr.msk.f32.vlgmr.msra.gmra.mrb[22].mxu1 %vm401_vm3, %v1901_v37 }
 0xce2   :  { %12514 = vmatpush3.bf16.msra.mxu1 %v13348_v43  ;;  %11252 = vmatprep.mubr.msk.f32.mxu1 %vm13191_vm2, %v13192_v26 }
 0xce3   :  { %12515 = vmatprep.subr.bf16.mxu1 %v13190_v19 }
 0xce6   :  { %12517 = vmatpush3.bf16.msra.mxu1 %v13362_v47 }
 0xce7   :  { %12518 = vmatprep.subr.bf16.mxu1 %v13190_v19 }
 0xcea   :  { %12520 = vmatpush3.bf16.msra.mxu1 %v13374_v50 }
 0xceb   :  { %12530 = vmatprep.subr.bf16.mxu1 %v13190_v19 }
 0xda8   :  { %v1820_v38 = vpop.f32.mrb[20].mxu1 }
 0xda9   :  { %v1821_v9 = vadd.f32 %v13652_v27, %v1820_v38  ;;  %v11194_v39 = vpop.f32.mrb[21].mxu1 }
 0xdab   :  { %v1824_v53 = vmin.f32 %v1750_v3, %v1821_v9 }
 0xdad   :  { %11208 = vmatmul.mubr.msk.f32.vlgmr.msra.gmra.mrb[30].mxu0 %vm401_vm3, %v1824_v53 }
 0xdae   :  { %12505 = vmatpush3.bf16.msra.mxu0 %v13348_v43  ;;  %11237 = vmatprep.mubr.msk.f32.mxu0 %vm13191_vm2, %v13192_v26 }
 0xdaf   :  { %12506 = vmatprep.subr.bf16.mxu0 %v13190_v19 }
 0xdb2   :  { %12508 = vmatpush3.bf16.msra.mxu0 %v13362_v47 }
 0xdb3   :  { %12509 = vmatprep.subr.bf16.mxu0 %v13190_v19 }
 0xdb4   :  { %v13793_v23 = vpop.f32.mrb[22].mxu1 }
 0xdb5   :  { %v11224_v40 = vpop.f32.mrb[23].mxu1  ;;  %v1975_v49 = vsub.f32 %v13793_v23, %v1901_v37 }
 0xdb6   :  { %12511 = vmatpush3.bf16.msra.mxu0 %v13374_v50 }
 0xdb7   :  { %12521 = vmatprep.subr.bf16.mxu0 %v13190_v19 }
 0xe80   :  { %v1894_v41 = vpop.f32.mrb[30].mxu0 }
 0xe81   :  { %v1895_v42 = vadd.f32 %v13669_v35, %v1894_v41  ;;  %v11209_v44 = vpop.f32.mrb[31].mxu0 }
 0xe83   :  { %v1898_v6 = vmin.f32 %v1824_v53, %v1895_v42  ;;  %v2797_v42 = vld [vmem:[#allocation2 + $0x30] sm:$0xff] }
 0xe85   :  { %v1899_v45 = vadd.f32 %v1898_v6, %v13730_v57 }
 0xe87   :  { %11238 = vmatmul.mubr.msk.f32.vlgmr.msra.gmra.mrb[32].mxu0 %vm401_vm3, %v1899_v45 }
 0xe88   :  { %12523 = vmatpush3.bf16.msra.mxu0 %v13402_v58  ;;  %11267 = vmatprep.mubr.msk.f32.mxu0 %vm13191_vm2, %v13192_v26 }
 0xe89   :  { %12524 = vmatprep.subr.bf16.mxu0 %v13190_v19 }
 0xe8c   :  { %12526 = vmatpush3.bf16.msra.mxu0 %v13427_v1 }
 0xe8d   :  { %12527 = vmatprep.subr.bf16.mxu0 %v13190_v19 }
 0xe90   :  { %12529 = vmatpush3.bf16.msra.mxu0 %v13441_v5 }
 0xe91   :  { %12539 = vmatprep.subr.bf16.mxu0 %v13190_v19 }
 0xf5a   :  { %v2045_v46 = vpop.f32.mrb[32].mxu0 }
 0xf5b   :  { %v2046_v15 = vadd.f32 %v13484_v14, %v2045_v46  ;;  %v11239_v48 = vpop.f32.mrb[33].mxu0 }
 0xf5d   :  { %v2049_v51 = vmin.f32 %v1899_v45, %v2046_v15 }
 0xf5f   :  { %v2050_v52 = vsub.f32 %v2049_v51, %v1975_v49 }
 0xf61   :  { %11253 = vmatmul.mubr.msk.f32.vlgmr.msra.gmra.mrb[24].mxu1 %vm401_vm3, %v2050_v52 }
 0xf62   :  { %12532 = vmatpush3.bf16.msra.mxu1 %v13524_v12  ;;  %11282 = vmatprep.mubr.msk.f32.mxu1 %vm13191_vm2, %v13192_v26 }
 0xf63   :  { %12533 = vmatprep.subr.bf16.mxu1 %v13190_v19 }
 0xf66   :  { %12535 = vmatpush3.bf16.msra.mxu1 %v13538_v20 }
 0xf67   :  { %12536 = vmatprep.subr.bf16.mxu1 %v13190_v19 }
 0xf6a   :  { %12538 = vmatpush3.bf16.msra.mxu1 %v13590_v59 }
 0xf6b   :  { %12548 = vmatprep.subr.bf16.mxu1 %v13190_v19 }
0x1034   :  { %v2120_v54 = vpop.f32.mrb[24].mxu1 }
0x1035   :  { %v2121_v55 = vadd.f32 %v13484_v14, %v2120_v54  ;;  %v11254_v8 = vpop.f32.mrb[25].mxu1 }
0x1037   :  { %v2124_v56 = vmin.f32 %v2050_v52, %v2121_v55 }
0x1039   :  { %11268 = vmatmul.mubr.msk.f32.vlgmr.msra.gmra.mrb[34].mxu0 %vm401_vm3, %v2124_v56 }
0x103a   :  { %12541 = vmatpush3.bf16.msra.mxu0 %v13603_v63  ;;  %11297 = vmatprep.mubr.msk.f32.mxu0 %vm13191_vm2, %v13192_v26 }
0x103b   :  { %12542 = vmatprep.subr.bf16.mxu0 %v13190_v19 }
0x103e   :  { %12544 = vmatpush3.bf16.msra.mxu0 %v13609_v2 }
0x103f   :  { %12545 = vmatprep.subr.bf16.mxu0 %v13190_v19 }
0x1042   :  { %12547 = vmatpush3.bf16.msra.mxu0 %v13645_v0 }
0x1043   :  { %12557 = vmatprep.subr.bf16.mxu0 %v13190_v19 }
0x110c   :  { %v2194_v57 = vpop.f32.mrb[34].mxu0 }
0x110d   :  { %v2195_v13 = vadd.f32 %v13617_v10, %v2194_v57  ;;  %v11269_v28 = vpop.f32.mrb[35].mxu0 }
0x110f   :  { %v2198_v60 = vmin.f32 %v2124_v56, %v2195_v13  ;;  %v13937_v56 = vld [vmem:[%s17396_s6] ss:$0 sm:$0xff] }
0x1111   :  { %11283 = vmatmul.mubr.msk.f32.vlgmr.msra.gmra.mrb[26].mxu1 %vm401_vm3, %v2198_v60 }
0x1112   :  { %12550 = vmatpush3.bf16.msra.mxu1 %v13297_v18  ;;  %11312 = vmatprep.mubr.msk.f32.mxu1 %vm13191_vm2, %v13192_v26 }
0x1113   :  { %12551 = vmatprep.subr.bf16.mxu1 %v13190_v19 }
0x1116   :  { %12553 = vmatpush3.bf16.msra.mxu1 %v13309_v22 }
0x1117   :  { %12554 = vmatprep.subr.bf16.mxu1 %v13190_v19 }
0x111a   :  { %12556 = vmatpush3.bf16.msra.mxu1 %v13319_v25 }
0x111b   :  { %12566 = vmatprep.subr.bf16.mxu1 %v13190_v19 }
0x111d   :  { %11313 = vmatmul.mubr.msk.f32.vlgmr.msra.gmra.mrb[28].mxu1 %vm401_vm3, %v2349_v61 }
0x111e   :  { %12568 = vmatpush3.bf16.msra.mxu1 %v13348_v43  ;;  %11342 = vmatprep.mubr.msk.f32.mxu1 %vm13191_vm2, %v13192_v26 }
0x111f   :  { %12569 = vmatprep.subr.bf16.mxu1 %v13190_v19 }
0x1122   :  { %12571 = vmatpush3.bf16.msra.mxu1 %v13362_v47 }
0x1123   :  { %12572 = vmatprep.subr.bf16.mxu1 %v13190_v19 }
0x1126   :  { %12574 = vmatpush3.bf16.msra.mxu1 %v13374_v50 }
0x1127   :  { %12584 = vmatprep.subr.bf16.mxu1 %v13190_v19 }
0x11e4   :  { %v2268_v62 = vpop.f32.mrb[26].mxu1 }
0x11e5   :  { %v2269_v11 = vadd.f32 %v13652_v27, %v2268_v62  ;;  %v11284_v4 = vpop.f32.mrb[27].mxu1 }
0x11e7   :  { %v2272_v16 = vmin.f32 %v2198_v60, %v2269_v11 }
0x11e9   :  { %11298 = vmatmul.mubr.msk.f32.vlgmr.msra.gmra.mrb[36].mxu0 %vm401_vm3, %v2272_v16 }
0x11ea   :  { %12559 = vmatpush3.bf16.msra.mxu0 %v13348_v43  ;;  %11327 = vmatprep.mubr.msk.f32.mxu0 %vm13191_vm2, %v13192_v26 }
0x11eb   :  { %12560 = vmatprep.subr.bf16.mxu0 %v13190_v19 }
0x11ee   :  { %12562 = vmatpush3.bf16.msra.mxu0 %v13362_v47 }
0x11ef   :  { %12563 = vmatprep.subr.bf16.mxu0 %v13190_v19 }
0x11f0   :  { %v13856_v17 = vpop.f32.mrb[28].mxu1 }
0x11f1   :  { %v11314_v21 = vpop.f32.mrb[29].mxu1  ;;  %v2423_v36 = vsub.f32 %v13856_v17, %v2349_v61 }
0x11f2   :  { %12565 = vmatpush3.bf16.msra.mxu0 %v13374_v50 }
0x11f3   :  { %12575 = vmatprep.subr.bf16.mxu0 %v13190_v19 }
0x12bc   :  { %v2342_v29 = vpop.f32.mrb[36].mxu0 }
0x12bd   :  { %v2343_v24 = vadd.f32 %v13669_v35, %v2342_v29  ;;  %v11299_v30 = vpop.f32.mrb[37].mxu0 }
0x12be   :  { %v3245_v30 = vld [vmem:[#allocation2 + $0x38] sm:$0xff] }
0x12bf   :  { %v2346_v7 = vmin.f32 %v2272_v16, %v2343_v24 }
0x12c1   :  { %v2347_v31 = vadd.f32 %v2346_v7, %v13793_v23 }
0x12c3   :  { %11328 = vmatmul.mubr.msk.f32.vlgmr.msra.gmra.mrb[38].mxu0 %vm401_vm3, %v2347_v31 }
0x12c4   :  { %12577 = vmatpush3.bf16.msra.mxu0 %v13402_v58  ;;  %11357 = vmatprep.mubr.msk.f32.mxu0 %vm13191_vm2, %v13192_v26 }
0x12c5   :  { %12578 = vmatprep.subr.bf16.mxu0 %v13190_v19 }
0x12c8   :  { %12580 = vmatpush3.bf16.msra.mxu0 %v13427_v1 }
0x12c9   :  { %12581 = vmatprep.subr.bf16.mxu0 %v13190_v19 }
0x12cc   :  { %12583 = vmatpush3.bf16.msra.mxu0 %v13441_v5 }
0x12cd   :  { %12593 = vmatprep.subr.bf16.mxu0 %v13190_v19 }
0x1396   :  { %v2493_v32 = vpop.f32.mrb[38].mxu0 }
0x1397   :  { %v2494_v33 = vadd.f32 %v13484_v14, %v2493_v32  ;;  %v11329_v34 = vpop.f32.mrb[39].mxu0 }
0x1399   :  { %v2497_v3 = vmin.f32 %v2347_v31, %v2494_v33 }
0x139b   :  { %v2498_v37 = vsub.f32 %v2497_v3, %v2423_v36 }
0x139d   :  { %11343 = vmatmul.mubr.msk.f32.vlgmr.msra.gmra.mrb[30].mxu1 %vm401_vm3, %v2498_v37 }
0x139e   :  { %12586 = vmatpush3.bf16.msra.mxu1 %v13524_v12  ;;  %11372 = vmatprep.mubr.msk.f32.mxu1 %vm13191_vm2, %v13192_v26 }
0x139f   :  { %12587 = vmatprep.subr.bf16.mxu1 %v13190_v19 }
0x13a2   :  { %12589 = vmatpush3.bf16.msra.mxu1 %v13538_v20 }
0x13a3   :  { %12590 = vmatprep.subr.bf16.mxu1 %v13190_v19 }
0x13a6   :  { %12592 = vmatpush3.bf16.msra.mxu1 %v13590_v59 }
0x13a7   :  { %12602 = vmatprep.subr.bf16.mxu1 %v13190_v19 }
0x1470   :  { %v2568_v38 = vpop.f32.mrb[30].mxu1 }
0x1471   :  { %v2569_v9 = vadd.f32 %v13484_v14, %v2568_v38  ;;  %v11344_v39 = vpop.f32.mrb[31].mxu1 }
0x1473   :  { %v2572_v53 = vmin.f32 %v2498_v37, %v2569_v9 }
0x1475   :  { %11358 = vmatmul.mubr.msk.f32.vlgmr.msra.gmra.mrb[40].mxu0 %vm401_vm3, %v2572_v53 }
0x1476   :  { %12595 = vmatpush3.bf16.msra.mxu0 %v13603_v63  ;;  %11387 = vmatprep.mubr.msk.f32.mxu0 %vm13191_vm2, %v13192_v26 }
0x1477   :  { %12596 = vmatprep.subr.bf16.mxu0 %v13190_v19 }
0x147a   :  { %12598 = vmatpush3.bf16.msra.mxu0 %v13609_v2 }
0x147b   :  { %12599 = vmatprep.subr.bf16.mxu0 %v13190_v19 }
0x147e   :  { %12601 = vmatpush3.bf16.msra.mxu0 %v13645_v0 }
0x147f   :  { %12611 = vmatprep.subr.bf16.mxu0 %v13190_v19 }
0x1548   :  { %v2642_v14 = vpop.f32.mrb[40].mxu0 }
0x1549   :  { %v2643_v23 = vadd.f32 %v13617_v10, %v2642_v14  ;;  %v11359_v40 = vpop.f32.mrb[41].mxu0 }
0x154b   :  { %v2646_v41 = vmin.f32 %v2572_v53, %v2643_v23 }
0x154d   :  { %11373 = vmatmul.mubr.msk.f32.vlgmr.msra.gmra.mrb[32].mxu1 %vm401_vm3, %v2646_v41 }
0x154e   :  { %12604 = vmatpush3.bf16.msra.mxu1 %v13297_v18  ;;  %11402 = vmatprep.mubr.msk.f32.mxu1 %vm13191_vm2, %v13192_v26 }
0x154f   :  { %12605 = vmatprep.subr.bf16.mxu1 %v13190_v19 }
0x1552   :  { %12607 = vmatpush3.bf16.msra.mxu1 %v13309_v22 }
0x1553   :  { %12608 = vmatprep.subr.bf16.mxu1 %v13190_v19 }
0x1556   :  { %12610 = vmatpush3.bf16.msra.mxu1 %v13319_v25 }
0x1557   :  { %12620 = vmatprep.subr.bf16.mxu1 %v13190_v19 }
0x1559   :  { %11403 = vmatmul.mubr.msk.f32.vlgmr.msra.gmra.mrb[34].mxu1 %vm401_vm3, %v2797_v42 }
0x155a   :  { %12622 = vmatpush3.bf16.msra.mxu1 %v13348_v43  ;;  %11432 = vmatprep.mubr.msk.f32.mxu1 %vm13191_vm2, %v13192_v26 }
0x155b   :  { %12623 = vmatprep.subr.bf16.mxu1 %v13190_v19 }
0x155e   :  { %12625 = vmatpush3.bf16.msra.mxu1 %v13362_v47 }
0x155f   :  { %12626 = vmatprep.subr.bf16.mxu1 %v13190_v19 }
0x1562   :  { %12628 = vmatpush3.bf16.msra.mxu1 %v13374_v50 }
0x1563   :  { %12638 = vmatprep.subr.bf16.mxu1 %v13190_v19 }
0x1620   :  { %v2716_v44 = vpop.f32.mrb[32].mxu1 }
0x1621   :  { %v2717_v6 = vadd.f32 %v13652_v27, %v2716_v44  ;;  %v11374_v45 = vpop.f32.mrb[33].mxu1 }
0x1623   :  { %v2720_v46 = vmin.f32 %v2646_v41, %v2717_v6 }
0x1625   :  { %11388 = vmatmul.mubr.msk.f32.vlgmr.msra.gmra.mrb[42].mxu0 %vm401_vm3, %v2720_v46 }
0x1626   :  { %12613 = vmatpush3.bf16.msra.mxu0 %v13348_v43  ;;  %11417 = vmatprep.mubr.msk.f32.mxu0 %vm13191_vm2, %v13192_v26 }
0x1627   :  { %12614 = vmatprep.subr.bf16.mxu0 %v13190_v19 }
0x162a   :  { %12616 = vmatpush3.bf16.msra.mxu0 %v13362_v47 }
0x162b   :  { %12617 = vmatprep.subr.bf16.mxu0 %v13190_v19 }
0x162c   :  { %v13919_v15 = vpop.f32.mrb[34].mxu1 }
0x162d   :  { %v11404_v48 = vpop.f32.mrb[35].mxu1  ;;  %v2871_v28 = vsub.f32 %v13919_v15, %v2797_v42 }
0x162e   :  { %12619 = vmatpush3.bf16.msra.mxu0 %v13374_v50 }
0x162f   :  { %12629 = vmatprep.subr.bf16.mxu0 %v13190_v19 }
0x16f8   :  { %v2790_v49 = vpop.f32.mrb[42].mxu0 }
0x16f9   :  { %v2791_v51 = vadd.f32 %v13669_v35, %v2790_v49  ;;  %v11389_v52 = vpop.f32.mrb[43].mxu0 }
0x16fb   :  { %v2794_v54 = vmin.f32 %v2720_v46, %v2791_v51 }
0x16fd   :  { %v2795_v55 = vadd.f32 %v2794_v54, %v13856_v17 }
0x16ff   :  { %11418 = vmatmul.mubr.msk.f32.vlgmr.msra.gmra.mrb[44].mxu0 %vm401_vm3, %v2795_v55 }
0x1700   :  { %12631 = vmatpush3.bf16.msra.mxu0 %v13402_v58  ;;  %11447 = vmatprep.mubr.msk.f32.mxu0 %vm13191_vm2, %v13192_v26 }
0x1701   :  { %12632 = vmatprep.subr.bf16.mxu0 %v13190_v19 }
0x1704   :  { %12634 = vmatpush3.bf16.msra.mxu0 %v13427_v1 }
0x1705   :  { %12635 = vmatprep.subr.bf16.mxu0 %v13190_v19 }
0x1708   :  { %12637 = vmatpush3.bf16.msra.mxu0 %v13441_v5 }
0x1709   :  { %12647 = vmatprep.subr.bf16.mxu0 %v13190_v19 }
0x17d2   :  { %v2941_v8 = vpop.f32.mrb[44].mxu0 }
0x17d3   :  { %v2942_v57 = vadd.f32 %v13937_v56, %v2941_v8  ;;  %v11419_v13 = vpop.f32.mrb[45].mxu0 }
0x17d5   :  { %v2945_v60 = vmin.f32 %v2795_v55, %v2942_v57 }
0x17d7   :  { %v2946_v61 = vsub.f32 %v2945_v60, %v2871_v28 }
0x17d9   :  { %11433 = vmatmul.mubr.msk.f32.vlgmr.msra.gmra.mrb[36].mxu1 %vm401_vm3, %v2946_v61 }
0x17da   :  { %12640 = vmatpush3.bf16.msra.mxu1 %v13524_v12  ;;  %11462 = vmatprep.mubr.msk.f32.mxu1 %vm13191_vm2, %v13192_v26 }
0x17db   :  { %12641 = vmatprep.subr.bf16.mxu1 %v13190_v19 }
0x17de   :  { %12643 = vmatpush3.bf16.msra.mxu1 %v13538_v20 }
0x17df   :  { %12644 = vmatprep.subr.bf16.mxu1 %v13190_v19 }
0x17e2   :  { %12646 = vmatpush3.bf16.msra.mxu1 %v13590_v59 }
0x17e3   :  { %12656 = vmatprep.subr.bf16.mxu1 %v13190_v19 }
0x18ac   :  { %v3016_v62 = vpop.f32.mrb[36].mxu1 }
0x18ad   :  { %v3017_v11 = vadd.f32 %v13937_v56, %v3016_v62  ;;  %v11434_v4 = vpop.f32.mrb[37].mxu1 }
0x18af   :  { %v3020_v16 = vmin.f32 %v2946_v61, %v3017_v11 }
0x18b1   :  { %11448 = vmatmul.mubr.msk.f32.vlgmr.msra.gmra.mrb[46].mxu0 %vm401_vm3, %v3020_v16 }
0x18b2   :  { %12649 = vmatpush3.bf16.msra.mxu0 %v13603_v63  ;;  %11477 = vmatprep.mubr.msk.f32.mxu0 %vm13191_vm2, %v13192_v26 }
0x18b3   :  { %12650 = vmatprep.subr.bf16.mxu0 %v13190_v19 }
0x18b6   :  { %12652 = vmatpush3.bf16.msra.mxu0 %v13609_v2 }
0x18b7   :  { %12653 = vmatprep.subr.bf16.mxu0 %v13190_v19 }
0x18ba   :  { %12655 = vmatpush3.bf16.msra.mxu0 %v13645_v0 }
0x18bb   :  { %12665 = vmatprep.subr.bf16.mxu0 %v13190_v19 }
0x1984   :  { %v3090_v17 = vpop.f32.mrb[46].mxu0 }
0x1985   :  { %v3091_v21 = vadd.f32 %v13617_v10, %v3090_v17  ;;  %v11449_v29 = vpop.f32.mrb[47].mxu0 }
0x1987   :  { %v3094_v24 = vmin.f32 %v3020_v16, %v3091_v21 }
0x1989   :  { %11463 = vmatmul.mubr.msk.f32.vlgmr.msra.gmra.mrb[38].mxu1 %vm401_vm3, %v3094_v24 }
0x198a   :  { %12658 = vmatpush3.bf16.msra.mxu1 %v13297_v18  ;;  %11492 = vmatprep.mubr.msk.f32.mxu1 %vm13191_vm2, %v13192_v26 }
0x198b   :  { %12659 = vmatprep.subr.bf16.mxu1 %v13190_v19 }
0x198e   :  { %12661 = vmatpush3.bf16.msra.mxu1 %v13309_v22 }
0x198f   :  { %12662 = vmatprep.subr.bf16.mxu1 %v13190_v19 }
0x1992   :  { %12664 = vmatpush3.bf16.msra.mxu1 %v13319_v25 }
0x1993   :  { %12674 = vmatprep.subr.bf16.mxu1 %v13190_v19 }
0x1995   :  { %11493 = vmatmul.mubr.msk.f32.vlgmr.msra.gmra.mrb[40].mxu1 %vm401_vm3, %v3245_v30 }
0x1996   :  { %12676 = vmatpush3.bf16.msra.mxu1 %v13348_v43  ;;  %11522 = vmatprep.mubr.msk.f32.mxu1 %vm13191_vm2, %v13192_v26 }
0x1997   :  { %12677 = vmatprep.subr.bf16.mxu1 %v13190_v19 }
0x199a   :  { %12679 = vmatpush3.bf16.msra.mxu1 %v13362_v47 }
0x199b   :  { %12680 = vmatprep.subr.bf16.mxu1 %v13190_v19 }
0x199e   :  { %12682 = vmatpush3.bf16.msra.mxu1 %v13374_v50 }
0x199f   :  { %12692 = vmatprep.subr.bf16.mxu1 %v13190_v19 }
0x1a5c   :  { %v3164_v7 = vpop.f32.mrb[38].mxu1 }
0x1a5d   :  { %v3165_v31 = vadd.f32 %v13652_v27, %v3164_v7  ;;  %v11464_v32 = vpop.f32.mrb[39].mxu1 }
0x1a5e   :  { %v14089_v32 = vld [vmem:[%s17396_s6 + $0x1] ss:$0 sm:$0xff] }
0x1a5f   :  { %v3168_v33 = vmin.f32 %v3094_v24, %v3165_v31 }
0x1a61   :  { %11478 = vmatmul.mubr.msk.f32.vlgmr.msra.gmra.mrb[48].mxu0 %vm401_vm3, %v3168_v33 }
0x1a62   :  { %12667 = vmatpush3.bf16.msra.mxu0 %v13348_v43  ;;  %11507 = vmatprep.mubr.msk.f32.mxu0 %vm13191_vm2, %v13192_v26 }
0x1a63   :  { %12668 = vmatprep.subr.bf16.mxu0 %v13190_v19 }
0x1a66   :  { %12670 = vmatpush3.bf16.msra.mxu0 %v13362_v47 }
0x1a67   :  { %12671 = vmatprep.subr.bf16.mxu0 %v13190_v19 }
0x1a68   :  { %v13987_v34 = vpop.f32.mrb[40].mxu1 }
0x1a69   :  { %v11494_v36 = vpop.f32.mrb[41].mxu1  ;;  %v3319_v40 = vsub.f32 %v13987_v34, %v3245_v30 }
0x1a6a   :  { %12673 = vmatpush3.bf16.msra.mxu0 %v13374_v50 }
0x1a6b   :  { %12683 = vmatprep.subr.bf16.mxu0 %v13190_v19 }
0x1b34   :  { %v3238_v3 = vpop.f32.mrb[48].mxu0 }
0x1b35   :  { %v3239_v37 = vadd.f32 %v13669_v35, %v3238_v3  ;;  %v11479_v38 = vpop.f32.mrb[49].mxu0  ;;  %v4141_v3 = vld [vmem:[#allocation2 + $0x48] sm:$0xff] }
0x1b36   :  { %v14113_v38 = vld [vmem:[%s17396_s6 + $0x2] ss:$0 sm:$0xff] }
0x1b37   :  { %v3242_v9 = vmin.f32 %v3168_v33, %v3239_v37 }
0x1b39   :  { %v3243_v39 = vadd.f32 %v3242_v9, %v13919_v15 }
0x1b3b   :  { %11508 = vmatmul.mubr.msk.f32.vlgmr.msra.gmra.mrb[50].mxu0 %vm401_vm3, %v3243_v39 }
0x1b3c   :  { %12685 = vmatpush3.bf16.msra.mxu0 %v13402_v58  ;;  %11537 = vmatprep.mubr.msk.f32.mxu0 %vm13191_vm2, %v13192_v26 }
0x1b3d   :  { %12686 = vmatprep.subr.bf16.mxu0 %v13190_v19 }
0x1b40   :  { %12688 = vmatpush3.bf16.msra.mxu0 %v13427_v1 }
0x1b41   :  { %12689 = vmatprep.subr.bf16.mxu0 %v13190_v19 }
0x1b44   :  { %12691 = vmatpush3.bf16.msra.mxu0 %v13441_v5 }
0x1b45   :  { %12701 = vmatprep.subr.bf16.mxu0 %v13190_v19 }
0x1c0e   :  { %v3389_v53 = vpop.f32.mrb[50].mxu0 }
0x1c0f   :  { %v3390_v14 = vadd.f32 %v13937_v56, %v3389_v53  ;;  %v11509_v23 = vpop.f32.mrb[51].mxu0 }
0x1c11   :  { %v3393_v41 = vmin.f32 %v3243_v39, %v3390_v14 }
0x1c13   :  { %v3394_v42 = vsub.f32 %v3393_v41, %v3319_v40  ;;  %v14130_v41 = vld [vmem:[%s17396_s6 + $0x3] ss:$0 sm:$0xff] }
0x1c15   :  { %11523 = vmatmul.mubr.msk.f32.vlgmr.msra.gmra.mrb[42].mxu1 %vm401_vm3, %v3394_v42 }
0x1c16   :  { %12694 = vmatpush3.bf16.msra.mxu1 %v13524_v12  ;;  %11552 = vmatprep.mubr.msk.f32.mxu1 %vm13191_vm2, %v13192_v26 }
0x1c17   :  { %12695 = vmatprep.subr.bf16.mxu1 %v13190_v19 }
0x1c1a   :  { %12697 = vmatpush3.bf16.msra.mxu1 %v13538_v20 }
0x1c1b   :  { %12698 = vmatprep.subr.bf16.mxu1 %v13190_v19 }
0x1c1e   :  { %12700 = vmatpush3.bf16.msra.mxu1 %v13590_v59 }
0x1c1f   :  { %12710 = vmatprep.subr.bf16.mxu1 %v13190_v19 }
0x1ce8   :  { %v3464_v44 = vpop.f32.mrb[42].mxu1 }
0x1ce9   :  { %v3465_v6 = vadd.f32 %v13937_v56, %v3464_v44  ;;  %v11524_v45 = vpop.f32.mrb[43].mxu1 }
0x1ceb   :  { %v3468_v46 = vmin.f32 %v3394_v42, %v3465_v6 }
0x1ced   :  { %11538 = vmatmul.mubr.msk.f32.vlgmr.msra.gmra.mrb[52].mxu0 %vm401_vm3, %v3468_v46 }
0x1cee   :  { %12703 = vmatpush3.bf16.msra.mxu0 %v13603_v63  ;;  %11567 = vmatprep.mubr.msk.f32.mxu0 %vm13191_vm2, %v13192_v26 }
0x1cef   :  { %12704 = vmatprep.subr.bf16.mxu0 %v13190_v19 }
0x1cf2   :  { %12706 = vmatpush3.bf16.msra.mxu0 %v13609_v2 }
0x1cf3   :  { %12707 = vmatprep.subr.bf16.mxu0 %v13190_v19 }
0x1cf6   :  { %12709 = vmatpush3.bf16.msra.mxu0 %v13645_v0 }
0x1cf7   :  { %12719 = vmatprep.subr.bf16.mxu0 %v13190_v19 }
0x1dc0   :  { %v3538_v15 = vpop.f32.mrb[52].mxu0 }
0x1dc1   :  { %v3539_v48 = vadd.f32 %v13617_v10, %v3538_v15  ;;  %v11539_v49 = vpop.f32.mrb[53].mxu0  ;;  %v3693_v10 = vld [vmem:[#allocation2 + $0x40] sm:$0xff] }
0x1dc3   :  { %v3542_v51 = vmin.f32 %v3468_v46, %v3539_v48 }
0x1dc5   :  { %11553 = vmatmul.mubr.msk.f32.vlgmr.msra.gmra.mrb[44].mxu1 %vm401_vm3, %v3542_v51 }
0x1dc6   :  { %12712 = vmatpush3.bf16.msra.mxu1 %v13297_v18  ;;  %11582 = vmatprep.mubr.msk.f32.mxu1 %vm13191_vm2, %v13192_v26 }
0x1dc7   :  { %12713 = vmatprep.subr.bf16.mxu1 %v13190_v19 }
0x1dca   :  { %12715 = vmatpush3.bf16.msra.mxu1 %v13309_v22 }
0x1dcb   :  { %12716 = vmatprep.subr.bf16.mxu1 %v13190_v19 }
0x1dce   :  { %12718 = vmatpush3.bf16.msra.mxu1 %v13319_v25 }
0x1dcf   :  { %12728 = vmatprep.subr.bf16.mxu1 %v13190_v19 }
0x1dd1   :  { %11583 = vmatmul.mubr.msk.f32.vlgmr.msra.gmra.mrb[46].mxu1 %vm401_vm3, %v3693_v10 }
0x1dd2   :  { %12730 = vmatpush3.bf16.msra.mxu1 %v13348_v43  ;;  %11612 = vmatprep.mubr.msk.f32.mxu1 %vm13191_vm2, %v13192_v26 }
0x1dd3   :  { %12731 = vmatprep.subr.bf16.mxu1 %v13190_v19 }
0x1dd6   :  { %12733 = vmatpush3.bf16.msra.mxu1 %v13362_v47 }
0x1dd7   :  { %12734 = vmatprep.subr.bf16.mxu1 %v13190_v19 }
0x1dda   :  { %12736 = vmatpush3.bf16.msra.mxu1 %v13374_v50 }
0x1ddb   :  { %12746 = vmatprep.subr.bf16.mxu1 %v13190_v19 }
0x1e98   :  { %v3612_v52 = vpop.f32.mrb[44].mxu1 }
0x1e99   :  { %v3613_v54 = vadd.f32 %v13652_v27, %v3612_v52  ;;  %v11554_v55 = vpop.f32.mrb[45].mxu1 }
0x1e9b   :  { %v3616_v8 = vmin.f32 %v3542_v51, %v3613_v54 }
0x1e9d   :  { %11568 = vmatmul.mubr.msk.f32.vlgmr.msra.gmra.mrb[54].mxu0 %vm401_vm3, %v3616_v8 }
0x1e9e   :  { %12721 = vmatpush3.bf16.msra.mxu0 %v13348_v43  ;;  %11597 = vmatprep.mubr.msk.f32.mxu0 %vm13191_vm2, %v13192_v26 }
0x1e9f   :  { %12722 = vmatprep.subr.bf16.mxu0 %v13190_v19 }
0x1ea2   :  { %12724 = vmatpush3.bf16.msra.mxu0 %v13362_v47 }
0x1ea3   :  { %12725 = vmatprep.subr.bf16.mxu0 %v13190_v19 }
0x1ea4   :  { %v14050_v57 = vpop.f32.mrb[46].mxu1 }
0x1ea5   :  { %v11584_v13 = vpop.f32.mrb[47].mxu1  ;;  %v3767_v16 = vsub.f32 %v14050_v57, %v3693_v10 }
0x1ea6   :  { %12727 = vmatpush3.bf16.msra.mxu0 %v13374_v50 }
0x1ea7   :  { %12737 = vmatprep.subr.bf16.mxu0 %v13190_v19 }
0x1f70   :  { %v3686_v27 = vpop.f32.mrb[54].mxu0 }
0x1f71   :  { %v3687_v28 = vadd.f32 %v13669_v35, %v3686_v27  ;;  %v11569_v60 = vpop.f32.mrb[55].mxu0 }
0x1f72   :  { %v4589_v60 = vld [vmem:[#allocation2 + $0x50] sm:$0xff] }
0x1f73   :  { %v3690_v61 = vmin.f32 %v3616_v8, %v3687_v28 }
0x1f75   :  { %v3691_v62 = vadd.f32 %v3690_v61, %v13987_v34 }
0x1f77   :  { %11598 = vmatmul.mubr.msk.f32.vlgmr.msra.gmra.mrb[56].mxu0 %vm401_vm3, %v3691_v62 }
0x1f78   :  { %12739 = vmatpush3.bf16.msra.mxu0 %v13402_v58  ;;  %11627 = vmatprep.mubr.msk.f32.mxu0 %vm13191_vm2, %v13192_v26 }
0x1f79   :  { %12740 = vmatprep.subr.bf16.mxu0 %v13190_v19 }
0x1f7c   :  { %12742 = vmatpush3.bf16.msra.mxu0 %v13427_v1 }
0x1f7d   :  { %12743 = vmatprep.subr.bf16.mxu0 %v13190_v19 }
0x1f80   :  { %12745 = vmatpush3.bf16.msra.mxu0 %v13441_v5 }
0x1f81   :  { %12755 = vmatprep.subr.bf16.mxu0 %v13190_v19 }
0x204a   :  { %v3837_v35 = vpop.f32.mrb[56].mxu0 }
0x204b   :  { %v3838_v11 = vadd.f32 %v13937_v56, %v3837_v35  ;;  %v11599_v4 = vpop.f32.mrb[57].mxu0 }
0x204d   :  { %v3841_v17 = vmin.f32 %v3691_v62, %v3838_v11 }
0x204f   :  { %v3842_v21 = vsub.f32 %v3841_v17, %v3767_v16 }
0x2051   :  { %11613 = vmatmul.mubr.msk.f32.vlgmr.msra.gmra.mrb[48].mxu1 %vm401_vm3, %v3842_v21 }
0x2052   :  { %12748 = vmatpush3.bf16.msra.mxu1 %v13524_v12  ;;  %11642 = vmatprep.mubr.msk.f32.mxu1 %vm13191_vm2, %v13192_v26 }
0x2053   :  { %12749 = vmatprep.subr.bf16.mxu1 %v13190_v19 }
0x2056   :  { %12751 = vmatpush3.bf16.msra.mxu1 %v13538_v20 }
0x2057   :  { %12752 = vmatprep.subr.bf16.mxu1 %v13190_v19 }
0x205a   :  { %12754 = vmatpush3.bf16.msra.mxu1 %v13590_v59 }
0x205b   :  { %12764 = vmatprep.subr.bf16.mxu1 %v13190_v19 }
0x2124   :  { %v3912_v29 = vpop.f32.mrb[48].mxu1 }
0x2125   :  { %v3913_v24 = vadd.f32 %v13937_v56, %v3912_v29  ;;  %v11614_v30 = vpop.f32.mrb[49].mxu1 }
0x2127   :  { %v3916_v7 = vmin.f32 %v3842_v21, %v3913_v24 }
0x2129   :  { %11628 = vmatmul.mubr.msk.f32.vlgmr.msra.gmra.mrb[58].mxu0 %vm401_vm3, %v3916_v7 }
0x212a   :  { %12757 = vmatpush3.bf16.msra.mxu0 %v13603_v63  ;;  %11657 = vmatprep.mubr.msk.f32.mxu0 %vm13191_vm2, %v13192_v26 }
0x212b   :  { %12758 = vmatprep.subr.bf16.mxu0 %v13190_v19 }
0x212e   :  { %12760 = vmatpush3.bf16.msra.mxu0 %v13609_v2 }
0x212f   :  { %12761 = vmatprep.subr.bf16.mxu0 %v13190_v19 }
0x2132   :  { %12763 = vmatpush3.bf16.msra.mxu0 %v13645_v0 }
0x2133   :  { %12773 = vmatprep.subr.bf16.mxu0 %v13190_v19 }
0x21fc   :  { %v3986_v31 = vpop.f32.mrb[58].mxu0 }
0x21fd   :  { %v3987_v33 = vadd.f32 %v14089_v32, %v3986_v31  ;;  %v11629_v34 = vpop.f32.mrb[59].mxu0 }
0x21ff   :  { %v3990_v36 = vmin.f32 %v3916_v7, %v3987_v33 }
0x2201   :  { %11643 = vmatmul.mubr.msk.f32.vlgmr.msra.gmra.mrb[50].mxu1 %vm401_vm3, %v3990_v36 }
0x2202   :  { %12766 = vmatpush3.bf16.msra.mxu1 %v13297_v18  ;;  %11672 = vmatprep.mubr.msk.f32.mxu1 %vm13191_vm2, %v13192_v26 }
0x2203   :  { %12767 = vmatprep.subr.bf16.mxu1 %v13190_v19 }
0x2206   :  { %12769 = vmatpush3.bf16.msra.mxu1 %v13309_v22 }
0x2207   :  { %12770 = vmatprep.subr.bf16.mxu1 %v13190_v19 }
0x220a   :  { %12772 = vmatpush3.bf16.msra.mxu1 %v13319_v25 }
0x220b   :  { %12782 = vmatprep.subr.bf16.mxu1 %v13190_v19 }
0x220d   :  { %11673 = vmatmul.mubr.msk.f32.vlgmr.msra.gmra.mrb[52].mxu1 %vm401_vm3, %v4141_v3 }
0x220e   :  { %12784 = vmatpush3.bf16.msra.mxu1 %v13348_v43  ;;  %11702 = vmatprep.mubr.msk.f32.mxu1 %vm13191_vm2, %v13192_v26 }
0x220f   :  { %12785 = vmatprep.subr.bf16.mxu1 %v13190_v19 }
0x2212   :  { %12787 = vmatpush3.bf16.msra.mxu1 %v13362_v47 }
0x2213   :  { %12788 = vmatprep.subr.bf16.mxu1 %v13190_v19 }
0x2216   :  { %12790 = vmatpush3.bf16.msra.mxu1 %v13374_v50 }
0x2217   :  { %12800 = vmatprep.subr.bf16.mxu1 %v13190_v19 }
0x22d4   :  { %v4060_v37 = vpop.f32.mrb[50].mxu1 }
0x22d5   :  { %v4061_v9 = vadd.f32 %v14113_v38, %v4060_v37  ;;  %v11644_v39 = vpop.f32.mrb[51].mxu1 }
0x22d7   :  { %v4064_v53 = vmin.f32 %v3990_v36, %v4061_v9 }
0x22d9   :  { %11658 = vmatmul.mubr.msk.f32.vlgmr.msra.gmra.mrb[60].mxu0 %vm401_vm3, %v4064_v53 }
0x22da   :  { %12775 = vmatpush3.bf16.msra.mxu0 %v13348_v43  ;;  %11687 = vmatprep.mubr.msk.f32.mxu0 %vm13191_vm2, %v13192_v26 }
0x22db   :  { %12776 = vmatprep.subr.bf16.mxu0 %v13190_v19 }
0x22de   :  { %12778 = vmatpush3.bf16.msra.mxu0 %v13362_v47 }
0x22df   :  { %12779 = vmatprep.subr.bf16.mxu0 %v13190_v19 }
0x22e0   :  { %v14123_v14 = vpop.f32.mrb[52].mxu1 }
0x22e1   :  { %v11674_v23 = vpop.f32.mrb[53].mxu1  ;;  %v4215_v49 = vsub.f32 %v14123_v14, %v4141_v3 }
0x22e2   :  { %12781 = vmatpush3.bf16.msra.mxu0 %v13374_v50 }
0x22e3   :  { %12791 = vmatprep.subr.bf16.mxu0 %v13190_v19 }
0x23ac   :  { %v4134_v40 = vpop.f32.mrb[60].mxu0 }
0x23ad   :  { %v4135_v42 = vadd.f32 %v14130_v41, %v4134_v40  ;;  %v11659_v44 = vpop.f32.mrb[61].mxu0 }
0x23ae   :  { %v5037_v44 = vld [vmem:[#allocation2 + $0x58] sm:$0xff] }
0x23af   :  { %v4138_v6 = vmin.f32 %v4064_v53, %v4135_v42 }
0x23b1   :  { %v4139_v45 = vadd.f32 %v4138_v6, %v14050_v57 }
0x23b3   :  { %11688 = vmatmul.mubr.msk.f32.vlgmr.msra.gmra.mrb[62].mxu0 %vm401_vm3, %v4139_v45 }
0x23b4   :  { %12793 = vmatpush3.bf16.msra.mxu0 %v13402_v58  ;;  %11717 = vmatprep.mubr.msk.f32.mxu0 %vm13191_vm2, %v13192_v26 }
0x23b5   :  { %12794 = vmatprep.subr.bf16.mxu0 %v13190_v19 }
0x23b8   :  { %12796 = vmatpush3.bf16.msra.mxu0 %v13427_v1 }
0x23b9   :  { %12797 = vmatprep.subr.bf16.mxu0 %v13190_v19 }
0x23bc   :  { %12799 = vmatpush3.bf16.msra.mxu0 %v13441_v5 }
0x23bd   :  { %12809 = vmatprep.subr.bf16.mxu0 %v13190_v19 }
0x2486   :  { %v4285_v46 = vpop.f32.mrb[62].mxu0 }
0x2487   :  { %v4286_v15 = vadd.f32 %v13937_v56, %v4285_v46  ;;  %v11689_v48 = vpop.f32.mrb[63].mxu0 }
0x2489   :  { %v4289_v51 = vmin.f32 %v4139_v45, %v4286_v15 }
0x248b   :  { %v4290_v10 = vsub.f32 %v4289_v51, %v4215_v49 }
0x248d   :  { %11703 = vmatmul.mubr.msk.f32.vlgmr.msra.gmra.mrb[54].mxu1 %vm401_vm3, %v4290_v10 }
0x248e   :  { %12802 = vmatpush3.bf16.msra.mxu1 %v13524_v12  ;;  %11732 = vmatprep.mubr.msk.f32.mxu1 %vm13191_vm2, %v13192_v26 }
0x248f   :  { %12803 = vmatprep.subr.bf16.mxu1 %v13190_v19 }
0x2492   :  { %12805 = vmatpush3.bf16.msra.mxu1 %v13538_v20 }
0x2493   :  { %12806 = vmatprep.subr.bf16.mxu1 %v13190_v19 }
0x2496   :  { %12808 = vmatpush3.bf16.msra.mxu1 %v13590_v59 }
0x2497   :  { %12818 = vmatprep.subr.bf16.mxu1 %v13190_v19 }
0x2560   :  { %v4360_v52 = vpop.f32.mrb[54].mxu1 }
0x2561   :  { %v4361_v54 = vadd.f32 %v13937_v56, %v4360_v52  ;;  %v11704_v55 = vpop.f32.mrb[55].mxu1 }
0x2563   :  { %v4364_v8 = vmin.f32 %v4290_v10, %v4361_v54 }
0x2565   :  { %11718 = vmatmul.mubr.msk.f32.vlgmr.msra.gmra.mrb[64].mxu0 %vm401_vm3, %v4364_v8 }
0x2566   :  { %12811 = vmatpush3.bf16.msra.mxu0 %v13603_v63  ;;  %11747 = vmatprep.mubr.msk.f32.mxu0 %vm13191_vm2, %v13192_v26 }
0x2567   :  { %12812 = vmatprep.subr.bf16.mxu0 %v13190_v19 }
0x256a   :  { %12814 = vmatpush3.bf16.msra.mxu0 %v13609_v2 }
0x256b   :  { %12815 = vmatprep.subr.bf16.mxu0 %v13190_v19 }
0x256e   :  { %12817 = vmatpush3.bf16.msra.mxu0 %v13645_v0 }
0x256f   :  { %12827 = vmatprep.subr.bf16.mxu0 %v13190_v19 }
0x2638   :  { %v4434_v57 = vpop.f32.mrb[64].mxu0 }
0x2639   :  { %v4435_v13 = vadd.f32 %v14089_v32, %v4434_v57  ;;  %v11719_v27 = vpop.f32.mrb[65].mxu0 }
0x263b   :  { %v4438_v28 = vmin.f32 %v4364_v8, %v4435_v13 }
0x263d   :  { %11733 = vmatmul.mubr.msk.f32.vlgmr.msra.gmra.mrb[56].mxu1 %vm401_vm3, %v4438_v28 }
0x263e   :  { %12820 = vmatpush3.bf16.msra.mxu1 %v13297_v18  ;;  %11762 = vmatprep.mubr.msk.f32.mxu1 %vm13191_vm2, %v13192_v26 }
0x263f   :  { %12821 = vmatprep.subr.bf16.mxu1 %v13190_v19 }
0x2642   :  { %12823 = vmatpush3.bf16.msra.mxu1 %v13309_v22 }
0x2643   :  { %12824 = vmatprep.subr.bf16.mxu1 %v13190_v19 }
0x2646   :  { %12826 = vmatpush3.bf16.msra.mxu1 %v13319_v25 }
0x2647   :  { %12836 = vmatprep.subr.bf16.mxu1 %v13190_v19 }
0x2649   :  { %11763 = vmatmul.mubr.msk.f32.vlgmr.msra.gmra.mrb[58].mxu1 %vm401_vm3, %v4589_v60 }
0x264a   :  { %12838 = vmatpush3.bf16.msra.mxu1 %v13348_v43  ;;  %11792 = vmatprep.mubr.msk.f32.mxu1 %vm13191_vm2, %v13192_v26 }
0x264b   :  { %12839 = vmatprep.subr.bf16.mxu1 %v13190_v19 }
0x264e   :  { %12841 = vmatpush3.bf16.msra.mxu1 %v13362_v47 }
0x264f   :  { %12842 = vmatprep.subr.bf16.mxu1 %v13190_v19 }
0x2652   :  { %12844 = vmatpush3.bf16.msra.mxu1 %v13374_v50 }
0x2653   :  { %12854 = vmatprep.subr.bf16.mxu1 %v13190_v19 }
0x2710   :  { %v4508_v61 = vpop.f32.mrb[56].mxu1 }
0x2711   :  { %v4509_v62 = vadd.f32 %v14113_v38, %v4508_v61  ;;  %v11734_v35 = vpop.f32.mrb[57].mxu1 }
0x2713   :  { %v4512_v11 = vmin.f32 %v4438_v28, %v4509_v62 }
0x2715   :  { %11748 = vmatmul.mubr.msk.f32.vlgmr.msra.gmra.mrb[66].mxu0 %vm401_vm3, %v4512_v11 }
0x2716   :  { %12829 = vmatpush3.bf16.msra.mxu0 %v13348_v43  ;;  %11777 = vmatprep.mubr.msk.f32.mxu0 %vm13191_vm2, %v13192_v26 }
0x2717   :  { %12830 = vmatprep.subr.bf16.mxu0 %v13190_v19 }
0x271a   :  { %12832 = vmatpush3.bf16.msra.mxu0 %v13362_v47 }
0x271b   :  { %12833 = vmatprep.subr.bf16.mxu0 %v13190_v19 }
0x271c   :  { %v14191_v4 = vpop.f32.mrb[58].mxu1 }
0x271d   :  { %v11764_v16 = vpop.f32.mrb[59].mxu1  ;;  %v4663_v34 = vsub.f32 %v14191_v4, %v4589_v60 }
0x271e   :  { %12835 = vmatpush3.bf16.msra.mxu0 %v13374_v50 }
0x271f   :  { %12845 = vmatprep.subr.bf16.mxu0 %v13190_v19 }
0x27e8   :  { %v4582_v17 = vpop.f32.mrb[66].mxu0 }
0x27e9   :  { %v4583_v21 = vadd.f32 %v14130_v41, %v4582_v17  ;;  %v11749_v29 = vpop.f32.mrb[67].mxu0 }
0x27ea   :  { %v5485_v29 = vld [vmem:[#allocation2 + $0x60] sm:$0xff] }
0x27eb   :  { %v4586_v24 = vmin.f32 %v4512_v11, %v4583_v21 }
0x27ed   :  { %v4587_v30 = vadd.f32 %v4586_v24, %v14123_v14 }
0x27ef   :  { %11778 = vmatmul.mubr.msk.f32.vlgmr.msra.gmra.mrb[68].mxu0 %vm401_vm3, %v4587_v30 }
0x27f0   :  { %12847 = vmatpush3.bf16.msra.mxu0 %v13402_v58  ;;  %11807 = vmatprep.mubr.msk.f32.mxu0 %vm13191_vm2, %v13192_v26 }
0x27f1   :  { %12848 = vmatprep.subr.bf16.mxu0 %v13190_v19 }
0x27f4   :  { %12850 = vmatpush3.bf16.msra.mxu0 %v13427_v1 }
0x27f5   :  { %12851 = vmatprep.subr.bf16.mxu0 %v13190_v19 }
0x27f8   :  { %12853 = vmatpush3.bf16.msra.mxu0 %v13441_v5 }
0x27f9   :  { %12863 = vmatprep.subr.bf16.mxu0 %v13190_v19 }
0x28c2   :  { %v4733_v7 = vpop.f32.mrb[68].mxu0 }
0x28c3   :  { %v4734_v31 = vadd.f32 %v13937_v56, %v4733_v7  ;;  %v11779_v33 = vpop.f32.mrb[69].mxu0 }
0x28c5   :  { %v4737_v36 = vmin.f32 %v4587_v30, %v4734_v31 }
0x28c7   :  { %v4738_v3 = vsub.f32 %v4737_v36, %v4663_v34 }
0x28c9   :  { %11793 = vmatmul.mubr.msk.f32.vlgmr.msra.gmra.mrb[60].mxu1 %vm401_vm3, %v4738_v3 }
0x28ca   :  { %12856 = vmatpush3.bf16.msra.mxu1 %v13524_v12  ;;  %11822 = vmatprep.mubr.msk.f32.mxu1 %vm13191_vm2, %v13192_v26 }
0x28cb   :  { %12857 = vmatprep.subr.bf16.mxu1 %v13190_v19 }
0x28ce   :  { %12859 = vmatpush3.bf16.msra.mxu1 %v13538_v20 }
0x28cf   :  { %12860 = vmatprep.subr.bf16.mxu1 %v13190_v19 }
0x28d2   :  { %12862 = vmatpush3.bf16.msra.mxu1 %v13590_v59 }
0x28d3   :  { %12872 = vmatprep.subr.bf16.mxu1 %v13190_v19 }
0x299c   :  { %v4808_v37 = vpop.f32.mrb[60].mxu1 }
0x299d   :  { %v4809_v9 = vadd.f32 %v13937_v56, %v4808_v37  ;;  %v11794_v39 = vpop.f32.mrb[61].mxu1 }
0x299f   :  { %v4812_v53 = vmin.f32 %v4738_v3, %v4809_v9 }
0x29a1   :  { %11808 = vmatmul.mubr.msk.f32.vlgmr.msra.gmra.mrb[70].mxu0 %vm401_vm3, %v4812_v53 }
0x29a2   :  { %12865 = vmatpush3.bf16.msra.mxu0 %v13603_v63  ;;  %11837 = vmatprep.mubr.msk.f32.mxu0 %vm13191_vm2, %v13192_v26 }
0x29a3   :  { %12866 = vmatprep.subr.bf16.mxu0 %v13190_v19 }
0x29a6   :  { %12868 = vmatpush3.bf16.msra.mxu0 %v13609_v2 }
0x29a7   :  { %12869 = vmatprep.subr.bf16.mxu0 %v13190_v19 }
0x29aa   :  { %12871 = vmatpush3.bf16.msra.mxu0 %v13645_v0 }
0x29ab   :  { %12881 = vmatprep.subr.bf16.mxu0 %v13190_v19 }
0x2a74   :  { %v4882_v14 = vpop.f32.mrb[70].mxu0 }
0x2a75   :  { %v4883_v23 = vadd.f32 %v14089_v32, %v4882_v14  ;;  %v11809_v40 = vpop.f32.mrb[71].mxu0 }
0x2a77   :  { %v4886_v42 = vmin.f32 %v4812_v53, %v4883_v23 }
0x2a79   :  { %11823 = vmatmul.mubr.msk.f32.vlgmr.msra.gmra.mrb[62].mxu1 %vm401_vm3, %v4886_v42 }
0x2a7a   :  { %12874 = vmatpush3.bf16.msra.mxu1 %v13297_v18  ;;  %11852 = vmatprep.mubr.msk.f32.mxu1 %vm13191_vm2, %v13192_v26 }
0x2a7b   :  { %12875 = vmatprep.subr.bf16.mxu1 %v13190_v19 }
0x2a7e   :  { %12877 = vmatpush3.bf16.msra.mxu1 %v13309_v22 }
0x2a7f   :  { %12878 = vmatprep.subr.bf16.mxu1 %v13190_v19 }
0x2a82   :  { %12880 = vmatpush3.bf16.msra.mxu1 %v13319_v25 }
0x2a83   :  { %12890 = vmatprep.subr.bf16.mxu1 %v13190_v19 }
0x2a85   :  { %11853 = vmatmul.mubr.msk.f32.vlgmr.msra.gmra.mrb[64].mxu1 %vm401_vm3, %v5037_v44 }
0x2a86   :  { %12892 = vmatpush3.bf16.msra.mxu1 %v13348_v43  ;;  %11882 = vmatprep.mubr.msk.f32.mxu1 %vm13191_vm2, %v13192_v26 }
0x2a87   :  { %12893 = vmatprep.subr.bf16.mxu1 %v13190_v19 }
0x2a8a   :  { %12895 = vmatpush3.bf16.msra.mxu1 %v13362_v47 }
0x2a8b   :  { %12896 = vmatprep.subr.bf16.mxu1 %v13190_v19 }
0x2a8e   :  { %12898 = vmatpush3.bf16.msra.mxu1 %v13374_v50 }
0x2a8f   :  { %12908 = vmatprep.subr.bf16.mxu1 %v13190_v19 }
0x2b4c   :  { %v4956_v6 = vpop.f32.mrb[62].mxu1 }
0x2b4d   :  { %v4957_v45 = vadd.f32 %v14113_v38, %v4956_v6  ;;  %v11824_v46 = vpop.f32.mrb[63].mxu1 }
0x2b4f   :  { %v4960_v15 = vmin.f32 %v4886_v42, %v4957_v45 }
0x2b51   :  { %11838 = vmatmul.mubr.msk.f32.vlgmr.msra.gmra.mrb[72].mxu0 %vm401_vm3, %v4960_v15 }
0x2b52   :  { %12883 = vmatpush3.bf16.msra.mxu0 %v13348_v43  ;;  %11867 = vmatprep.mubr.msk.f32.mxu0 %vm13191_vm2, %v13192_v26 }
0x2b53   :  { %12884 = vmatprep.subr.bf16.mxu0 %v13190_v19 }
0x2b56   :  { %12886 = vmatpush3.bf16.msra.mxu0 %v13362_v47 }
0x2b57   :  { %12887 = vmatprep.subr.bf16.mxu0 %v13190_v19 }
0x2b58   :  { %v14254_v48 = vpop.f32.mrb[64].mxu1 }
0x2b59   :  { %v11854_v49 = vpop.f32.mrb[65].mxu1  ;;  %v5111_v27 = vsub.f32 %v14254_v48, %v5037_v44 }
0x2b5a   :  { %12889 = vmatpush3.bf16.msra.mxu0 %v13374_v50 }
0x2b5b   :  { %12899 = vmatprep.subr.bf16.mxu0 %v13190_v19 }
0x2c24   :  { %v5030_v51 = vpop.f32.mrb[72].mxu0 }
0x2c25   :  { %v5031_v10 = vadd.f32 %v14130_v41, %v5030_v51  ;;  %v11839_v52 = vpop.f32.mrb[73].mxu0 }
0x2c27   :  { %v5034_v54 = vmin.f32 %v4960_v15, %v5031_v10  ;;  %v5933_v10 = vld [vmem:[#allocation2 + $0x68] sm:$0xff] }
0x2c29   :  { %v5035_v55 = vadd.f32 %v5034_v54, %v14191_v4 }
0x2c2b   :  { %11868 = vmatmul.mubr.msk.f32.vlgmr.msra.gmra.mrb[74].mxu0 %vm401_vm3, %v5035_v55 }
0x2c2c   :  { %12901 = vmatpush3.bf16.msra.mxu0 %v13402_v58  ;;  %11897 = vmatprep.mubr.msk.f32.mxu0 %vm13191_vm2, %v13192_v26 }
0x2c2d   :  { %12902 = vmatprep.subr.bf16.mxu0 %v13190_v19 }
0x2c30   :  { %12904 = vmatpush3.bf16.msra.mxu0 %v13427_v1 }
0x2c31   :  { %12905 = vmatprep.subr.bf16.mxu0 %v13190_v19 }
0x2c34   :  { %12907 = vmatpush3.bf16.msra.mxu0 %v13441_v5 }
0x2c35   :  { %12917 = vmatprep.subr.bf16.mxu0 %v13190_v19 }
0x2cfe   :  { %v5181_v8 = vpop.f32.mrb[74].mxu0 }
0x2cff   :  { %v5182_v57 = vadd.f32 %v13937_v56, %v5181_v8  ;;  %v11869_v13 = vpop.f32.mrb[75].mxu0 }
0x2d01   :  { %v5185_v28 = vmin.f32 %v5035_v55, %v5182_v57 }
0x2d03   :  { %v5186_v60 = vsub.f32 %v5185_v28, %v5111_v27 }
0x2d05   :  { %11883 = vmatmul.mubr.msk.f32.vlgmr.msra.gmra.mrb[66].mxu1 %vm401_vm3, %v5186_v60 }
0x2d06   :  { %12910 = vmatpush3.bf16.msra.mxu1 %v13524_v12  ;;  %11912 = vmatprep.mubr.msk.f32.mxu1 %vm13191_vm2, %v13192_v26 }
0x2d07   :  { %12911 = vmatprep.subr.bf16.mxu1 %v13190_v19 }
0x2d0a   :  { %12913 = vmatpush3.bf16.msra.mxu1 %v13538_v20 }
0x2d0b   :  { %12914 = vmatprep.subr.bf16.mxu1 %v13190_v19 }
0x2d0e   :  { %12916 = vmatpush3.bf16.msra.mxu1 %v13590_v59 }
0x2d0f   :  { %12926 = vmatprep.subr.bf16.mxu1 %v13190_v19 }
0x2dd8   :  { %v5256_v61 = vpop.f32.mrb[66].mxu1 }
0x2dd9   :  { %v5257_v62 = vadd.f32 %v13937_v56, %v5256_v61  ;;  %v11884_v35 = vpop.f32.mrb[67].mxu1 }
0x2ddb   :  { %v5260_v11 = vmin.f32 %v5186_v60, %v5257_v62 }
0x2ddd   :  { %11898 = vmatmul.mubr.msk.f32.vlgmr.msra.gmra.mrb[76].mxu0 %vm401_vm3, %v5260_v11 }
0x2dde   :  { %12919 = vmatpush3.bf16.msra.mxu0 %v13603_v63  ;;  %11927 = vmatprep.mubr.msk.f32.mxu0 %vm13191_vm2, %v13192_v26 }
0x2ddf   :  { %12920 = vmatprep.subr.bf16.mxu0 %v13190_v19 }
0x2de2   :  { %12922 = vmatpush3.bf16.msra.mxu0 %v13609_v2 }
0x2de3   :  { %12923 = vmatprep.subr.bf16.mxu0 %v13190_v19 }
0x2de6   :  { %12925 = vmatpush3.bf16.msra.mxu0 %v13645_v0 }
0x2de7   :  { %12935 = vmatprep.subr.bf16.mxu0 %v13190_v19 }
0x2eb0   :  { %v5330_v4 = vpop.f32.mrb[76].mxu0 }
0x2eb1   :  { %v5331_v16 = vadd.f32 %v14089_v32, %v5330_v4  ;;  %v11899_v17 = vpop.f32.mrb[77].mxu0 }
0x2eb3   :  { %v5334_v21 = vmin.f32 %v5260_v11, %v5331_v16  ;;  %v14398_v11 = vld [vmem:[%s17396_s6] ss:$0 sm:$0xff] }
0x2eb5   :  { %11913 = vmatmul.mubr.msk.f32.vlgmr.msra.gmra.mrb[68].mxu1 %vm401_vm3, %v5334_v21 }
0x2eb6   :  { %12928 = vmatpush3.bf16.msra.mxu1 %v13297_v18  ;;  %11942 = vmatprep.mubr.msk.f32.mxu1 %vm13191_vm2, %v13192_v26 }
0x2eb7   :  { %12929 = vmatprep.subr.bf16.mxu1 %v13190_v19 }
0x2eba   :  { %12931 = vmatpush3.bf16.msra.mxu1 %v13309_v22 }
0x2ebb   :  { %12932 = vmatprep.subr.bf16.mxu1 %v13190_v19 }
0x2ebe   :  { %12934 = vmatpush3.bf16.msra.mxu1 %v13319_v25 }
0x2ebf   :  { %12944 = vmatprep.subr.bf16.mxu1 %v13190_v19 }
0x2ec1   :  { %11943 = vmatmul.mubr.msk.f32.vlgmr.msra.gmra.mrb[70].mxu1 %vm401_vm3, %v5485_v29 }
0x2ec2   :  { %12946 = vmatpush3.bf16.msra.mxu1 %v13348_v43  ;;  %11972 = vmatprep.mubr.msk.f32.mxu1 %vm13191_vm2, %v13192_v26 }
0x2ec3   :  { %12947 = vmatprep.subr.bf16.mxu1 %v13190_v19 }
0x2ec6   :  { %12949 = vmatpush3.bf16.msra.mxu1 %v13362_v47 }
0x2ec7   :  { %12950 = vmatprep.subr.bf16.mxu1 %v13190_v19 }
0x2eca   :  { %12952 = vmatpush3.bf16.msra.mxu1 %v13374_v50 }
0x2ecb   :  { %12962 = vmatprep.subr.bf16.mxu1 %v13190_v19 }
0x2f88   :  { %v5404_v24 = vpop.f32.mrb[68].mxu1 }
0x2f89   :  { %v5405_v30 = vadd.f32 %v14113_v38, %v5404_v24  ;;  %v11914_v7 = vpop.f32.mrb[69].mxu1 }
0x2f8b   :  { %v5408_v31 = vmin.f32 %v5334_v21, %v5405_v30 }
0x2f8d   :  { %11928 = vmatmul.mubr.msk.f32.vlgmr.msra.gmra.mrb[78].mxu0 %vm401_vm3, %v5408_v31 }
0x2f8e   :  { %12937 = vmatpush3.bf16.msra.mxu0 %v13348_v43  ;;  %11957 = vmatprep.mubr.msk.f32.mxu0 %vm13191_vm2, %v13192_v26 }
0x2f8f   :  { %12938 = vmatprep.subr.bf16.mxu0 %v13190_v19 }
0x2f92   :  { %12940 = vmatpush3.bf16.msra.mxu0 %v13362_v47 }
0x2f93   :  { %12941 = vmatprep.subr.bf16.mxu0 %v13190_v19 }
0x2f94   :  { %v14317_v33 = vpop.f32.mrb[70].mxu1 }
0x2f95   :  { %v11944_v34 = vpop.f32.mrb[71].mxu1  ;;  %v5559_v40 = vsub.f32 %v14317_v33, %v5485_v29 }
0x2f96   :  { %12943 = vmatpush3.bf16.msra.mxu0 %v13374_v50 }
0x2f97   :  { %12953 = vmatprep.subr.bf16.mxu0 %v13190_v19 }
0x3060   :  { %v5478_v36 = vpop.f32.mrb[78].mxu0 }
0x3061   :  { %v5479_v3 = vadd.f32 %v14130_v41, %v5478_v36  ;;  %v11929_v37 = vpop.f32.mrb[79].mxu0 }
0x3062   :  { %v6381_v37 = vld [vmem:[#allocation2 + $0x70] sm:$0xff] }
0x3063   :  { %v5482_v9 = vmin.f32 %v5408_v31, %v5479_v3 }
0x3065   :  { %v5483_v39 = vadd.f32 %v5482_v9, %v14254_v48 }
0x3067   :  { %11958 = vmatmul.mubr.msk.f32.vlgmr.msra.gmra.mrb[80].mxu0 %vm401_vm3, %v5483_v39 }
0x3068   :  { %12955 = vmatpush3.bf16.msra.mxu0 %v13402_v58  ;;  %11987 = vmatprep.mubr.msk.f32.mxu0 %vm13191_vm2, %v13192_v26 }
0x3069   :  { %12956 = vmatprep.subr.bf16.mxu0 %v13190_v19 }
0x306c   :  { %12958 = vmatpush3.bf16.msra.mxu0 %v13427_v1 }
0x306d   :  { %12959 = vmatprep.subr.bf16.mxu0 %v13190_v19 }
0x3070   :  { %12961 = vmatpush3.bf16.msra.mxu0 %v13441_v5 }
0x3071   :  { %12971 = vmatprep.subr.bf16.mxu0 %v13190_v19 }
0x313a   :  { %v5629_v53 = vpop.f32.mrb[80].mxu0 }
0x313b   :  { %v5630_v14 = vadd.f32 %v13937_v56, %v5629_v53  ;;  %v11959_v23 = vpop.f32.mrb[81].mxu0 }
0x313d   :  { %v5633_v42 = vmin.f32 %v5483_v39, %v5630_v14 }
0x313f   :  { %v5634_v44 = vsub.f32 %v5633_v42, %v5559_v40 }
0x3141   :  { %11973 = vmatmul.mubr.msk.f32.vlgmr.msra.gmra.mrb[72].mxu1 %vm401_vm3, %v5634_v44 }
0x3142   :  { %12964 = vmatpush3.bf16.msra.mxu1 %v13524_v12  ;;  %12002 = vmatprep.mubr.msk.f32.mxu1 %vm13191_vm2, %v13192_v26 }
0x3143   :  { %12965 = vmatprep.subr.bf16.mxu1 %v13190_v19 }
0x3146   :  { %12967 = vmatpush3.bf16.msra.mxu1 %v13538_v20 }
0x3147   :  { %12968 = vmatprep.subr.bf16.mxu1 %v13190_v19 }
0x314a   :  { %12970 = vmatpush3.bf16.msra.mxu1 %v13590_v59 }
0x314b   :  { %12980 = vmatprep.subr.bf16.mxu1 %v13190_v19 }
0x3214   :  { %v5704_v6 = vpop.f32.mrb[72].mxu1 }
0x3215   :  { %v5705_v45 = vadd.f32 %v13937_v56, %v5704_v6  ;;  %v11974_v46 = vpop.f32.mrb[73].mxu1 }
0x3217   :  { %v5708_v15 = vmin.f32 %v5634_v44, %v5705_v45 }
0x3219   :  { %11988 = vmatmul.mubr.msk.f32.vlgmr.msra.gmra.mrb[82].mxu0 %vm401_vm3, %v5708_v15 }
0x321a   :  { %12973 = vmatpush3.bf16.msra.mxu0 %v13603_v63  ;;  %12017 = vmatprep.mubr.msk.f32.mxu0 %vm13191_vm2, %v13192_v26 }
0x321b   :  { %12974 = vmatprep.subr.bf16.mxu0 %v13190_v19 }
0x321e   :  { %12976 = vmatpush3.bf16.msra.mxu0 %v13609_v2 }
0x321f   :  { %12977 = vmatprep.subr.bf16.mxu0 %v13190_v19 }
0x3222   :  { %12979 = vmatpush3.bf16.msra.mxu0 %v13645_v0 }
0x3223   :  { %12989 = vmatprep.subr.bf16.mxu0 %v13190_v19 }
0x32ec   :  { %v5778_v56 = vpop.f32.mrb[82].mxu0 }
0x32ed   :  { %v5779_v48 = vadd.f32 %v14089_v32, %v5778_v56  ;;  %v11989_v49 = vpop.f32.mrb[83].mxu0 }
0x32ef   :  { %v5782_v51 = vmin.f32 %v5708_v15, %v5779_v48 }
0x32f1   :  { %12003 = vmatmul.mubr.msk.f32.vlgmr.msra.gmra.mrb[74].mxu1 %vm401_vm3, %v5782_v51 }
0x32f2   :  { %12982 = vmatpush3.bf16.msra.mxu1 %v13297_v18  ;;  %12032 = vmatprep.mubr.msk.f32.mxu1 %vm13191_vm2, %v13192_v26 }
0x32f3   :  { %12983 = vmatprep.subr.bf16.mxu1 %v13190_v19 }
0x32f6   :  { %12985 = vmatpush3.bf16.msra.mxu1 %v13309_v22 }
0x32f7   :  { %12986 = vmatprep.subr.bf16.mxu1 %v13190_v19 }
0x32fa   :  { %12988 = vmatpush3.bf16.msra.mxu1 %v13319_v25 }
0x32fb   :  { %12998 = vmatprep.subr.bf16.mxu1 %v13190_v19 }
0x32fd   :  { %12033 = vmatmul.mubr.msk.f32.vlgmr.msra.gmra.mrb[76].mxu1 %vm401_vm3, %v5933_v10 }
0x32fe   :  { %13000 = vmatpush3.bf16.msra.mxu1 %v13348_v43  ;;  %12062 = vmatprep.mubr.msk.f32.mxu1 %vm13191_vm2, %v13192_v26 }
0x32ff   :  { %13001 = vmatprep.subr.bf16.mxu1 %v13190_v19 }
0x3302   :  { %13003 = vmatpush3.bf16.msra.mxu1 %v13362_v47 }
0x3303   :  { %13004 = vmatprep.subr.bf16.mxu1 %v13190_v19 }
0x3306   :  { %13006 = vmatpush3.bf16.msra.mxu1 %v13374_v50 }
0x3307   :  { %13016 = vmatprep.subr.bf16.mxu1 %v13190_v19 }
0x33c4   :  { %v5852_v52 = vpop.f32.mrb[74].mxu1 }
0x33c5   :  { %v5853_v54 = vadd.f32 %v14113_v38, %v5852_v52  ;;  %v12004_v55 = vpop.f32.mrb[75].mxu1 }
0x33c7   :  { %v5856_v8 = vmin.f32 %v5782_v51, %v5853_v54 }
0x33c9   :  { %12018 = vmatmul.mubr.msk.f32.vlgmr.msra.gmra.mrb[84].mxu0 %vm401_vm3, %v5856_v8 }
0x33ca   :  { %12991 = vmatpush3.bf16.msra.mxu0 %v13348_v43  ;;  %12047 = vmatprep.mubr.msk.f32.mxu0 %vm13191_vm2, %v13192_v26 }
0x33cb   :  { %12992 = vmatprep.subr.bf16.mxu0 %v13190_v19 }
0x33ce   :  { %12994 = vmatpush3.bf16.msra.mxu0 %v13362_v47 }
0x33cf   :  { %12995 = vmatprep.subr.bf16.mxu0 %v13190_v19 }
0x33d0   :  { %v14380_v57 = vpop.f32.mrb[76].mxu1 }
0x33d1   :  { %v12034_v13 = vpop.f32.mrb[77].mxu1  ;;  %v6007_v17 = vsub.f32 %v14380_v57, %v5933_v10 }
0x33d2   :  { %12997 = vmatpush3.bf16.msra.mxu0 %v13374_v50 }
0x33d3   :  { %13007 = vmatprep.subr.bf16.mxu0 %v13190_v19 }
0x349c   :  { %v5926_v27 = vpop.f32.mrb[84].mxu0 }
0x349d   :  { %v5927_v28 = vadd.f32 %v14130_v41, %v5926_v27  ;;  %v12019_v60 = vpop.f32.mrb[85].mxu0 }
0x349f   :  { %v5930_v61 = vmin.f32 %v5856_v8, %v5927_v28 }
0x34a1   :  { %v5931_v62 = vadd.f32 %v5930_v61, %v14317_v33 }
0x34a3   :  { %12048 = vmatmul.mubr.msk.f32.vlgmr.msra.gmra.mrb[86].mxu0 %vm401_vm3, %v5931_v62 }
0x34a4   :  { %13009 = vmatpush3.bf16.msra.mxu0 %v13402_v58  ;;  %12077 = vmatprep.mubr.msk.f32.mxu0 %vm13191_vm2, %v13192_v26 }
0x34a5   :  { %13010 = vmatprep.subr.bf16.mxu0 %v13190_v19 }
0x34a8   :  { %13012 = vmatpush3.bf16.msra.mxu0 %v13427_v1 }
0x34a9   :  { %13013 = vmatprep.subr.bf16.mxu0 %v13190_v19 }
0x34ac   :  { %13015 = vmatpush3.bf16.msra.mxu0 %v13441_v5 }
0x34ad   :  { %13025 = vmatprep.subr.bf16.mxu0 %v13190_v19 }
0x3576   :  { %v6077_v35 = vpop.f32.mrb[86].mxu0 }
0x3577   :  { %v6078_v4 = vadd.f32 %v14398_v11, %v6077_v35  ;;  %v12049_v16 = vpop.f32.mrb[87].mxu0 }
0x3579   :  { %v6081_v21 = vmin.f32 %v5931_v62, %v6078_v4 }
0x357b   :  { %v6082_v29 = vsub.f32 %v6081_v21, %v6007_v17 }
0x357d   :  { %12063 = vmatmul.mubr.msk.f32.vlgmr.msra.gmra.mrb[78].mxu1 %vm401_vm3, %v6082_v29 }
0x357e   :  { %13018 = vmatpush3.bf16.msra.mxu1 %v13524_v12  ;;  %12092 = vmatprep.mubr.msk.f32.mxu1 %vm13191_vm2, %v13192_v26 }
0x357f   :  { %13019 = vmatprep.subr.bf16.mxu1 %v13190_v19 }
0x3582   :  { %13021 = vmatpush3.bf16.msra.mxu1 %v13538_v20 }
0x3583   :  { %13022 = vmatprep.subr.bf16.mxu1 %v13190_v19 }
0x3586   :  { %13024 = vmatpush3.bf16.msra.mxu1 %v13590_v59 }
0x3587   :  { %13034 = vmatprep.subr.bf16.mxu1 %v13190_v19 }
0x3650   :  { %v6152_v24 = vpop.f32.mrb[78].mxu1 }
0x3651   :  { %v6153_v30 = vadd.f32 %v14398_v11, %v6152_v24  ;;  %v12064_v7 = vpop.f32.mrb[79].mxu1 }
0x3653   :  { %v6156_v31 = vmin.f32 %v6082_v29, %v6153_v30 }
0x3655   :  { %12078 = vmatmul.mubr.msk.f32.vlgmr.msra.gmra.mrb[88].mxu0 %vm401_vm3, %v6156_v31 }
0x3656   :  { %13027 = vmatpush3.bf16.msra.mxu0 %v13603_v63  ;;  %12107 = vmatprep.mubr.msk.f32.mxu0 %vm13191_vm2, %v13192_v26 }
0x3657   :  { %13028 = vmatprep.subr.bf16.mxu0 %v13190_v19 }
0x365a   :  { %13030 = vmatpush3.bf16.msra.mxu0 %v13609_v2 }
0x365b   :  { %13031 = vmatprep.subr.bf16.mxu0 %v13190_v19 }
0x365e   :  { %13033 = vmatpush3.bf16.msra.mxu0 %v13645_v0 }
0x365f   :  { %13043 = vmatprep.subr.bf16.mxu0 %v13190_v19 }
0x3728   :  { %v6226_v33 = vpop.f32.mrb[88].mxu0 }
0x3729   :  { %v6227_v34 = vadd.f32 %v14089_v32, %v6226_v33  ;;  %v12079_v36 = vpop.f32.mrb[89].mxu0 }
0x372b   :  { %v6230_v3 = vmin.f32 %v6156_v31, %v6227_v34 }
0x372d   :  { %12093 = vmatmul.mubr.msk.f32.vlgmr.msra.gmra.mrb[80].mxu1 %vm401_vm3, %v6230_v3 }
0x372e   :  { %13036 = vmatpush3.bf16.msra.mxu1 %v13297_v18  ;;  %12122 = vmatprep.mubr.msk.f32.mxu1 %vm13191_vm2, %v13192_v26 }
0x372f   :  { %13037 = vmatprep.subr.bf16.mxu1 %v13190_v19 }
0x3732   :  { %13039 = vmatpush3.bf16.msra.mxu1 %v13309_v22 }
0x3733   :  { %13040 = vmatprep.subr.bf16.mxu1 %v13190_v19 }
0x3736   :  { %13042 = vmatpush3.bf16.msra.mxu1 %v13319_v25 }
0x3737   :  { %13052 = vmatprep.subr.bf16.mxu1 %v13190_v19 }
0x3739   :  { %12123 = vmatmul.mubr.msk.f32.vlgmr.msra.gmra.mrb[82].mxu1 %vm401_vm3, %v6381_v37 }
0x373a   :  { %13054 = vmatpush3.bf16.msra.mxu1 %v13348_v43  ;;  %12152 = vmatprep.mubr.msk.f32.mxu1 %vm13191_vm2, %v13192_v26 }
0x373b   :  { %13055 = vmatprep.subr.bf16.mxu1 %v13190_v19 }
0x373e   :  { %13057 = vmatpush3.bf16.msra.mxu1 %v13362_v47 }
0x373f   :  { %13058 = vmatprep.subr.bf16.mxu1 %v13190_v19 }
0x3742   :  { %13060 = vmatpush3.bf16.msra.mxu1 %v13374_v50 }
0x3743   :  { %13070 = vmatprep.subr.bf16.mxu1 %v13190_v19 }
0x3800   :  { %v6300_v9 = vpop.f32.mrb[80].mxu1 }
0x3801   :  { %v6301_v39 = vadd.f32 %v14113_v38, %v6300_v9  ;;  %v12094_v53 = vpop.f32.mrb[81].mxu1 }
0x3803   :  { %v6304_v14 = vmin.f32 %v6230_v3, %v6301_v39  ;;  %v13164_v3 = vld [vmem:[%s17396_s6 + $0x2] ss:$0 sm:$0xff] }
0x3805   :  { %12108 = vmatmul.mubr.msk.f32.vlgmr.msra.gmra.mrb[90].mxu0 %vm401_vm3, %v6304_v14 }
0x3806   :  { %13045 = vmatpush3.bf16.msra.mxu0 %v13348_v43  ;;  %12137 = vmatprep.mubr.msk.f32.mxu0 %vm13191_vm2, %v13192_v26 }
0x3807   :  { %13046 = vmatprep.subr.bf16.mxu0 %v13190_v19 }
0x380a   :  { %13048 = vmatpush3.bf16.msra.mxu0 %v13362_v47 }
0x380b   :  { %13049 = vmatprep.subr.bf16.mxu0 %v13190_v19 }
0x380c   :  { %v14448_v23 = vpop.f32.mrb[82].mxu1 }
0x380d   :  { %v12124_v40 = vpop.f32.mrb[83].mxu1  ;;  %v6455_v49 = vsub.f32 %v14448_v23, %v6381_v37 }
0x380e   :  { %13051 = vmatpush3.bf16.msra.mxu0 %v13374_v50 }
0x380f   :  { %13061 = vmatprep.subr.bf16.mxu0 %v13190_v19 }
0x38d8   :  { %v6374_v42 = vpop.f32.mrb[90].mxu0 }
0x38d9   :  { %v6375_v44 = vadd.f32 %v14130_v41, %v6374_v42  ;;  %v12109_v6 = vpop.f32.mrb[91].mxu0  ;;  %v7416_v42 = vld [vmem:[%s17391_s1 + $0x8] sm:$0xff] }
0x38db   :  { %v6378_v45 = vmin.f32 %v6304_v14, %v6375_v44  ;;  %v14632_v44 = vld [vmem:[%s17397_s7] ss:$0 sm:$0xff] }
0x38dd   :  { %v6379_v46 = vadd.f32 %v6378_v45, %v14380_v57  ;;  %v7483_v45 = vmul.f32 %v14632_v44, %v7416_v42 }
0x38df   :  { %12138 = vmatmul.mubr.msk.f32.vlgmr.msra.gmra.mrb[92].mxu0 %vm401_vm3, %v6379_v46 }
0x38e0   :  { %13063 = vmatpush3.bf16.msra.mxu0 %v13402_v58  ;;  %12167 = vmatprep.mubr.msk.f32.mxu0 %vm13191_vm2, %v13192_v26 }
0x38e1   :  { %13064 = vmatprep.subr.bf16.mxu0 %v13190_v19 }
0x38e4   :  { %13066 = vmatpush3.bf16.msra.mxu0 %v13427_v1 }
0x38e5   :  { %13067 = vmatprep.subr.bf16.mxu0 %v13190_v19 }
0x38e8   :  { %13069 = vmatpush3.bf16.msra.mxu0 %v13441_v5 }
0x38e9   :  { %13079 = vmatprep.subr.bf16.mxu0 %v13190_v19 }
0x39b2   :  { %v6525_v15 = vpop.f32.mrb[92].mxu0 }
0x39b3   :  { %v6526_v56 = vadd.f32 %v14398_v11, %v6525_v15  ;;  %v12139_v48 = vpop.f32.mrb[93].mxu0  ;;  %v7447_v15 = vld [vmem:[#allocation3 + $0x8] sm:$0xff] }
0x39b5   :  { %v6529_v51 = vmin.f32 %v6379_v46, %v6526_v56  ;;  %v7446_v46 = vld [vmem:[#allocation3] sm:$0xff] }
0x39b7   :  { %v6530_v10 = vsub.f32 %v6529_v51, %v6455_v49  ;;  %v7514_v49 = vadd.f32 %v7483_v45, %v7447_v15  ;;  %v14646_v51 = vld [vmem:[%s17391_s1 + $0x18] sm:$0xff]  ;;  %v14742_v15 = vld [vmem:[%s17397_s7 + $0x2] ss:$0 sm:$0xff] }
0x39b9   :  { %12153 = vmatmul.mubr.msk.f32.vlgmr.msra.gmra.mrb[84].mxu1 %vm401_vm3, %v6530_v10  ;;  %7545 = vst.msk [vmem:[#allocation3 + $0x8] sm:$0xff] %vm7383_vm13, %v7514_v49 }
0x39ba   :  { %13072 = vmatpush3.bf16.msra.mxu1 %v13524_v12  ;;  %12182 = vmatprep.mubr.msk.f32.mxu1 %vm13191_vm2, %v13192_v26 }
0x39bb   :  { %13073 = vmatprep.subr.bf16.mxu1 %v13190_v19 }
0x39be   :  { %13075 = vmatpush3.bf16.msra.mxu1 %v13538_v20 }
0x39bf   :  { %13076 = vmatprep.subr.bf16.mxu1 %v13190_v19 }
0x39c2   :  { %13078 = vmatpush3.bf16.msra.mxu1 %v13590_v59 }
0x39c3   :  { %13088 = vmatprep.subr.bf16.mxu1 %v13190_v19 }
0x3a8c   :  { %v6600_v52 = vpop.f32.mrb[84].mxu1 }
0x3a8d   :  { %v6601_v54 = vadd.f32 %v14398_v11, %v6600_v52  ;;  %v12154_v55 = vpop.f32.mrb[85].mxu1  ;;  %v7485_v52 = vmul.f32 %v14632_v44, %v14646_v51 }
0x3a8e   :  { %v14655_v55 = vld [vmem:[%s17391_s1 + $0x20] sm:$0xff] }
0x3a8f   :  { %v6604_v8 = vmin.f32 %v6530_v10, %v6601_v54  ;;  %v7448_v10 = vld [vmem:[#allocation3 + $0x10] sm:$0xff] }
0x3a91   :  { %12168 = vmatmul.mubr.msk.f32.vlgmr.msra.gmra.mrb[94].mxu0 %vm401_vm3, %v6604_v8 }
0x3a92   :  { %13081 = vmatpush3.bf16.msra.mxu0 %v13603_v63  ;;  %12197 = vmatprep.mubr.msk.f32.mxu0 %vm13191_vm2, %v13192_v26 }
0x3a93   :  { %13082 = vmatprep.subr.bf16.mxu0 %v13190_v19 }
0x3a96   :  { %13084 = vmatpush3.bf16.msra.mxu0 %v13609_v2 }
0x3a97   :  { %13085 = vmatprep.subr.bf16.mxu0 %v13190_v19 }
0x3a9a   :  { %13087 = vmatpush3.bf16.msra.mxu0 %v13645_v0 }
0x3a9b   :  { %13097 = vmatprep.subr.bf16.mxu0 %v13190_v19 }
0x3b64   :  { %v6674_v57 = vpop.f32.mrb[94].mxu0 }
0x3b65   :  { %v6675_v13 = vadd.f32 %v14089_v32, %v6674_v57  ;;  %v12169_v27 = vpop.f32.mrb[95].mxu0  ;;  %v6829_v32 = vld [vmem:[#allocation2 + $0x78] sm:$0xff]  ;;  %v7486_v57 = vmul.f32 %v14632_v44, %v14655_v55 }
0x3b66   :  { %v14663_v27 = vld [vmem:[%s17391_s1 + $0x28] sm:$0xff] }
0x3b67   :  { %v6678_v28 = vmin.f32 %v6604_v8, %v6675_v13  ;;  %v7449_v8 = vld [vmem:[#allocation3 + $0x18] sm:$0xff] }
0x3b68   :  { %v7516_v13 = vadd.f32 %v7485_v52, %v7449_v8  ;;  %v7803_v52 = vmul.f32 %v14742_v15, %v14646_v51 }
0x3b69   :  { %12183 = vmatmul.mubr.msk.f32.vlgmr.msra.gmra.mrb[86].mxu1 %vm401_vm3, %v6678_v28 }
0x3b6a   :  { %13090 = vmatpush3.bf16.msra.mxu1 %v13297_v18  ;;  %12212 = vmatprep.mubr.msk.f32.mxu1 %vm13191_vm2, %v13192_v26  ;;  %7547 = vst.msk [vmem:[#allocation3 + $0x18] sm:$0xff] %vm7383_vm13, %v7516_v13 }
0x3b6b   :  { %13091 = vmatprep.subr.bf16.mxu1 %v13190_v19 }
0x3b6e   :  { %13093 = vmatpush3.bf16.msra.mxu1 %v13309_v22 }
0x3b6f   :  { %13094 = vmatprep.subr.bf16.mxu1 %v13190_v19 }
0x3b72   :  { %13096 = vmatpush3.bf16.msra.mxu1 %v13319_v25 }
0x3b73   :  { %13106 = vmatprep.subr.bf16.mxu1 %v13190_v19 }
0x3b75   :  { %12213 = vmatmul.mubr.msk.f32.vlgmr.msra.gmra.mrb[88].mxu1 %vm401_vm3, %v6829_v32 }
0x3b76   :  { %13108 = vmatpush3.bf16.msra.mxu1 %v13348_v43  ;;  %12242 = vmatprep.mubr.msk.f32.mxu1 %vm13191_vm2, %v13192_v26 }
0x3b77   :  { %13109 = vmatprep.subr.bf16.mxu1 %v13190_v19 }
0x3b7a   :  { %13111 = vmatpush3.bf16.msra.mxu1 %v13362_v47 }
0x3b7b   :  { %13112 = vmatprep.subr.bf16.mxu1 %v13190_v19 }
0x3b7e   :  { %13114 = vmatpush3.bf16.msra.mxu1 %v13374_v50 }
0x3b7f   :  { %13124 = vmatprep.subr.bf16.mxu1 %v13190_v19 }
0x3c3c   :  { %v6748_v18 = vpop.f32.mrb[86].mxu1 }
0x3c3d   :  { %v6749_v22 = vadd.f32 %v14113_v38, %v6748_v18  ;;  %v12184_v25 = vpop.f32.mrb[87].mxu1 }
0x3c3e   :  { %v7451_v25 = vld [vmem:[#allocation3 + $0x28] sm:$0xff] }
0x3c3f   :  { %v6752_v60 = vmin.f32 %v6678_v28, %v6749_v22  ;;  %v7450_v28 = vld [vmem:[#allocation3 + $0x20] sm:$0xff]  ;;  %v14671_v22 = vld [vmem:[%s17391_s1 + $0x30] sm:$0xff] }
0x3c40   :  { %v7517_v18 = vadd.f32 %v7486_v57, %v7450_v28 }
0x3c41   :  { %12198 = vmatmul.mubr.msk.f32.vlgmr.msra.gmra.mrb[96].mxu0 %vm401_vm3, %v6752_v60 }
0x3c42   :  { %13099 = vmatpush3.bf16.msra.mxu0 %v13348_v43  ;;  %12227 = vmatprep.mubr.msk.f32.mxu0 %vm13191_vm2, %v13192_v26  ;;  %7548 = vst.msk [vmem:[#allocation3 + $0x20] sm:$0xff] %vm7383_vm13, %v7517_v18  ;;  %v7458_v18 = vld [vmem:[#allocation3 + $0x60] sm:$0xff] }
0x3c43   :  { %13100 = vmatprep.subr.bf16.mxu0 %v13190_v19 }
0x3c46   :  { %13102 = vmatpush3.bf16.msra.mxu0 %v13362_v47 }
0x3c47   :  { %13103 = vmatprep.subr.bf16.mxu0 %v13190_v19 }
0x3c48   :  { %v14511_v61 = vpop.f32.mrb[88].mxu1 }
0x3c49   :  { %17585 = vst [vmem:[#allocation7_spill] sm:$0xff] %v14511_v61  ;;  %v12214_v62 = vpop.f32.mrb[89].mxu1  ;;  %v6903_v17 = vsub.f32 %v14511_v61, %v6829_v32  ;;  %v7487_v32 = vmul.f32 %v14632_v44, %v14663_v27 }
0x3c4a   :  { %13105 = vmatpush3.bf16.msra.mxu0 %v13374_v50  ;;  %v7488_v62 = vmul.f32 %v14632_v44, %v14671_v22 }
0x3c4b   :  { %13115 = vmatprep.subr.bf16.mxu0 %v13190_v19 }
0x3d14   :  { %v6822_v38 = vpop.f32.mrb[96].mxu0 }
0x3d15   :  { %v6823_v35 = vadd.f32 %v14130_v41, %v6822_v38  ;;  %v12199_v43 = vpop.f32.mrb[97].mxu0  ;;  %v7518_v38 = vadd.f32 %v7487_v32, %v7451_v25 }
0x3d17   :  { %v6826_v4 = vmin.f32 %v6752_v60, %v6823_v35  ;;  %v14676_v60 = vld [vmem:[%s17397_s7 + $0x1] ss:$0 sm:$0xff]  ;;  %7549 = vst.msk [vmem:[#allocation3 + $0x28] sm:$0xff] %vm7383_vm13, %v7518_v38 }
0x3d18   :  { %v7642_v35 = vmul.f32 %v14676_v60, %v7416_v42 }
0x3d19   :  { %v6827_v16 = vadd.f32 %v6826_v4, %v14448_v23  ;;  %v14687_v4 = vld [vmem:[%s17391_s1 + $0x38] sm:$0xff] }
0x3d1a   :  { %v7648_v45 = vmul.f32 %v14676_v60, %v14687_v4 }
0x3d1b   :  { %12228 = vmatmul.mubr.msk.f32.vlgmr.msra.gmra.mrb[98].mxu0 %vm401_vm3, %v6827_v16 }
0x3d1c   :  { %13117 = vmatpush3.bf16.msra.mxu0 %v13402_v58  ;;  %12257 = vmatprep.mubr.msk.f32.mxu0 %vm13191_vm2, %v13192_v26 }
0x3d1d   :  { %13118 = vmatprep.subr.bf16.mxu0 %v13190_v19 }
0x3d20   :  { %13120 = vmatpush3.bf16.msra.mxu0 %v13427_v1 }
0x3d21   :  { %13121 = vmatprep.subr.bf16.mxu0 %v13190_v19 }
0x3d24   :  { %13123 = vmatpush3.bf16.msra.mxu0 %v13441_v5 }
0x3d25   :  { %13133 = vmatprep.subr.bf16.mxu0 %v13190_v19 }
0x3dee   :  { %v6973_v47 = vpop.f32.mrb[98].mxu0 }
0x3def   :  { %v6974_v50 = vadd.f32 %v14398_v11, %v6973_v47  ;;  %v12229_v41 = vpop.f32.mrb[99].mxu0 }
0x3df1   :  { %v6977_v58 = vmin.f32 %v6827_v16, %v6974_v50  ;;  %v7452_v16 = vld [vmem:[#allocation3 + $0x30] sm:$0xff]  ;;  %v7489_v50 = vmul.f32 %v14632_v44, %v14687_v4 }
0x3df2   :  { %v7519_v41 = vadd.f32 %v7488_v62, %v7452_v16  ;;  %v7804_v62 = vmul.f32 %v14742_v15, %v14655_v55 }
0x3df3   :  { %v6978_v21 = vsub.f32 %v6977_v58, %v6903_v17  ;;  %v7607_v17 = vld [vmem:[#allocation3 + $0x8] sm:$0xff]  ;;  %v7644_v58 = vmul.f32 %v14676_v60, %v14646_v51 }
0x3df4   :  { %7550 = vst.msk [vmem:[#allocation3 + $0x30] sm:$0xff] %vm7383_vm13, %v7519_v41 }
0x3df5   :  { %12243 = vmatmul.mubr.msk.f32.vlgmr.msra.gmra.mrb[90].mxu1 %vm401_vm3, %v6978_v21 }
0x3df6   :  { %13126 = vmatpush3.bf16.msra.mxu1 %v13524_v12  ;;  %12272 = vmatprep.mubr.msk.f32.mxu1 %vm13191_vm2, %v13192_v26 }
0x3df7   :  { %13127 = vmatprep.subr.bf16.mxu1 %v13190_v19 }
0x3dfa   :  { %13129 = vmatpush3.bf16.msra.mxu1 %v13538_v20  ;;  %v13163_v20 = vld [vmem:[%s17396_s6 + $0x1] ss:$0 sm:$0xff] }
0x3dfb   :  { %13130 = vmatprep.subr.bf16.mxu1 %v13190_v19  ;;  %v7612_v49 = vld [vmem:[#allocation3 + $0x30] sm:$0xff] }
0x3dfc   :  { %v7679_v13 = vadd.f32 %v7648_v45, %v7612_v49 }
0x3dfe   :  { %13132 = vmatpush3.bf16.msra.mxu1 %v13590_v59  ;;  %7710 = vst.msk [vmem:[#allocation3 + $0x30] sm:$0xff] %vm7383_vm13, %v7679_v13 }
0x3dff   :  { %13142 = vmatprep.subr.bf16.mxu1 %v13190_v19 }
0x3ec8   :  { %v7048_v1 = vpop.f32.mrb[90].mxu1 }
0x3ec9   :  { %v7049_v5 = vadd.f32 %v14398_v11, %v7048_v1  ;;  %v12244_v29 = vpop.f32.mrb[91].mxu1  ;;  %v14697_v1 = vld [vmem:[%s17391_s1 + $0x40] sm:$0xff] }
0x3eca   :  { %v7649_v57 = vmul.f32 %v14676_v60, %v14697_v1 }
0x3ecb   :  { %v7052_v24 = vmin.f32 %v6978_v21, %v7049_v5  ;;  %v7453_v5 = vld [vmem:[#allocation3 + $0x38] sm:$0xff] }
0x3ecd   :  { %12258 = vmatmul.mubr.msk.f32.vlgmr.msra.gmra.mrb[100].mxu0 %vm401_vm3, %v7052_v24 }
0x3ece   :  { %13135 = vmatpush3.bf16.msra.mxu0 %v13603_v63  ;;  %12287 = vmatprep.mubr.msk.f32.mxu0 %vm13191_vm2, %v13192_v26  ;;  %v7276_v63 = vlaneseq }
0x3ecf   :  { %13136 = vmatprep.subr.bf16.mxu0 %v13190_v19 }
0x3ed0   :  { %v7277_v7 = vshrl.u32 %v7276_v63, 7 }
0x3ed2   :  { %13138 = vmatpush3.bf16.msra.mxu0 %v13609_v2  ;;  %v7284_v2 = vand.u32 127, %v7276_v63  ;;  %v7278_v31 = vadd.s32 8, %v7277_v7  ;;  %v7279_v53 = vadd.s32 16, %v7277_v7  ;;  %v7280_v14 = vadd.s32 24, %v7277_v7  ;;  %v7454_v63 = vld [vmem:[#allocation3 + $0x40] sm:$0xff] }
0x3ed3   :  { %13139 = vmatprep.subr.bf16.mxu0 %v13190_v19  ;;  %v7281_v23 = vadd.s32 32, %v7277_v7  ;;  %v7282_v40 = vadd.s32 40, %v7277_v7 }
0x3ed4   :  { %v7285_v33 = vmul.u32 16, %v7284_v2 }
0x3ed6   :  { %13141 = vmatpush3.bf16.msra.mxu0 %v13645_v0  ;;  %v7286_v34 = vadd.s32 15, %v7285_v33  ;;  %v13193_v0 = vmov 1.0|1.0   ;;  %v7646_v33 = vmul.f32 %v14676_v60, %v14663_v27 }
0x3ed8   :  { %vm7287_vm4 = vcmp.eq.s32.totalorder %v7277_v7, %v7286_v34  ;;  %vm7288_vm5 = vcmp.eq.s32.totalorder %v7278_v31, %v7286_v34  ;;  %vm7289_vm7 = vcmp.eq.s32.totalorder %v7279_v53, %v7286_v34  ;;  %vm7290_vm8 = vcmp.eq.s32.totalorder %v7280_v14, %v7286_v34  ;;  %v7609_v7 = vld [vmem:[#allocation3 + $0x18] sm:$0xff] }
0x3ed9   :  { %vm13143_vm6 = vmpackc.low %vm7288_vm5, %vm7287_vm4  ;;  %vm7291_vm10 = vcmp.eq.s32.totalorder %v7281_v23, %v7286_v34  ;;  %vm7292_vm11 = vcmp.eq.s32.totalorder %v7282_v40, %v7286_v34  ;;  %v7647_v53 = vmul.f32 %v14676_v60, %v14671_v22  ;;  %v14731_v23 = vld [vmem:[%s17391_s1 + $0x58] sm:$0xff]  ;;  %v7456_v40 = vld [vmem:[#allocation3 + $0x50] sm:$0xff] }
0x3eda   :  { %vm13146_vm9 = vmpackc.low %vm7290_vm8, %vm7289_vm7  ;;  %v7493_v42 = vmul.f32 %v14632_v44, %v14731_v23 }
0x3edb   :  { %vm13149_vm12 = vmpackc.low %vm7292_vm11, %vm7291_vm10 }
0x3fa0   :  { %v7122_v12 = vpop.f32.mrb[100].mxu0 }
0x3fa1   :  { %v7123_v59 = vadd.f32 %v13163_v20, %v7122_v12  ;;  %v12259_v11 = vpop.f32.mrb[101].mxu0  ;;  %v7490_v12 = vmul.f32 %v14632_v44, %v14697_v1  ;;  %v7520_v20 = vadd.f32 %v7489_v50, %v7453_v5  ;;  %v7805_v5 = vmul.f32 %v14742_v15, %v14663_v27 }
0x3fa3   :  { %v7126_v30 = vmin.f32 %v7052_v24, %v7123_v59  ;;  %v7645_v59 = vmul.f32 %v14676_v60, %v14655_v55  ;;  %v7521_v31 = vadd.f32 %v7490_v12, %v7454_v63  ;;  %7551 = vst.msk [vmem:[#allocation3 + $0x38] sm:$0xff] %vm7383_vm13, %v7520_v20  ;;  %v14790_v63 = vld [vmem:[%s17391_s1 + $0x78] sm:$0xff] }
0x3fa5   :  { %12273 = vmatmul.mubr.msk.f32.vlgmr.msra.gmra.mrb[92].mxu1 %vm401_vm3, %v7126_v30  ;;  %v7676_v34 = vadd.f32 %v7645_v59, %v7609_v7  ;;  %7552 = vst.msk [vmem:[#allocation3 + $0x40] sm:$0xff] %vm7383_vm13, %v7521_v31  ;;  %v7460_v7 = vld [vmem:[#allocation3 + $0x70] sm:$0xff]  ;;  %v7806_v31 = vmul.f32 %v14742_v15, %v14671_v22 }
0x3fa6   :  { %12302 = vmatprep.mubr.msk.f32.mxu1 %vm13191_vm2, %v13192_v26  ;;  %13144 = vmatpush3.bf16.msk.msra.mxu1 %vm13143_vm6, %v13193_v0  ;;  %v14639_v26 = vld [vmem:[%s17391_s1 + $0x10] sm:$0xff] }
0x3fa7   :  { %13145 = vmatprep.subr.bf16.mxu1 %v13190_v19  ;;  %v7484_v56 = vmul.f32 %v14632_v44, %v14639_v26  ;;  %v7643_v43 = vmul.f32 %v14676_v60, %v14639_v26  ;;  %7707 = vst.msk [vmem:[#allocation3 + $0x18] sm:$0xff] %vm7383_vm13, %v7676_v34  ;;  %v7497_v34 = vmul.f32 %v14632_v44, %v14790_v63 }
0x3fa9   :  { %v7515_v54 = vadd.f32 %v7484_v56, %v7448_v10  ;;  %v7674_v24 = vadd.f32 %v7643_v43, %v7607_v17  ;;  %v14747_v56 = vld [vmem:[%s17391_s1 + $0x60] sm:$0xff]  ;;  %v7802_v10 = vmul.f32 %v14742_v15, %v14639_v26  ;;  %v14762_v26 = vld [vmem:[%s17391_s1 + $0x68] sm:$0xff]  ;;  %v14775_v17 = vld [vmem:[%s17391_s1 + $0x70] sm:$0xff] }
0x3faa   :  { %13147 = vmatpush3.bf16.msk.msra.mxu1 %vm13146_vm9, %v13193_v0  ;;  %v7613_v25 = vld [vmem:[#allocation3 + $0x38] sm:$0xff]  ;;  %v7495_v43 = vmul.f32 %v14632_v44, %v14762_v26 }
0x3fab   :  { %13148 = vmatprep.subr.bf16.mxu1 %v13190_v19  ;;  %v7415_v19 = vld [vmem:[%s17391_s1] sm:$0xff]  ;;  %7546 = vst.msk [vmem:[#allocation3 + $0x10] sm:$0xff] %vm7383_vm13, %v7515_v54  ;;  %7705 = vst.msk [vmem:[#allocation3 + $0x8] sm:$0xff] %vm7383_vm13, %v7674_v24  ;;  %v7494_v54 = vmul.f32 %v14632_v44, %v14747_v56  ;;  %v7680_v50 = vadd.f32 %v7649_v57, %v7613_v25  ;;  %v7496_v24 = vmul.f32 %v14632_v44, %v14775_v17 }
0x3fac   :  { %v7482_v6 = vmul.f32 %v14632_v44, %v7415_v19  ;;  %v7611_v19 = vld [vmem:[#allocation3 + $0x28] sm:$0xff]  ;;  %v7808_v57 = vmul.f32 %v14742_v15, %v14697_v1 }
0x3fad   :  { %v7525_v16 = vadd.f32 %v7494_v54, %v7458_v18  ;;  %7711 = vst.msk [vmem:[#allocation3 + $0x38] sm:$0xff] %vm7383_vm13, %v7680_v50  ;;  %v7462_v54 = vld [vmem:[#allocation3 + $0x80] sm:$0xff] }
0x3fae   :  { %13150 = vmatpush3.bf16.msk.msra.mxu1 %vm13149_vm12, %v13193_v0  ;;  %v7513_v48 = vadd.f32 %v7482_v6, %v7446_v46  ;;  %v14720_v0 = vld [vmem:[%s17391_s1 + $0x50] sm:$0xff]  ;;  %v7678_v46 = vadd.f32 %v7647_v53, %v7611_v19  ;;  %v14804_v53 = vld [vmem:[%s17391_s1 + $0x80] sm:$0xff]  ;;  %v7807_v19 = vmul.f32 %v14742_v15, %v14687_v4 }
0x3faf   :  { %7556 = vst.msk [vmem:[#allocation3 + $0x60] sm:$0xff] %vm7383_vm13, %v7525_v16  ;;  %v7651_v20 = vmul.f32 %v14676_v60, %v14720_v0 }
0x3fb0   :  { %7544 = vst.msk [vmem:[#allocation3] sm:$0xff] %vm7383_vm13, %v7513_v48  ;;  %v7457_v48 = vld [vmem:[#allocation3 + $0x58] sm:$0xff]  ;;  %7709 = vst.msk [vmem:[#allocation3 + $0x28] sm:$0xff] %vm7383_vm13, %v7678_v46  ;;  %v7653_v46 = vmul.f32 %v14676_v60, %v14747_v56 }
0x3fb1   :  { %v7524_v8 = vadd.f32 %v7493_v42, %v7457_v48 }
0x3fb2   :  { %v7608_v29 = vld [vmem:[#allocation3 + $0x10] sm:$0xff]  ;;  %v7767_v32 = vld [vmem:[#allocation3 + $0x8] sm:$0xff] }
0x3fb3   :  { %v7675_v11 = vadd.f32 %v7644_v58, %v7608_v29  ;;  %7555 = vst.msk [vmem:[#allocation3 + $0x58] sm:$0xff] %vm7383_vm13, %v7524_v8  ;;  %v7459_v58 = vld [vmem:[#allocation3 + $0x68] sm:$0xff] }
0x3fb4   :  { %v7526_v12 = vadd.f32 %v7495_v43, %v7459_v58 }
0x3fb5   :  { %7706 = vst.msk [vmem:[#allocation3 + $0x10] sm:$0xff] %vm7383_vm13, %v7675_v11  ;;  %v7769_v11 = vld [vmem:[#allocation3 + $0x18] sm:$0xff] }
0x3fb6   :  { %7557 = vst.msk [vmem:[#allocation3 + $0x68] sm:$0xff] %vm7383_vm13, %v7526_v12 }
0x3fb7   :  { %v7606_v47 = vld [vmem:[#allocation3] sm:$0xff]  ;;  %v7771_v49 = vld [vmem:[#allocation3 + $0x28] sm:$0xff] }
0x3fb8   :  { %v7673_v21 = vadd.f32 %v7642_v35, %v7606_v47  ;;  %v7834_v35 = vadd.f32 %v7803_v52, %v7767_v32  ;;  %v14823_v52 = vld [vmem:[%s17391_s1 + $0x88] sm:$0xff]  ;;  %v7838_v13 = vadd.f32 %v7807_v19, %v7771_v49  ;;  %v7465_v19 = vld [vmem:[#allocation3 + $0x98] sm:$0xff] }
0x3fb9   :  { %v7499_v18 = vmul.f32 %v14632_v44, %v14823_v52 }
0x3fba   :  { %7704 = vst.msk [vmem:[#allocation3] sm:$0xff] %vm7383_vm13, %v7673_v21  ;;  %v7614_v21 = vld [vmem:[#allocation3 + $0x40] sm:$0xff]  ;;  %7865 = vst.msk [vmem:[#allocation3 + $0x8] sm:$0xff] %vm7383_vm13, %v7834_v35  ;;  %v7617_v8 = vld [vmem:[#allocation3 + $0x58] sm:$0xff] }
0x3fbb   :  { %v7772_v35 = vld [vmem:[#allocation3 + $0x30] sm:$0xff]  ;;  %7869 = vst.msk [vmem:[#allocation3 + $0x28] sm:$0xff] %vm7383_vm13, %v7838_v13 }
0x3fbc   :  { %v7768_v41 = vld [vmem:[#allocation3 + $0x10] sm:$0xff] }
0x3fbd   :  { %v7835_v29 = vadd.f32 %v7804_v62, %v7768_v41  ;;  %v7654_v62 = vmul.f32 %v14676_v60, %v14762_v26  ;;  %v7839_v41 = vadd.f32 %v7808_v57, %v7772_v35 }
0x3fbf   :  { %7866 = vst.msk [vmem:[#allocation3 + $0x10] sm:$0xff] %vm7383_vm13, %v7835_v29  ;;  %7870 = vst.msk [vmem:[#allocation3 + $0x30] sm:$0xff] %vm7383_vm13, %v7839_v41 }
0x3fc1   :  { %v7766_v28 = vld [vmem:[#allocation3] sm:$0xff]  ;;  %v7927_v16 = vld [vmem:[#allocation3 + $0x8] sm:$0xff] }
0x3fc2   :  { %v7833_v38 = vadd.f32 %v7802_v10, %v7766_v28  ;;  %v14818_v10 = vld [vmem:[%s17397_s7 + $0x3] ss:$0 sm:$0xff]  ;;  %v7931_v41 = vld [vmem:[#allocation3 + $0x28] sm:$0xff] }
0x3fc3   :  { %v7962_v28 = vmul.f32 %v14818_v10, %v14646_v51  ;;  %v7963_v32 = vmul.f32 %v14818_v10, %v14655_v55  ;;  %v14841_v51 = vld [vmem:[%s17391_s1 + $0x90] sm:$0xff]  ;;  %v7463_v55 = vld [vmem:[#allocation3 + $0x88] sm:$0xff]  ;;  %v7964_v58 = vmul.f32 %v14818_v10, %v14663_v27 }
0x3fc4   :  { %7864 = vst.msk [vmem:[#allocation3] sm:$0xff] %vm7383_vm13, %v7833_v38  ;;  %v7684_v38 = vadd.f32 %v7653_v46, %v7617_v8  ;;  %v7530_v29 = vadd.f32 %v7499_v18, %v7463_v55  ;;  %v7464_v27 = vld [vmem:[#allocation3 + $0x90] sm:$0xff]  ;;  %v7966_v46 = vmul.f32 %v14818_v10, %v14687_v4  ;;  %v7657_v8 = vmul.f32 %v14676_v60, %v14804_v53  ;;  %v14891_v4 = vld [vmem:[%s17391_s1 + $0xa8] sm:$0xff] }
0x3fc5   :  { %v7658_v55 = vmul.f32 %v14676_v60, %v14823_v52 }
0x3fc6   :  { %7715 = vst.msk [vmem:[#allocation3 + $0x58] sm:$0xff] %vm7383_vm13, %v7684_v38  ;;  %7561 = vst.msk [vmem:[#allocation3 + $0x88] sm:$0xff] %vm7383_vm13, %v7530_v29  ;;  %v7967_v38 = vmul.f32 %v14818_v10, %v14697_v1  ;;  %v14908_v1 = vld [vmem:[%s17391_s1 + $0xb0] sm:$0xff] }
0x3fcb   :  { %v7926_v43 = vld [vmem:[#allocation3] sm:$0xff] }
0x4078   :  { %v7196_v36 = vpop.f32.mrb[92].mxu1 }
0x4079   :  { %v7197_v37 = vadd.f32 %v13164_v3, %v7196_v36  ;;  %v12274_v9 = vpop.f32.mrb[93].mxu1  ;;  %v7455_v36 = vld [vmem:[#allocation3 + $0x48] sm:$0xff]  ;;  %v7610_v3 = vld [vmem:[#allocation3 + $0x20] sm:$0xff] }
0x407a   :  { %v7677_v14 = vadd.f32 %v7646_v33, %v7610_v3  ;;  %v7836_v33 = vadd.f32 %v7805_v5, %v7769_v11  ;;  %v7652_v3 = vmul.f32 %v14676_v60, %v14731_v23  ;;  %v7500_v5 = vmul.f32 %v14632_v44, %v14841_v51  ;;  %v14857_v11 = vld [vmem:[%s17391_s1 + $0x98] sm:$0xff] }
0x407b   :  { %v14556_v39 = vmin.f32 %v7126_v30, %v7197_v37  ;;  %v14708_v30 = vld [vmem:[%s17391_s1 + $0x48] sm:$0xff]  ;;  %v7492_v37 = vmul.f32 %v14632_v44, %v14720_v0 }
0x407c   :  { %v7491_v2 = vmul.f32 %v14632_v44, %v14708_v30  ;;  %7708 = vst.msk [vmem:[#allocation3 + $0x20] sm:$0xff] %vm7383_vm13, %v7677_v14  ;;  %v7650_v47 = vmul.f32 %v14676_v60, %v14708_v30  ;;  %v7461_v14 = vld [vmem:[#allocation3 + $0x78] sm:$0xff]  ;;  %7867 = vst.msk [vmem:[#allocation3 + $0x18] sm:$0xff] %vm7383_vm13, %v7836_v33  ;;  %v7809_v50 = vmul.f32 %v14742_v15, %v14708_v30 }
0x407d   :  { %17586 = vst [vmem:[#allocation8_spill] sm:$0xff] %v14556_v39  ;;  %12288 = vmatmul.mubr.msk.f32.vlgmr.msra.gmra.mrb[102].mxu0 %vm401_vm3, %v14556_v39  ;;  %v7523_v6 = vadd.f32 %v7492_v37, %v7456_v40  ;;  %v7528_v45 = vadd.f32 %v7497_v34, %v7461_v14  ;;  %v7965_v33 = vmul.f32 %v14818_v10, %v14671_v22  ;;  %v14874_v22 = vld [vmem:[%s17391_s1 + $0xa0] sm:$0xff] }
0x407e   :  { %v7522_v9 = vadd.f32 %v7491_v2, %v7455_v36  ;;  %v7681_v59 = vadd.f32 %v7650_v47, %v7614_v21  ;;  %v7527_v36 = vadd.f32 %v7496_v24, %v7460_v7  ;;  %v7618_v47 = vld [vmem:[#allocation3 + $0x60] sm:$0xff]  ;;  %v7993_v21 = vadd.f32 %v7962_v28, %v7926_v43  ;;  %v7619_v7 = vld [vmem:[#allocation3 + $0x68] sm:$0xff] }
0x407f   :  { %7554 = vst.msk [vmem:[#allocation3 + $0x50] sm:$0xff] %vm7383_vm13, %v7523_v6  ;;  %v7498_v6 = vmul.f32 %v14632_v44, %v14804_v53  ;;  %7559 = vst.msk [vmem:[#allocation3 + $0x78] sm:$0xff] %vm7383_vm13, %v7528_v45  ;;  %v7655_v24 = vmul.f32 %v14676_v60, %v14775_v17  ;;  %v7685_v12 = vadd.f32 %v7654_v62, %v7618_v47 }
0x4080   :  { %7553 = vst.msk [vmem:[#allocation3 + $0x48] sm:$0xff] %vm7383_vm13, %v7522_v9  ;;  %7712 = vst.msk [vmem:[#allocation3 + $0x40] sm:$0xff] %vm7383_vm13, %v7681_v59  ;;  %v7928_v59 = vld [vmem:[#allocation3 + $0x10] sm:$0xff]  ;;  %v7994_v34 = vadd.f32 %v7963_v32, %v7927_v16  ;;  %v7502_v49 = vmul.f32 %v14632_v44, %v14874_v22  ;;  %v7466_v32 = vld [vmem:[#allocation3 + $0xa0] sm:$0xff]  ;;  %v7503_v43 = vmul.f32 %v14632_v44, %v14891_v4 }
0x4081   :  { %7558 = vst.msk [vmem:[#allocation3 + $0x70] sm:$0xff] %vm7383_vm13, %v7527_v36  ;;  %v7529_v25 = vadd.f32 %v7498_v6, %v7462_v54  ;;  %8024 = vst.msk [vmem:[#allocation3] sm:$0xff] %vm7383_vm13, %v7993_v21  ;;  %v7501_v36 = vmul.f32 %v14632_v44, %v14857_v11  ;;  %v7811_v6 = vmul.f32 %v14742_v15, %v14731_v23 }
0x4082   :  { %7716 = vst.msk [vmem:[#allocation3 + $0x60] sm:$0xff] %vm7383_vm13, %v7685_v12  ;;  %8025 = vst.msk [vmem:[#allocation3 + $0x8] sm:$0xff] %vm7383_vm13, %v7994_v34  ;;  %v7533_v16 = vadd.f32 %v7502_v49, %v7466_v32  ;;  %v7623_v34 = vld [vmem:[#allocation3 + $0x88] sm:$0xff]  ;;  %v7815_v49 = vmul.f32 %v14742_v15, %v14790_v63  ;;  %v7661_v32 = vmul.f32 %v14676_v60, %v14874_v22 }
0x4083   :  { %v7770_v9 = vld [vmem:[#allocation3 + $0x20] sm:$0xff]  ;;  %7560 = vst.msk [vmem:[#allocation3 + $0x80] sm:$0xff] %vm7383_vm13, %v7529_v25  ;;  %v7532_v54 = vadd.f32 %v7501_v36, %v7465_v19  ;;  %v7812_v25 = vmul.f32 %v14742_v15, %v14747_v56  ;;  %v7814_v36 = vmul.f32 %v14742_v15, %v14775_v17  ;;  %v7660_v19 = vmul.f32 %v14676_v60, %v14857_v11 }
0x4084   :  { %v7837_v42 = vadd.f32 %v7806_v31, %v7770_v9  ;;  %v7686_v9 = vadd.f32 %v7655_v24, %v7619_v7  ;;  %v7968_v24 = vmul.f32 %v14818_v10, %v14708_v30  ;;  %7564 = vst.msk [vmem:[#allocation3 + $0xa0] sm:$0xff] %vm7383_vm13, %v7533_v16  ;;  %v14925_v30 = vld [vmem:[%s17391_s1 + $0xb8] sm:$0xff] }
0x4085   :  { %7563 = vst.msk [vmem:[#allocation3 + $0x98] sm:$0xff] %vm7383_vm13, %v7532_v54 }
0x4086   :  { %v7616_v40 = vld [vmem:[#allocation3 + $0x50] sm:$0xff]  ;;  %7868 = vst.msk [vmem:[#allocation3 + $0x20] sm:$0xff] %vm7383_vm13, %v7837_v42  ;;  %7717 = vst.msk [vmem:[#allocation3 + $0x68] sm:$0xff] %vm7383_vm13, %v7686_v9  ;;  %v7621_v18 = vld [vmem:[#allocation3 + $0x78] sm:$0xff]  ;;  %v7998_v9 = vadd.f32 %v7967_v38, %v7931_v41 }
0x4087   :  { %v7615_v2 = vld [vmem:[#allocation3 + $0x48] sm:$0xff]  ;;  %v7683_v48 = vadd.f32 %v7652_v3, %v7616_v40  ;;  %v7531_v3 = vadd.f32 %v7500_v5, %v7464_v27  ;;  %v7774_v14 = vld [vmem:[#allocation3 + $0x40] sm:$0xff]  ;;  %v7929_v40 = vld [vmem:[#allocation3 + $0x18] sm:$0xff]  ;;  %v7688_v47 = vadd.f32 %v7657_v8, %v7621_v18  ;;  %v7813_v5 = vmul.f32 %v14742_v15, %v14762_v26 }
0x4088   :  { %v7682_v37 = vadd.f32 %v7651_v20, %v7615_v2  ;;  %v7773_v20 = vld [vmem:[#allocation3 + $0x38] sm:$0xff]  ;;  %v7810_v2 = vmul.f32 %v14742_v15, %v14720_v0  ;;  %v7620_v42 = vld [vmem:[#allocation3 + $0x70] sm:$0xff]  ;;  %v7996_v35 = vadd.f32 %v7965_v33, %v7929_v40  ;;  %v7659_v27 = vmul.f32 %v14676_v60, %v14841_v51  ;;  %8029 = vst.msk [vmem:[#allocation3 + $0x28] sm:$0xff] %vm7383_vm13, %v7998_v9  ;;  %v7470_v38 = vld [vmem:[#allocation3 + $0xc0] sm:$0xff] }
0x4089   :  { %7714 = vst.msk [vmem:[#allocation3 + $0x50] sm:$0xff] %vm7383_vm13, %v7683_v48  ;;  %v7840_v31 = vadd.f32 %v7809_v50, %v7773_v20  ;;  %v7995_v48 = vadd.f32 %v7964_v58, %v7928_v59  ;;  %7562 = vst.msk [vmem:[#allocation3 + $0x90] sm:$0xff] %vm7383_vm13, %v7531_v3  ;;  %v7467_v58 = vld [vmem:[#allocation3 + $0xa8] sm:$0xff]  ;;  %v7504_v20 = vmul.f32 %v14632_v44, %v14908_v1  ;;  %v7468_v33 = vld [vmem:[#allocation3 + $0xb0] sm:$0xff] }
0x408a   :  { %7713 = vst.msk [vmem:[#allocation3 + $0x48] sm:$0xff] %vm7383_vm13, %v7682_v37  ;;  %v7656_v37 = vmul.f32 %v14676_v60, %v14790_v63  ;;  %v7841_v45 = vadd.f32 %v7810_v2, %v7774_v14  ;;  %v7622_v21 = vld [vmem:[#allocation3 + $0x80] sm:$0xff]  ;;  %8027 = vst.msk [vmem:[#allocation3 + $0x18] sm:$0xff] %vm7383_vm13, %v7996_v35  ;;  %v7534_v59 = vadd.f32 %v7503_v43, %v7467_v58  ;;  %v7777_v2 = vld [vmem:[#allocation3 + $0x58] sm:$0xff] }
0x408b   :  { %7871 = vst.msk [vmem:[#allocation3 + $0x38] sm:$0xff] %vm7383_vm13, %v7840_v31  ;;  %8026 = vst.msk [vmem:[#allocation3 + $0x10] sm:$0xff] %vm7383_vm13, %v7995_v48  ;;  %v7689_v7 = vadd.f32 %v7658_v55, %v7622_v21  ;;  %v7932_v31 = vld [vmem:[#allocation3 + $0x30] sm:$0xff]  ;;  %v7844_v3 = vadd.f32 %v7813_v5, %v7777_v2  ;;  %v7505_v14 = vmul.f32 %v14632_v44, %v14925_v30 }
0x408c   :  { %v7687_v57 = vadd.f32 %v7656_v37, %v7620_v42  ;;  %7872 = vst.msk [vmem:[#allocation3 + $0x40] sm:$0xff] %vm7383_vm13, %v7841_v45  ;;  %7719 = vst.msk [vmem:[#allocation3 + $0x78] sm:$0xff] %vm7383_vm13, %v7688_v47  ;;  %v7969_v37 = vmul.f32 %v14818_v10, %v14720_v0  ;;  %v7535_v40 = vadd.f32 %v7504_v20, %v7468_v33  ;;  %v14942_v0 = vld [vmem:[%s17391_s1 + $0xc0] sm:$0xff]  ;;  %v7625_v35 = vld [vmem:[#allocation3 + $0x98] sm:$0xff] }
0x408d   :  { %v7930_v28 = vld [vmem:[#allocation3 + $0x20] sm:$0xff]  ;;  %7565 = vst.msk [vmem:[#allocation3 + $0xa8] sm:$0xff] %vm7383_vm13, %v7534_v59  ;;  %v7690_v42 = vadd.f32 %v7659_v27, %v7623_v34  ;;  %7720 = vst.msk [vmem:[#allocation3 + $0x80] sm:$0xff] %vm7383_vm13, %v7689_v7  ;;  %v7970_v8 = vmul.f32 %v14818_v10, %v14731_v23  ;;  %v14959_v23 = vld [vmem:[%s17391_s1 + $0xc8] sm:$0xff]  ;;  %v7816_v43 = vmul.f32 %v14742_v15, %v14804_v53 }
0x408e   :  { %7718 = vst.msk [vmem:[#allocation3 + $0x70] sm:$0xff] %vm7383_vm13, %v7687_v57  ;;  %v7997_v12 = vadd.f32 %v7966_v46, %v7930_v28  ;;  %v7469_v46 = vld [vmem:[#allocation3 + $0xb8] sm:$0xff]  ;;  %7875 = vst.msk [vmem:[#allocation3 + $0x58] sm:$0xff] %vm7383_vm13, %v7844_v3  ;;  %v7999_v57 = vadd.f32 %v7968_v24, %v7932_v31  ;;  %v7971_v55 = vmul.f32 %v14818_v10, %v14747_v56  ;;  %v14976_v56 = vld [vmem:[%s17391_s1 + $0xd0] sm:$0xff] }
0x408f   :  { %v7536_v28 = vadd.f32 %v7505_v14, %v7469_v46  ;;  %7566 = vst.msk [vmem:[#allocation3 + $0xb0] sm:$0xff] %vm7383_vm13, %v7535_v40  ;;  %7721 = vst.msk [vmem:[#allocation3 + $0x88] sm:$0xff] %vm7383_vm13, %v7690_v42  ;;  %v7662_v58 = vmul.f32 %v14676_v60, %v14891_v4  ;;  %v7692_v21 = vadd.f32 %v7661_v32, %v7625_v35  ;;  %v7471_v24 = vld [vmem:[#allocation3 + $0xc8] sm:$0xff] }
0x4090   :  { %v7776_v50 = vld [vmem:[#allocation3 + $0x50] sm:$0xff]  ;;  %8028 = vst.msk [vmem:[#allocation3 + $0x20] sm:$0xff] %vm7383_vm13, %v7997_v12  ;;  %8030 = vst.msk [vmem:[#allocation3 + $0x30] sm:$0xff] %vm7383_vm13, %v7999_v57  ;;  %v7626_v12 = vld [vmem:[#allocation3 + $0xa0] sm:$0xff]  ;;  %v7817_v20 = vmul.f32 %v14742_v15, %v14823_v52  ;;  %v7972_v27 = vmul.f32 %v14818_v10, %v14762_v26  ;;  %v7508_v2 = vmul.f32 %v14632_v44, %v14976_v56 }
0x4091   :  { %v7775_v13 = vld [vmem:[#allocation3 + $0x48] sm:$0xff]  ;;  %v7843_v29 = vadd.f32 %v7812_v25, %v7776_v50  ;;  %v7624_v48 = vld [vmem:[#allocation3 + $0x90] sm:$0xff]  ;;  %v7507_v50 = vmul.f32 %v14632_v44, %v14959_v23  ;;  %7567 = vst.msk [vmem:[#allocation3 + $0xb8] sm:$0xff] %vm7383_vm13, %v7536_v28  ;;  %v7663_v33 = vmul.f32 %v14676_v60, %v14908_v1  ;;  %v7693_v34 = vadd.f32 %v7662_v58, %v7626_v12  ;;  %v14993_v26 = vld [vmem:[%s17391_s1 + $0xd8] sm:$0xff] }
0x4092   :  { %v7842_v62 = vadd.f32 %v7811_v6, %v7775_v13  ;;  %v7778_v6 = vld [vmem:[#allocation3 + $0x60] sm:$0xff]  ;;  %v7933_v45 = vld [vmem:[#allocation3 + $0x38] sm:$0xff]  ;;  %v7506_v13 = vmul.f32 %v14632_v44, %v14942_v0  ;;  %v7691_v18 = vadd.f32 %v7660_v19, %v7624_v48  ;;  %v7779_v25 = vld [vmem:[#allocation3 + $0x68] sm:$0xff]  ;;  %7723 = vst.msk [vmem:[#allocation3 + $0x98] sm:$0xff] %vm7383_vm13, %v7692_v21  ;;  %v7818_v14 = vmul.f32 %v14742_v15, %v14841_v51 }
0x4093   :  { %7874 = vst.msk [vmem:[#allocation3 + $0x50] sm:$0xff] %vm7383_vm13, %v7843_v29  ;;  %v7845_v54 = vadd.f32 %v7814_v36, %v7778_v6  ;;  %v7846_v16 = vadd.f32 %v7815_v49, %v7779_v25  ;;  %v8000_v47 = vadd.f32 %v7969_v37, %v7933_v45  ;;  %v7538_v31 = vadd.f32 %v7507_v50, %v7471_v24  ;;  %v7781_v36 = vld [vmem:[#allocation3 + $0x78] sm:$0xff]  ;;  %v7472_v37 = vld [vmem:[#allocation3 + $0xd0] sm:$0xff] }
0x4094   :  { %7873 = vst.msk [vmem:[#allocation3 + $0x48] sm:$0xff] %vm7383_vm13, %v7842_v62  ;;  %v7934_v62 = vld [vmem:[#allocation3 + $0x40] sm:$0xff]  ;;  %v7537_v41 = vadd.f32 %v7506_v13, %v7470_v38  ;;  %7722 = vst.msk [vmem:[#allocation3 + $0x90] sm:$0xff] %vm7383_vm13, %v7691_v18  ;;  %v7627_v9 = vld [vmem:[#allocation3 + $0xa8] sm:$0xff]  ;;  %v7848_v40 = vadd.f32 %v7817_v20, %v7781_v36  ;;  %v7973_v19 = vmul.f32 %v14818_v10, %v14775_v17 }
0x4095   :  { %7876 = vst.msk [vmem:[#allocation3 + $0x60] sm:$0xff] %vm7383_vm13, %v7845_v54  ;;  %v7780_v5 = vld [vmem:[#allocation3 + $0x70] sm:$0xff]  ;;  %7877 = vst.msk [vmem:[#allocation3 + $0x68] sm:$0xff] %vm7383_vm13, %v7846_v16  ;;  %v8001_v7 = vadd.f32 %v7970_v8, %v7934_v62  ;;  %v7509_v6 = vmul.f32 %v14632_v44, %v14993_v26  ;;  %v7539_v45 = vadd.f32 %v7508_v2, %v7472_v37  ;;  %v7782_v49 = vld [vmem:[#allocation3 + $0x80] sm:$0xff] }
0x4096   :  { %v7847_v59 = vadd.f32 %v7816_v43, %v7780_v5  ;;  %8031 = vst.msk [vmem:[#allocation3 + $0x38] sm:$0xff] %vm7383_vm13, %v8000_v47  ;;  %7568 = vst.msk [vmem:[#allocation3 + $0xc0] sm:$0xff] %vm7383_vm13, %v7537_v41  ;;  %v7664_v46 = vmul.f32 %v14676_v60, %v14925_v30  ;;  %v7694_v48 = vadd.f32 %v7663_v33, %v7627_v9  ;;  %v7937_v54 = vld [vmem:[#allocation3 + $0x58] sm:$0xff]  ;;  %v15010_v17 = vld [vmem:[%s17391_s1 + $0xe0] sm:$0xff] }
0x4097   :  { %8032 = vst.msk [vmem:[#allocation3 + $0x40] sm:$0xff] %vm7383_vm13, %v8001_v7  ;;  %7569 = vst.msk [vmem:[#allocation3 + $0xc8] sm:$0xff] %vm7383_vm13, %v7538_v31  ;;  %v7473_v8 = vld [vmem:[#allocation3 + $0xd8] sm:$0xff]  ;;  %v7628_v57 = vld [vmem:[#allocation3 + $0xb0] sm:$0xff]  ;;  %v7819_v13 = vmul.f32 %v14742_v15, %v14857_v11  ;;  %v7849_v28 = vadd.f32 %v7818_v14, %v7782_v49  ;;  %v7974_v32 = vmul.f32 %v14818_v10, %v14790_v63 }
0x4098   :  { %7878 = vst.msk [vmem:[#allocation3 + $0x70] sm:$0xff] %vm7383_vm13, %v7847_v59  ;;  %7724 = vst.msk [vmem:[#allocation3 + $0xa0] sm:$0xff] %vm7383_vm13, %v7693_v34  ;;  %v7510_v25 = vmul.f32 %v14632_v44, %v15010_v17  ;;  %v7540_v62 = vadd.f32 %v7509_v6, %v7473_v8  ;;  %v7665_v38 = vmul.f32 %v14676_v60, %v14942_v0  ;;  %v7783_v43 = vld [vmem:[#allocation3 + $0x88] sm:$0xff]  ;;  %v7629_v47 = vld [vmem:[#allocation3 + $0xb8] sm:$0xff] }
0x4099   :  { %7879 = vst.msk [vmem:[#allocation3 + $0x78] sm:$0xff] %vm7383_vm13, %v7848_v40  ;;  %7570 = vst.msk [vmem:[#allocation3 + $0xd0] sm:$0xff] %vm7383_vm13, %v7539_v45  ;;  %v7695_v35 = vadd.f32 %v7664_v46, %v7628_v57  ;;  %v15027_v63 = vld [vmem:[%s17391_s1 + $0xe8] sm:$0xff]  ;;  %v7820_v50 = vmul.f32 %v14742_v15, %v14874_v22  ;;  %v7850_v41 = vadd.f32 %v7819_v13, %v7783_v43  ;;  %v7785_v14 = vld [vmem:[#allocation3 + $0x98] sm:$0xff] }
0x409a   :  { %v7936_v3 = vld [vmem:[#allocation3 + $0x50] sm:$0xff]  ;;  %7725 = vst.msk [vmem:[#allocation3 + $0xa8] sm:$0xff] %vm7383_vm13, %v7694_v48  ;;  %7880 = vst.msk [vmem:[#allocation3 + $0x80] sm:$0xff] %vm7383_vm13, %v7849_v28  ;;  %v7975_v58 = vmul.f32 %v14818_v10, %v14804_v53  ;;  %v8004_v21 = vadd.f32 %v7973_v19, %v7937_v54  ;;  %v7511_v5 = vmul.f32 %v14632_v44, %v15027_v63 }
0x409b   :  { %v7935_v29 = vld [vmem:[#allocation3 + $0x48] sm:$0xff]  ;;  %v8003_v18 = vadd.f32 %v7972_v27, %v7936_v3  ;;  %7571 = vst.msk [vmem:[#allocation3 + $0xd8] sm:$0xff] %vm7383_vm13, %v7540_v62  ;;  %v7666_v24 = vmul.f32 %v14676_v60, %v14959_v23  ;;  %v7696_v12 = vadd.f32 %v7665_v38, %v7629_v47  ;;  %7726 = vst.msk [vmem:[#allocation3 + $0xb0] sm:$0xff] %vm7383_vm13, %v7695_v35  ;;  %v7784_v20 = vld [vmem:[#allocation3 + $0x90] sm:$0xff] }
0x409c   :  { %v8002_v42 = vadd.f32 %v7971_v55, %v7935_v29  ;;  %v7938_v16 = vld [vmem:[#allocation3 + $0x60] sm:$0xff]  ;;  %v7939_v59 = vld [vmem:[#allocation3 + $0x68] sm:$0xff]  ;;  %v15044_v53 = vld [vmem:[%s17391_s1 + $0xf0] sm:$0xff]  ;;  %v7821_v2 = vmul.f32 %v14742_v15, %v14891_v4  ;;  %v7851_v31 = vadd.f32 %v7820_v50, %v7784_v20  ;;  %7881 = vst.msk [vmem:[#allocation3 + $0x88] sm:$0xff] %vm7383_vm13, %v7850_v41  ;;  %v7976_v33 = vmul.f32 %v14818_v10, %v14823_v52 }
0x409d   :  { %v7474_v55 = vld [vmem:[#allocation3 + $0xe0] sm:$0xff]  ;;  %8034 = vst.msk [vmem:[#allocation3 + $0x50] sm:$0xff] %vm7383_vm13, %v8003_v18  ;;  %v7475_v27 = vld [vmem:[#allocation3 + $0xe8] sm:$0xff]  ;;  %v8005_v34 = vadd.f32 %v7974_v32, %v7938_v16  ;;  %8035 = vst.msk [vmem:[#allocation3 + $0x58] sm:$0xff] %vm7383_vm13, %v8004_v21  ;;  %v7512_v36 = vmul.f32 %v14632_v44, %v15044_v53  ;;  %v7667_v37 = vmul.f32 %v14676_v60, %v14976_v56 }
0x409e   :  { %8033 = vst.msk [vmem:[#allocation3 + $0x48] sm:$0xff] %vm7383_vm13, %v8002_v42  ;;  %v7541_v29 = vadd.f32 %v7510_v25, %v7474_v55  ;;  %v7630_v7 = vld [vmem:[#allocation3 + $0xc0] sm:$0xff]  ;;  %v7542_v3 = vadd.f32 %v7511_v5, %v7475_v27  ;;  %7727 = vst.msk [vmem:[#allocation3 + $0xb8] sm:$0xff] %vm7383_vm13, %v7696_v12  ;;  %v7476_v19 = vld [vmem:[#allocation3 + $0xf0] sm:$0xff]  ;;  %v7822_v6 = vmul.f32 %v14742_v15, %v14908_v1 }
0x409f   :  { %v7697_v9 = vadd.f32 %v7666_v24, %v7630_v7  ;;  %v7940_v40 = vld [vmem:[#allocation3 + $0x70] sm:$0xff]  ;;  %v7631_v42 = vld [vmem:[#allocation3 + $0xc8] sm:$0xff]  ;;  %v7786_v52 = vld [vmem:[#allocation3 + $0xa0] sm:$0xff]  ;;  %v7852_v45 = vadd.f32 %v7821_v2, %v7785_v14  ;;  %7882 = vst.msk [vmem:[#allocation3 + $0x90] sm:$0xff] %vm7383_vm13, %v7851_v31  ;;  %v7977_v44 = vmul.f32 %v14818_v10, %v14841_v51  ;;  %v8006_v46 = vadd.f32 %v7975_v58, %v7939_v59 }
0x40a0   :  { %7572 = vst.msk [vmem:[#allocation3 + $0xe0] sm:$0xff] %vm7383_vm13, %v7541_v29  ;;  %8036 = vst.msk [vmem:[#allocation3 + $0x60] sm:$0xff] %vm7383_vm13, %v8005_v34  ;;  %v7543_v48 = vadd.f32 %v7512_v36, %v7476_v19  ;;  %v7668_v49 = vmul.f32 %v14676_v60, %v14993_v26  ;;  %v7698_v54 = vadd.f32 %v7667_v37, %v7631_v42  ;;  %v7941_v57 = vld [vmem:[#allocation3 + $0x78] sm:$0xff]  ;;  %v7632_v13 = vld [vmem:[#allocation3 + $0xd0] sm:$0xff] }
0x40a1   :  { %7573 = vst.msk [vmem:[#allocation3 + $0xe8] sm:$0xff] %vm7383_vm13, %v7542_v3  ;;  %7728 = vst.msk [vmem:[#allocation3 + $0xc0] sm:$0xff] %vm7383_vm13, %v7697_v9  ;;  %v7823_v8 = vmul.f32 %v14742_v15, %v14925_v30  ;;  %v7787_v28 = vld [vmem:[#allocation3 + $0xa8] sm:$0xff]  ;;  %v7853_v32 = vadd.f32 %v7822_v6, %v7786_v52  ;;  %v7978_v51 = vmul.f32 %v14818_v10, %v14857_v11  ;;  %v7942_v16 = vld [vmem:[#allocation3 + $0x80] sm:$0xff] }
0x40a2   :  { %7883 = vst.msk [vmem:[#allocation3 + $0x98] sm:$0xff] %vm7383_vm13, %v7852_v45  ;;  %v8007_v18 = vadd.f32 %v7976_v33, %v7940_v40  ;;  %v8008_v25 = vadd.f32 %v7977_v44, %v7941_v57  ;;  %8037 = vst.msk [vmem:[#allocation3 + $0x68] sm:$0xff] %vm7383_vm13, %v8006_v46  ;;  %v7669_v62 = vmul.f32 %v14676_v60, %v15010_v17  ;;  %v7633_v55 = vld [vmem:[#allocation3 + $0xd8] sm:$0xff]  ;;  %v7788_v47 = vld [vmem:[#allocation3 + $0xb0] sm:$0xff] }
0x40a3   :  { %7574 = vst.msk [vmem:[#allocation3 + $0xf0] sm:$0xff] %vm7383_vm13, %v7543_v48  ;;  %v7699_v38 = vadd.f32 %v7668_v49, %v7632_v13  ;;  %7729 = vst.msk [vmem:[#allocation3 + $0xc8] sm:$0xff] %vm7383_vm13, %v7698_v54  ;;  %v7824_v35 = vmul.f32 %v14742_v15, %v14942_v0  ;;  %v7854_v43 = vadd.f32 %v7823_v8, %v7787_v28  ;;  %v7943_v29 = vld [vmem:[#allocation3 + $0x88] sm:$0xff] }
0x40a4   :  { %7884 = vst.msk [vmem:[#allocation3 + $0xa0] sm:$0xff] %vm7383_vm13, %v7853_v32  ;;  %v7979_v11 = vmul.f32 %v14818_v10, %v14874_v22  ;;  %v8009_v50 = vadd.f32 %v7978_v51, %v7942_v16  ;;  %8038 = vst.msk [vmem:[#allocation3 + $0x70] sm:$0xff] %vm7383_vm13, %v8007_v18  ;;  %v7670_v41 = vmul.f32 %v14676_v60, %v15027_v63 }
0x40a5   :  { %8039 = vst.msk [vmem:[#allocation3 + $0x78] sm:$0xff] %vm7383_vm13, %v8008_v25  ;;  %v7700_v58 = vadd.f32 %v7669_v62, %v7633_v55  ;;  %7730 = vst.msk [vmem:[#allocation3 + $0xd0] sm:$0xff] %vm7383_vm13, %v7699_v38  ;;  %v7825_v21 = vmul.f32 %v14742_v15, %v14959_v23  ;;  %v7855_v5 = vadd.f32 %v7824_v35, %v7788_v47  ;;  %v7789_v22 = vld [vmem:[#allocation3 + $0xb8] sm:$0xff]  ;;  %v15149_v47 = vld [vmem:[%s17391_s1 + $0x28] sm:$0xff] }
0x40a6   :  { %7885 = vst.msk [vmem:[#allocation3 + $0xa8] sm:$0xff] %vm7383_vm13, %v7854_v43  ;;  %v7980_v12 = vmul.f32 %v14818_v10, %v14891_v4  ;;  %v8010_v20 = vadd.f32 %v7979_v11, %v7943_v29  ;;  %8040 = vst.msk [vmem:[#allocation3 + $0x80] sm:$0xff] %vm7383_vm13, %v8009_v50  ;;  %v7671_v59 = vmul.f32 %v14676_v60, %v15044_v53  ;;  %v7944_v31 = vld [vmem:[#allocation3 + $0x90] sm:$0xff]  ;;  %v15103_v4 = vld [vmem:[%s17391_s1 + $0xf8] sm:$0xff] }
0x40a7   :  { %v7634_v24 = vld [vmem:[#allocation3 + $0xe0] sm:$0xff]  ;;  %7731 = vst.msk [vmem:[#allocation3 + $0xd8] sm:$0xff] %vm7383_vm13, %v7700_v58  ;;  %v7826_v7 = vmul.f32 %v14742_v15, %v14976_v56  ;;  %v7856_v2 = vadd.f32 %v7825_v21, %v7789_v22  ;;  %7886 = vst.msk [vmem:[#allocation3 + $0xb0] sm:$0xff] %vm7383_vm13, %v7855_v5  ;;  %v7981_v36 = vmul.f32 %v14818_v10, %v14908_v1  ;;  %v15154_v11 = vld [vmem:[%s17391_s1 + $0x30] sm:$0xff] }
0x40a8   :  { %v7701_v27 = vadd.f32 %v7670_v41, %v7634_v24  ;;  %v7635_v33 = vld [vmem:[#allocation3 + $0xe8] sm:$0xff]  ;;  %v7790_v34 = vld [vmem:[#allocation3 + $0xc0] sm:$0xff]  ;;  %v8011_v3 = vadd.f32 %v7980_v12, %v7944_v31  ;;  %8041 = vst.msk [vmem:[#allocation3 + $0x88] sm:$0xff] %vm7383_vm13, %v8010_v20  ;;  %v7672_v37 = vmul.f32 %v14676_v60, %v15103_v4  ;;  %v7827_v14 = vmul.f32 %v14742_v15, %v14993_v26  ;;  %v15185_v20 = vld [vmem:[%s17391_s1 + $0x50] sm:$0xff] }
0x40a9   :  { %v7702_v9 = vadd.f32 %v7671_v59, %v7635_v33  ;;  %v7857_v40 = vadd.f32 %v7826_v7, %v7790_v34  ;;  %7887 = vst.msk [vmem:[#allocation3 + $0xb8] sm:$0xff] %vm7383_vm13, %v7856_v2  ;;  %v7945_v19 = vld [vmem:[#allocation3 + $0x98] sm:$0xff]  ;;  %v7982_v1 = vmul.f32 %v14818_v10, %v14925_v30  ;;  %v7828_v60 = vmul.f32 %v14742_v15, %v15010_v17  ;;  %v15164_v50 = vld [vmem:[%s17391_s1 + $0x100] sm:$0xff]  ;;  %v15174_v5 = vld [vmem:[%s17391_s1 + $0x48] sm:$0xff] }
0x40aa   :  { %7732 = vst.msk [vmem:[#allocation3 + $0xe0] sm:$0xff] %vm7383_vm13, %v7701_v27  ;;  %v7636_v42 = vld [vmem:[#allocation3 + $0xf0] sm:$0xff]  ;;  %v7791_v52 = vld [vmem:[#allocation3 + $0xc8] sm:$0xff]  ;;  %v8012_v6 = vadd.f32 %v7981_v36, %v7945_v19  ;;  %8042 = vst.msk [vmem:[#allocation3 + $0x90] sm:$0xff] %vm7383_vm13, %v8011_v3  ;;  %v7983_v48 = vmul.f32 %v14818_v10, %v14942_v0  ;;  %v7829_v30 = vmul.f32 %v14742_v15, %v15027_v63 }
0x40ab   :  { %v7703_v45 = vadd.f32 %v7672_v37, %v7636_v42  ;;  %7733 = vst.msk [vmem:[#allocation3 + $0xe8] sm:$0xff] %vm7383_vm13, %v7702_v9  ;;  %v7858_v44 = vadd.f32 %v7827_v14, %v7791_v52  ;;  %7888 = vst.msk [vmem:[#allocation3 + $0xc0] sm:$0xff] %vm7383_vm13, %v7857_v40  ;;  %v7946_v46 = vld [vmem:[#allocation3 + $0xa0] sm:$0xff]  ;;  %v7984_v13 = vmul.f32 %v14818_v10, %v14959_v23  ;;  %v15190_v59 = vld [vmem:[%s17391_s1 + $0x58] sm:$0xff] }
0x40ac   :  { %v7792_v49 = vld [vmem:[#allocation3 + $0xd0] sm:$0xff]  ;;  %v8013_v8 = vadd.f32 %v7982_v1, %v7946_v46  ;;  %8043 = vst.msk [vmem:[#allocation3 + $0x98] sm:$0xff] %vm7383_vm13, %v8012_v6  ;;  %v7830_v0 = vmul.f32 %v14742_v15, %v15044_v53  ;;  %v7985_v25 = vmul.f32 %v14818_v10, %v14976_v56  ;;  %v7831_v23 = vmul.f32 %v14742_v15, %v15103_v4  ;;  %v8055_v56 = vld [vmem:[%s17391_s1 + $0x20] sm:$0xff]  ;;  %v15200_v7 = vld [vmem:[%s17391_s1 + $0x68] sm:$0xff] }
0x40ad   :  { %v7947_v54 = vld [vmem:[#allocation3 + $0xa8] sm:$0xff]  ;;  %7734 = vst.msk [vmem:[#allocation3 + $0xf0] sm:$0xff] %vm7383_vm13, %v7703_v45  ;;  %v7859_v57 = vadd.f32 %v7828_v60, %v7792_v49  ;;  %7889 = vst.msk [vmem:[#allocation3 + $0xc8] sm:$0xff] %vm7383_vm13, %v7858_v44  ;;  %v7986_v16 = vmul.f32 %v14818_v10, %v14993_v26  ;;  %v15159_v26 = vld [vmem:[%s17391_s1 + $0x38] sm:$0xff]  ;;  %v7832_v29 = vmul.f32 %v14742_v15, %v15164_v50 }
0x40ae   :  { %v8014_v28 = vadd.f32 %v7983_v48, %v7947_v54  ;;  %v7793_v32 = vld [vmem:[#allocation3 + $0xd8] sm:$0xff]  ;;  %v7948_v51 = vld [vmem:[#allocation3 + $0xb0] sm:$0xff]  ;;  %8044 = vst.msk [vmem:[#allocation3 + $0xa0] sm:$0xff] %vm7383_vm13, %v8013_v8  ;;  %17587 = vst [vmem:[#allocation9_spill] sm:$0xff] %v15154_v11  ;;  %v7987_v22 = vmul.f32 %v14818_v10, %v15010_v17  ;;  %v7988_v31 = vmul.f32 %v14818_v10, %v15027_v63 }
0x40af   :  { %v7860_v18 = vadd.f32 %v7829_v30, %v7793_v32  ;;  %7890 = vst.msk [vmem:[#allocation3 + $0xd0] sm:$0xff] %vm7383_vm13, %v7859_v57  ;;  %v8015_v62 = vadd.f32 %v7984_v13, %v7948_v51  ;;  %17588 = vst [vmem:[#allocation10_spill] sm:$0xff] %v15159_v26  ;;  %v15169_v21 = vld [vmem:[%s17391_s1 + $0x40] sm:$0xff]  ;;  %v15209_v34 = vld [vmem:[%s17391_s1 + $0x70] sm:$0xff]  ;;  %v7989_v52 = vmul.f32 %v14818_v10, %v15044_v53 }
0x40b0   :  { %8045 = vst.msk [vmem:[#allocation3 + $0xa8] sm:$0xff] %vm7383_vm13, %v8014_v28  ;;  %v7949_v35 = vld [vmem:[#allocation3 + $0xb8] sm:$0xff]  ;;  %17589 = vst [vmem:[#allocation11_spill] sm:$0xff] %v15169_v21  ;;  %v15195_v15 = vld [vmem:[%s17391_s1 + $0x60] sm:$0xff]  ;;  %v7990_v13 = vmul.f32 %v14818_v10, %v15103_v4 }
0x40b1   :  { %v7794_v38 = vld [vmem:[#allocation3 + $0xe0] sm:$0xff]  ;;  %7891 = vst.msk [vmem:[#allocation3 + $0xd8] sm:$0xff] %vm7383_vm13, %v7860_v18  ;;  %v8016_v55 = vadd.f32 %v7985_v25, %v7949_v35  ;;  %8046 = vst.msk [vmem:[#allocation3 + $0xb0] sm:$0xff] %vm7383_vm13, %v8015_v62  ;;  %v15214_v36 = vld [vmem:[%s17391_s1 + $0x78] sm:$0xff] }
0x40b2   :  { %v7861_v43 = vadd.f32 %v7830_v0, %v7794_v38  ;;  %v7795_v41 = vld [vmem:[#allocation3 + $0xe8] sm:$0xff]  ;;  %v7950_v58 = vld [vmem:[#allocation3 + $0xc0] sm:$0xff]  ;;  %17590 = vst [vmem:[#allocation12_spill] sm:$0xff] %v15174_v5  ;;  %17591 = vst [vmem:[#allocation13_spill] sm:$0xff] %v15185_v20 }
0x40b3   :  { %v7862_v24 = vadd.f32 %v7831_v23, %v7795_v41  ;;  %v8017_v12 = vadd.f32 %v7986_v16, %v7950_v58  ;;  %8047 = vst.msk [vmem:[#allocation3 + $0xb8] sm:$0xff] %vm7383_vm13, %v8016_v55  ;;  %17592 = vst [vmem:[#allocation14_spill] sm:$0xff] %v15190_v59  ;;  %v15219_v3 = vld [vmem:[%s17397_s7 + $0x4] ss:$0 sm:$0xff]  ;;  %v15229_v9 = vld [vmem:[%s17391_s1 + $0x88] sm:$0xff] }
0x40b4   :  { %7892 = vst.msk [vmem:[#allocation3 + $0xe0] sm:$0xff] %vm7383_vm13, %v7861_v43  ;;  %17593 = vst [vmem:[#allocation15_spill] sm:$0xff] %v15195_v15  ;;  %v7796_v27 = vld [vmem:[#allocation3 + $0xf0] sm:$0xff]  ;;  %v7951_v17 = vld [vmem:[#allocation3 + $0xc8] sm:$0xff]  ;;  %v15232_v14 = vmul.f32 %v15219_v3, %v8055_v56  ;;  %v15236_v40 = vmul.f32 %v15219_v3, %v15149_v47  ;;  %v15240_v19 = vmul.f32 %v15219_v3, %v15154_v11 }
0x40b5   :  { %17594 = vst [vmem:[#allocation16_spill] sm:$0xff] %v15200_v7  ;;  %v7863_v2 = vadd.f32 %v7832_v29, %v7796_v27  ;;  %7893 = vst.msk [vmem:[#allocation3 + $0xe8] sm:$0xff] %vm7383_vm13, %v7862_v24  ;;  %v8018_v33 = vadd.f32 %v7987_v22, %v7951_v17  ;;  %v15224_v63 = vld [vmem:[%s17391_s1 + $0x80] sm:$0xff]  ;;  %v15244_v42 = vmul.f32 %v15219_v3, %v15159_v26  ;;  %v15253_v6 = vld [vmem:[%s17391_s1 + $0x90] sm:$0xff] }
0x40b6   :  { %8048 = vst.msk [vmem:[#allocation3 + $0xc0] sm:$0xff] %vm7383_vm13, %v8017_v12  ;;  %17595 = vst [vmem:[#allocation17_spill] sm:$0xff] %v15209_v34  ;;  %v7952_v37 = vld [vmem:[#allocation3 + $0xd0] sm:$0xff]  ;;  %v15258_v45 = vld [vmem:[%s17391_s1 + $0x98] sm:$0xff]  ;;  %v15267_v53 = vmul.f32 %v15219_v3, %v15169_v21  ;;  %v15271_v44 = vmul.f32 %v15219_v3, %v15174_v5  ;;  %v15285_v54 = vmul.f32 %v15219_v3, %v15185_v20 }
0x40b7   :  { %17596 = vst [vmem:[#allocation18_spill] sm:$0xff] %v15214_v36  ;;  %17597 = vst [vmem:[#allocation19_spill] sm:$0xff] %v15224_v63  ;;  %v8019_v1 = vadd.f32 %v7988_v31, %v7952_v37  ;;  %v15263_v60 = vld [vmem:[%s17391_s1 + $0xa0] sm:$0xff]  ;;  %v15276_v48 = vld [vmem:[%s17391_s1 + $0xa8] sm:$0xff]  ;;  %v15289_v8 = vmul.f32 %v15219_v3, %v15190_v59  ;;  %v15293_v30 = vmul.f32 %v15219_v3, %v15195_v15 }
0x40b8   :  { %17598 = vst [vmem:[#allocation20_spill] sm:$0xff] %v15229_v9  ;;  %7894 = vst.msk [vmem:[#allocation3 + $0xf0] sm:$0xff] %vm7383_vm13, %v7863_v2  ;;  %v7953_v46 = vld [vmem:[#allocation3 + $0xd8] sm:$0xff]  ;;  %v15281_v49 = vld [vmem:[%s17391_s1 + $0xb0] sm:$0xff]  ;;  %v15297_v57 = vmul.f32 %v15219_v3, %v15200_v7  ;;  %v15319_v62 = vmul.f32 %v15219_v3, %v15209_v34  ;;  %v15323_v38 = vmul.f32 %v15219_v3, %v15214_v36 }
0x40b9   :  { %8049 = vst.msk [vmem:[#allocation3 + $0xc8] sm:$0xff] %vm7383_vm13, %v8018_v33  ;;  %17599 = vst [vmem:[#allocation21_spill] sm:$0xff] %v15253_v6  ;;  %v8020_v28 = vadd.f32 %v7989_v52, %v7953_v46  ;;  %v15305_v32 = vld [vmem:[%s17391_s1 + $0xb8] sm:$0xff]  ;;  %v15310_v51 = vld [vmem:[%s17391_s1 + $0xc0] sm:$0xff]  ;;  %v15337_v56 = vmul.f32 %v15219_v3, %v15224_v63  ;;  %v15341_v41 = vmul.f32 %v15219_v3, %v15229_v9 }
0x40ba   :  { %17600 = vst [vmem:[#allocation22_spill] sm:$0xff] %v15258_v45  ;;  %17601 = vst [vmem:[#allocation23_spill] sm:$0xff] %v15263_v60  ;;  %v15315_v0 = vld [vmem:[%s17391_s1 + $0xc8] sm:$0xff]  ;;  %v8086_v18 = vld [vmem:[#allocation3] sm:$0xff]  ;;  %v15345_v58 = vmul.f32 %v15219_v3, %v15253_v6  ;;  %v15349_v29 = vmul.f32 %v15219_v3, %v15258_v45  ;;  %v7991_v24 = vmul.f32 %v14818_v10, %v15164_v50 }
0x40bb   :  { %17602 = vst [vmem:[#allocation24_spill] sm:$0xff] %v15276_v48  ;;  %17603 = vst [vmem:[#allocation25_spill] sm:$0xff] %v15281_v49  ;;  %v8087_v25 = vld [vmem:[#allocation3 + $0x8] sm:$0xff]  ;;  %v7954_v35 = vld [vmem:[#allocation3 + $0xe0] sm:$0xff]  ;;  %v15361_v33 = vmul.f32 %v15219_v3, %v15263_v60  ;;  %v15365_v37 = vmul.f32 %v15219_v3, %v15276_v48  ;;  %v15387_v61 = vmul.f32 %v15219_v3, %v15310_v51 }
0x40bc   :  { %8050 = vst.msk [vmem:[#allocation3 + $0xd0] sm:$0xff] %vm7383_vm13, %v8019_v1  ;;  %17604 = vst [vmem:[#allocation26_spill] sm:$0xff] %v15305_v32  ;;  %v15328_v23 = vld [vmem:[%s17391_s1 + $0xd0] sm:$0xff]  ;;  %v15333_v43 = vld [vmem:[%s17391_s1 + $0xd8] sm:$0xff]  ;;  %v8021_v22 = vadd.f32 %v7990_v13, %v7954_v35  ;;  %v15383_v35 = vmul.f32 %v15219_v3, %v15305_v32  ;;  %v15391_v39 = vmul.f32 %v15219_v3, %v15315_v0 }
0x40bd   :  { %17605 = vst [vmem:[#allocation27_spill] sm:$0xff] %v15310_v51  ;;  %17606 = vst [vmem:[#allocation28_spill] sm:$0xff] %v15315_v0  ;;  %v8088_v16 = vld [vmem:[#allocation3 + $0x10] sm:$0xff]  ;;  %v8089_v55 = vld [vmem:[#allocation3 + $0x18] sm:$0xff]  ;;  %v15398_v32 = vmul.f32 %v15219_v3, %v15328_v23  ;;  %v15402_v51 = vmul.f32 %v15219_v3, %v15333_v43 }
0x40be   :  { %17607 = vst [vmem:[#allocation29_spill] sm:$0xff] %v15328_v23  ;;  %17608 = vst [vmem:[#allocation30_spill] sm:$0xff] %v15333_v43  ;;  %v15357_v12 = vld [vmem:[%s17391_s1 + $0xe0] sm:$0xff]  ;;  %v8091_v17 = vld [vmem:[#allocation3 + $0x28] sm:$0xff]  ;;  %v8154_v43 = vadd.f32 %v15236_v40, %v8087_v25  ;;  %v8156_v15 = vadd.f32 %v15244_v42, %v8089_v55 }
0x40bf   :  { %8051 = vst.msk [vmem:[#allocation3 + $0xd8] sm:$0xff] %vm7383_vm13, %v8020_v28  ;;  %17609 = vst [vmem:[#allocation31_spill] sm:$0xff] %v15357_v12  ;;  %v8090_v27 = vld [vmem:[#allocation3 + $0x20] sm:$0xff]  ;;  %v8092_v2 = vld [vmem:[#allocation3 + $0x30] sm:$0xff]  ;;  %v15379_v28 = vmul.f32 %v15219_v3, %v15281_v49 }
0x40c0   :  { %v8093_v31 = vld [vmem:[#allocation3 + $0x38] sm:$0xff]  ;;  %v15370_v52 = vld [vmem:[%s17391_s1 + $0x108] sm:$0xff]  ;;  %v8094_v13 = vld [vmem:[#allocation3 + $0x40] sm:$0xff]  ;;  %8052 = vst.msk [vmem:[#allocation3 + $0xe0] sm:$0xff] %vm7383_vm13, %v8021_v22  ;;  %v8159_v40 = vadd.f32 %v15285_v54, %v8092_v2 }
0x40c1   :  { %17610 = vst [vmem:[#allocation32_spill] sm:$0xff] %v15370_v52  ;;  %v7955_v1 = vld [vmem:[#allocation3 + $0xe8] sm:$0xff]  ;;  %v7992_v48 = vmul.f32 %v14818_v10, %v15370_v52  ;;  %v8096_v45 = vld [vmem:[#allocation3 + $0x50] sm:$0xff]  ;;  %v8097_v6 = vld [vmem:[#allocation3 + $0x58] sm:$0xff] }
0x40c2   :  { %v15375_v46 = vld [vmem:[%s17391_s1 + $0xe8] sm:$0xff]  ;;  %v8022_v60 = vadd.f32 %v7991_v24, %v7955_v1  ;;  %v7956_v9 = vld [vmem:[#allocation3 + $0xf0] sm:$0xff]  ;;  %v8098_v10 = vld [vmem:[#allocation3 + $0x60] sm:$0xff]  ;;  %v15411_v24 = vmul.f32 %v15219_v3, %v15357_v12  ;;  %v8153_v1 = vadd.f32 %v15232_v14, %v8086_v18  ;;  %v8155_v12 = vadd.f32 %v15240_v19, %v8088_v16  ;;  %8185 = vst.msk [vmem:[#allocation3 + $0x8] sm:$0xff] %vm7383_vm13, %v8154_v43 }
0x40c3   :  { %17611 = vst [vmem:[#allocation33_spill] sm:$0xff] %v15375_v46  ;;  %v8095_v49 = vld [vmem:[#allocation3 + $0x48] sm:$0xff]  ;;  %v15407_v0 = vld [vmem:[%s17391_s1 + $0xf0] sm:$0xff]  ;;  %v15415_v22 = vmul.f32 %v15219_v3, %v15375_v46  ;;  %v8023_v23 = vadd.f32 %v7992_v48, %v7956_v9  ;;  %v8101_v34 = vld [vmem:[#allocation3 + $0x78] sm:$0xff]  ;;  %v8157_v14 = vadd.f32 %v15267_v53, %v8090_v27  ;;  %v8158_v9 = vadd.f32 %v15271_v44, %v8091_v17 }
0x40c4   :  { %17612 = vst [vmem:[#allocation34_spill] sm:$0xff] %v15407_v0  ;;  %8053 = vst.msk [vmem:[#allocation3 + $0xe8] sm:$0xff] %vm7383_vm13, %v8022_v60  ;;  %v8099_v63 = vld [vmem:[#allocation3 + $0x68] sm:$0xff]  ;;  %v8100_v36 = vld [vmem:[#allocation3 + $0x70] sm:$0xff]  ;;  %v15422_v7 = vmul.f32 %v15219_v3, %v15407_v0  ;;  %v8160_v60 = vadd.f32 %v15289_v8, %v8093_v31  ;;  %v8149_v18 = vmul.f32 %v15219_v3, %v15103_v4 }
0x40c5   :  { %v8102_v46 = vld [vmem:[#allocation3 + $0x80] sm:$0xff]  ;;  %v8103_v59 = vld [vmem:[#allocation3 + $0x88] sm:$0xff]  ;;  %v8104_v20 = vld [vmem:[#allocation3 + $0x90] sm:$0xff]  ;;  %8184 = vst.msk [vmem:[#allocation3] sm:$0xff] %vm7383_vm13, %v8153_v1  ;;  %v8161_v53 = vadd.f32 %v15293_v30, %v8094_v13  ;;  %v8162_v44 = vadd.f32 %v15297_v57, %v8095_v49  ;;  %v8163_v54 = vadd.f32 %v15319_v62, %v8096_v45  ;;  %v8165_v16 = vadd.f32 %v15337_v56, %v8098_v10 }
0x40c6   :  { %8054 = vst.msk [vmem:[#allocation3 + $0xf0] sm:$0xff] %vm7383_vm13, %v8023_v23  ;;  %v8105_v19 = vld [vmem:[#allocation3 + $0x98] sm:$0xff]  ;;  %v8106_v48 = vld [vmem:[#allocation3 + $0xa0] sm:$0xff]  ;;  %v8107_v42 = vld [vmem:[#allocation3 + $0xa8] sm:$0xff]  ;;  %v8164_v23 = vadd.f32 %v15323_v38, %v8097_v6  ;;  %v8166_v55 = vadd.f32 %v15341_v41, %v8099_v63  ;;  %v8167_v4 = vadd.f32 %v15345_v58, %v8100_v36  ;;  %v8150_v6 = vmul.f32 %v15219_v3, %v15164_v50 }
0x40c7   :  { %8186 = vst.msk [vmem:[#allocation3 + $0x10] sm:$0xff] %vm7383_vm13, %v8155_v12  ;;  %8187 = vst.msk [vmem:[#allocation3 + $0x18] sm:$0xff] %vm7383_vm13, %v8156_v15  ;;  %v8108_v8 = vld [vmem:[#allocation3 + $0xb0] sm:$0xff]  ;;  %v8109_v25 = vld [vmem:[#allocation3 + $0xb8] sm:$0xff]  ;;  %v8168_v30 = vadd.f32 %v15349_v29, %v8101_v34  ;;  %v8169_v63 = vadd.f32 %v15361_v33, %v8102_v46  ;;  %v8170_v36 = vadd.f32 %v15365_v37, %v8103_v59 }
0x40c8   :  { %v8110_v43 = vld [vmem:[#allocation3 + $0xc0] sm:$0xff]  ;;  %8188 = vst.msk [vmem:[#allocation3 + $0x20] sm:$0xff] %vm7383_vm13, %v8157_v14  ;;  %8189 = vst.msk [vmem:[#allocation3 + $0x28] sm:$0xff] %vm7383_vm13, %v8158_v9  ;;  %v8111_v15 = vld [vmem:[#allocation3 + $0xc8] sm:$0xff]  ;;  %v8171_v62 = vadd.f32 %v15379_v28, %v8104_v20  ;;  %v8172_v38 = vadd.f32 %v15383_v35, %v8105_v19  ;;  %v8173_v56 = vadd.f32 %v15387_v61, %v8106_v48 }
0x40c9   :  { %8190 = vst.msk [vmem:[#allocation3 + $0x30] sm:$0xff] %vm7383_vm13, %v8159_v40  ;;  %8191 = vst.msk [vmem:[#allocation3 + $0x38] sm:$0xff] %vm7383_vm13, %v8160_v60  ;;  %v8112_v45 = vld [vmem:[#allocation3 + $0xd0] sm:$0xff]  ;;  %v8113_v49 = vld [vmem:[#allocation3 + $0xd8] sm:$0xff]  ;;  %v8174_v41 = vadd.f32 %v15391_v39, %v8107_v42  ;;  %v8151_v20 = vmul.f32 %v15219_v3, %v15370_v52  ;;  %v8175_v61 = vadd.f32 %v15398_v32, %v8108_v8 }
0x40ca   :  { %8192 = vst.msk [vmem:[#allocation3 + $0x40] sm:$0xff] %vm7383_vm13, %v8161_v53  ;;  %8193 = vst.msk [vmem:[#allocation3 + $0x48] sm:$0xff] %vm7383_vm13, %v8162_v44  ;;  %v8114_v57 = vld [vmem:[#allocation3 + $0xe0] sm:$0xff]  ;;  %v8176_v39 = vadd.f32 %v15402_v51, %v8109_v25  ;;  %v8177_v34 = vadd.f32 %v15411_v24, %v8110_v43  ;;  %v15480_v58 = vld [vmem:[%s17391_s1 + $0x110] sm:$0xff]  ;;  %v8178_v12 = vadd.f32 %v15415_v22, %v8111_v15 }
0x40cb   :  { %8194 = vst.msk [vmem:[#allocation3 + $0x50] sm:$0xff] %vm7383_vm13, %v8163_v54  ;;  %8195 = vst.msk [vmem:[#allocation3 + $0x58] sm:$0xff] %vm7383_vm13, %v8164_v23  ;;  %v15467_v59 = vld [vmem:[%s17397_s7 + $0x5] ss:$0 sm:$0xff]  ;;  %v8115_v29 = vld [vmem:[#allocation3 + $0xe8] sm:$0xff]  ;;  %v8179_v32 = vadd.f32 %v15422_v7, %v8112_v45  ;;  %v8180_v27 = vadd.f32 %v8149_v18, %v8113_v49  ;;  %v8181_v51 = vadd.f32 %v8150_v6, %v8114_v57 }
0x40cc   :  { %8196 = vst.msk [vmem:[#allocation3 + $0x60] sm:$0xff] %vm7383_vm13, %v8165_v16  ;;  %8197 = vst.msk [vmem:[#allocation3 + $0x68] sm:$0xff] %vm7383_vm13, %v8166_v55  ;;  %v8152_v17 = vmul.f32 %v15219_v3, %v15480_v58  ;;  %v8182_v2 = vadd.f32 %v8151_v20, %v8115_v29  ;;  %v8282_v7 = vmul.f32 %v15467_v59, %v15149_v47  ;;  %v17614_v46 = vld [vmem:[#allocation13_spill] sm:$0xff]  ;;  %v17615_v35 = vld [vmem:[#allocation14_spill] sm:$0xff] }
0x40cd   :  { %8198 = vst.msk [vmem:[#allocation3 + $0x70] sm:$0xff] %vm7383_vm13, %v8167_v4  ;;  %8199 = vst.msk [vmem:[#allocation3 + $0x78] sm:$0xff] %vm7383_vm13, %v8168_v30  ;;  %v8283_v31 = vmul.f32 %v15467_v59, %v15154_v11  ;;  %v8116_v33 = vld [vmem:[#allocation3 + $0xf0] sm:$0xff]  ;;  %v8284_v3 = vmul.f32 %v15467_v59, %v15159_v26  ;;  %v8285_v37 = vmul.f32 %v15467_v59, %v15169_v21  ;;  %v17616_v24 = vld [vmem:[#allocation15_spill] sm:$0xff] }
0x40ce   :  { %8200 = vst.msk [vmem:[#allocation3 + $0x80] sm:$0xff] %vm7383_vm13, %v8169_v63  ;;  %8201 = vst.msk [vmem:[#allocation3 + $0x88] sm:$0xff] %vm7383_vm13, %v8170_v36  ;;  %v8286_v47 = vmul.f32 %v15467_v59, %v15174_v5  ;;  %v8287_v13 = vmul.f32 %v15467_v59, %v17614_v46  ;;  %v8183_v28 = vadd.f32 %v8152_v17, %v8116_v33  ;;  %v17617_v1 = vld [vmem:[#allocation16_spill] sm:$0xff]  ;;  %v15519_v9 = vld [vmem:[%s17391_s1 + $0xf8] sm:$0xff] }
0x40cf   :  { %17613 = vst [vmem:[#allocation35_spill] sm:$0xff] %v15480_v58  ;;  %8202 = vst.msk [vmem:[#allocation3 + $0x90] sm:$0xff] %vm7383_vm13, %v8171_v62  ;;  %v8288_v10 = vmul.f32 %v15467_v59, %v17615_v35  ;;  %v8289_v22 = vmul.f32 %v15467_v59, %v17616_v24  ;;  %v8290_v14 = vmul.f32 %v15467_v59, %v17617_v1  ;;  %v8246_v40 = vld [vmem:[#allocation3] sm:$0xff]  ;;  %v8247_v60 = vld [vmem:[#allocation3 + $0x8] sm:$0xff] }
0x40d0   :  { %8203 = vst.msk [vmem:[#allocation3 + $0x98] sm:$0xff] %vm7383_vm13, %v8172_v38  ;;  %8204 = vst.msk [vmem:[#allocation3 + $0xa0] sm:$0xff] %vm7383_vm13, %v8173_v56  ;;  %v8248_v19 = vld [vmem:[#allocation3 + $0x10] sm:$0xff]  ;;  %v17620_v18 = vld [vmem:[#allocation18_spill] sm:$0xff] }
0x40d1   :  { %8205 = vst.msk [vmem:[#allocation3 + $0xa8] sm:$0xff] %vm7383_vm13, %v8174_v41  ;;  %8206 = vst.msk [vmem:[#allocation3 + $0xb0] sm:$0xff] %vm7383_vm13, %v8175_v61  ;;  %v17619_v48 = vld [vmem:[#allocation17_spill] sm:$0xff]  ;;  %v8292_v53 = vmul.f32 %v15467_v59, %v17620_v18  ;;  %v17621_v44 = vld [vmem:[#allocation19_spill] sm:$0xff]  ;;  %v15582_v18 = vmul.f32 %v15467_v59, %v15480_v58  ;;  %v8315_v1 = vadd.f32 %v8284_v3, %v8248_v19 }
0x40d2   :  { %8207 = vst.msk [vmem:[#allocation3 + $0xb8] sm:$0xff] %vm7383_vm13, %v8176_v39  ;;  %8208 = vst.msk [vmem:[#allocation3 + $0xc0] sm:$0xff] %vm7383_vm13, %v8177_v34  ;;  %v8291_v42 = vmul.f32 %v15467_v59, %v17619_v48  ;;  %v8293_v54 = vmul.f32 %v15467_v59, %v17621_v44  ;;  %v17622_v8 = vld [vmem:[#allocation20_spill] sm:$0xff]  ;;  %v8249_v43 = vld [vmem:[#allocation3 + $0x18] sm:$0xff]  ;;  %v8314_v48 = vadd.f32 %v8283_v31, %v8247_v60 }
0x40d3   :  { %8209 = vst.msk [vmem:[#allocation3 + $0xc8] sm:$0xff] %vm7383_vm13, %v8178_v12  ;;  %8210 = vst.msk [vmem:[#allocation3 + $0xd0] sm:$0xff] %vm7383_vm13, %v8179_v32  ;;  %v8294_v25 = vmul.f32 %v15467_v59, %v17622_v8  ;;  %v8250_v23 = vld [vmem:[#allocation3 + $0x20] sm:$0xff]  ;;  %v8251_v16 = vld [vmem:[#allocation3 + $0x28] sm:$0xff]  ;;  %v8316_v35 = vadd.f32 %v8285_v37, %v8249_v43 }
0x40d4   :  { %8211 = vst.msk [vmem:[#allocation3 + $0xd8] sm:$0xff] %vm7383_vm13, %v8180_v27  ;;  %8212 = vst.msk [vmem:[#allocation3 + $0xe0] sm:$0xff] %vm7383_vm13, %v8181_v51  ;;  %v8252_v55 = vld [vmem:[#allocation3 + $0x30] sm:$0xff]  ;;  %v17624_v45 = vld [vmem:[#allocation22_spill] sm:$0xff]  ;;  %v8318_v46 = vadd.f32 %v8287_v13, %v8251_v16 }
0x40d5   :  { %8213 = vst.msk [vmem:[#allocation3 + $0xe8] sm:$0xff] %vm7383_vm13, %v8182_v2  ;;  %17618 = vst [vmem:[#allocation36_spill] sm:$0xff] %v15519_v9  ;;  %v17623_v4 = vld [vmem:[#allocation21_spill] sm:$0xff]  ;;  %v8296_v49 = vmul.f32 %v15467_v59, %v17624_v45  ;;  %v17625_v6 = vld [vmem:[#allocation23_spill] sm:$0xff]  ;;  %v8319_v5 = vadd.f32 %v8288_v10, %v8252_v55 }
0x40d6   :  { %8214 = vst.msk [vmem:[#allocation3 + $0xf0] sm:$0xff] %vm7383_vm13, %v8183_v28  ;;  %v8295_v15 = vmul.f32 %v15467_v59, %v17623_v4  ;;  %v8297_v30 = vmul.f32 %v15467_v59, %v17625_v6  ;;  %v17626_v63 = vld [vmem:[#allocation24_spill] sm:$0xff]  ;;  %v8253_v57 = vld [vmem:[#allocation3 + $0x38] sm:$0xff]  ;;  %v8254_v62 = vld [vmem:[#allocation3 + $0x40] sm:$0xff]  ;;  %v8307_v4 = vmul.f32 %v15467_v59, %v15407_v0  ;;  %v8313_v0 = vadd.f32 %v8282_v7, %v8246_v40 }
0x40d7   :  { %v8298_v36 = vmul.f32 %v15467_v59, %v17626_v63  ;;  %v8255_v38 = vld [vmem:[#allocation3 + $0x48] sm:$0xff]  ;;  %v17627_v56 = vld [vmem:[#allocation25_spill] sm:$0xff]  ;;  %v17628_v20 = vld [vmem:[#allocation26_spill] sm:$0xff]  ;;  %v8320_v7 = vadd.f32 %v8289_v22, %v8253_v57  ;;  %v8321_v31 = vadd.f32 %v8290_v14, %v8254_v62  ;;  %8345 = vst.msk [vmem:[#allocation3 + $0x8] sm:$0xff] %vm7383_vm13, %v8314_v48 }
0x40d8   :  { %v8299_v41 = vmul.f32 %v15467_v59, %v17627_v56  ;;  %v15542_v61 = vmul.f32 %v15467_v59, %v17628_v20  ;;  %v17629_v39 = vld [vmem:[#allocation27_spill] sm:$0xff]  ;;  %v17630_v29 = vld [vmem:[#allocation28_spill] sm:$0xff]  ;;  %v8256_v32 = vld [vmem:[#allocation3 + $0x50] sm:$0xff]  ;;  %v8322_v3 = vadd.f32 %v8291_v42, %v8255_v38  ;;  %8344 = vst.msk [vmem:[#allocation3] sm:$0xff] %vm7383_vm13, %v8313_v0 }
0x40d9   :  { %v15546_v34 = vmul.f32 %v15467_v59, %v17629_v39  ;;  %v15550_v12 = vmul.f32 %v15467_v59, %v17630_v29  ;;  %v8257_v27 = vld [vmem:[#allocation3 + $0x58] sm:$0xff]  ;;  %v8258_v51 = vld [vmem:[#allocation3 + $0x60] sm:$0xff]  ;;  %v17631_v17 = vld [vmem:[#allocation29_spill] sm:$0xff]  ;;  %8346 = vst.msk [vmem:[#allocation3 + $0x10] sm:$0xff] %vm7383_vm13, %v8315_v1  ;;  %v8323_v13 = vadd.f32 %v8292_v53, %v8256_v32 }
0x40da   :  { %v8303_v2 = vmul.f32 %v15467_v59, %v17631_v17  ;;  %v17632_v33 = vld [vmem:[#allocation30_spill] sm:$0xff]  ;;  %v17633_v20 = vld [vmem:[#allocation31_spill] sm:$0xff]  ;;  %v17634_v39 = vld [vmem:[#allocation33_spill] sm:$0xff]  ;;  %v15570_v17 = vmul.f32 %v15467_v59, %v15519_v9  ;;  %v8324_v10 = vadd.f32 %v8293_v54, %v8257_v27  ;;  %v8325_v60 = vadd.f32 %v8294_v25, %v8258_v51  ;;  %8347 = vst.msk [vmem:[#allocation3 + $0x18] sm:$0xff] %vm7383_vm13, %v8316_v35 }
0x40db   :  { %v15556_v28 = vmul.f32 %v15467_v59, %v17632_v33  ;;  %v15560_v56 = vmul.f32 %v15467_v59, %v17633_v20  ;;  %v15564_v63 = vmul.f32 %v15467_v59, %v17634_v39  ;;  %v8259_v29 = vld [vmem:[#allocation3 + $0x68] sm:$0xff]  ;;  %v8260_v6 = vld [vmem:[#allocation3 + $0x70] sm:$0xff]  ;;  %v8261_v45 = vld [vmem:[#allocation3 + $0x78] sm:$0xff]  ;;  %v15574_v33 = vmul.f32 %v15467_v59, %v15164_v50  ;;  %8349 = vst.msk [vmem:[#allocation3 + $0x28] sm:$0xff] %vm7383_vm13, %v8318_v46 }
0x40dc   :  { %v15578_v20 = vmul.f32 %v15467_v59, %v15370_v52  ;;  %v8262_v39 = vld [vmem:[#allocation3 + $0x80] sm:$0xff]  ;;  %v8263_v8 = vld [vmem:[#allocation3 + $0x88] sm:$0xff]  ;;  %v8264_v44 = vld [vmem:[#allocation3 + $0x90] sm:$0xff]  ;;  %v8317_v52 = vadd.f32 %v8286_v47, %v8250_v23  ;;  %v8326_v19 = vadd.f32 %v8295_v15, %v8259_v29  ;;  %8350 = vst.msk [vmem:[#allocation3 + $0x30] sm:$0xff] %vm7383_vm13, %v8319_v5  ;;  %v8327_v14 = vadd.f32 %v8296_v49, %v8260_v6 }
0x40dd   :  { %v15587_v9 = vld [vmem:[%s17391_s1 + $0x118] sm:$0xff]  ;;  %v8266_v24 = vld [vmem:[#allocation3 + $0xa0] sm:$0xff]  ;;  %v8267_v21 = vld [vmem:[#allocation3 + $0xa8] sm:$0xff]  ;;  %v8328_v1 = vadd.f32 %v8297_v30, %v8261_v45  ;;  %v8329_v48 = vadd.f32 %v8298_v36, %v8262_v39  ;;  %v8330_v42 = vadd.f32 %v8299_v41, %v8263_v8  ;;  %8351 = vst.msk [vmem:[#allocation3 + $0x38] sm:$0xff] %vm7383_vm13, %v8320_v7 }
0x40de   :  { %17635 = vst [vmem:[#allocation37_spill] sm:$0xff] %v15587_v9  ;;  %v8265_v50 = vld [vmem:[#allocation3 + $0x98] sm:$0xff]  ;;  %v8268_v26 = vld [vmem:[#allocation3 + $0xb0] sm:$0xff]  ;;  %v8312_v58 = vmul.f32 %v15467_v59, %v15587_v9  ;;  %v8270_v40 = vld [vmem:[#allocation3 + $0xc0] sm:$0xff]  ;;  %v8333_v5 = vadd.f32 %v15550_v12, %v8266_v24  ;;  %v8334_v53 = vadd.f32 %v8303_v2, %v8267_v21 }
0x40df   :  { %v8269_v11 = vld [vmem:[#allocation3 + $0xb8] sm:$0xff]  ;;  %v8271_v37 = vld [vmem:[#allocation3 + $0xc8] sm:$0xff]  ;;  %v8272_v47 = vld [vmem:[#allocation3 + $0xd0] sm:$0xff]  ;;  %8348 = vst.msk [vmem:[#allocation3 + $0x20] sm:$0xff] %vm7383_vm13, %v8317_v52  ;;  %v8331_v52 = vadd.f32 %v15542_v61, %v8264_v44  ;;  %v8332_v46 = vadd.f32 %v15546_v34, %v8265_v50  ;;  %v8335_v44 = vadd.f32 %v15556_v28, %v8268_v26  ;;  %v8337_v24 = vadd.f32 %v15564_v63, %v8270_v40 }
0x40e0   :  { %v8273_v0 = vld [vmem:[#allocation3 + $0xd8] sm:$0xff]  ;;  %v8274_v59 = vld [vmem:[#allocation3 + $0xe0] sm:$0xff]  ;;  %v8275_v22 = vld [vmem:[#allocation3 + $0xe8] sm:$0xff]  ;;  %8352 = vst.msk [vmem:[#allocation3 + $0x40] sm:$0xff] %vm7383_vm13, %v8321_v31  ;;  %v8336_v8 = vadd.f32 %v15560_v56, %v8269_v11  ;;  %v8338_v21 = vadd.f32 %v8307_v4, %v8271_v37  ;;  %v8339_v25 = vadd.f32 %v15570_v17, %v8272_v47 }
0x40e1   :  { %8353 = vst.msk [vmem:[#allocation3 + $0x48] sm:$0xff] %vm7383_vm13, %v8322_v3  ;;  %v8276_v35 = vld [vmem:[#allocation3 + $0xf0] sm:$0xff]  ;;  %8354 = vst.msk [vmem:[#allocation3 + $0x50] sm:$0xff] %vm7383_vm13, %v8323_v13  ;;  %v15611_v54 = vld [vmem:[%s17397_s7 + $0x6] ss:$0 sm:$0xff]  ;;  %v8340_v43 = vadd.f32 %v15574_v33, %v8273_v0  ;;  %v8341_v23 = vadd.f32 %v15578_v20, %v8274_v59  ;;  %v8342_v26 = vadd.f32 %v15582_v18, %v8275_v22 }
0x40e2   :  { %8355 = vst.msk [vmem:[#allocation3 + $0x58] sm:$0xff] %vm7383_vm13, %v8324_v10  ;;  %8356 = vst.msk [vmem:[#allocation3 + $0x60] sm:$0xff] %vm7383_vm13, %v8325_v60  ;;  %v8343_v11 = vadd.f32 %v8312_v58, %v8276_v35  ;;  %v17636_v16 = vld [vmem:[#allocation9_spill] sm:$0xff]  ;;  %v17637_v55 = vld [vmem:[#allocation10_spill] sm:$0xff] }
0x40e3   :  { %8357 = vst.msk [vmem:[#allocation3 + $0x68] sm:$0xff] %vm7383_vm13, %v8326_v19  ;;  %8358 = vst.msk [vmem:[#allocation3 + $0x70] sm:$0xff] %vm7383_vm13, %v8327_v14  ;;  %v8442_v18 = vmul.f32 %v15611_v54, %v17636_v16  ;;  %v15636_v4 = vmul.f32 %v15611_v54, %v17637_v55  ;;  %v17638_v15 = vld [vmem:[#allocation11_spill] sm:$0xff]  ;;  %v17639_v58 = vld [vmem:[#allocation12_spill] sm:$0xff] }
0x40e4   :  { %8359 = vst.msk [vmem:[#allocation3 + $0x78] sm:$0xff] %vm7383_vm13, %v8328_v1  ;;  %8360 = vst.msk [vmem:[#allocation3 + $0x80] sm:$0xff] %vm7383_vm13, %v8329_v48  ;;  %v15640_v45 = vmul.f32 %v15611_v54, %v17638_v15  ;;  %v8445_v49 = vmul.f32 %v15611_v54, %v17639_v58  ;;  %v17640_v6 = vld [vmem:[#allocation13_spill] sm:$0xff]  ;;  %v17641_v63 = vld [vmem:[#allocation14_spill] sm:$0xff] }
0x40e5   :  { %8361 = vst.msk [vmem:[#allocation3 + $0x88] sm:$0xff] %vm7383_vm13, %v8330_v42  ;;  %8362 = vst.msk [vmem:[#allocation3 + $0x90] sm:$0xff] %vm7383_vm13, %v8331_v52  ;;  %v8446_v30 = vmul.f32 %v15611_v54, %v17640_v6  ;;  %v15652_v36 = vmul.f32 %v15611_v54, %v17641_v63  ;;  %v17642_v57 = vld [vmem:[#allocation15_spill] sm:$0xff]  ;;  %v17643_v56 = vld [vmem:[#allocation16_spill] sm:$0xff] }
0x40e6   :  { %8363 = vst.msk [vmem:[#allocation3 + $0x98] sm:$0xff] %vm7383_vm13, %v8332_v46  ;;  %8364 = vst.msk [vmem:[#allocation3 + $0xa0] sm:$0xff] %vm7383_vm13, %v8333_v5  ;;  %v15656_v62 = vmul.f32 %v15611_v54, %v17642_v57  ;;  %v8449_v41 = vmul.f32 %v15611_v54, %v17643_v56  ;;  %v17644_v20 = vld [vmem:[#allocation17_spill] sm:$0xff]  ;;  %v17645_v39 = vld [vmem:[#allocation18_spill] sm:$0xff] }
0x40e7   :  { %8365 = vst.msk [vmem:[#allocation3 + $0xa8] sm:$0xff] %vm7383_vm13, %v8334_v53  ;;  %8366 = vst.msk [vmem:[#allocation3 + $0xb0] sm:$0xff] %vm7383_vm13, %v8335_v44  ;;  %v8450_v61 = vmul.f32 %v15611_v54, %v17644_v20  ;;  %v15665_v34 = vmul.f32 %v15611_v54, %v17645_v39  ;;  %v17646_v29 = vld [vmem:[#allocation19_spill] sm:$0xff]  ;;  %v17648_v33 = vld [vmem:[#allocation20_spill] sm:$0xff] }
0x40e8   :  { %8367 = vst.msk [vmem:[#allocation3 + $0xb8] sm:$0xff] %vm7383_vm13, %v8336_v8  ;;  %8368 = vst.msk [vmem:[#allocation3 + $0xc0] sm:$0xff] %vm7383_vm13, %v8337_v24  ;;  %v15669_v12 = vmul.f32 %v15611_v54, %v17646_v29  ;;  %v13165_v32 = vld [vmem:[%s17396_s6 + $0x3] ss:$0 sm:$0xff]  ;;  %v8453_v28 = vmul.f32 %v15611_v54, %v17648_v33  ;;  %v17649_v50 = vld [vmem:[#allocation21_spill] sm:$0xff] }
0x40e9   :  { %8369 = vst.msk [vmem:[#allocation3 + $0xc8] sm:$0xff] %vm7383_vm13, %v8338_v21  ;;  %8370 = vst.msk [vmem:[#allocation3 + $0xd0] sm:$0xff] %vm7383_vm13, %v8339_v25  ;;  %v15677_v17 = vld [vmem:[%s17391_s1 + $0x100] sm:$0xff]  ;;  %v8454_v7 = vmul.f32 %v15611_v54, %v17649_v50  ;;  %v17650_v31 = vld [vmem:[#allocation22_spill] sm:$0xff] }
0x40ea   :  { %8371 = vst.msk [vmem:[#allocation3 + $0xd8] sm:$0xff] %vm7383_vm13, %v8340_v43  ;;  %8372 = vst.msk [vmem:[#allocation3 + $0xe0] sm:$0xff] %vm7383_vm13, %v8341_v23  ;;  %v8406_v2 = vld [vmem:[#allocation3] sm:$0xff]  ;;  %v15685_v3 = vmul.f32 %v15611_v54, %v17650_v31  ;;  %v8407_v40 = vld [vmem:[#allocation3 + $0x8] sm:$0xff] }
0x40eb   :  { %8373 = vst.msk [vmem:[#allocation3 + $0xe8] sm:$0xff] %vm7383_vm13, %v8342_v26  ;;  %8374 = vst.msk [vmem:[#allocation3 + $0xf0] sm:$0xff] %vm7383_vm13, %v8343_v11  ;;  %v8408_v37 = vld [vmem:[#allocation3 + $0x10] sm:$0xff]  ;;  %v8409_v47 = vld [vmem:[#allocation3 + $0x18] sm:$0xff]  ;;  %v8474_v56 = vadd.f32 %v15636_v4, %v8407_v40 }
0x40ec   :  { %17647 = vst [vmem:[#allocation9_spill] sm:$0xff] %v15677_v17  ;;  %v8410_v13 = vld [vmem:[#allocation3 + $0x20] sm:$0xff]  ;;  %v17652_v19 = vld [vmem:[#allocation24_spill] sm:$0xff]  ;;  %v17653_v59 = vld [vmem:[#allocation25_spill] sm:$0xff]  ;;  %v8475_v57 = vadd.f32 %v15640_v45, %v8408_v37 }
0x40ed   :  { %v17651_v10 = vld [vmem:[#allocation23_spill] sm:$0xff]  ;;  %v15693_v0 = vmul.f32 %v15611_v54, %v17652_v19  ;;  %v15697_v22 = vmul.f32 %v15611_v54, %v17653_v59  ;;  %v17654_v14 = vld [vmem:[#allocation26_spill] sm:$0xff]  ;;  %v17655_v48 = vld [vmem:[#allocation8_spill] sm:$0xff]  ;;  %v8477_v63 = vadd.f32 %v8446_v30, %v8410_v13  ;;  %8505 = vst.msk [vmem:[#allocation3 + $0x8] sm:$0xff] %vm7383_vm13, %v8474_v56 }
0x40ee   :  { %v15689_v60 = vmul.f32 %v15611_v54, %v17651_v10  ;;  %v15701_v1 = vmul.f32 %v15611_v54, %v17654_v14  ;;  %v15707_v35 = vld [vmem:[%s17391_s1 + $0x120] sm:$0xff]  ;;  %v8411_v52 = vld [vmem:[#allocation3 + $0x28] sm:$0xff]  ;;  %v8412_v46 = vld [vmem:[#allocation3 + $0x30] sm:$0xff]  ;;  %8506 = vst.msk [vmem:[#allocation3 + $0x10] sm:$0xff] %vm7383_vm13, %v8475_v57 }
0x40ef   :  { %17656 = vst [vmem:[#allocation8_spill] sm:$0xff] %v15707_v35  ;;  %v8413_v5 = vld [vmem:[#allocation3 + $0x38] sm:$0xff]  ;;  %v17657_v53 = vld [vmem:[#allocation27_spill] sm:$0xff]  ;;  %v17658_v8 = vld [vmem:[#allocation28_spill] sm:$0xff]  ;;  %v8478_v15 = vadd.f32 %v15652_v36, %v8411_v52 }
0x40f0   :  { %v15711_v44 = vmul.f32 %v15611_v54, %v17657_v53  ;;  %v15715_v24 = vmul.f32 %v15611_v54, %v17658_v8  ;;  %v17659_v21 = vld [vmem:[#allocation29_spill] sm:$0xff]  ;;  %v8414_v43 = vld [vmem:[#allocation3 + $0x40] sm:$0xff]  ;;  %v8415_v23 = vld [vmem:[#allocation3 + $0x48] sm:$0xff]  ;;  %8508 = vst.msk [vmem:[#allocation3 + $0x20] sm:$0xff] %vm7383_vm13, %v8477_v63 }
0x40f1   :  { %v15719_v25 = vmul.f32 %v15611_v54, %v17659_v21  ;;  %v8416_v26 = vld [vmem:[#allocation3 + $0x50] sm:$0xff]  ;;  %v17660_v11 = vld [vmem:[#allocation30_spill] sm:$0xff]  ;;  %v17664_v21 = vld [vmem:[#allocation7_spill] sm:$0xff]  ;;  %v8482_v4 = vadd.f32 %v15665_v34, %v8415_v23  ;;  %8509 = vst.msk [vmem:[#allocation3 + $0x28] sm:$0xff] %vm7383_vm13, %v8478_v15 }
0x40f2   :  { %v15723_v16 = vmul.f32 %v15611_v54, %v17660_v11  ;;  %v8417_v14 = vld [vmem:[#allocation3 + $0x58] sm:$0xff]  ;;  %v8418_v59 = vld [vmem:[#allocation3 + $0x60] sm:$0xff]  ;;  %v8419_v19 = vld [vmem:[#allocation3 + $0x68] sm:$0xff]  ;;  %v8483_v45 = vadd.f32 %v15669_v12, %v8416_v26 }
0x40f3   :  { %v17665_v10 = vld [vmem:[#allocation36_spill] sm:$0xff]  ;;  %v8420_v50 = vld [vmem:[#allocation3 + $0x70] sm:$0xff]  ;;  %v8422_v33 = vld [vmem:[#allocation3 + $0x80] sm:$0xff]  ;;  %v8485_v30 = vadd.f32 %v8454_v7, %v8418_v59  ;;  %8513 = vst.msk [vmem:[#allocation3 + $0x48] sm:$0xff] %vm7383_vm13, %v8482_v4 }
0x40f4   :  { %v15740_v11 = vmul.f32 %v15611_v54, %v17665_v10  ;;  %v17666_v31 = vld [vmem:[#allocation32_spill] sm:$0xff]  ;;  %v17667_v29 = vld [vmem:[#allocation35_spill] sm:$0xff]  ;;  %v15760_v10 = vmul.f32 %v15611_v54, %v15707_v35  ;;  %v8424_v39 = vld [vmem:[#allocation3 + $0x90] sm:$0xff]  ;;  %v8480_v35 = vadd.f32 %v8449_v41, %v8413_v5  ;;  %v8489_v12 = vadd.f32 %v15697_v22, %v8422_v33  ;;  %8514 = vst.msk [vmem:[#allocation3 + $0x50] sm:$0xff] %vm7383_vm13, %v8483_v45 }
0x40f5   :  { %v8425_v20 = vld [vmem:[#allocation3 + $0x98] sm:$0xff]  ;;  %v8426_v6 = vld [vmem:[#allocation3 + $0xa0] sm:$0xff]  ;;  %v8427_v58 = vld [vmem:[#allocation3 + $0xa8] sm:$0xff]  ;;  %8516 = vst.msk [vmem:[#allocation3 + $0x60] sm:$0xff] %vm7383_vm13, %v8485_v30 }
0x40f6   :  { %v8431_v55 = vld [vmem:[#allocation3 + $0xc8] sm:$0xff]  ;;  %v8432_v36 = vld [vmem:[#allocation3 + $0xd0] sm:$0xff]  ;;  %v8434_v41 = vld [vmem:[#allocation3 + $0xe0] sm:$0xff]  ;;  %8511 = vst.msk [vmem:[#allocation3 + $0x38] sm:$0xff] %vm7383_vm13, %v8480_v35  ;;  %v8494_v33 = vadd.f32 %v15723_v16, %v8427_v58 }
0x40f7   :  { %v8435_v63 = vld [vmem:[#allocation3 + $0xe8] sm:$0xff]  ;;  %v8436_v57 = vld [vmem:[#allocation3 + $0xf0] sm:$0xff]  ;;  %v15793_v15 = vld [vmem:[%s17397_s7 + $0x7] ss:$0 sm:$0xff]  ;;  %8520 = vst.msk [vmem:[#allocation3 + $0x80] sm:$0xff] %vm7383_vm13, %v8489_v12  ;;  %v8498_v7 = vadd.f32 %v15740_v11, %v8431_v55 }
0x40f8   :  { %v8503_v37 = vadd.f32 %v15760_v10, %v8436_v57  ;;  %8525 = vst.msk [vmem:[#allocation3 + $0xa8] sm:$0xff] %vm7383_vm13, %v8494_v33  ;;  %v17668_v55 = vld [vmem:[#allocation10_spill] sm:$0xff]  ;;  %v17669_v13 = vld [vmem:[#allocation11_spill] sm:$0xff]  ;;  %v17670_v10 = vld [vmem:[#allocation12_spill] sm:$0xff] }
0x40f9   :  { %8529 = vst.msk [vmem:[#allocation3 + $0xc8] sm:$0xff] %vm7383_vm13, %v8498_v7  ;;  %v17672_v22 = vld [vmem:[#allocation14_spill] sm:$0xff]  ;;  %v15838_v52 = vld [vmem:[%s17391_s1 + $0x108] sm:$0xff]  ;;  %v17685_v30 = vld [vmem:[#allocation25_spill] sm:$0xff] }
0x40fa   :  { %8534 = vst.msk [vmem:[#allocation3 + $0xf0] sm:$0xff] %vm7383_vm13, %v8503_v37  ;;  %17674 = vst [vmem:[#allocation7_spill] sm:$0xff] %v15838_v52  ;;  %v15851_v26 = vld [vmem:[%s17391_s1 + $0x128] sm:$0xff] }
0x40fb   :  { %17679 = vst [vmem:[#allocation32_spill] sm:$0xff] %v15851_v26  ;;  %v8567_v16 = vld [vmem:[#allocation3 + $0x8] sm:$0xff] }
0x40fc   :  { %v17684_v45 = vld [vmem:[#allocation24_spill] sm:$0xff] }
0x40fd   :  { %v17688_v57 = vld [vmem:[#allocation28_spill] sm:$0xff] }
0x4150   :  { %v7270_v38 = vpop.f32.mrb[102].mxu0 }
0x4151   :  { %v7271_v27 = vadd.f32 %v13165_v32, %v7270_v38  ;;  %v12289_v51 = vpop.f32.mrb[103].mxu0  ;;  %v17661_v38 = vld [vmem:[#allocation31_spill] sm:$0xff] }
0x4152   :  { %v15727_v32 = vmul.f32 %v15611_v54, %v17661_v38  ;;  %v15744_v38 = vmul.f32 %v15611_v54, %v15677_v17  ;;  %v8473_v17 = vadd.f32 %v8442_v18, %v8406_v2  ;;  %v8481_v18 = vadd.f32 %v8450_v61, %v8414_v43  ;;  %v8429_v2 = vld [vmem:[#allocation3 + $0xb8] sm:$0xff]  ;;  %v17678_v43 = vld [vmem:[#allocation19_spill] sm:$0xff] }
0x4153   :  { %v7274_v42 = vmin.f32 %v17655_v48, %v7271_v27  ;;  %v17662_v27 = vld [vmem:[#allocation33_spill] sm:$0xff]  ;;  %v17663_v48 = vld [vmem:[#allocation34_spill] sm:$0xff]  ;;  %v8486_v61 = vadd.f32 %v15685_v3, %v8419_v19  ;;  %v8604_v19 = vmul.f32 %v15793_v15, %v17670_v10  ;;  %v8611_v23 = vmul.f32 %v15793_v15, %v17678_v43 }
0x4154   :  { %v15731_v51 = vmul.f32 %v15611_v54, %v17662_v27  ;;  %v15735_v8 = vmul.f32 %v15611_v54, %v17663_v48  ;;  %v15748_v27 = vmul.f32 %v15611_v54, %v17666_v31  ;;  %v8421_v48 = vld [vmem:[#allocation3 + $0x78] sm:$0xff]  ;;  %v8423_v31 = vld [vmem:[#allocation3 + $0x88] sm:$0xff]  ;;  %8504 = vst.msk [vmem:[#allocation3] sm:$0xff] %vm7383_vm13, %v8473_v17  ;;  %v8487_v17 = vadd.f32 %v15689_v60, %v8420_v50  ;;  %v17695_v10 = vld [vmem:[#allocation9_spill] sm:$0xff] }
0x4155   :  { %v7275_v53 = vadd.f32 %v7274_v42, %v17664_v21  ;;  %v15752_v42 = vmul.f32 %v15611_v54, %v17667_v29  ;;  %v15756_v21 = vmul.f32 %v15611_v54, %v15587_v9  ;;  %v8476_v29 = vadd.f32 %v8445_v49, %v8409_v47  ;;  %v8428_v9 = vld [vmem:[#allocation3 + $0xb0] sm:$0xff]  ;;  %8512 = vst.msk [vmem:[#allocation3 + $0x40] sm:$0xff] %vm7383_vm13, %v8481_v18 }
0x4156   :  { %v8479_v54 = vadd.f32 %v15656_v62, %v8412_v46  ;;  %v8484_v49 = vadd.f32 %v8453_v28, %v8417_v14  ;;  %v8433_v62 = vld [vmem:[#allocation3 + $0xd8] sm:$0xff]  ;;  %v8488_v34 = vadd.f32 %v15693_v0, %v8421_v48  ;;  %v8490_v56 = vadd.f32 %v15701_v1, %v8423_v31  ;;  %8517 = vst.msk [vmem:[#allocation3 + $0x68] sm:$0xff] %vm7383_vm13, %v8486_v61  ;;  %v17671_v0 = vld [vmem:[#allocation13_spill] sm:$0xff]  ;;  %v17673_v1 = vld [vmem:[#allocation15_spill] sm:$0xff] }
0x4157   :  { %12303 = vmatmul.mubr.msk.f32.vlgmr.msra.gmra.mrb[94].mxu1 %vm401_vm3, %v7275_v53  ;;  %v8430_v53 = vld [vmem:[#allocation3 + $0xc0] sm:$0xff]  ;;  %8507 = vst.msk [vmem:[#allocation3 + $0x18] sm:$0xff] %vm7383_vm13, %v8476_v29  ;;  %v8491_v29 = vadd.f32 %v15711_v44, %v8424_v39  ;;  %v8492_v28 = vadd.f32 %v15715_v24, %v8425_v20  ;;  %v8493_v50 = vadd.f32 %v15719_v25, %v8426_v6  ;;  %8518 = vst.msk [vmem:[#allocation3 + $0x70] sm:$0xff] %vm7383_vm13, %v8487_v17  ;;  %v17675_v46 = vld [vmem:[#allocation16_spill] sm:$0xff] }
0x4158   :  { %8510 = vst.msk [vmem:[#allocation3 + $0x30] sm:$0xff] %vm7383_vm13, %v8479_v54  ;;  %8515 = vst.msk [vmem:[#allocation3 + $0x58] sm:$0xff] %vm7383_vm13, %v8484_v49  ;;  %v8495_v39 = vadd.f32 %v15727_v32, %v8428_v9  ;;  %v8496_v20 = vadd.f32 %v15731_v51, %v8429_v2  ;;  %v8497_v6 = vadd.f32 %v15735_v8, %v8430_v53  ;;  %v17676_v44 = vld [vmem:[#allocation17_spill] sm:$0xff]  ;;  %v17677_v24 = vld [vmem:[#allocation18_spill] sm:$0xff] }
0x4159   :  { %8519 = vst.msk [vmem:[#allocation3 + $0x78] sm:$0xff] %vm7383_vm13, %v8488_v34  ;;  %v8499_v3 = vadd.f32 %v15744_v38, %v8432_v36  ;;  %v8500_v58 = vadd.f32 %v15748_v27, %v8433_v62  ;;  %v8501_v9 = vadd.f32 %v15752_v42, %v8434_v41  ;;  %8521 = vst.msk [vmem:[#allocation3 + $0x88] sm:$0xff] %vm7383_vm13, %v8490_v56  ;;  %v8568_v38 = vld [vmem:[#allocation3 + $0x10] sm:$0xff]  ;;  %v17680_v32 = vld [vmem:[#allocation20_spill] sm:$0xff] }
0x415a   :  { %8522 = vst.msk [vmem:[#allocation3 + $0x90] sm:$0xff] %vm7383_vm13, %v8491_v29  ;;  %8523 = vst.msk [vmem:[#allocation3 + $0x98] sm:$0xff] %vm7383_vm13, %v8492_v28  ;;  %v8502_v40 = vadd.f32 %v15756_v21, %v8435_v63  ;;  %v8602_v47 = vmul.f32 %v15793_v15, %v17668_v55  ;;  %v8603_v60 = vmul.f32 %v15793_v15, %v17669_v13  ;;  %v17681_v51 = vld [vmem:[#allocation21_spill] sm:$0xff]  ;;  %v17682_v42 = vld [vmem:[#allocation22_spill] sm:$0xff] }
0x415b   :  { %8524 = vst.msk [vmem:[#allocation3 + $0xa0] sm:$0xff] %vm7383_vm13, %v8493_v50  ;;  %8526 = vst.msk [vmem:[#allocation3 + $0xb0] sm:$0xff] %vm7383_vm13, %v8495_v39  ;;  %v8605_v59 = vmul.f32 %v15793_v15, %v17671_v0  ;;  %v8606_v14 = vmul.f32 %v15793_v15, %v17672_v22  ;;  %v8607_v35 = vmul.f32 %v15793_v15, %v17673_v1  ;;  %v8566_v11 = vld [vmem:[#allocation3] sm:$0xff]  ;;  %v8571_v53 = vld [vmem:[#allocation3 + $0x28] sm:$0xff] }
0x415c   :  { %8527 = vst.msk [vmem:[#allocation3 + $0xb8] sm:$0xff] %vm7383_vm13, %v8496_v20  ;;  %8528 = vst.msk [vmem:[#allocation3 + $0xc0] sm:$0xff] %vm7383_vm13, %v8497_v6  ;;  %v8608_v5 = vmul.f32 %v15793_v15, %v17675_v46  ;;  %v8609_v8 = vmul.f32 %v15793_v15, %v17676_v44  ;;  %v8610_v25 = vmul.f32 %v15793_v15, %v17677_v24  ;;  %v17683_v31 = vld [vmem:[#allocation23_spill] sm:$0xff]  ;;  %v17686_v62 = vld [vmem:[#allocation26_spill] sm:$0xff] }
0x415d   :  { %8530 = vst.msk [vmem:[#allocation3 + $0xd0] sm:$0xff] %vm7383_vm13, %v8499_v3  ;;  %8531 = vst.msk [vmem:[#allocation3 + $0xd8] sm:$0xff] %vm7383_vm13, %v8500_v58  ;;  %v8612_v27 = vmul.f32 %v15793_v15, %v17680_v32  ;;  %v8613_v48 = vmul.f32 %v15793_v15, %v17681_v51  ;;  %v8614_v21 = vmul.f32 %v15793_v15, %v17682_v42  ;;  %v8570_v2 = vld [vmem:[#allocation3 + $0x20] sm:$0xff]  ;;  %v8573_v34 = vld [vmem:[#allocation3 + $0x38] sm:$0xff] }
0x415e   :  { %8532 = vst.msk [vmem:[#allocation3 + $0xe0] sm:$0xff] %vm7383_vm13, %v8501_v9  ;;  %8533 = vst.msk [vmem:[#allocation3 + $0xe8] sm:$0xff] %vm7383_vm13, %v8502_v40  ;;  %v8615_v54 = vmul.f32 %v15793_v15, %v17683_v31  ;;  %v8569_v18 = vld [vmem:[#allocation3 + $0x18] sm:$0xff]  ;;  %v8616_v49 = vmul.f32 %v15793_v15, %v17684_v45  ;;  %v15865_v36 = vmul.f32 %v15793_v15, %v17685_v30  ;;  %v17687_v61 = vld [vmem:[#allocation27_spill] sm:$0xff] }
0x415f   :  { %v8572_v4 = vld [vmem:[#allocation3 + $0x30] sm:$0xff]  ;;  %v15869_v41 = vmul.f32 %v15793_v15, %v17686_v62  ;;  %v15873_v17 = vmul.f32 %v15793_v15, %v17687_v61  ;;  %v8574_v12 = vld [vmem:[#allocation3 + $0x40] sm:$0xff]  ;;  %v8575_v63 = vld [vmem:[#allocation3 + $0x48] sm:$0xff]  ;;  %v15877_v56 = vmul.f32 %v15793_v15, %v17688_v57  ;;  %v15905_v0 = vmul.f32 %v15793_v15, %v17695_v10 }
0x4160   :  { %v17689_v29 = vld [vmem:[#allocation29_spill] sm:$0xff]  ;;  %v17690_v50 = vld [vmem:[#allocation30_spill] sm:$0xff]  ;;  %v17691_v39 = vld [vmem:[#allocation31_spill] sm:$0xff]  ;;  %v15909_v44 = vmul.f32 %v15793_v15, %v15838_v52  ;;  %v15925_v61 = vmul.f32 %v15793_v15, %v15851_v26  ;;  %v8633_v57 = vadd.f32 %v8602_v47, %v8566_v11  ;;  %v8638_v52 = vadd.f32 %v8607_v35, %v8571_v53 }
0x4161   :  { %v15881_v28 = vmul.f32 %v15793_v15, %v17689_v29  ;;  %v15885_v33 = vmul.f32 %v15793_v15, %v17690_v50  ;;  %v15889_v20 = vmul.f32 %v15793_v15, %v17691_v39  ;;  %v8576_v6 = vld [vmem:[#allocation3 + $0x50] sm:$0xff]  ;;  %v8577_v7 = vld [vmem:[#allocation3 + $0x58] sm:$0xff]  ;;  %v8578_v3 = vld [vmem:[#allocation3 + $0x60] sm:$0xff]  ;;  %17696 = vst [vmem:[#allocation10_spill] sm:$0xff] %v15905_v0  ;;  %v8634_v29 = vadd.f32 %v8603_v60, %v8567_v16 }
0x4162   :  { %v17692_v58 = vld [vmem:[#allocation33_spill] sm:$0xff]  ;;  %v17693_v40 = vld [vmem:[#allocation34_spill] sm:$0xff]  ;;  %v17694_v55 = vld [vmem:[#allocation36_spill] sm:$0xff]  ;;  %17697 = vst [vmem:[#allocation11_spill] sm:$0xff] %v15909_v44  ;;  %v8635_v50 = vadd.f32 %v8604_v19, %v8568_v38  ;;  %v8639_v10 = vadd.f32 %v8608_v5, %v8572_v4  ;;  %v8642_v44 = vadd.f32 %v8611_v23, %v8575_v63  ;;  %v8643_v0 = vadd.f32 %v8612_v27, %v8576_v6 }
0x4163   :  { %v15893_v9 = vmul.f32 %v15793_v15, %v17692_v58  ;;  %v15897_v37 = vmul.f32 %v15793_v15, %v17693_v40  ;;  %v15901_v13 = vmul.f32 %v15793_v15, %v17694_v55  ;;  %v8579_v22 = vld [vmem:[#allocation3 + $0x68] sm:$0xff]  ;;  %v8580_v1 = vld [vmem:[#allocation3 + $0x70] sm:$0xff]  ;;  %v8581_v46 = vld [vmem:[#allocation3 + $0x78] sm:$0xff]  ;;  %8664 = vst.msk [vmem:[#allocation3] sm:$0xff] %vm7383_vm13, %v8633_v57  ;;  %v8644_v19 = vadd.f32 %v8613_v48, %v8577_v7 }
0x4164   :  { %v17698_v24 = vld [vmem:[#allocation35_spill] sm:$0xff]  ;;  %v17700_v32 = vld [vmem:[#allocation37_spill] sm:$0xff]  ;;  %v17702_v42 = vld [vmem:[#allocation8_spill] sm:$0xff]  ;;  %8665 = vst.msk [vmem:[#allocation3 + $0x8] sm:$0xff] %vm7383_vm13, %v8634_v29  ;;  %v8647_v35 = vadd.f32 %v8616_v49, %v8580_v1  ;;  %v8648_v27 = vadd.f32 %v15865_v36, %v8581_v46 }
0x4165   :  { %v15913_v43 = vmul.f32 %v15793_v15, %v17698_v24  ;;  %v15917_v51 = vmul.f32 %v15793_v15, %v17700_v32  ;;  %v15921_v31 = vmul.f32 %v15793_v15, %v17702_v42  ;;  %v8582_v45 = vld [vmem:[#allocation3 + $0x80] sm:$0xff]  ;;  %v8583_v30 = vld [vmem:[#allocation3 + $0x88] sm:$0xff]  ;;  %v8584_v62 = vld [vmem:[#allocation3 + $0x90] sm:$0xff]  ;;  %v8636_v24 = vadd.f32 %v8605_v59, %v8569_v18  ;;  %8666 = vst.msk [vmem:[#allocation3 + $0x10] sm:$0xff] %vm7383_vm13, %v8635_v50 }
0x4166   :  { %v8585_v39 = vld [vmem:[#allocation3 + $0x98] sm:$0xff]  ;;  %v8586_v58 = vld [vmem:[#allocation3 + $0xa0] sm:$0xff]  ;;  %v8587_v40 = vld [vmem:[#allocation3 + $0xa8] sm:$0xff]  ;;  %v8637_v32 = vadd.f32 %v8606_v14, %v8570_v2  ;;  %v8645_v59 = vadd.f32 %v8614_v21, %v8578_v3  ;;  %v8646_v14 = vadd.f32 %v8615_v54, %v8579_v22  ;;  %8669 = vst.msk [vmem:[#allocation3 + $0x28] sm:$0xff] %vm7383_vm13, %v8638_v52  ;;  %v8649_v48 = vadd.f32 %v15869_v41, %v8582_v45 }
0x4167   :  { %17699 = vst [vmem:[#allocation12_spill] sm:$0xff] %v15913_v43  ;;  %17701 = vst [vmem:[#allocation13_spill] sm:$0xff] %v15917_v51  ;;  %v8588_v55 = vld [vmem:[#allocation3 + $0xb0] sm:$0xff]  ;;  %v8589_v42 = vld [vmem:[#allocation3 + $0xb8] sm:$0xff]  ;;  %v8640_v51 = vadd.f32 %v8609_v8, %v8573_v34  ;;  %v8641_v43 = vadd.f32 %v8610_v25, %v8574_v12  ;;  %v8650_v21 = vadd.f32 %v15873_v17, %v8583_v30 }
0x4168   :  { %17703 = vst [vmem:[#allocation14_spill] sm:$0xff] %v15921_v31  ;;  %v8590_v31 = vld [vmem:[#allocation3 + $0xc0] sm:$0xff]  ;;  %v8591_v15 = vld [vmem:[#allocation3 + $0xc8] sm:$0xff]  ;;  %v8592_v47 = vld [vmem:[#allocation3 + $0xd0] sm:$0xff]  ;;  %v8651_v54 = vadd.f32 %v15877_v56, %v8584_v62  ;;  %v8652_v49 = vadd.f32 %v15881_v28, %v8585_v39  ;;  %v8653_v36 = vadd.f32 %v15885_v33, %v8586_v58  ;;  %v8654_v41 = vadd.f32 %v15889_v20, %v8587_v40 }
0x4169   :  { %v8593_v60 = vld [vmem:[#allocation3 + $0xd8] sm:$0xff]  ;;  %8667 = vst.msk [vmem:[#allocation3 + $0x18] sm:$0xff] %vm7383_vm13, %v8636_v24  ;;  %8668 = vst.msk [vmem:[#allocation3 + $0x20] sm:$0xff] %vm7383_vm13, %v8637_v32  ;;  %v8695_v5 = vld [vmem:[%s17391_s1 + $0x40] sm:$0xff]  ;;  %v8655_v17 = vadd.f32 %v15893_v9, %v8588_v55  ;;  %v8656_v56 = vadd.f32 %v15897_v37, %v8589_v42  ;;  %v8657_v28 = vadd.f32 %v15901_v13, %v8590_v31 }
0x416a   :  { %8670 = vst.msk [vmem:[#allocation3 + $0x30] sm:$0xff] %vm7383_vm13, %v8639_v10  ;;  %v15940_v8 = vld [vmem:[%s17391_s1 + $0x48] sm:$0xff]  ;;  %v15945_v25 = vld [vmem:[%s17391_s1 + $0x50] sm:$0xff]  ;;  %v15950_v52 = vld [vmem:[%s17391_s1 + $0x58] sm:$0xff] }
0x416b   :  { %17704 = vst [vmem:[#allocation15_spill] sm:$0xff] %v15940_v8  ;;  %17705 = vst [vmem:[#allocation16_spill] sm:$0xff] %v15945_v25  ;;  %v15955_v23 = vld [vmem:[%s17397_s7 + $0x8] ss:$0 sm:$0xff]  ;;  %v8594_v11 = vld [vmem:[#allocation3 + $0xe0] sm:$0xff] }
0x416c   :  { %17706 = vst [vmem:[#allocation17_spill] sm:$0xff] %v15950_v52  ;;  %v8595_v16 = vld [vmem:[#allocation3 + $0xe8] sm:$0xff]  ;;  %v8596_v38 = vld [vmem:[#allocation3 + $0xf0] sm:$0xff]  ;;  %8671 = vst.msk [vmem:[#allocation3 + $0x38] sm:$0xff] %vm7383_vm13, %v8640_v51  ;;  %v8762_v45 = vmul.f32 %v15955_v23, %v8695_v5  ;;  %v8763_v30 = vmul.f32 %v15955_v23, %v15940_v8  ;;  %v8764_v62 = vmul.f32 %v15955_v23, %v15945_v25 }
0x416d   :  { %8672 = vst.msk [vmem:[#allocation3 + $0x40] sm:$0xff] %vm7383_vm13, %v8641_v43  ;;  %8673 = vst.msk [vmem:[#allocation3 + $0x48] sm:$0xff] %vm7383_vm13, %v8642_v44  ;;  %v15968_v18 = vld [vmem:[%s17391_s1 + $0x60] sm:$0xff]  ;;  %v15973_v2 = vld [vmem:[%s17391_s1 + $0x68] sm:$0xff]  ;;  %v8663_v46 = vadd.f32 %v15925_v61, %v8596_v38  ;;  %v8765_v61 = vmul.f32 %v15955_v23, %v15950_v52 }
0x416e   :  { %8674 = vst.msk [vmem:[#allocation3 + $0x50] sm:$0xff] %vm7383_vm13, %v8643_v0  ;;  %17707 = vst [vmem:[#allocation18_spill] sm:$0xff] %v15968_v18  ;;  %v15978_v53 = vld [vmem:[%s17391_s1 + $0x70] sm:$0xff]  ;;  %v15983_v4 = vld [vmem:[%s17391_s1 + $0x78] sm:$0xff]  ;;  %v8766_v39 = vmul.f32 %v15955_v23, %v15968_v18  ;;  %v8767_v58 = vmul.f32 %v15955_v23, %v15973_v2 }
0x416f   :  { %17708 = vst [vmem:[#allocation19_spill] sm:$0xff] %v15973_v2  ;;  %17709 = vst [vmem:[#allocation20_spill] sm:$0xff] %v15978_v53  ;;  %v15996_v34 = vld [vmem:[%s17391_s1 + $0x80] sm:$0xff]  ;;  %v16001_v12 = vld [vmem:[%s17391_s1 + $0x88] sm:$0xff]  ;;  %v8768_v40 = vmul.f32 %v15955_v23, %v15978_v53  ;;  %v8769_v24 = vmul.f32 %v15955_v23, %v15983_v4 }
0x4170   :  { %17710 = vst [vmem:[#allocation21_spill] sm:$0xff] %v15983_v4  ;;  %8675 = vst.msk [vmem:[#allocation3 + $0x58] sm:$0xff] %vm7383_vm13, %v8644_v19  ;;  %v16006_v63 = vld [vmem:[%s17391_s1 + $0x90] sm:$0xff]  ;;  %v17714_v33 = vld [vmem:[#allocation10_spill] sm:$0xff]  ;;  %v8770_v19 = vmul.f32 %v15955_v23, %v15996_v34 }
0x4171   :  { %8676 = vst.msk [vmem:[#allocation3 + $0x60] sm:$0xff] %vm7383_vm13, %v8645_v59  ;;  %8677 = vst.msk [vmem:[#allocation3 + $0x68] sm:$0xff] %vm7383_vm13, %v8646_v14  ;;  %v8658_v20 = vadd.f32 %v17714_v33, %v8591_v15  ;;  %v17715_v6 = vld [vmem:[#allocation11_spill] sm:$0xff]  ;;  %v16019_v3 = vld [vmem:[%s17391_s1 + $0x98] sm:$0xff]  ;;  %v8771_v59 = vmul.f32 %v15955_v23, %v16001_v12  ;;  %v8772_v14 = vmul.f32 %v15955_v23, %v16006_v63 }
0x4172   :  { %8678 = vst.msk [vmem:[#allocation3 + $0x70] sm:$0xff] %vm7383_vm13, %v8647_v35  ;;  %17711 = vst [vmem:[#allocation22_spill] sm:$0xff] %v15996_v34  ;;  %v8659_v7 = vadd.f32 %v17715_v6, %v8592_v47  ;;  %v16024_v9 = vld [vmem:[%s17391_s1 + $0xa0] sm:$0xff]  ;;  %v16029_v37 = vld [vmem:[%s17391_s1 + $0xa8] sm:$0xff]  ;;  %v8773_v35 = vmul.f32 %v15955_v23, %v16019_v3 }
0x4173   :  { %17712 = vst [vmem:[#allocation23_spill] sm:$0xff] %v16001_v12  ;;  %17713 = vst [vmem:[#allocation24_spill] sm:$0xff] %v16006_v63  ;;  %v17719_v55 = vld [vmem:[#allocation12_spill] sm:$0xff]  ;;  %v17720_v10 = vld [vmem:[#allocation13_spill] sm:$0xff] }
0x4174   :  { %8679 = vst.msk [vmem:[#allocation3 + $0x78] sm:$0xff] %vm7383_vm13, %v8648_v27  ;;  %8680 = vst.msk [vmem:[#allocation3 + $0x80] sm:$0xff] %vm7383_vm13, %v8649_v48  ;;  %v8660_v13 = vadd.f32 %v17719_v55, %v8593_v60  ;;  %v8661_v0 = vadd.f32 %v17720_v10, %v8594_v11  ;;  %v17721_v22 = vld [vmem:[#allocation14_spill] sm:$0xff]  ;;  %v16042_v44 = vld [vmem:[%s17391_s1 + $0xb0] sm:$0xff]  ;;  %v8774_v27 = vmul.f32 %v15955_v23, %v16024_v9 }
0x4175   :  { %8681 = vst.msk [vmem:[#allocation3 + $0x88] sm:$0xff] %vm7383_vm13, %v8650_v21  ;;  %8682 = vst.msk [vmem:[#allocation3 + $0x90] sm:$0xff] %vm7383_vm13, %v8651_v54  ;;  %v8662_v1 = vadd.f32 %v17721_v22, %v8595_v16  ;;  %v16047_v43 = vld [vmem:[%s17391_s1 + $0xb8] sm:$0xff]  ;;  %v16052_v32 = vld [vmem:[%s17391_s1 + $0xc0] sm:$0xff]  ;;  %v8775_v48 = vmul.f32 %v15955_v23, %v16029_v37  ;;  %v8776_v21 = vmul.f32 %v15955_v23, %v16042_v44 }
0x4176   :  { %17716 = vst [vmem:[#allocation25_spill] sm:$0xff] %v16019_v3  ;;  %17717 = vst [vmem:[#allocation26_spill] sm:$0xff] %v16024_v9  ;;  %v16061_v51 = vld [vmem:[%s17391_s1 + $0xc8] sm:$0xff]  ;;  %v16066_v42 = vld [vmem:[%s17391_s1 + $0xd0] sm:$0xff]  ;;  %v8777_v54 = vmul.f32 %v15955_v23, %v16047_v43 }
0x4177   :  { %17718 = vst [vmem:[#allocation27_spill] sm:$0xff] %v16029_v37  ;;  %8683 = vst.msk [vmem:[#allocation3 + $0x98] sm:$0xff] %vm7383_vm13, %v8652_v49  ;;  %v16071_v31 = vld [vmem:[%s17391_s1 + $0xd8] sm:$0xff]  ;;  %v16087_v57 = vld [vmem:[%s17391_s1 + $0xe0] sm:$0xff] }
0x4178   :  { %8684 = vst.msk [vmem:[#allocation3 + $0xa0] sm:$0xff] %vm7383_vm13, %v8653_v36  ;;  %8685 = vst.msk [vmem:[#allocation3 + $0xa8] sm:$0xff] %vm7383_vm13, %v8654_v41  ;;  %v16092_v29 = vld [vmem:[%s17391_s1 + $0xe8] sm:$0xff]  ;;  %v16097_v50 = vld [vmem:[%s17391_s1 + $0xf0] sm:$0xff]  ;;  %v16145_v33 = vmul.f32 %v15955_v23, %v16071_v31  ;;  %v8782_v55 = vmul.f32 %v15955_v23, %v16087_v57 }
0x4179   :  { %8686 = vst.msk [vmem:[#allocation3 + $0xb0] sm:$0xff] %vm7383_vm13, %v8655_v17  ;;  %17722 = vst [vmem:[#allocation28_spill] sm:$0xff] %v16042_v44  ;;  %v16110_v15 = vld [vmem:[%s17391_s1 + $0x110] sm:$0xff]  ;;  %v8726_v60 = vld [vmem:[#allocation3] sm:$0xff]  ;;  %v8778_v17 = vmul.f32 %v15955_v23, %v16052_v32  ;;  %v16155_v10 = vmul.f32 %v15955_v23, %v16097_v50 }
0x417a   :  { %17723 = vst [vmem:[#allocation29_spill] sm:$0xff] %v16047_v43  ;;  %17724 = vst [vmem:[#allocation30_spill] sm:$0xff] %v16052_v32  ;;  %v16115_v47 = vld [vmem:[%s17391_s1 + $0x130] sm:$0xff]  ;;  %v8727_v5 = vld [vmem:[#allocation3 + $0x8] sm:$0xff] }
0x417b   :  { %8687 = vst.msk [vmem:[#allocation3 + $0xb8] sm:$0xff] %vm7383_vm13, %v8656_v56  ;;  %8688 = vst.msk [vmem:[#allocation3 + $0xc0] sm:$0xff] %vm7383_vm13, %v8657_v28  ;;  %v8728_v11 = vld [vmem:[#allocation3 + $0x10] sm:$0xff]  ;;  %v8729_v16 = vld [vmem:[#allocation3 + $0x18] sm:$0xff]  ;;  %v16137_v56 = vmul.f32 %v15955_v23, %v16061_v51  ;;  %v16141_v28 = vmul.f32 %v15955_v23, %v16066_v42  ;;  %v8794_v34 = vadd.f32 %v8763_v30, %v8727_v5 }
0x417c   :  { %8689 = vst.msk [vmem:[#allocation3 + $0xc8] sm:$0xff] %vm7383_vm13, %v8658_v20  ;;  %8690 = vst.msk [vmem:[#allocation3 + $0xd0] sm:$0xff] %vm7383_vm13, %v8659_v7  ;;  %v8730_v38 = vld [vmem:[#allocation3 + $0x20] sm:$0xff]  ;;  %v8731_v49 = vld [vmem:[#allocation3 + $0x28] sm:$0xff]  ;;  %v8795_v4 = vadd.f32 %v8764_v62, %v8728_v11  ;;  %v8796_v53 = vadd.f32 %v8765_v61, %v8729_v16 }
0x417d   :  { %17725 = vst [vmem:[#allocation31_spill] sm:$0xff] %v16061_v51  ;;  %17726 = vst [vmem:[#allocation33_spill] sm:$0xff] %v16066_v42  ;;  %v8732_v36 = vld [vmem:[#allocation3 + $0x30] sm:$0xff]  ;;  %v8733_v41 = vld [vmem:[#allocation3 + $0x38] sm:$0xff]  ;;  %v8797_v2 = vadd.f32 %v8766_v39, %v8730_v38  ;;  %v8798_v25 = vadd.f32 %v8767_v58, %v8731_v49 }
0x417e   :  { %17727 = vst [vmem:[#allocation34_spill] sm:$0xff] %v16071_v31  ;;  %8691 = vst.msk [vmem:[#allocation3 + $0xd8] sm:$0xff] %vm7383_vm13, %v8660_v13  ;;  %v8734_v20 = vld [vmem:[#allocation3 + $0x40] sm:$0xff]  ;;  %v8735_v6 = vld [vmem:[#allocation3 + $0x48] sm:$0xff]  ;;  %v16151_v13 = vmul.f32 %v15955_v23, %v16092_v29  ;;  %v8799_v8 = vadd.f32 %v8768_v40, %v8732_v36 }
0x417f   :  { %8692 = vst.msk [vmem:[#allocation3 + $0xe0] sm:$0xff] %vm7383_vm13, %v8661_v0  ;;  %8693 = vst.msk [vmem:[#allocation3 + $0xe8] sm:$0xff] %vm7383_vm13, %v8662_v1  ;;  %v8736_v7 = vld [vmem:[#allocation3 + $0x50] sm:$0xff]  ;;  %v17733_v0 = vld [vmem:[#allocation36_spill] sm:$0xff] }
0x4180   :  { %8694 = vst.msk [vmem:[#allocation3 + $0xf0] sm:$0xff] %vm7383_vm13, %v8663_v46  ;;  %17728 = vst [vmem:[#allocation35_spill] sm:$0xff] %v16087_v57  ;;  %v16159_v22 = vmul.f32 %v15955_v23, %v17733_v0  ;;  %v8737_v1 = vld [vmem:[#allocation3 + $0x58] sm:$0xff]  ;;  %v8738_v46 = vld [vmem:[#allocation3 + $0x60] sm:$0xff] }
0x4181   :  { %17729 = vst [vmem:[#allocation10_spill] sm:$0xff] %v16092_v29  ;;  %17730 = vst [vmem:[#allocation11_spill] sm:$0xff] %v16097_v50  ;;  %v8739_v31 = vld [vmem:[#allocation3 + $0x68] sm:$0xff]  ;;  %v17734_v42 = vld [vmem:[#allocation9_spill] sm:$0xff]  ;;  %v16169_v29 = vmul.f32 %v15955_v23, %v16110_v15 }
0x4182   :  { %17731 = vst [vmem:[#allocation12_spill] sm:$0xff] %v16110_v15  ;;  %17732 = vst [vmem:[#allocation13_spill] sm:$0xff] %v16115_v47  ;;  %v8786_v51 = vmul.f32 %v15955_v23, %v17734_v42  ;;  %v17735_v32 = vld [vmem:[#allocation7_spill] sm:$0xff]  ;;  %v17736_v50 = vld [vmem:[#allocation37_spill] sm:$0xff]  ;;  %v16181_v42 = vmul.f32 %v15955_v23, %v15851_v26  ;;  %v8793_v15 = vadd.f32 %v8762_v45, %v8726_v60 }
0x4183   :  { %v16165_v57 = vmul.f32 %v15955_v23, %v17735_v32  ;;  %v16173_v43 = vmul.f32 %v15955_v23, %v17736_v50  ;;  %v8740_v0 = vld [vmem:[#allocation3 + $0x70] sm:$0xff]  ;;  %v8741_v44 = vld [vmem:[#allocation3 + $0x78] sm:$0xff]  ;;  %v8742_v37 = vld [vmem:[#allocation3 + $0x80] sm:$0xff]  ;;  %v16185_v32 = vmul.f32 %v15955_v23, %v16115_v47  ;;  %v8801_v26 = vadd.f32 %v8770_v19, %v8734_v20  ;;  %8825 = vst.msk [vmem:[#allocation3 + $0x8] sm:$0xff] %vm7383_vm13, %v8794_v34 }
0x4184   :  { %v17738_v9 = vld [vmem:[#allocation8_spill] sm:$0xff]  ;;  %17740 = vst [vmem:[#allocation37_spill] sm:$0xff] %v16181_v42  ;;  %v8744_v12 = vld [vmem:[#allocation3 + $0x90] sm:$0xff]  ;;  %v8745_v50 = vld [vmem:[#allocation3 + $0x98] sm:$0xff]  ;;  %v8802_v45 = vadd.f32 %v8771_v59, %v8735_v6  ;;  %v8803_v60 = vadd.f32 %v8772_v14, %v8736_v7  ;;  %v8806_v39 = vadd.f32 %v8775_v48, %v8739_v31  ;;  %v8807_v58 = vadd.f32 %v8776_v21, %v8740_v0 }
0x4185   :  { %17737 = vst [vmem:[#allocation14_spill] sm:$0xff] %v16173_v43  ;;  %v16177_v3 = vmul.f32 %v15955_v23, %v17738_v9  ;;  %17741 = vst [vmem:[#allocation38_spill] sm:$0xff] %v16185_v32  ;;  %v8743_v63 = vld [vmem:[#allocation3 + $0x88] sm:$0xff]  ;;  %v8746_v18 = vld [vmem:[#allocation3 + $0xa0] sm:$0xff]  ;;  %v8804_v32 = vadd.f32 %v8773_v35, %v8737_v1  ;;  %v8805_v43 = vadd.f32 %v8774_v27, %v8738_v46 }
0x4186   :  { %v8747_v52 = vld [vmem:[#allocation3 + $0xa8] sm:$0xff]  ;;  %v8748_v9 = vld [vmem:[#allocation3 + $0xb0] sm:$0xff]  ;;  %8824 = vst.msk [vmem:[#allocation3] sm:$0xff] %vm7383_vm13, %v8793_v15  ;;  %v8749_v42 = vld [vmem:[#allocation3 + $0xb8] sm:$0xff]  ;;  %v8808_v40 = vadd.f32 %v8777_v54, %v8741_v44  ;;  %v8812_v15 = vadd.f32 %v16145_v33, %v8745_v50  ;;  %v8813_v31 = vadd.f32 %v8782_v55, %v8746_v18 }
0x4187   :  { %17739 = vst [vmem:[#allocation36_spill] sm:$0xff] %v16177_v3  ;;  %v8800_v3 = vadd.f32 %v8769_v24, %v8733_v41  ;;  %v8750_v23 = vld [vmem:[#allocation3 + $0xc0] sm:$0xff]  ;;  %v8751_v47 = vld [vmem:[#allocation3 + $0xc8] sm:$0xff]  ;;  %8826 = vst.msk [vmem:[#allocation3 + $0x10] sm:$0xff] %vm7383_vm13, %v8795_v4  ;;  %v8809_v24 = vadd.f32 %v8778_v17, %v8742_v37 }
0x4188   :  { %8827 = vst.msk [vmem:[#allocation3 + $0x18] sm:$0xff] %vm7383_vm13, %v8796_v53  ;;  %8828 = vst.msk [vmem:[#allocation3 + $0x20] sm:$0xff] %vm7383_vm13, %v8797_v2  ;;  %v8752_v30 = vld [vmem:[#allocation3 + $0xd0] sm:$0xff]  ;;  %v8753_v62 = vld [vmem:[#allocation3 + $0xd8] sm:$0xff]  ;;  %v8810_v53 = vadd.f32 %v16137_v56, %v8743_v63  ;;  %v8811_v2 = vadd.f32 %v16141_v28, %v8744_v12  ;;  %v8816_v12 = vadd.f32 %v16159_v22, %v8749_v42 }
0x4189   :  { %v8754_v61 = vld [vmem:[#allocation3 + $0xe0] sm:$0xff]  ;;  %8829 = vst.msk [vmem:[#allocation3 + $0x28] sm:$0xff] %vm7383_vm13, %v8798_v25  ;;  %8830 = vst.msk [vmem:[#allocation3 + $0x30] sm:$0xff] %vm7383_vm13, %v8799_v8  ;;  %v8755_v4 = vld [vmem:[#allocation3 + $0xe8] sm:$0xff]  ;;  %v8814_v8 = vadd.f32 %v16151_v13, %v8747_v52  ;;  %v8815_v25 = vadd.f32 %v16155_v10, %v8748_v9  ;;  %v8817_v18 = vadd.f32 %v8786_v51, %v8750_v23 }
0x418a   :  { %8831 = vst.msk [vmem:[#allocation3 + $0x38] sm:$0xff] %vm7383_vm13, %v8800_v3  ;;  %8832 = vst.msk [vmem:[#allocation3 + $0x40] sm:$0xff] %vm7383_vm13, %v8801_v26  ;;  %v8756_v34 = vld [vmem:[#allocation3 + $0xf0] sm:$0xff]  ;;  %v16206_v26 = vld [vmem:[%s17397_s7 + $0x9] ss:$0 sm:$0xff]  ;;  %v8818_v63 = vadd.f32 %v16165_v57, %v8751_v47  ;;  %v8819_v3 = vadd.f32 %v16169_v29, %v8752_v30 }
0x418b   :  { %8833 = vst.msk [vmem:[#allocation3 + $0x48] sm:$0xff] %vm7383_vm13, %v8802_v45  ;;  %8834 = vst.msk [vmem:[#allocation3 + $0x50] sm:$0xff] %vm7383_vm13, %v8803_v60  ;;  %v17744_v9 = vld [vmem:[#allocation37_spill] sm:$0xff]  ;;  %v17746_v57 = vld [vmem:[#allocation15_spill] sm:$0xff] }
0x418c   :  { %8835 = vst.msk [vmem:[#allocation3 + $0x58] sm:$0xff] %vm7383_vm13, %v8804_v32  ;;  %8836 = vst.msk [vmem:[#allocation3 + $0x60] sm:$0xff] %vm7383_vm13, %v8805_v43  ;;  %v17742_v37 = vld [vmem:[#allocation14_spill] sm:$0xff]  ;;  %v8822_v32 = vadd.f32 %v17744_v9, %v8755_v4  ;;  %v8922_v29 = vmul.f32 %v16206_v26, %v17746_v57  ;;  %v17747_v47 = vld [vmem:[#allocation16_spill] sm:$0xff] }
0x418d   :  { %8837 = vst.msk [vmem:[#allocation3 + $0x68] sm:$0xff] %vm7383_vm13, %v8806_v39  ;;  %8838 = vst.msk [vmem:[#allocation3 + $0x70] sm:$0xff] %vm7383_vm13, %v8807_v58  ;;  %v8820_v44 = vadd.f32 %v17742_v37, %v8753_v62  ;;  %v17745_v51 = vld [vmem:[#allocation38_spill] sm:$0xff]  ;;  %v8923_v19 = vmul.f32 %v16206_v26, %v17747_v47  ;;  %v17748_v59 = vld [vmem:[#allocation17_spill] sm:$0xff] }
0x418e   :  { %8839 = vst.msk [vmem:[#allocation3 + $0x78] sm:$0xff] %vm7383_vm13, %v8808_v40  ;;  %8840 = vst.msk [vmem:[#allocation3 + $0x80] sm:$0xff] %vm7383_vm13, %v8809_v24  ;;  %v17743_v52 = vld [vmem:[#allocation36_spill] sm:$0xff]  ;;  %v8823_v42 = vadd.f32 %v17745_v51, %v8756_v34  ;;  %v8924_v14 = vmul.f32 %v16206_v26, %v17748_v59  ;;  %v17749_v35 = vld [vmem:[#allocation18_spill] sm:$0xff] }
0x418f   :  { %v8821_v43 = vadd.f32 %v17743_v52, %v8754_v61  ;;  %8841 = vst.msk [vmem:[#allocation3 + $0x88] sm:$0xff] %vm7383_vm13, %v8810_v53  ;;  %8842 = vst.msk [vmem:[#allocation3 + $0x90] sm:$0xff] %vm7383_vm13, %v8811_v2  ;;  %v8925_v5 = vmul.f32 %v16206_v26, %v17749_v35  ;;  %v17750_v11 = vld [vmem:[#allocation19_spill] sm:$0xff]  ;;  %v17751_v38 = vld [vmem:[#allocation20_spill] sm:$0xff] }
0x4190   :  { %8843 = vst.msk [vmem:[#allocation3 + $0x98] sm:$0xff] %vm7383_vm13, %v8812_v15  ;;  %8844 = vst.msk [vmem:[#allocation3 + $0xa0] sm:$0xff] %vm7383_vm13, %v8813_v31  ;;  %v8926_v16 = vmul.f32 %v16206_v26, %v17750_v11  ;;  %v8927_v27 = vmul.f32 %v16206_v26, %v17751_v38  ;;  %v16250_v48 = vld [vmem:[%s17391_s1 + $0xf8] sm:$0xff]  ;;  %v17754_v54 = vld [vmem:[#allocation21_spill] sm:$0xff] }
0x4191   :  { %8845 = vst.msk [vmem:[#allocation3 + $0xa8] sm:$0xff] %vm7383_vm13, %v8814_v8  ;;  %8846 = vst.msk [vmem:[#allocation3 + $0xb0] sm:$0xff] %vm7383_vm13, %v8815_v25  ;;  %v16255_v21 = vld [vmem:[%s17391_s1 + $0x118] sm:$0xff]  ;;  %v8928_v49 = vmul.f32 %v16206_v26, %v17754_v54  ;;  %v17756_v17 = vld [vmem:[#allocation23_spill] sm:$0xff] }
0x4192   :  { %8847 = vst.msk [vmem:[#allocation3 + $0xb8] sm:$0xff] %vm7383_vm13, %v8816_v12  ;;  %8848 = vst.msk [vmem:[#allocation3 + $0xc0] sm:$0xff] %vm7383_vm13, %v8817_v18  ;;  %v17755_v36 = vld [vmem:[#allocation22_spill] sm:$0xff]  ;;  %v8930_v56 = vmul.f32 %v16206_v26, %v17756_v17  ;;  %v17757_v28 = vld [vmem:[#allocation24_spill] sm:$0xff] }
0x4193   :  { %8849 = vst.msk [vmem:[#allocation3 + $0xc8] sm:$0xff] %vm7383_vm13, %v8818_v63  ;;  %8850 = vst.msk [vmem:[#allocation3 + $0xd0] sm:$0xff] %vm7383_vm13, %v8819_v3  ;;  %v8929_v41 = vmul.f32 %v16206_v26, %v17755_v36  ;;  %v8931_v33 = vmul.f32 %v16206_v26, %v17757_v28  ;;  %v16268_v20 = vld [vmem:[%s17391_s1 + $0x138] sm:$0xff]  ;;  %v8886_v6 = vld [vmem:[#allocation3] sm:$0xff] }
0x4194   :  { %8851 = vst.msk [vmem:[#allocation3 + $0xd8] sm:$0xff] %vm7383_vm13, %v8820_v44  ;;  %8852 = vst.msk [vmem:[#allocation3 + $0xe0] sm:$0xff] %vm7383_vm13, %v8821_v43  ;;  %v8887_v7 = vld [vmem:[#allocation3 + $0x8] sm:$0xff]  ;;  %v8888_v55 = vld [vmem:[#allocation3 + $0x10] sm:$0xff]  ;;  %v16330_v28 = vmul.f32 %v16206_v26, %v16268_v20 }
0x4195   :  { %8853 = vst.msk [vmem:[#allocation3 + $0xe8] sm:$0xff] %vm7383_vm13, %v8822_v32  ;;  %8854 = vst.msk [vmem:[#allocation3 + $0xf0] sm:$0xff] %vm7383_vm13, %v8823_v42  ;;  %v17759_v13 = vld [vmem:[#allocation25_spill] sm:$0xff]  ;;  %v17760_v22 = vld [vmem:[#allocation26_spill] sm:$0xff]  ;;  %v8944_v32 = vmul.f32 %v16206_v26, %v16250_v48  ;;  %v8954_v17 = vadd.f32 %v8923_v19, %v8887_v7  ;;  %v8955_v36 = vadd.f32 %v8924_v14, %v8888_v55 }
0x4196   :  { %17752 = vst [vmem:[#allocation14_spill] sm:$0xff] %v16250_v48  ;;  %17753 = vst [vmem:[#allocation36_spill] sm:$0xff] %v16255_v21  ;;  %v8932_v10 = vmul.f32 %v16206_v26, %v17759_v13  ;;  %v8933_v1 = vmul.f32 %v16206_v26, %v17760_v22  ;;  %v17761_v46 = vld [vmem:[#allocation27_spill] sm:$0xff]  ;;  %v17762_v50 = vld [vmem:[#allocation28_spill] sm:$0xff] }
0x4197   :  { %17758 = vst [vmem:[#allocation37_spill] sm:$0xff] %v16268_v20  ;;  %v8934_v0 = vmul.f32 %v16206_v26, %v17761_v46  ;;  %v8935_v23 = vmul.f32 %v16206_v26, %v17762_v50  ;;  %v8889_v45 = vld [vmem:[#allocation3 + $0x18] sm:$0xff]  ;;  %v8890_v60 = vld [vmem:[#allocation3 + $0x20] sm:$0xff]  ;;  %v8891_v30 = vld [vmem:[#allocation3 + $0x28] sm:$0xff] }
0x4198   :  { %v8892_v62 = vld [vmem:[#allocation3 + $0x30] sm:$0xff]  ;;  %v17764_v58 = vld [vmem:[#allocation30_spill] sm:$0xff]  ;;  %v17765_v24 = vld [vmem:[#allocation31_spill] sm:$0xff]  ;;  %v8956_v11 = vadd.f32 %v8925_v5, %v8889_v45  ;;  %v8958_v35 = vadd.f32 %v8927_v27, %v8891_v30  ;;  %8985 = vst.msk [vmem:[#allocation3 + $0x8] sm:$0xff] %vm7383_vm13, %v8954_v17 }
0x4199   :  { %v17763_v61 = vld [vmem:[#allocation29_spill] sm:$0xff]  ;;  %v8937_v40 = vmul.f32 %v16206_v26, %v17764_v58  ;;  %v8938_v4 = vmul.f32 %v16206_v26, %v17765_v24  ;;  %v8893_v2 = vld [vmem:[#allocation3 + $0x38] sm:$0xff]  ;;  %v8894_v15 = vld [vmem:[#allocation3 + $0x40] sm:$0xff]  ;;  %v8948_v58 = vmul.f32 %v16206_v26, %v16255_v21  ;;  %v8953_v21 = vadd.f32 %v8922_v29, %v8886_v6  ;;  %8986 = vst.msk [vmem:[#allocation3 + $0x10] sm:$0xff] %vm7383_vm13, %v8955_v36 }
0x419a   :  { %v8936_v39 = vmul.f32 %v16206_v26, %v17763_v61  ;;  %v17766_v34 = vld [vmem:[#allocation33_spill] sm:$0xff]  ;;  %v8895_v31 = vld [vmem:[#allocation3 + $0x48] sm:$0xff]  ;;  %v17767_v8 = vld [vmem:[#allocation34_spill] sm:$0xff]  ;;  %v8959_v59 = vadd.f32 %v8928_v49, %v8892_v62  ;;  %8987 = vst.msk [vmem:[#allocation3 + $0x18] sm:$0xff] %vm7383_vm13, %v8956_v11 }
0x419b   :  { %v8939_v53 = vmul.f32 %v16206_v26, %v17766_v34  ;;  %v8940_v25 = vmul.f32 %v16206_v26, %v17767_v8  ;;  %v17768_v12 = vld [vmem:[#allocation35_spill] sm:$0xff]  ;;  %v17769_v63 = vld [vmem:[#allocation10_spill] sm:$0xff]  ;;  %v8896_v52 = vld [vmem:[#allocation3 + $0x50] sm:$0xff]  ;;  %8984 = vst.msk [vmem:[#allocation3] sm:$0xff] %vm7383_vm13, %v8953_v21 }
0x419c   :  { %v16290_v18 = vmul.f32 %v16206_v26, %v17768_v12  ;;  %v16294_v3 = vmul.f32 %v16206_v26, %v17769_v63  ;;  %v17770_v37 = vld [vmem:[#allocation11_spill] sm:$0xff]  ;;  %v8897_v43 = vld [vmem:[#allocation3 + $0x58] sm:$0xff]  ;;  %v17771_v51 = vld [vmem:[#allocation9_spill] sm:$0xff]  ;;  %8989 = vst.msk [vmem:[#allocation3 + $0x28] sm:$0xff] %vm7383_vm13, %v8958_v35 }
0x419d   :  { %v16298_v44 = vmul.f32 %v16206_v26, %v17770_v37  ;;  %v8898_v9 = vld [vmem:[#allocation3 + $0x60] sm:$0xff]  ;;  %v16304_v42 = vmul.f32 %v16206_v26, %v17771_v51  ;;  %v17774_v63 = vld [vmem:[#allocation12_spill] sm:$0xff]  ;;  %v8900_v34 = vld [vmem:[#allocation3 + $0x70] sm:$0xff]  ;;  %v8964_v14 = vadd.f32 %v8933_v1, %v8897_v43  ;;  %8990 = vst.msk [vmem:[#allocation3 + $0x30] sm:$0xff] %vm7383_vm13, %v8959_v59 }
0x419e   :  { %v17772_v57 = vld [vmem:[#allocation7_spill] sm:$0xff]  ;;  %v16312_v8 = vmul.f32 %v16206_v26, %v17774_v63  ;;  %v8899_v37 = vld [vmem:[#allocation3 + $0x68] sm:$0xff]  ;;  %v8901_v24 = vld [vmem:[#allocation3 + $0x78] sm:$0xff]  ;;  %v8965_v5 = vadd.f32 %v8934_v0, %v8898_v9  ;;  %v8967_v27 = vadd.f32 %v8936_v39, %v8900_v34 }
0x419f   :  { %v16308_v12 = vmul.f32 %v16206_v26, %v17772_v57  ;;  %v17776_v61 = vld [vmem:[#allocation8_spill] sm:$0xff]  ;;  %v17780_v57 = vld [vmem:[#allocation13_spill] sm:$0xff]  ;;  %v8902_v63 = vld [vmem:[#allocation3 + $0x80] sm:$0xff]  ;;  %v8968_v17 = vadd.f32 %v8937_v40, %v8901_v24  ;;  %8995 = vst.msk [vmem:[#allocation3 + $0x58] sm:$0xff] %vm7383_vm13, %v8964_v14 }
0x41a0   :  { %17775 = vst [vmem:[#allocation15_spill] sm:$0xff] %v16312_v8  ;;  %v16318_v48 = vmul.f32 %v16206_v26, %v17776_v61  ;;  %v17778_v51 = vld [vmem:[#allocation32_spill] sm:$0xff]  ;;  %v16326_v46 = vmul.f32 %v16206_v26, %v17780_v57  ;;  %v8904_v13 = vld [vmem:[#allocation3 + $0x90] sm:$0xff]  ;;  %v8905_v61 = vld [vmem:[#allocation3 + $0x98] sm:$0xff]  ;;  %v8962_v8 = vadd.f32 %v8931_v33, %v8895_v31  ;;  %v8969_v36 = vadd.f32 %v8938_v4, %v8902_v63 }
0x41a1   :  { %17773 = vst [vmem:[#allocation38_spill] sm:$0xff] %v16308_v12  ;;  %v16322_v50 = vmul.f32 %v16206_v26, %v17778_v51  ;;  %v8903_v22 = vld [vmem:[#allocation3 + $0x88] sm:$0xff]  ;;  %v8906_v54 = vld [vmem:[#allocation3 + $0xa0] sm:$0xff]  ;;  %v8957_v51 = vadd.f32 %v8926_v16, %v8890_v60  ;;  %v8908_v47 = vld [vmem:[#allocation3 + $0xb0] sm:$0xff]  ;;  %v8963_v12 = vadd.f32 %v8932_v10, %v8896_v52  ;;  %v8966_v16 = vadd.f32 %v8935_v23, %v8899_v37 }
0x41a2   :  { %17777 = vst [vmem:[#allocation9_spill] sm:$0xff] %v16318_v48  ;;  %17781 = vst [vmem:[#allocation39_spill] sm:$0xff] %v16326_v46  ;;  %v8907_v38 = vld [vmem:[#allocation3 + $0xa8] sm:$0xff]  ;;  %v8909_v57 = vld [vmem:[#allocation3 + $0xb8] sm:$0xff]  ;;  %v8961_v48 = vadd.f32 %v8930_v56, %v8894_v15  ;;  %v8970_v56 = vadd.f32 %v8939_v53, %v8903_v22  ;;  %v8971_v33 = vadd.f32 %v8940_v25, %v8904_v13 }
0x41a3   :  { %17779 = vst [vmem:[#allocation8_spill] sm:$0xff] %v16322_v50  ;;  %v8910_v46 = vld [vmem:[#allocation3 + $0xc0] sm:$0xff]  ;;  %v8960_v50 = vadd.f32 %v8929_v41, %v8893_v2  ;;  %v8911_v26 = vld [vmem:[#allocation3 + $0xc8] sm:$0xff]  ;;  %v8912_v29 = vld [vmem:[#allocation3 + $0xd0] sm:$0xff]  ;;  %v8972_v11 = vadd.f32 %v16290_v18, %v8905_v61  ;;  %v8973_v35 = vadd.f32 %v16294_v3, %v8906_v54  ;;  %v8974_v59 = vadd.f32 %v16298_v44, %v8907_v38 }
0x41a4   :  { %v8913_v19 = vld [vmem:[#allocation3 + $0xd8] sm:$0xff]  ;;  %8988 = vst.msk [vmem:[#allocation3 + $0x20] sm:$0xff] %vm7383_vm13, %v8957_v51  ;;  %v8914_v21 = vld [vmem:[#allocation3 + $0xe0] sm:$0xff]  ;;  %v8915_v49 = vld [vmem:[#allocation3 + $0xe8] sm:$0xff]  ;;  %v8975_v6 = vadd.f32 %v8944_v32, %v8908_v47  ;;  %v8976_v7 = vadd.f32 %v16304_v42, %v8909_v57  ;;  %v8979_v47 = vadd.f32 %v8948_v58, %v8912_v29 }
0x41a5   :  { %v8916_v41 = vld [vmem:[#allocation3 + $0xf0] sm:$0xff]  ;;  %8991 = vst.msk [vmem:[#allocation3 + $0x38] sm:$0xff] %vm7383_vm13, %v8960_v50  ;;  %8992 = vst.msk [vmem:[#allocation3 + $0x40] sm:$0xff] %vm7383_vm13, %v8961_v48  ;;  %v16353_v48 = vld [vmem:[%s17397_s7 + $0xa] ss:$0 sm:$0xff] }
0x41a6   :  { %8993 = vst.msk [vmem:[#allocation3 + $0x48] sm:$0xff] %vm7383_vm13, %v8962_v8  ;;  %8994 = vst.msk [vmem:[#allocation3 + $0x50] sm:$0xff] %vm7383_vm13, %v8963_v12  ;;  %v8983_v45 = vadd.f32 %v16330_v28, %v8916_v41  ;;  %v17788_v28 = vld [vmem:[#allocation17_spill] sm:$0xff]  ;;  %v17789_v62 = vld [vmem:[#allocation18_spill] sm:$0xff] }
0x41a7   :  { %8996 = vst.msk [vmem:[#allocation3 + $0x60] sm:$0xff] %vm7383_vm13, %v8965_v5  ;;  %8997 = vst.msk [vmem:[#allocation3 + $0x68] sm:$0xff] %vm7383_vm13, %v8966_v16  ;;  %v17783_v13 = vld [vmem:[#allocation15_spill] sm:$0xff]  ;;  %v9083_v30 = vmul.f32 %v16353_v48, %v17788_v28  ;;  %v9084_v39 = vmul.f32 %v16353_v48, %v17789_v62  ;;  %v17792_v4 = vld [vmem:[#allocation20_spill] sm:$0xff] }
0x41a8   :  { %8998 = vst.msk [vmem:[#allocation3 + $0x70] sm:$0xff] %vm7383_vm13, %v8967_v27  ;;  %v17782_v55 = vld [vmem:[#allocation38_spill] sm:$0xff]  ;;  %v8978_v38 = vadd.f32 %v17783_v13, %v8911_v26  ;;  %8999 = vst.msk [vmem:[#allocation3 + $0x78] sm:$0xff] %vm7383_vm13, %v8968_v17  ;;  %v17790_v58 = vld [vmem:[#allocation19_spill] sm:$0xff]  ;;  %v9086_v34 = vmul.f32 %v16353_v48, %v17792_v4 }
0x41a9   :  { %v8977_v54 = vadd.f32 %v17782_v55, %v8910_v46  ;;  %9000 = vst.msk [vmem:[#allocation3 + $0x80] sm:$0xff] %vm7383_vm13, %v8969_v36  ;;  %9001 = vst.msk [vmem:[#allocation3 + $0x88] sm:$0xff] %vm7383_vm13, %v8970_v56  ;;  %v17784_v10 = vld [vmem:[#allocation9_spill] sm:$0xff]  ;;  %v17786_v50 = vld [vmem:[#allocation39_spill] sm:$0xff]  ;;  %v9085_v40 = vmul.f32 %v16353_v48, %v17790_v58 }
0x41aa   :  { %9002 = vst.msk [vmem:[#allocation3 + $0x90] sm:$0xff] %vm7383_vm13, %v8971_v33  ;;  %v8980_v22 = vadd.f32 %v17784_v10, %v8913_v19  ;;  %v17785_v1 = vld [vmem:[#allocation8_spill] sm:$0xff]  ;;  %v8982_v23 = vadd.f32 %v17786_v50, %v8915_v49  ;;  %9003 = vst.msk [vmem:[#allocation3 + $0x98] sm:$0xff] %vm7383_vm13, %v8972_v11  ;;  %v16389_v24 = vld [vmem:[%s17391_s1 + $0x100] sm:$0xff] }
0x41ab   :  { %v8981_v0 = vadd.f32 %v17785_v1, %v8914_v21  ;;  %9004 = vst.msk [vmem:[#allocation3 + $0xa0] sm:$0xff] %vm7383_vm13, %v8973_v35  ;;  %9005 = vst.msk [vmem:[#allocation3 + $0xa8] sm:$0xff] %vm7383_vm13, %v8974_v59  ;;  %v17787_v46 = vld [vmem:[#allocation16_spill] sm:$0xff]  ;;  %v17793_v53 = vld [vmem:[#allocation21_spill] sm:$0xff] }
0x41ac   :  { %9006 = vst.msk [vmem:[#allocation3 + $0xb0] sm:$0xff] %vm7383_vm13, %v8975_v6  ;;  %9007 = vst.msk [vmem:[#allocation3 + $0xb8] sm:$0xff] %vm7383_vm13, %v8976_v7  ;;  %v9082_v60 = vmul.f32 %v16353_v48, %v17787_v46  ;;  %v9087_v2 = vmul.f32 %v16353_v48, %v17793_v53  ;;  %v17794_v15 = vld [vmem:[#allocation22_spill] sm:$0xff]  ;;  %v17795_v8 = vld [vmem:[#allocation23_spill] sm:$0xff] }
0x41ad   :  { %9008 = vst.msk [vmem:[#allocation3 + $0xc0] sm:$0xff] %vm7383_vm13, %v8977_v54  ;;  %9009 = vst.msk [vmem:[#allocation3 + $0xc8] sm:$0xff] %vm7383_vm13, %v8978_v38  ;;  %v9088_v31 = vmul.f32 %v16353_v48, %v17794_v15  ;;  %v9089_v25 = vmul.f32 %v16353_v48, %v17795_v8  ;;  %v16402_v12 = vld [vmem:[%s17391_s1 + $0x120] sm:$0xff]  ;;  %v17798_v3 = vld [vmem:[#allocation24_spill] sm:$0xff] }
0x41ae   :  { %9010 = vst.msk [vmem:[#allocation3 + $0xd0] sm:$0xff] %vm7383_vm13, %v8979_v47  ;;  %9011 = vst.msk [vmem:[#allocation3 + $0xd8] sm:$0xff] %vm7383_vm13, %v8980_v22  ;;  %v16407_v18 = vld [vmem:[%s17391_s1 + $0x140] sm:$0xff]  ;;  %v9090_v37 = vmul.f32 %v16353_v48, %v17798_v3  ;;  %v17799_v44 = vld [vmem:[#allocation25_spill] sm:$0xff] }
0x41af   :  { %9012 = vst.msk [vmem:[#allocation3 + $0xe0] sm:$0xff] %vm7383_vm13, %v8981_v0  ;;  %9013 = vst.msk [vmem:[#allocation3 + $0xe8] sm:$0xff] %vm7383_vm13, %v8982_v23  ;;  %v9046_v63 = vld [vmem:[#allocation3] sm:$0xff]  ;;  %v9091_v52 = vmul.f32 %v16353_v48, %v17799_v44  ;;  %v17800_v43 = vld [vmem:[#allocation26_spill] sm:$0xff]  ;;  %v16447_v0 = vmul.f32 %v16353_v48, %v16389_v24 }
0x41b0   :  { %9014 = vst.msk [vmem:[#allocation3 + $0xf0] sm:$0xff] %vm7383_vm13, %v8983_v45  ;;  %17791 = vst [vmem:[#allocation38_spill] sm:$0xff] %v16389_v24  ;;  %v9092_v9 = vmul.f32 %v16353_v48, %v17800_v43  ;;  %v17801_v32 = vld [vmem:[#allocation27_spill] sm:$0xff]  ;;  %v9047_v57 = vld [vmem:[#allocation3 + $0x8] sm:$0xff] }
0x41b1   :  { %17796 = vst [vmem:[#allocation15_spill] sm:$0xff] %v16402_v12  ;;  %17797 = vst [vmem:[#allocation9_spill] sm:$0xff] %v16407_v18  ;;  %v9093_v42 = vmul.f32 %v16353_v48, %v17801_v32  ;;  %v9048_v51 = vld [vmem:[#allocation3 + $0x10] sm:$0xff]  ;;  %v9049_v61 = vld [vmem:[#allocation3 + $0x18] sm:$0xff]  ;;  %v9114_v3 = vadd.f32 %v9083_v30, %v9047_v57 }
0x41b2   :  { %v9050_v26 = vld [vmem:[#allocation3 + $0x20] sm:$0xff]  ;;  %v17802_v29 = vld [vmem:[#allocation28_spill] sm:$0xff]  ;;  %v17803_v14 = vld [vmem:[#allocation29_spill] sm:$0xff]  ;;  %v9115_v8 = vadd.f32 %v9084_v39, %v9048_v51  ;;  %v9116_v15 = vadd.f32 %v9085_v40, %v9049_v61 }
0x41b3   :  { %v9094_v19 = vmul.f32 %v16353_v48, %v17802_v29  ;;  %v9095_v5 = vmul.f32 %v16353_v48, %v17803_v14  ;;  %v17804_v16 = vld [vmem:[#allocation30_spill] sm:$0xff]  ;;  %v17805_v21 = vld [vmem:[#allocation31_spill] sm:$0xff]  ;;  %v9051_v41 = vld [vmem:[#allocation3 + $0x28] sm:$0xff]  ;;  %v9117_v53 = vadd.f32 %v9086_v34, %v9050_v26  ;;  %9145 = vst.msk [vmem:[#allocation3 + $0x8] sm:$0xff] %vm7383_vm13, %v9114_v3 }
0x41b4   :  { %v9096_v27 = vmul.f32 %v16353_v48, %v17804_v16  ;;  %v9097_v49 = vmul.f32 %v16353_v48, %v17805_v21  ;;  %v9052_v17 = vld [vmem:[#allocation3 + $0x30] sm:$0xff]  ;;  %v9053_v36 = vld [vmem:[#allocation3 + $0x38] sm:$0xff]  ;;  %v17808_v59 = vld [vmem:[#allocation35_spill] sm:$0xff]  ;;  %v9118_v62 = vadd.f32 %v9087_v2, %v9051_v41  ;;  %9146 = vst.msk [vmem:[#allocation3 + $0x10] sm:$0xff] %vm7383_vm13, %v9115_v8 }
0x41b5   :  { %v17806_v56 = vld [vmem:[#allocation33_spill] sm:$0xff]  ;;  %v17807_v11 = vld [vmem:[#allocation34_spill] sm:$0xff]  ;;  %v16433_v6 = vmul.f32 %v16353_v48, %v17808_v59  ;;  %v9054_v54 = vld [vmem:[#allocation3 + $0x40] sm:$0xff]  ;;  %v9119_v28 = vadd.f32 %v9088_v31, %v9052_v17  ;;  %9147 = vst.msk [vmem:[#allocation3 + $0x18] sm:$0xff] %vm7383_vm13, %v9116_v15 }
0x41b6   :  { %v9098_v33 = vmul.f32 %v16353_v48, %v17806_v56  ;;  %v16429_v35 = vmul.f32 %v16353_v48, %v17807_v11  ;;  %v17809_v7 = vld [vmem:[#allocation10_spill] sm:$0xff]  ;;  %v9055_v13 = vld [vmem:[#allocation3 + $0x48] sm:$0xff]  ;;  %v9056_v38 = vld [vmem:[#allocation3 + $0x50] sm:$0xff]  ;;  %9148 = vst.msk [vmem:[#allocation3 + $0x20] sm:$0xff] %vm7383_vm13, %v9117_v53 }
0x41b7   :  { %v16437_v55 = vmul.f32 %v16353_v48, %v17809_v7  ;;  %v17810_v47 = vld [vmem:[#allocation11_spill] sm:$0xff]  ;;  %v17811_v22 = vld [vmem:[#allocation14_spill] sm:$0xff]  ;;  %v9059_v7 = vld [vmem:[#allocation3 + $0x68] sm:$0xff]  ;;  %9149 = vst.msk [vmem:[#allocation3 + $0x28] sm:$0xff] %vm7383_vm13, %v9118_v62 }
0x41b8   :  { %v9102_v10 = vmul.f32 %v16353_v48, %v17810_v47  ;;  %v16443_v1 = vmul.f32 %v16353_v48, %v17811_v22  ;;  %v17812_v50 = vld [vmem:[#allocation7_spill] sm:$0xff]  ;;  %v9057_v45 = vld [vmem:[#allocation3 + $0x58] sm:$0xff]  ;;  %v17813_v59 = vld [vmem:[#allocation12_spill] sm:$0xff]  ;;  %v16461_v22 = vmul.f32 %v16353_v48, %v16402_v12  ;;  %v9113_v12 = vadd.f32 %v9082_v60, %v9046_v63  ;;  %9150 = vst.msk [vmem:[#allocation3 + $0x30] sm:$0xff] %vm7383_vm13, %v9119_v28 }
0x41b9   :  { %v16451_v23 = vmul.f32 %v16353_v48, %v17812_v50  ;;  %v9058_v46 = vld [vmem:[#allocation3 + $0x60] sm:$0xff]  ;;  %v9106_v11 = vmul.f32 %v16353_v48, %v17813_v59  ;;  %v17814_v56 = vld [vmem:[#allocation36_spill] sm:$0xff]  ;;  %v9060_v50 = vld [vmem:[#allocation3 + $0x70] sm:$0xff]  ;;  %v16473_v59 = vmul.f32 %v16353_v48, %v16268_v20  ;;  %v9121_v20 = vadd.f32 %v9090_v37, %v9054_v54 }
0x41ba   :  { %v16457_v47 = vmul.f32 %v16353_v48, %v17814_v56  ;;  %v17815_v24 = vld [vmem:[#allocation32_spill] sm:$0xff]  ;;  %v9061_v16 = vld [vmem:[#allocation3 + $0x78] sm:$0xff]  ;;  %v9062_v14 = vld [vmem:[#allocation3 + $0x80] sm:$0xff]  ;;  %v16477_v56 = vmul.f32 %v16353_v48, %v16407_v18  ;;  %9144 = vst.msk [vmem:[#allocation3] sm:$0xff] %vm7383_vm13, %v9113_v12  ;;  %v9122_v60 = vadd.f32 %v9091_v52, %v9055_v13  ;;  %v9123_v63 = vadd.f32 %v9092_v9, %v9056_v38 }
0x41bb   :  { %v16465_v21 = vmul.f32 %v16353_v48, %v17815_v24  ;;  %v17817_v29 = vld [vmem:[#allocation13_spill] sm:$0xff]  ;;  %17819 = vst [vmem:[#allocation16_spill] sm:$0xff] %v16473_v59  ;;  %v9063_v43 = vld [vmem:[#allocation3 + $0x88] sm:$0xff]  ;;  %v9065_v24 = vld [vmem:[#allocation3 + $0x98] sm:$0xff]  ;;  %v9126_v34 = vadd.f32 %v9095_v5, %v9059_v7  ;;  %v9127_v2 = vadd.f32 %v9096_v27, %v9060_v50  ;;  %v9128_v31 = vadd.f32 %v9097_v49, %v9061_v16 }
0x41bc   :  { %v16469_v32 = vmul.f32 %v16353_v48, %v17817_v29  ;;  %17820 = vst [vmem:[#allocation7_spill] sm:$0xff] %v16477_v56  ;;  %v9064_v44 = vld [vmem:[#allocation3 + $0x90] sm:$0xff]  ;;  %v9066_v4 = vld [vmem:[#allocation3 + $0xa0] sm:$0xff]  ;;  %v9067_v58 = vld [vmem:[#allocation3 + $0xa8] sm:$0xff]  ;;  %v9124_v56 = vadd.f32 %v9093_v42, %v9057_v45  ;;  %v9130_v15 = vadd.f32 %v16429_v35, %v9063_v43  ;;  %v9132_v3 = vadd.f32 %v16437_v55, %v9065_v24 }
0x41bd   :  { %17816 = vst [vmem:[#allocation8_spill] sm:$0xff] %v16465_v21  ;;  %v9068_v29 = vld [vmem:[#allocation3 + $0xb0] sm:$0xff]  ;;  %v9069_v59 = vld [vmem:[#allocation3 + $0xb8] sm:$0xff]  ;;  %v9070_v48 = vld [vmem:[#allocation3 + $0xc0] sm:$0xff]  ;;  %v9125_v21 = vadd.f32 %v9094_v19, %v9058_v46  ;;  %v9131_v53 = vadd.f32 %v16433_v6, %v9064_v44  ;;  %v9133_v37 = vadd.f32 %v9102_v10, %v9066_v4  ;;  %v9134_v28 = vadd.f32 %v16443_v1, %v9067_v58 }
0x41be   :  { %17818 = vst [vmem:[#allocation39_spill] sm:$0xff] %v16469_v32  ;;  %v9120_v32 = vadd.f32 %v9089_v25, %v9053_v36  ;;  %v9071_v18 = vld [vmem:[#allocation3 + $0xc8] sm:$0xff]  ;;  %v9072_v30 = vld [vmem:[#allocation3 + $0xd0] sm:$0xff]  ;;  %v9073_v39 = vld [vmem:[#allocation3 + $0xd8] sm:$0xff]  ;;  %v9129_v25 = vadd.f32 %v9098_v33, %v9062_v14  ;;  %v9135_v62 = vadd.f32 %v16447_v0, %v9068_v29  ;;  %v9136_v44 = vadd.f32 %v16451_v23, %v9069_v59 }
0x41bf   :  { %v9074_v40 = vld [vmem:[#allocation3 + $0xe0] sm:$0xff]  ;;  %9152 = vst.msk [vmem:[#allocation3 + $0x40] sm:$0xff] %vm7383_vm13, %v9121_v20  ;;  %v9075_v8 = vld [vmem:[#allocation3 + $0xe8] sm:$0xff]  ;;  %v9076_v12 = vld [vmem:[#allocation3 + $0xf0] sm:$0xff]  ;;  %v9137_v4 = vadd.f32 %v9106_v11, %v9070_v48  ;;  %v9138_v52 = vadd.f32 %v16457_v47, %v9071_v18  ;;  %v9139_v43 = vadd.f32 %v16461_v22, %v9072_v30 }
0x41c0   :  { %9151 = vst.msk [vmem:[#allocation3 + $0x38] sm:$0xff] %vm7383_vm13, %v9120_v32  ;;  %9153 = vst.msk [vmem:[#allocation3 + $0x48] sm:$0xff] %vm7383_vm13, %v9122_v60  ;;  %v16498_v20 = vld [vmem:[%s17397_s7 + $0xb] ss:$0 sm:$0xff]  ;;  %v17825_v18 = vld [vmem:[#allocation17_spill] sm:$0xff] }
0x41c1   :  { %9154 = vst.msk [vmem:[#allocation3 + $0x50] sm:$0xff] %vm7383_vm13, %v9123_v63  ;;  %9155 = vst.msk [vmem:[#allocation3 + $0x58] sm:$0xff] %vm7383_vm13, %v9124_v56  ;;  %v9242_v29 = vmul.f32 %v16498_v20, %v17825_v18  ;;  %v17826_v19 = vld [vmem:[#allocation18_spill] sm:$0xff]  ;;  %v17827_v5 = vld [vmem:[#allocation19_spill] sm:$0xff] }
0x41c2   :  { %9156 = vst.msk [vmem:[#allocation3 + $0x60] sm:$0xff] %vm7383_vm13, %v9125_v21  ;;  %9157 = vst.msk [vmem:[#allocation3 + $0x68] sm:$0xff] %vm7383_vm13, %v9126_v34  ;;  %v17823_v57 = vld [vmem:[#allocation16_spill] sm:$0xff]  ;;  %v9243_v14 = vmul.f32 %v16498_v20, %v17826_v19  ;;  %v9244_v16 = vmul.f32 %v16498_v20, %v17827_v5  ;;  %v17829_v49 = vld [vmem:[#allocation21_spill] sm:$0xff] }
0x41c3   :  { %9158 = vst.msk [vmem:[#allocation3 + $0x70] sm:$0xff] %vm7383_vm13, %v9127_v2  ;;  %9159 = vst.msk [vmem:[#allocation3 + $0x78] sm:$0xff] %vm7383_vm13, %v9128_v31  ;;  %v9142_v51 = vadd.f32 %v17823_v57, %v9075_v8  ;;  %v17824_v61 = vld [vmem:[#allocation7_spill] sm:$0xff]  ;;  %v17828_v27 = vld [vmem:[#allocation20_spill] sm:$0xff]  ;;  %v9246_v41 = vmul.f32 %v16498_v20, %v17829_v49 }
0x41c4   :  { %9160 = vst.msk [vmem:[#allocation3 + $0x80] sm:$0xff] %vm7383_vm13, %v9129_v25  ;;  %v17821_v9 = vld [vmem:[#allocation8_spill] sm:$0xff]  ;;  %9161 = vst.msk [vmem:[#allocation3 + $0x88] sm:$0xff] %vm7383_vm13, %v9130_v15  ;;  %v9143_v26 = vadd.f32 %v17824_v61, %v9076_v12  ;;  %v9245_v21 = vmul.f32 %v16498_v20, %v17828_v27  ;;  %v17830_v17 = vld [vmem:[#allocation22_spill] sm:$0xff] }
0x41c5   :  { %v9140_v32 = vadd.f32 %v17821_v9, %v9073_v39  ;;  %v17822_v58 = vld [vmem:[#allocation39_spill] sm:$0xff]  ;;  %9162 = vst.msk [vmem:[#allocation3 + $0x90] sm:$0xff] %vm7383_vm13, %v9131_v53  ;;  %9163 = vst.msk [vmem:[#allocation3 + $0x98] sm:$0xff] %vm7383_vm13, %v9132_v3  ;;  %v9247_v36 = vmul.f32 %v16498_v20, %v17830_v17  ;;  %v16542_v56 = vld [vmem:[%s17391_s1 + $0x108] sm:$0xff] }
0x41c6   :  { %v9141_v42 = vadd.f32 %v17822_v58, %v9074_v40  ;;  %9164 = vst.msk [vmem:[#allocation3 + $0xa0] sm:$0xff] %vm7383_vm13, %v9133_v37  ;;  %9165 = vst.msk [vmem:[#allocation3 + $0xa8] sm:$0xff] %vm7383_vm13, %v9134_v28  ;;  %v16547_v33 = vld [vmem:[%s17391_s1 + $0x128] sm:$0xff]  ;;  %v17833_v11 = vld [vmem:[#allocation23_spill] sm:$0xff] }
0x41c7   :  { %9166 = vst.msk [vmem:[#allocation3 + $0xb0] sm:$0xff] %vm7383_vm13, %v9135_v62  ;;  %9167 = vst.msk [vmem:[#allocation3 + $0xb8] sm:$0xff] %vm7383_vm13, %v9136_v44  ;;  %v9248_v35 = vmul.f32 %v16498_v20, %v17833_v11  ;;  %v17834_v59 = vld [vmem:[#allocation24_spill] sm:$0xff]  ;;  %v17835_v7 = vld [vmem:[#allocation25_spill] sm:$0xff] }
0x41c8   :  { %9168 = vst.msk [vmem:[#allocation3 + $0xc0] sm:$0xff] %vm7383_vm13, %v9137_v4  ;;  %9169 = vst.msk [vmem:[#allocation3 + $0xc8] sm:$0xff] %vm7383_vm13, %v9138_v52  ;;  %v9249_v6 = vmul.f32 %v16498_v20, %v17834_v59  ;;  %v9250_v55 = vmul.f32 %v16498_v20, %v17835_v7  ;;  %v17836_v54 = vld [vmem:[#allocation26_spill] sm:$0xff]  ;;  %v16560_v38 = vld [vmem:[%s17391_s1 + $0x148] sm:$0xff]  ;;  %v16618_v59 = vmul.f32 %v16498_v20, %v16547_v33 }
0x41c9   :  { %9170 = vst.msk [vmem:[#allocation3 + $0xd0] sm:$0xff] %vm7383_vm13, %v9139_v43  ;;  %9171 = vst.msk [vmem:[#allocation3 + $0xd8] sm:$0xff] %vm7383_vm13, %v9140_v32  ;;  %v9251_v13 = vmul.f32 %v16498_v20, %v17836_v54  ;;  %v9206_v47 = vld [vmem:[#allocation3] sm:$0xff]  ;;  %v9207_v10 = vld [vmem:[#allocation3 + $0x8] sm:$0xff] }
0x41ca   :  { %9172 = vst.msk [vmem:[#allocation3 + $0xe0] sm:$0xff] %vm7383_vm13, %v9141_v42  ;;  %9173 = vst.msk [vmem:[#allocation3 + $0xe8] sm:$0xff] %vm7383_vm13, %v9142_v51  ;;  %v9208_v22 = vld [vmem:[#allocation3 + $0x10] sm:$0xff]  ;;  %v17838_v1 = vld [vmem:[#allocation27_spill] sm:$0xff]  ;;  %v16602_v51 = vmul.f32 %v16498_v20, %v16542_v56 }
0x41cb   :  { %9174 = vst.msk [vmem:[#allocation3 + $0xf0] sm:$0xff] %vm7383_vm13, %v9143_v26  ;;  %17831 = vst [vmem:[#allocation32_spill] sm:$0xff] %v16542_v56  ;;  %v9252_v0 = vmul.f32 %v16498_v20, %v17838_v1  ;;  %v17839_v23 = vld [vmem:[#allocation28_spill] sm:$0xff]  ;;  %v17840_v46 = vld [vmem:[#allocation29_spill] sm:$0xff] }
0x41cc   :  { %17832 = vst [vmem:[#allocation8_spill] sm:$0xff] %v16547_v33  ;;  %17837 = vst [vmem:[#allocation39_spill] sm:$0xff] %v16560_v38  ;;  %v9253_v45 = vmul.f32 %v16498_v20, %v17839_v23  ;;  %v9254_v50 = vmul.f32 %v16498_v20, %v17840_v46  ;;  %v17841_v24 = vld [vmem:[#allocation30_spill] sm:$0xff]  ;;  %v9210_v63 = vld [vmem:[#allocation3 + $0x20] sm:$0xff] }
0x41cd   :  { %v9255_v48 = vmul.f32 %v16498_v20, %v17841_v24  ;;  %v9209_v60 = vld [vmem:[#allocation3 + $0x18] sm:$0xff]  ;;  %v9211_v30 = vld [vmem:[#allocation3 + $0x28] sm:$0xff]  ;;  %v9212_v39 = vld [vmem:[#allocation3 + $0x30] sm:$0xff]  ;;  %17854 = vst [vmem:[#allocation7_spill] sm:$0xff] %v16618_v59 }
0x41ce   :  { %v17842_v40 = vld [vmem:[#allocation31_spill] sm:$0xff]  ;;  %v17843_v2 = vld [vmem:[#allocation33_spill] sm:$0xff]  ;;  %v17844_v25 = vld [vmem:[#allocation34_spill] sm:$0xff]  ;;  %v9278_v56 = vadd.f32 %v9247_v36, %v9211_v30 }
0x41cf   :  { %v9256_v34 = vmul.f32 %v16498_v20, %v17842_v40  ;;  %v16574_v31 = vmul.f32 %v16498_v20, %v17843_v2  ;;  %v16578_v8 = vmul.f32 %v16498_v20, %v17844_v25  ;;  %v17845_v12 = vld [vmem:[#allocation35_spill] sm:$0xff]  ;;  %v9213_v53 = vld [vmem:[#allocation3 + $0x38] sm:$0xff]  ;;  %v9215_v37 = vld [vmem:[#allocation3 + $0x48] sm:$0xff] }
0x41d0   :  { %v16582_v15 = vmul.f32 %v16498_v20, %v17845_v12  ;;  %v9214_v3 = vld [vmem:[#allocation3 + $0x40] sm:$0xff]  ;;  %v17846_v28 = vld [vmem:[#allocation10_spill] sm:$0xff]  ;;  %v9216_v58 = vld [vmem:[#allocation3 + $0x50] sm:$0xff]  ;;  %v16634_v12 = vmul.f32 %v16498_v20, %v16560_v38  ;;  %v9282_v59 = vadd.f32 %v9251_v13, %v9215_v37  ;;  %9309 = vst.msk [vmem:[#allocation3 + $0x28] sm:$0xff] %vm7383_vm13, %v9278_v56 }
0x41d1   :  { %v16586_v62 = vmul.f32 %v16498_v20, %v17846_v28  ;;  %v17847_v44 = vld [vmem:[#allocation11_spill] sm:$0xff]  ;;  %v17848_v52 = vld [vmem:[#allocation14_spill] sm:$0xff]  ;;  %v17850_v61 = vld [vmem:[#allocation12_spill] sm:$0xff]  ;;  %v9273_v28 = vadd.f32 %v9242_v29, %v9206_v47 }
0x41d2   :  { %v16590_v4 = vmul.f32 %v16498_v20, %v17847_v44  ;;  %v16594_v43 = vmul.f32 %v16498_v20, %v17848_v52  ;;  %v17849_v9 = vld [vmem:[#allocation38_spill] sm:$0xff]  ;;  %v9218_v57 = vld [vmem:[#allocation3 + $0x60] sm:$0xff]  ;;  %v16606_v26 = vmul.f32 %v16498_v20, %v17850_v61  ;;  %v17851_v18 = vld [vmem:[#allocation36_spill] sm:$0xff]  ;;  %v9274_v44 = vadd.f32 %v9243_v14, %v9207_v10  ;;  %9313 = vst.msk [vmem:[#allocation3 + $0x48] sm:$0xff] %vm7383_vm13, %v9282_v59 }
0x41d3   :  { %v16598_v32 = vmul.f32 %v16498_v20, %v17849_v9  ;;  %v9217_v42 = vld [vmem:[#allocation3 + $0x58] sm:$0xff]  ;;  %v16610_v19 = vmul.f32 %v16498_v20, %v17851_v18  ;;  %v17852_v5 = vld [vmem:[#allocation15_spill] sm:$0xff]  ;;  %v9219_v49 = vld [vmem:[#allocation3 + $0x68] sm:$0xff]  ;;  %v9275_v61 = vadd.f32 %v9244_v16, %v9208_v22  ;;  %v9276_v18 = vadd.f32 %v9245_v21, %v9209_v60  ;;  %9304 = vst.msk [vmem:[#allocation3] sm:$0xff] %vm7383_vm13, %v9273_v28 }
0x41d4   :  { %v16614_v27 = vmul.f32 %v16498_v20, %v17852_v5  ;;  %v9220_v17 = vld [vmem:[#allocation3 + $0x70] sm:$0xff]  ;;  %v9221_v11 = vld [vmem:[#allocation3 + $0x78] sm:$0xff]  ;;  %v9222_v40 = vld [vmem:[#allocation3 + $0x80] sm:$0xff]  ;;  %v9279_v9 = vadd.f32 %v9248_v35, %v9212_v39  ;;  %9305 = vst.msk [vmem:[#allocation3 + $0x8] sm:$0xff] %vm7383_vm13, %v9274_v44  ;;  %v9284_v16 = vadd.f32 %v9253_v45, %v9217_v42  ;;  %v9285_v21 = vadd.f32 %v9254_v50, %v9218_v57 }
0x41d5   :  { %v17855_v7 = vld [vmem:[#allocation13_spill] sm:$0xff]  ;;  %v9223_v2 = vld [vmem:[#allocation3 + $0x88] sm:$0xff]  ;;  %v9226_v33 = vld [vmem:[#allocation3 + $0xa0] sm:$0xff]  ;;  %9306 = vst.msk [vmem:[#allocation3 + $0x10] sm:$0xff] %vm7383_vm13, %v9275_v61  ;;  %v9287_v36 = vadd.f32 %v9256_v34, %v9220_v17  ;;  %v9288_v22 = vadd.f32 %v16574_v31, %v9221_v11 }
0x41d6   :  { %17853 = vst [vmem:[#allocation16_spill] sm:$0xff] %v16614_v27  ;;  %v16622_v54 = vmul.f32 %v16498_v20, %v17855_v7  ;;  %v17857_v1 = vld [vmem:[#allocation37_spill] sm:$0xff]  ;;  %v9225_v7 = vld [vmem:[#allocation3 + $0x98] sm:$0xff]  ;;  %v9227_v5 = vld [vmem:[#allocation3 + $0xa8] sm:$0xff]  ;;  %v9283_v27 = vadd.f32 %v9252_v0, %v9216_v58  ;;  %v9289_v0 = vadd.f32 %v16578_v8, %v9222_v40  ;;  %v9290_v45 = vadd.f32 %v16582_v15, %v9223_v2 }
0x41d7   :  { %v16626_v23 = vmul.f32 %v16498_v20, %v17857_v1  ;;  %v17859_v46 = vld [vmem:[#allocation9_spill] sm:$0xff]  ;;  %v9277_v1 = vadd.f32 %v9246_v41, %v9210_v63  ;;  %v9233_v14 = vld [vmem:[#allocation3 + $0xd8] sm:$0xff]  ;;  %v9286_v41 = vadd.f32 %v9255_v48, %v9219_v49  ;;  %9307 = vst.msk [vmem:[#allocation3 + $0x18] sm:$0xff] %vm7383_vm13, %v9276_v18  ;;  %9310 = vst.msk [vmem:[#allocation3 + $0x30] sm:$0xff] %vm7383_vm13, %v9279_v9 }
0x41d8   :  { %17856 = vst [vmem:[#allocation17_spill] sm:$0xff] %v16622_v54  ;;  %v16630_v24 = vmul.f32 %v16498_v20, %v17859_v46  ;;  %v9224_v25 = vld [vmem:[#allocation3 + $0x90] sm:$0xff]  ;;  %v9229_v46 = vld [vmem:[#allocation3 + $0xb8] sm:$0xff]  ;;  %v9281_v54 = vadd.f32 %v9250_v55, %v9214_v3  ;;  %v9231_v20 = vld [vmem:[#allocation3 + $0xc8] sm:$0xff]  ;;  %v9292_v63 = vadd.f32 %v16590_v4, %v9225_v7  ;;  %v9293_v30 = vadd.f32 %v16594_v43, %v9226_v33 }
0x41d9   :  { %17858 = vst [vmem:[#allocation18_spill] sm:$0xff] %v16626_v23  ;;  %v9228_v52 = vld [vmem:[#allocation3 + $0xb0] sm:$0xff]  ;;  %v9280_v23 = vadd.f32 %v9249_v6, %v9213_v53  ;;  %9308 = vst.msk [vmem:[#allocation3 + $0x20] sm:$0xff] %vm7383_vm13, %v9277_v1  ;;  %v9335_v35 = vld [vmem:[%s17391_s1 + $0x60] sm:$0xff]  ;;  %v9291_v50 = vadd.f32 %v16586_v62, %v9224_v25  ;;  %v9294_v39 = vadd.f32 %v16598_v32, %v9227_v5 }
0x41da   :  { %17860 = vst [vmem:[#allocation19_spill] sm:$0xff] %v16630_v24  ;;  %v9230_v24 = vld [vmem:[#allocation3 + $0xc0] sm:$0xff]  ;;  %v9232_v29 = vld [vmem:[#allocation3 + $0xd0] sm:$0xff]  ;;  %v16649_v6 = vld [vmem:[%s17391_s1 + $0x68] sm:$0xff]  ;;  %v9295_v34 = vadd.f32 %v16602_v51, %v9228_v52  ;;  %v9296_v15 = vadd.f32 %v16606_v26, %v9229_v46 }
0x41db   :  { %17861 = vst [vmem:[#allocation20_spill] sm:$0xff] %v16649_v6  ;;  %v16654_v55 = vld [vmem:[%s17391_s1 + $0x70] sm:$0xff]  ;;  %v16659_v56 = vld [vmem:[%s17391_s1 + $0x78] sm:$0xff]  ;;  %v9234_v13 = vld [vmem:[#allocation3 + $0xe0] sm:$0xff]  ;;  %v9297_v53 = vadd.f32 %v16610_v19, %v9230_v24 }
0x41dc   :  { %17862 = vst [vmem:[#allocation21_spill] sm:$0xff] %v16654_v55  ;;  %17863 = vst [vmem:[#allocation22_spill] sm:$0xff] %v16659_v56  ;;  %v9235_v47 = vld [vmem:[#allocation3 + $0xe8] sm:$0xff]  ;;  %v9236_v10 = vld [vmem:[#allocation3 + $0xf0] sm:$0xff] }
0x41dd   :  { %9311 = vst.msk [vmem:[#allocation3 + $0x38] sm:$0xff] %vm7383_vm13, %v9280_v23  ;;  %9312 = vst.msk [vmem:[#allocation3 + $0x40] sm:$0xff] %vm7383_vm13, %v9281_v54  ;;  %v16672_v48 = vld [vmem:[%s17391_s1 + $0x80] sm:$0xff]  ;;  %v16677_v60 = vld [vmem:[%s17391_s1 + $0x88] sm:$0xff]  ;;  %v9303_v18 = vadd.f32 %v16634_v12, %v9236_v10 }
0x41de   :  { %9314 = vst.msk [vmem:[#allocation3 + $0x50] sm:$0xff] %vm7383_vm13, %v9283_v27  ;;  %17864 = vst [vmem:[#allocation23_spill] sm:$0xff] %v16672_v48  ;;  %v16690_v31 = vld [vmem:[%s17391_s1 + $0x90] sm:$0xff]  ;;  %v16695_v33 = vld [vmem:[%s17391_s1 + $0x98] sm:$0xff] }
0x41df   :  { %17865 = vst [vmem:[#allocation24_spill] sm:$0xff] %v16677_v60  ;;  %9315 = vst.msk [vmem:[#allocation3 + $0x58] sm:$0xff] %vm7383_vm13, %v9284_v16  ;;  %v16700_v8 = vld [vmem:[%s17397_s7 + $0xc] ss:$0 sm:$0xff]  ;;  %v17869_v62 = vld [vmem:[#allocation7_spill] sm:$0xff] }
0x41e0   :  { %9316 = vst.msk [vmem:[#allocation3 + $0x60] sm:$0xff] %vm7383_vm13, %v9285_v21  ;;  %9317 = vst.msk [vmem:[#allocation3 + $0x68] sm:$0xff] %vm7383_vm13, %v9286_v41  ;;  %v17868_v3 = vld [vmem:[#allocation16_spill] sm:$0xff]  ;;  %v9299_v4 = vadd.f32 %v17869_v62, %v9232_v29  ;;  %v16713_v52 = vld [vmem:[%s17391_s1 + $0xa0] sm:$0xff]  ;;  %v9402_v59 = vmul.f32 %v16700_v8, %v9335_v35  ;;  %v9403_v54 = vmul.f32 %v16700_v8, %v16649_v6 }
0x41e1   :  { %9318 = vst.msk [vmem:[#allocation3 + $0x70] sm:$0xff] %vm7383_vm13, %v9287_v36  ;;  %17866 = vst [vmem:[#allocation25_spill] sm:$0xff] %v16690_v31  ;;  %v9298_v37 = vadd.f32 %v17868_v3, %v9231_v20  ;;  %v16718_v43 = vld [vmem:[%s17391_s1 + $0xa8] sm:$0xff]  ;;  %v16723_v9 = vld [vmem:[%s17391_s1 + $0xb0] sm:$0xff]  ;;  %v9404_v1 = vmul.f32 %v16700_v8, %v16654_v55  ;;  %v9405_v23 = vmul.f32 %v16700_v8, %v16659_v56 }
0x41e2   :  { %17867 = vst [vmem:[#allocation26_spill] sm:$0xff] %v16695_v33  ;;  %9319 = vst.msk [vmem:[#allocation3 + $0x78] sm:$0xff] %vm7383_vm13, %v9288_v22  ;;  %v17873_v32 = vld [vmem:[#allocation17_spill] sm:$0xff]  ;;  %v17874_v42 = vld [vmem:[#allocation18_spill] sm:$0xff]  ;;  %v9406_v2 = vmul.f32 %v16700_v8, %v16672_v48  ;;  %v9407_v25 = vmul.f32 %v16700_v8, %v16677_v60  ;;  %v9408_v12 = vmul.f32 %v16700_v8, %v16690_v31 }
0x41e3   :  { %9320 = vst.msk [vmem:[#allocation3 + $0x80] sm:$0xff] %vm7383_vm13, %v9289_v0  ;;  %9321 = vst.msk [vmem:[#allocation3 + $0x88] sm:$0xff] %vm7383_vm13, %v9290_v45  ;;  %v9300_v58 = vadd.f32 %v17873_v32, %v9233_v14  ;;  %v9301_v57 = vadd.f32 %v17874_v42, %v9234_v13  ;;  %v17875_v51 = vld [vmem:[#allocation19_spill] sm:$0xff]  ;;  %v16736_v19 = vld [vmem:[%s17391_s1 + $0xb8] sm:$0xff]  ;;  %v9409_v28 = vmul.f32 %v16700_v8, %v16695_v33 }
0x41e4   :  { %9322 = vst.msk [vmem:[#allocation3 + $0x90] sm:$0xff] %vm7383_vm13, %v9291_v50  ;;  %17870 = vst [vmem:[#allocation27_spill] sm:$0xff] %v16713_v52  ;;  %v9302_v26 = vadd.f32 %v17875_v51, %v9235_v47  ;;  %v16741_v5 = vld [vmem:[%s17391_s1 + $0xc0] sm:$0xff]  ;;  %v16746_v27 = vld [vmem:[%s17391_s1 + $0xc8] sm:$0xff]  ;;  %v9410_v20 = vmul.f32 %v16700_v8, %v16713_v52  ;;  %v9411_v29 = vmul.f32 %v16700_v8, %v16718_v43 }
0x41e5   :  { %17871 = vst [vmem:[#allocation28_spill] sm:$0xff] %v16718_v43  ;;  %17872 = vst [vmem:[#allocation29_spill] sm:$0xff] %v16723_v9  ;;  %v16755_v49 = vld [vmem:[%s17391_s1 + $0xd0] sm:$0xff]  ;;  %v16760_v17 = vld [vmem:[%s17391_s1 + $0xd8] sm:$0xff]  ;;  %v9412_v14 = vmul.f32 %v16700_v8, %v16723_v9  ;;  %v9413_v16 = vmul.f32 %v16700_v8, %v16736_v19  ;;  %v9414_v35 = vmul.f32 %v16700_v8, %v16741_v5 }
0x41e6   :  { %9323 = vst.msk [vmem:[#allocation3 + $0x98] sm:$0xff] %vm7383_vm13, %v9292_v63  ;;  %9324 = vst.msk [vmem:[#allocation3 + $0xa0] sm:$0xff] %vm7383_vm13, %v9293_v30  ;;  %v16765_v11 = vld [vmem:[%s17391_s1 + $0xe0] sm:$0xff]  ;;  %v16781_v46 = vld [vmem:[%s17391_s1 + $0xe8] sm:$0xff]  ;;  %v9415_v13 = vmul.f32 %v16700_v8, %v16746_v27  ;;  %v9416_v47 = vmul.f32 %v16700_v8, %v16755_v49  ;;  %v9417_v10 = vmul.f32 %v16700_v8, %v16760_v17 }
0x41e7   :  { %9325 = vst.msk [vmem:[#allocation3 + $0xa8] sm:$0xff] %vm7383_vm13, %v9294_v39  ;;  %9326 = vst.msk [vmem:[#allocation3 + $0xb0] sm:$0xff] %vm7383_vm13, %v9295_v34  ;;  %v16786_v24 = vld [vmem:[%s17391_s1 + $0xf0] sm:$0xff]  ;;  %v9366_v7 = vld [vmem:[#allocation3] sm:$0xff]  ;;  %v9418_v50 = vmul.f32 %v16700_v8, %v16765_v11  ;;  %v16831_v63 = vmul.f32 %v16700_v8, %v16781_v46 }
0x41e8   :  { %17876 = vst [vmem:[#allocation30_spill] sm:$0xff] %v16736_v19  ;;  %17877 = vst [vmem:[#allocation31_spill] sm:$0xff] %v16741_v5  ;;  %v16791_v40 = vld [vmem:[%s17391_s1 + $0x110] sm:$0xff]  ;;  %v9367_v21 = vld [vmem:[#allocation3 + $0x8] sm:$0xff]  ;;  %v16835_v30 = vmul.f32 %v16700_v8, %v16786_v24 }
0x41e9   :  { %17878 = vst [vmem:[#allocation33_spill] sm:$0xff] %v16746_v27  ;;  %9327 = vst.msk [vmem:[#allocation3 + $0xb8] sm:$0xff] %vm7383_vm13, %v9296_v15  ;;  %v16804_v44 = vld [vmem:[%s17391_s1 + $0x130] sm:$0xff]  ;;  %v9369_v36 = vld [vmem:[#allocation3 + $0x18] sm:$0xff]  ;;  %v9434_v43 = vadd.f32 %v9403_v54, %v9367_v21 }
0x41ea   :  { %9328 = vst.msk [vmem:[#allocation3 + $0xc0] sm:$0xff] %vm7383_vm13, %v9297_v53  ;;  %9329 = vst.msk [vmem:[#allocation3 + $0xc8] sm:$0xff] %vm7383_vm13, %v9298_v37  ;;  %v16809_v61 = vld [vmem:[%s17391_s1 + $0x150] sm:$0xff]  ;;  %v9370_v22 = vld [vmem:[#allocation3 + $0x20] sm:$0xff]  ;;  %v9436_v33 = vadd.f32 %v9405_v23, %v9369_v36 }
0x41eb   :  { %9330 = vst.msk [vmem:[#allocation3 + $0xd0] sm:$0xff] %vm7383_vm13, %v9299_v4  ;;  %17879 = vst [vmem:[#allocation34_spill] sm:$0xff] %v16755_v49  ;;  %v9368_v41 = vld [vmem:[#allocation3 + $0x10] sm:$0xff]  ;;  %v9371_v0 = vld [vmem:[#allocation3 + $0x28] sm:$0xff]  ;;  %v9437_v31 = vadd.f32 %v9406_v2, %v9370_v22 }
0x41ec   :  { %17880 = vst [vmem:[#allocation35_spill] sm:$0xff] %v16760_v17  ;;  %17881 = vst [vmem:[#allocation10_spill] sm:$0xff] %v16765_v11  ;;  %v9372_v45 = vld [vmem:[#allocation3 + $0x30] sm:$0xff]  ;;  %v17887_v39 = vld [vmem:[#allocation14_spill] sm:$0xff]  ;;  %v9435_v52 = vadd.f32 %v9404_v1, %v9368_v41  ;;  %v9438_v56 = vadd.f32 %v9407_v25, %v9371_v0 }
0x41ed   :  { %9331 = vst.msk [vmem:[#allocation3 + $0xd8] sm:$0xff] %vm7383_vm13, %v9300_v58  ;;  %9332 = vst.msk [vmem:[#allocation3 + $0xe0] sm:$0xff] %vm7383_vm13, %v9301_v57  ;;  %v16839_v34 = vmul.f32 %v16700_v8, %v17887_v39  ;;  %v9373_v15 = vld [vmem:[#allocation3 + $0x38] sm:$0xff]  ;;  %v9374_v53 = vld [vmem:[#allocation3 + $0x40] sm:$0xff]  ;;  %v16851_v58 = vmul.f32 %v16700_v8, %v16791_v40  ;;  %v9439_v55 = vadd.f32 %v9408_v12, %v9372_v45 }
0x41ee   :  { %9333 = vst.msk [vmem:[#allocation3 + $0xe8] sm:$0xff] %vm7383_vm13, %v9302_v26  ;;  %9334 = vst.msk [vmem:[#allocation3 + $0xf0] sm:$0xff] %vm7383_vm13, %v9303_v18  ;;  %v9375_v3 = vld [vmem:[#allocation3 + $0x48] sm:$0xff]  ;;  %v17888_v37 = vld [vmem:[#allocation38_spill] sm:$0xff]  ;;  %v9440_v6 = vadd.f32 %v9409_v28, %v9373_v15 }
0x41ef   :  { %17882 = vst [vmem:[#allocation11_spill] sm:$0xff] %v16781_v46  ;;  %17883 = vst [vmem:[#allocation12_spill] sm:$0xff] %v16786_v24  ;;  %v16843_v62 = vmul.f32 %v16700_v8, %v17888_v37  ;;  %v17889_v4 = vld [vmem:[#allocation32_spill] sm:$0xff]  ;;  %v9376_v51 = vld [vmem:[#allocation3 + $0x50] sm:$0xff] }
0x41f0   :  { %17884 = vst [vmem:[#allocation13_spill] sm:$0xff] %v16791_v40  ;;  %17885 = vst [vmem:[#allocation16_spill] sm:$0xff] %v16804_v44  ;;  %v16847_v32 = vmul.f32 %v16700_v8, %v17889_v4  ;;  %v17890_v42 = vld [vmem:[#allocation36_spill] sm:$0xff]  ;;  %v9377_v26 = vld [vmem:[#allocation3 + $0x58] sm:$0xff]  ;;  %v16867_v4 = vmul.f32 %v16700_v8, %v16804_v44  ;;  %v9433_v44 = vadd.f32 %v9402_v59, %v9366_v7 }
0x41f1   :  { %17886 = vst [vmem:[#allocation7_spill] sm:$0xff] %v16809_v61  ;;  %v16855_v57 = vmul.f32 %v16700_v8, %v17890_v42  ;;  %v9378_v18 = vld [vmem:[#allocation3 + $0x60] sm:$0xff]  ;;  %v17892_v37 = vld [vmem:[#allocation8_spill] sm:$0xff]  ;;  %v17893_v40 = vld [vmem:[#allocation37_spill] sm:$0xff]  ;;  %v9442_v59 = vadd.f32 %v9411_v29, %v9375_v3  ;;  %v9443_v7 = vadd.f32 %v9412_v14, %v9376_v51 }
0x41f2   :  { %v17891_v39 = vld [vmem:[#allocation15_spill] sm:$0xff]  ;;  %v16863_v46 = vmul.f32 %v16700_v8, %v17892_v37  ;;  %v16871_v11 = vmul.f32 %v16700_v8, %v17893_v40  ;;  %v9379_v42 = vld [vmem:[#allocation3 + $0x68] sm:$0xff]  ;;  %v9380_v17 = vld [vmem:[#allocation3 + $0x70] sm:$0xff]  ;;  %v16883_v37 = vmul.f32 %v16700_v8, %v16809_v61  ;;  %9464 = vst.msk [vmem:[#allocation3] sm:$0xff] %vm7383_vm13, %v9433_v44 }
0x41f3   :  { %v16859_v24 = vmul.f32 %v16700_v8, %v17891_v39  ;;  %v9381_v49 = vld [vmem:[#allocation3 + $0x78] sm:$0xff]  ;;  %v17894_v27 = vld [vmem:[#allocation9_spill] sm:$0xff]  ;;  %v16879_v39 = vmul.f32 %v16700_v8, %v16560_v38  ;;  %v9382_v19 = vld [vmem:[#allocation3 + $0x80] sm:$0xff]  ;;  %v9441_v38 = vadd.f32 %v9410_v20, %v9374_v53  ;;  %9465 = vst.msk [vmem:[#allocation3 + $0x8] sm:$0xff] %vm7383_vm13, %v9434_v43  ;;  %v9446_v25 = vadd.f32 %v9415_v13, %v9379_v42 }
0x41f4   :  { %v16875_v5 = vmul.f32 %v16700_v8, %v17894_v27  ;;  %17897 = vst [vmem:[#allocation19_spill] sm:$0xff] %v16883_v37  ;;  %v9383_v9 = vld [vmem:[#allocation3 + $0x88] sm:$0xff]  ;;  %v9384_v40 = vld [vmem:[#allocation3 + $0x90] sm:$0xff]  ;;  %v9385_v60 = vld [vmem:[#allocation3 + $0x98] sm:$0xff]  ;;  %v9444_v37 = vadd.f32 %v9413_v16, %v9377_v26  ;;  %v9447_v12 = vadd.f32 %v9416_v47, %v9380_v17  ;;  %v9448_v28 = vadd.f32 %v9417_v10, %v9381_v49 }
0x41f5   :  { %17896 = vst [vmem:[#allocation18_spill] sm:$0xff] %v16879_v39  ;;  %v9386_v48 = vld [vmem:[#allocation3 + $0xa0] sm:$0xff]  ;;  %v9387_v27 = vld [vmem:[#allocation3 + $0xa8] sm:$0xff]  ;;  %v9388_v39 = vld [vmem:[#allocation3 + $0xb0] sm:$0xff]  ;;  %v9449_v44 = vadd.f32 %v9418_v50, %v9382_v19  ;;  %v9450_v43 = vadd.f32 %v16831_v63, %v9383_v9  ;;  %v9451_v20 = vadd.f32 %v16835_v30, %v9384_v40  ;;  %v9452_v29 = vadd.f32 %v16839_v34, %v9385_v60 }
0x41f6   :  { %17895 = vst [vmem:[#allocation17_spill] sm:$0xff] %v16875_v5  ;;  %v9389_v8 = vld [vmem:[#allocation3 + $0xb8] sm:$0xff]  ;;  %v9390_v61 = vld [vmem:[#allocation3 + $0xc0] sm:$0xff]  ;;  %v9445_v5 = vadd.f32 %v9414_v35, %v9378_v18  ;;  %9466 = vst.msk [vmem:[#allocation3 + $0x10] sm:$0xff] %vm7383_vm13, %v9435_v52 }
0x41f7   :  { %9467 = vst.msk [vmem:[#allocation3 + $0x18] sm:$0xff] %vm7383_vm13, %v9436_v33  ;;  %9468 = vst.msk [vmem:[#allocation3 + $0x20] sm:$0xff] %vm7383_vm13, %v9437_v31  ;;  %v16893_v54 = vld [vmem:[%s17397_s7 + $0xd] ss:$0 sm:$0xff]  ;;  %v9392_v23 = vld [vmem:[#allocation3 + $0xd0] sm:$0xff]  ;;  %v9457_v60 = vadd.f32 %v16859_v24, %v9390_v61 }
0x41f8   :  { %v9391_v1 = vld [vmem:[#allocation3 + $0xc8] sm:$0xff]  ;;  %v9393_v2 = vld [vmem:[#allocation3 + $0xd8] sm:$0xff]  ;;  %9469 = vst.msk [vmem:[#allocation3 + $0x28] sm:$0xff] %vm7383_vm13, %v9438_v56  ;;  %9470 = vst.msk [vmem:[#allocation3 + $0x30] sm:$0xff] %vm7383_vm13, %v9439_v55  ;;  %v9455_v55 = vadd.f32 %v16851_v58, %v9388_v39  ;;  %v9456_v56 = vadd.f32 %v16855_v57, %v9389_v8 }
0x41f9   :  { %9471 = vst.msk [vmem:[#allocation3 + $0x38] sm:$0xff] %vm7383_vm13, %v9440_v6  ;;  %9472 = vst.msk [vmem:[#allocation3 + $0x40] sm:$0xff] %vm7383_vm13, %v9441_v38  ;;  %v9394_v31 = vld [vmem:[#allocation3 + $0xe0] sm:$0xff]  ;;  %v9395_v33 = vld [vmem:[#allocation3 + $0xe8] sm:$0xff]  ;;  %v9453_v6 = vadd.f32 %v16843_v62, %v9386_v48  ;;  %v9454_v38 = vadd.f32 %v16847_v32, %v9387_v27  ;;  %v9458_v9 = vadd.f32 %v16863_v46, %v9391_v1 }
0x41fa   :  { %v9396_v52 = vld [vmem:[#allocation3 + $0xf0] sm:$0xff]  ;;  %9473 = vst.msk [vmem:[#allocation3 + $0x48] sm:$0xff] %vm7383_vm13, %v9442_v59  ;;  %9474 = vst.msk [vmem:[#allocation3 + $0x50] sm:$0xff] %vm7383_vm13, %v9443_v7  ;;  %v9459_v48 = vadd.f32 %v16867_v4, %v9392_v23  ;;  %v9460_v19 = vadd.f32 %v16871_v11, %v9393_v2  ;;  %v17901_v11 = vld [vmem:[#allocation20_spill] sm:$0xff] }
0x41fb   :  { %9475 = vst.msk [vmem:[#allocation3 + $0x58] sm:$0xff] %vm7383_vm13, %v9444_v37  ;;  %9476 = vst.msk [vmem:[#allocation3 + $0x60] sm:$0xff] %vm7383_vm13, %v9445_v5  ;;  %v17900_v14 = vld [vmem:[#allocation19_spill] sm:$0xff]  ;;  %v9562_v46 = vmul.f32 %v16893_v54, %v17901_v11  ;;  %v17902_v24 = vld [vmem:[#allocation21_spill] sm:$0xff] }
0x41fc   :  { %9477 = vst.msk [vmem:[#allocation3 + $0x68] sm:$0xff] %vm7383_vm13, %v9446_v25  ;;  %9478 = vst.msk [vmem:[#allocation3 + $0x70] sm:$0xff] %vm7383_vm13, %v9447_v12  ;;  %v17899_v49 = vld [vmem:[#allocation18_spill] sm:$0xff]  ;;  %v9463_v16 = vadd.f32 %v17900_v14, %v9396_v52  ;;  %v9563_v61 = vmul.f32 %v16893_v54, %v17902_v24  ;;  %v17904_v36 = vld [vmem:[#allocation23_spill] sm:$0xff] }
0x41fd   :  { %9479 = vst.msk [vmem:[#allocation3 + $0x78] sm:$0xff] %vm7383_vm13, %v9448_v28  ;;  %9480 = vst.msk [vmem:[#allocation3 + $0x80] sm:$0xff] %vm7383_vm13, %v9449_v44  ;;  %v17898_v5 = vld [vmem:[#allocation17_spill] sm:$0xff]  ;;  %v9462_v17 = vadd.f32 %v17899_v49, %v9395_v33  ;;  %v17903_v21 = vld [vmem:[#allocation22_spill] sm:$0xff]  ;;  %v9565_v35 = vmul.f32 %v16893_v54, %v17904_v36 }
0x41fe   :  { %9481 = vst.msk [vmem:[#allocation3 + $0x88] sm:$0xff] %vm7383_vm13, %v9450_v43  ;;  %9482 = vst.msk [vmem:[#allocation3 + $0x90] sm:$0xff] %vm7383_vm13, %v9451_v20  ;;  %v9461_v27 = vadd.f32 %v17898_v5, %v9394_v31  ;;  %v9564_v41 = vmul.f32 %v16893_v54, %v17903_v21  ;;  %v17905_v13 = vld [vmem:[#allocation24_spill] sm:$0xff]  ;;  %v16948_v10 = vld [vmem:[%s17391_s1 + $0xf8] sm:$0xff] }
0x41ff   :  { %9483 = vst.msk [vmem:[#allocation3 + $0x98] sm:$0xff] %vm7383_vm13, %v9452_v29  ;;  %9484 = vst.msk [vmem:[#allocation3 + $0xa0] sm:$0xff] %vm7383_vm13, %v9453_v6  ;;  %v9566_v47 = vmul.f32 %v16893_v54, %v17905_v13  ;;  %v16953_v22 = vld [vmem:[%s17391_s1 + $0x118] sm:$0xff]  ;;  %v17909_v45 = vld [vmem:[#allocation25_spill] sm:$0xff]  ;;  %v16993_v6 = vmul.f32 %v16893_v54, %v16948_v10 }
0x4200   :  { %9485 = vst.msk [vmem:[#allocation3 + $0xa8] sm:$0xff] %vm7383_vm13, %v9454_v38  ;;  %9486 = vst.msk [vmem:[#allocation3 + $0xb0] sm:$0xff] %vm7383_vm13, %v9455_v55  ;;  %v16958_v0 = vld [vmem:[%s17391_s1 + $0x138] sm:$0xff]  ;;  %v9567_v50 = vmul.f32 %v16893_v54, %v17909_v45  ;;  %v17911_v34 = vld [vmem:[#allocation27_spill] sm:$0xff]  ;;  %v17007_v49 = vmul.f32 %v16893_v54, %v16953_v22 }
0x4201   :  { %9487 = vst.msk [vmem:[#allocation3 + $0xb8] sm:$0xff] %vm7383_vm13, %v9456_v56  ;;  %9488 = vst.msk [vmem:[#allocation3 + $0xc0] sm:$0xff] %vm7383_vm13, %v9457_v60  ;;  %v17910_v63 = vld [vmem:[#allocation26_spill] sm:$0xff]  ;;  %v9569_v15 = vmul.f32 %v16893_v54, %v17911_v34  ;;  %v17912_v53 = vld [vmem:[#allocation28_spill] sm:$0xff] }
0x4202   :  { %9489 = vst.msk [vmem:[#allocation3 + $0xc8] sm:$0xff] %vm7383_vm13, %v9458_v9  ;;  %9490 = vst.msk [vmem:[#allocation3 + $0xd0] sm:$0xff] %vm7383_vm13, %v9459_v48  ;;  %v9568_v30 = vmul.f32 %v16893_v54, %v17910_v63  ;;  %v9570_v3 = vmul.f32 %v16893_v54, %v17912_v53  ;;  %v16971_v37 = vld [vmem:[%s17391_s1 + $0x158] sm:$0xff]  ;;  %v9526_v62 = vld [vmem:[#allocation3] sm:$0xff] }
0x4203   :  { %9491 = vst.msk [vmem:[#allocation3 + $0xd8] sm:$0xff] %vm7383_vm13, %v9460_v19  ;;  %9492 = vst.msk [vmem:[#allocation3 + $0xe0] sm:$0xff] %vm7383_vm13, %v9461_v27  ;;  %v9527_v4 = vld [vmem:[#allocation3 + $0x8] sm:$0xff]  ;;  %v17914_v32 = vld [vmem:[#allocation29_spill] sm:$0xff] }
0x4204   :  { %9493 = vst.msk [vmem:[#allocation3 + $0xe8] sm:$0xff] %vm7383_vm13, %v9462_v17  ;;  %9494 = vst.msk [vmem:[#allocation3 + $0xf0] sm:$0xff] %vm7383_vm13, %v9463_v16  ;;  %v9571_v58 = vmul.f32 %v16893_v54, %v17914_v32  ;;  %v17915_v57 = vld [vmem:[#allocation30_spill] sm:$0xff]  ;;  %v17916_v26 = vld [vmem:[#allocation31_spill] sm:$0xff]  ;;  %v9594_v32 = vadd.f32 %v9563_v61, %v9527_v4 }
0x4205   :  { %17906 = vst [vmem:[#allocation14_spill] sm:$0xff] %v16948_v10  ;;  %17907 = vst [vmem:[#allocation36_spill] sm:$0xff] %v16953_v22  ;;  %v9572_v51 = vmul.f32 %v16893_v54, %v17915_v57  ;;  %v9573_v18 = vmul.f32 %v16893_v54, %v17916_v26  ;;  %v17917_v39 = vld [vmem:[#allocation33_spill] sm:$0xff]  ;;  %v9529_v8 = vld [vmem:[#allocation3 + $0x18] sm:$0xff] }
0x4206   :  { %17908 = vst [vmem:[#allocation37_spill] sm:$0xff] %v16958_v0  ;;  %17913 = vst [vmem:[#allocation17_spill] sm:$0xff] %v16971_v37  ;;  %v9574_v42 = vmul.f32 %v16893_v54, %v17917_v39  ;;  %v9528_v40 = vld [vmem:[#allocation3 + $0x10] sm:$0xff]  ;;  %v9530_v59 = vld [vmem:[#allocation3 + $0x20] sm:$0xff]  ;;  %v9596_v45 = vadd.f32 %v9565_v35, %v9529_v8 }
0x4207   :  { %v9531_v7 = vld [vmem:[#allocation3 + $0x28] sm:$0xff]  ;;  %v17918_v1 = vld [vmem:[#allocation34_spill] sm:$0xff]  ;;  %v17919_v2 = vld [vmem:[#allocation35_spill] sm:$0xff]  ;;  %v9595_v63 = vadd.f32 %v9564_v41, %v9528_v40  ;;  %9625 = vst.msk [vmem:[#allocation3 + $0x8] sm:$0xff] %vm7383_vm13, %v9594_v32 }
0x4208   :  { %v9575_v23 = vmul.f32 %v16893_v54, %v17918_v1  ;;  %v9576_v25 = vmul.f32 %v16893_v54, %v17919_v2  ;;  %v17920_v12 = vld [vmem:[#allocation10_spill] sm:$0xff]  ;;  %v17921_v44 = vld [vmem:[#allocation11_spill] sm:$0xff]  ;;  %v9532_v33 = vld [vmem:[#allocation3 + $0x30] sm:$0xff]  ;;  %v9598_v13 = vadd.f32 %v9567_v50, %v9531_v7  ;;  %9627 = vst.msk [vmem:[#allocation3 + $0x18] sm:$0xff] %vm7383_vm13, %v9596_v45 }
0x4209   :  { %v9577_v28 = vmul.f32 %v16893_v54, %v17920_v12  ;;  %v9578_v31 = vmul.f32 %v16893_v54, %v17921_v44  ;;  %v9533_v52 = vld [vmem:[#allocation3 + $0x38] sm:$0xff]  ;;  %v9534_v43 = vld [vmem:[#allocation3 + $0x40] sm:$0xff]  ;;  %v17922_v20 = vld [vmem:[#allocation12_spill] sm:$0xff]  ;;  %9626 = vst.msk [vmem:[#allocation3 + $0x10] sm:$0xff] %vm7383_vm13, %v9595_v63 }
0x420a   :  { %v9579_v29 = vmul.f32 %v16893_v54, %v17922_v20  ;;  %v17923_v38 = vld [vmem:[#allocation38_spill] sm:$0xff]  ;;  %v17924_v56 = vld [vmem:[#allocation32_spill] sm:$0xff]  ;;  %v9536_v48 = vld [vmem:[#allocation3 + $0x50] sm:$0xff]  ;;  %9629 = vst.msk [vmem:[#allocation3 + $0x28] sm:$0xff] %vm7383_vm13, %v9598_v13 }
0x420b   :  { %v16997_v55 = vmul.f32 %v16893_v54, %v17923_v38  ;;  %v17001_v60 = vmul.f32 %v16893_v54, %v17924_v56  ;;  %v9535_v9 = vld [vmem:[#allocation3 + $0x48] sm:$0xff]  ;;  %v9537_v19 = vld [vmem:[#allocation3 + $0x58] sm:$0xff]  ;;  %v17925_v5 = vld [vmem:[#allocation13_spill] sm:$0xff] }
0x420c   :  { %v9583_v27 = vmul.f32 %v16893_v54, %v17925_v5  ;;  %v17926_v17 = vld [vmem:[#allocation15_spill] sm:$0xff]  ;;  %v17927_v16 = vld [vmem:[#allocation8_spill] sm:$0xff]  ;;  %v9540_v10 = vld [vmem:[#allocation3 + $0x70] sm:$0xff]  ;;  %v17021_v5 = vmul.f32 %v16893_v54, %v16958_v0  ;;  %v9593_v0 = vadd.f32 %v9562_v46, %v9526_v62  ;;  %v9603_v62 = vadd.f32 %v9572_v51, %v9536_v48 }
0x420d   :  { %v17011_v14 = vmul.f32 %v16893_v54, %v17926_v17  ;;  %v17015_v11 = vmul.f32 %v16893_v54, %v17927_v16  ;;  %v9538_v38 = vld [vmem:[#allocation3 + $0x60] sm:$0xff]  ;;  %v9539_v56 = vld [vmem:[#allocation3 + $0x68] sm:$0xff]  ;;  %v17929_v22 = vld [vmem:[#allocation9_spill] sm:$0xff]  ;;  %v9604_v4 = vadd.f32 %v9573_v18, %v9537_v19 }
0x420e   :  { %v17928_v20 = vld [vmem:[#allocation16_spill] sm:$0xff]  ;;  %v17025_v12 = vmul.f32 %v16893_v54, %v17929_v22  ;;  %v17931_v17 = vld [vmem:[#allocation39_spill] sm:$0xff]  ;;  %v9541_v16 = vld [vmem:[#allocation3 + $0x78] sm:$0xff]  ;;  %9624 = vst.msk [vmem:[#allocation3] sm:$0xff] %vm7383_vm13, %v9593_v0  ;;  %v9605_v41 = vadd.f32 %v9574_v42, %v9538_v38  ;;  %v9606_v35 = vadd.f32 %v9575_v23, %v9539_v56 }
0x420f   :  { %v9587_v44 = vmul.f32 %v16893_v54, %v17928_v20  ;;  %v17029_v2 = vmul.f32 %v16893_v54, %v17931_v17  ;;  %v9542_v1 = vld [vmem:[#allocation3 + $0x80] sm:$0xff]  ;;  %v9543_v39 = vld [vmem:[#allocation3 + $0x88] sm:$0xff]  ;;  %v17037_v20 = vmul.f32 %v16893_v54, %v16971_v37  ;;  %v9544_v53 = vld [vmem:[#allocation3 + $0x90] sm:$0xff]  ;;  %v9597_v17 = vadd.f32 %v9566_v47, %v9530_v59  ;;  %9634 = vst.msk [vmem:[#allocation3 + $0x50] sm:$0xff] %vm7383_vm13, %v9603_v62 }
0x4210   :  { %17930 = vst [vmem:[#allocation18_spill] sm:$0xff] %v17025_v12  ;;  %v17933_v26 = vld [vmem:[#allocation7_spill] sm:$0xff]  ;;  %v9545_v22 = vld [vmem:[#allocation3 + $0x98] sm:$0xff]  ;;  %v9547_v36 = vld [vmem:[#allocation3 + $0xa8] sm:$0xff]  ;;  %v9600_v12 = vadd.f32 %v9569_v15, %v9533_v52  ;;  %v9608_v15 = vadd.f32 %v9577_v28, %v9541_v16  ;;  %v9610_v32 = vadd.f32 %v9579_v29, %v9543_v39  ;;  %v9611_v63 = vadd.f32 %v16993_v6, %v9544_v53 }
0x4211   :  { %17932 = vst [vmem:[#allocation19_spill] sm:$0xff] %v17029_v2  ;;  %v17033_v57 = vmul.f32 %v16893_v54, %v17933_v26  ;;  %v9546_v34 = vld [vmem:[#allocation3 + $0xa0] sm:$0xff]  ;;  %v9548_v21 = vld [vmem:[#allocation3 + $0xb0] sm:$0xff]  ;;  %v9549_v24 = vld [vmem:[#allocation3 + $0xb8] sm:$0xff]  ;;  %v9599_v2 = vadd.f32 %v9568_v30, %v9532_v33  ;;  %v9601_v26 = vadd.f32 %v9570_v3, %v9534_v43  ;;  %v9607_v30 = vadd.f32 %v9576_v25, %v9540_v10 }
0x4212   :  { %v9550_v54 = vld [vmem:[#allocation3 + $0xc0] sm:$0xff]  ;;  %v9551_v46 = vld [vmem:[#allocation3 + $0xc8] sm:$0xff]  ;;  %v9552_v61 = vld [vmem:[#allocation3 + $0xd0] sm:$0xff]  ;;  %9628 = vst.msk [vmem:[#allocation3 + $0x20] sm:$0xff] %vm7383_vm13, %v9597_v17  ;;  %v9609_v3 = vadd.f32 %v9578_v31, %v9542_v1  ;;  %v9612_v13 = vadd.f32 %v16997_v55, %v9545_v22  ;;  %v9614_v51 = vadd.f32 %v9583_v27, %v9547_v36  ;;  %v9615_v53 = vadd.f32 %v17007_v49, %v9548_v21 }
0x4213   :  { %17934 = vst [vmem:[#allocation20_spill] sm:$0xff] %v17033_v57  ;;  %v9602_v57 = vadd.f32 %v9571_v58, %v9535_v9  ;;  %v9553_v47 = vld [vmem:[#allocation3 + $0xd8] sm:$0xff]  ;;  %v9554_v50 = vld [vmem:[#allocation3 + $0xe0] sm:$0xff]  ;;  %v9555_v0 = vld [vmem:[#allocation3 + $0xe8] sm:$0xff]  ;;  %v9613_v58 = vadd.f32 %v17001_v60, %v9546_v34  ;;  %v9617_v34 = vadd.f32 %v17015_v11, %v9550_v54  ;;  %v9618_v36 = vadd.f32 %v9587_v44, %v9551_v46 }
0x4214   :  { %9630 = vst.msk [vmem:[#allocation3 + $0x30] sm:$0xff] %vm7383_vm13, %v9599_v2  ;;  %9631 = vst.msk [vmem:[#allocation3 + $0x38] sm:$0xff] %vm7383_vm13, %v9600_v12  ;;  %v9556_v45 = vld [vmem:[#allocation3 + $0xf0] sm:$0xff]  ;;  %v17059_v10 = vld [vmem:[%s17397_s7 + $0xe] ss:$0 sm:$0xff] }
0x4215   :  { %9632 = vst.msk [vmem:[#allocation3 + $0x40] sm:$0xff] %vm7383_vm13, %v9601_v26  ;;  %9633 = vst.msk [vmem:[#allocation3 + $0x48] sm:$0xff] %vm7383_vm13, %v9602_v57  ;;  %v9616_v57 = vadd.f32 %v17011_v14, %v9549_v24  ;;  %v9619_v26 = vadd.f32 %v17021_v5, %v9552_v61  ;;  %v9623_v24 = vadd.f32 %v17037_v20, %v9556_v45  ;;  %v17938_v59 = vld [vmem:[#allocation21_spill] sm:$0xff]  ;;  %v17939_v1 = vld [vmem:[#allocation22_spill] sm:$0xff] }
0x4216   :  { %9635 = vst.msk [vmem:[#allocation3 + $0x58] sm:$0xff] %vm7383_vm13, %v9604_v4  ;;  %9636 = vst.msk [vmem:[#allocation3 + $0x60] sm:$0xff] %vm7383_vm13, %v9605_v41  ;;  %v9722_v7 = vmul.f32 %v17059_v10, %v17938_v59  ;;  %v9723_v23 = vmul.f32 %v17059_v10, %v17939_v1  ;;  %v17940_v2 = vld [vmem:[#allocation23_spill] sm:$0xff]  ;;  %v17942_v28 = vld [vmem:[#allocation24_spill] sm:$0xff] }
0x4217   :  { %9637 = vst.msk [vmem:[#allocation3 + $0x68] sm:$0xff] %vm7383_vm13, %v9606_v35  ;;  %9638 = vst.msk [vmem:[#allocation3 + $0x70] sm:$0xff] %vm7383_vm13, %v9607_v30  ;;  %v17935_v18 = vld [vmem:[#allocation18_spill] sm:$0xff]  ;;  %v9724_v25 = vmul.f32 %v17059_v10, %v17940_v2  ;;  %v17094_v12 = vld [vmem:[%s17391_s1 + $0x100] sm:$0xff]  ;;  %v9725_v44 = vmul.f32 %v17059_v10, %v17942_v28 }
0x4218   :  { %9639 = vst.msk [vmem:[#allocation3 + $0x78] sm:$0xff] %vm7383_vm13, %v9608_v15  ;;  %9640 = vst.msk [vmem:[#allocation3 + $0x80] sm:$0xff] %vm7383_vm13, %v9609_v3  ;;  %v9620_v39 = vadd.f32 %v17935_v18, %v9553_v47  ;;  %v17936_v42 = vld [vmem:[#allocation19_spill] sm:$0xff]  ;;  %v17943_v31 = vld [vmem:[#allocation25_spill] sm:$0xff] }
0x4219   :  { %9641 = vst.msk [vmem:[#allocation3 + $0x88] sm:$0xff] %vm7383_vm13, %v9610_v32  ;;  %v9621_v40 = vadd.f32 %v17936_v42, %v9554_v50  ;;  %9642 = vst.msk [vmem:[#allocation3 + $0x90] sm:$0xff] %vm7383_vm13, %v9611_v63  ;;  %v9726_v33 = vmul.f32 %v17059_v10, %v17943_v31  ;;  %v17944_v52 = vld [vmem:[#allocation26_spill] sm:$0xff]  ;;  %v17945_v20 = vld [vmem:[#allocation27_spill] sm:$0xff] }
0x421a   :  { %v17937_v21 = vld [vmem:[#allocation20_spill] sm:$0xff]  ;;  %9643 = vst.msk [vmem:[#allocation3 + $0x98] sm:$0xff] %vm7383_vm13, %v9612_v13  ;;  %9644 = vst.msk [vmem:[#allocation3 + $0xa0] sm:$0xff] %vm7383_vm13, %v9613_v58  ;;  %v9727_v43 = vmul.f32 %v17059_v10, %v17944_v52  ;;  %v9728_v29 = vmul.f32 %v17059_v10, %v17945_v20  ;;  %v17108_v6 = vld [vmem:[%s17391_s1 + $0x120] sm:$0xff]  ;;  %v17148_v13 = vmul.f32 %v17059_v10, %v17094_v12 }
0x421b   :  { %v9622_v8 = vadd.f32 %v17937_v21, %v9555_v0  ;;  %9645 = vst.msk [vmem:[#allocation3 + $0xa8] sm:$0xff] %vm7383_vm13, %v9614_v51  ;;  %9646 = vst.msk [vmem:[#allocation3 + $0xb0] sm:$0xff] %vm7383_vm13, %v9615_v53  ;;  %v17113_v55 = vld [vmem:[%s17391_s1 + $0x140] sm:$0xff]  ;;  %v17949_v60 = vld [vmem:[#allocation28_spill] sm:$0xff]  ;;  %v17162_v42 = vmul.f32 %v17059_v10, %v17108_v6 }
0x421c   :  { %9647 = vst.msk [vmem:[#allocation3 + $0xb8] sm:$0xff] %vm7383_vm13, %v9616_v57  ;;  %9648 = vst.msk [vmem:[#allocation3 + $0xc0] sm:$0xff] %vm7383_vm13, %v9617_v34  ;;  %v17118_v56 = vld [vmem:[%s17391_s1 + $0x160] sm:$0xff]  ;;  %v9729_v9 = vmul.f32 %v17059_v10, %v17949_v60  ;;  %v17950_v48 = vld [vmem:[#allocation29_spill] sm:$0xff] }
0x421d   :  { %9649 = vst.msk [vmem:[#allocation3 + $0xc8] sm:$0xff] %vm7383_vm13, %v9618_v36  ;;  %9650 = vst.msk [vmem:[#allocation3 + $0xd0] sm:$0xff] %vm7383_vm13, %v9619_v26  ;;  %v9730_v19 = vmul.f32 %v17059_v10, %v17950_v48  ;;  %v17951_v5 = vld [vmem:[#allocation30_spill] sm:$0xff]  ;;  %v17952_v49 = vld [vmem:[#allocation31_spill] sm:$0xff] }
0x421e   :  { %9651 = vst.msk [vmem:[#allocation3 + $0xd8] sm:$0xff] %vm7383_vm13, %v9620_v39  ;;  %9652 = vst.msk [vmem:[#allocation3 + $0xe0] sm:$0xff] %vm7383_vm13, %v9621_v40  ;;  %v9731_v27 = vmul.f32 %v17059_v10, %v17951_v5  ;;  %v9732_v14 = vmul.f32 %v17059_v10, %v17952_v49  ;;  %v9686_v16 = vld [vmem:[#allocation3] sm:$0xff]  ;;  %v9687_v11 = vld [vmem:[#allocation3 + $0x8] sm:$0xff] }
0x421f   :  { %9653 = vst.msk [vmem:[#allocation3 + $0xe8] sm:$0xff] %vm7383_vm13, %v9622_v8  ;;  %17941 = vst [vmem:[#allocation38_spill] sm:$0xff] %v17094_v12  ;;  %v9688_v38 = vld [vmem:[#allocation3 + $0x10] sm:$0xff]  ;;  %v9689_v17 = vld [vmem:[#allocation3 + $0x18] sm:$0xff]  ;;  %v9753_v5 = vadd.f32 %v9722_v7, %v9686_v16  ;;  %v9754_v48 = vadd.f32 %v9723_v23, %v9687_v11 }
0x4220   :  { %9654 = vst.msk [vmem:[#allocation3 + $0xf0] sm:$0xff] %vm7383_vm13, %v9623_v24  ;;  %17946 = vst [vmem:[#allocation15_spill] sm:$0xff] %v17108_v6  ;;  %v17953_v22 = vld [vmem:[#allocation33_spill] sm:$0xff]  ;;  %v17954_v46 = vld [vmem:[#allocation34_spill] sm:$0xff]  ;;  %v9755_v60 = vadd.f32 %v9724_v25, %v9688_v38 }
0x4221   :  { %17947 = vst [vmem:[#allocation9_spill] sm:$0xff] %v17113_v55  ;;  %17948 = vst [vmem:[#allocation18_spill] sm:$0xff] %v17118_v56  ;;  %v9733_v54 = vmul.f32 %v17059_v10, %v17953_v22  ;;  %v9734_v61 = vmul.f32 %v17059_v10, %v17954_v46  ;;  %v17955_v62 = vld [vmem:[#allocation35_spill] sm:$0xff]  ;;  %v17956_v41 = vld [vmem:[#allocation10_spill] sm:$0xff] }
0x4222   :  { %v9735_v4 = vmul.f32 %v17059_v10, %v17955_v62  ;;  %v9736_v35 = vmul.f32 %v17059_v10, %v17956_v41  ;;  %v9690_v47 = vld [vmem:[#allocation3 + $0x20] sm:$0xff]  ;;  %v9691_v50 = vld [vmem:[#allocation3 + $0x28] sm:$0xff]  ;;  %v9692_v0 = vld [vmem:[#allocation3 + $0x30] sm:$0xff]  ;;  %9784 = vst.msk [vmem:[#allocation3] sm:$0xff] %vm7383_vm13, %v9753_v5 }
0x4223   :  { %v17957_v30 = vld [vmem:[#allocation11_spill] sm:$0xff]  ;;  %v17958_v3 = vld [vmem:[#allocation12_spill] sm:$0xff]  ;;  %v17959_v45 = vld [vmem:[#allocation14_spill] sm:$0xff]  ;;  %v9758_v28 = vadd.f32 %v9727_v43, %v9691_v50  ;;  %v9759_v2 = vadd.f32 %v9728_v29, %v9692_v0  ;;  %9785 = vst.msk [vmem:[#allocation3 + $0x8] sm:$0xff] %vm7383_vm13, %v9754_v48 }
0x4224   :  { %v9737_v15 = vmul.f32 %v17059_v10, %v17957_v30  ;;  %v17140_v32 = vmul.f32 %v17059_v10, %v17958_v3  ;;  %v17144_v63 = vmul.f32 %v17059_v10, %v17959_v45  ;;  %v9693_v58 = vld [vmem:[#allocation3 + $0x38] sm:$0xff]  ;;  %v9694_v51 = vld [vmem:[#allocation3 + $0x40] sm:$0xff]  ;;  %v9695_v53 = vld [vmem:[#allocation3 + $0x48] sm:$0xff]  ;;  %9786 = vst.msk [vmem:[#allocation3 + $0x10] sm:$0xff] %vm7383_vm13, %v9755_v60 }
0x4225   :  { %v17960_v57 = vld [vmem:[#allocation32_spill] sm:$0xff]  ;;  %v17961_v36 = vld [vmem:[#allocation13_spill] sm:$0xff]  ;;  %v9697_v21 = vld [vmem:[#allocation3 + $0x58] sm:$0xff]  ;;  %v9760_v1 = vadd.f32 %v9729_v9, %v9693_v58  ;;  %9789 = vst.msk [vmem:[#allocation3 + $0x28] sm:$0xff] %vm7383_vm13, %v9758_v28 }
0x4226   :  { %v9741_v34 = vmul.f32 %v17059_v10, %v17960_v57  ;;  %v17154_v26 = vmul.f32 %v17059_v10, %v17961_v36  ;;  %v17962_v18 = vld [vmem:[#allocation36_spill] sm:$0xff]  ;;  %v9696_v40 = vld [vmem:[#allocation3 + $0x50] sm:$0xff]  ;;  %v9698_v8 = vld [vmem:[#allocation3 + $0x60] sm:$0xff]  ;;  %9790 = vst.msk [vmem:[#allocation3 + $0x30] sm:$0xff] %vm7383_vm13, %v9759_v2 }
0x4227   :  { %v17158_v39 = vmul.f32 %v17059_v10, %v17962_v18  ;;  %v17963_v24 = vld [vmem:[#allocation8_spill] sm:$0xff]  ;;  %v17965_v36 = vld [vmem:[#allocation37_spill] sm:$0xff]  ;;  %v17176_v18 = vmul.f32 %v17059_v10, %v17113_v55  ;;  %v9701_v30 = vld [vmem:[#allocation3 + $0x78] sm:$0xff]  ;;  %9791 = vst.msk [vmem:[#allocation3 + $0x38] sm:$0xff] %vm7383_vm13, %v9760_v1 }
0x4228   :  { %v9745_v59 = vmul.f32 %v17059_v10, %v17963_v24  ;;  %v17964_v12 = vld [vmem:[#allocation16_spill] sm:$0xff]  ;;  %v17172_v45 = vmul.f32 %v17059_v10, %v17965_v36  ;;  %v9700_v3 = vld [vmem:[#allocation3 + $0x70] sm:$0xff]  ;;  %v17966_v41 = vld [vmem:[#allocation39_spill] sm:$0xff]  ;;  %v17192_v36 = vmul.f32 %v17059_v10, %v17118_v56  ;;  %v9763_v56 = vadd.f32 %v9732_v14, %v9696_v40 }
0x4229   :  { %v17168_v57 = vmul.f32 %v17059_v10, %v17964_v12  ;;  %v9699_v6 = vld [vmem:[#allocation3 + $0x68] sm:$0xff]  ;;  %v17180_v62 = vmul.f32 %v17059_v10, %v17966_v41  ;;  %v17968_v24 = vld [vmem:[#allocation7_spill] sm:$0xff]  ;;  %v17188_v12 = vmul.f32 %v17059_v10, %v16971_v37  ;;  %v9704_v49 = vld [vmem:[#allocation3 + $0x90] sm:$0xff]  ;;  %v9756_v41 = vadd.f32 %v9725_v44, %v9689_v17 }
0x422a   :  { %v17184_v46 = vmul.f32 %v17059_v10, %v17968_v24  ;;  %17971 = vst [vmem:[#allocation32_spill] sm:$0xff] %v17192_v36  ;;  %v9702_v55 = vld [vmem:[#allocation3 + $0x80] sm:$0xff]  ;;  %v9703_v22 = vld [vmem:[#allocation3 + $0x88] sm:$0xff]  ;;  %v9705_v20 = vld [vmem:[#allocation3 + $0x98] sm:$0xff]  ;;  %v9757_v24 = vadd.f32 %v9726_v33, %v9690_v47  ;;  %v9762_v10 = vadd.f32 %v9731_v27, %v9695_v53  ;;  %v9764_v36 = vadd.f32 %v9733_v54, %v9697_v21 }
0x422b   :  { %17967 = vst [vmem:[#allocation19_spill] sm:$0xff] %v17180_v62  ;;  %17970 = vst [vmem:[#allocation21_spill] sm:$0xff] %v17188_v12  ;;  %v9706_v52 = vld [vmem:[#allocation3 + $0xa0] sm:$0xff]  ;;  %v9707_v31 = vld [vmem:[#allocation3 + $0xa8] sm:$0xff]  ;;  %v9761_v62 = vadd.f32 %v9730_v19, %v9694_v51  ;;  %v9765_v33 = vadd.f32 %v9734_v61, %v9698_v8  ;;  %v9766_v43 = vadd.f32 %v9735_v4, %v9699_v6 }
0x422c   :  { %17969 = vst [vmem:[#allocation20_spill] sm:$0xff] %v17184_v46  ;;  %v9708_v37 = vld [vmem:[#allocation3 + $0xb0] sm:$0xff]  ;;  %v9709_v12 = vld [vmem:[#allocation3 + $0xb8] sm:$0xff]  ;;  %v9710_v46 = vld [vmem:[#allocation3 + $0xc0] sm:$0xff]  ;;  %v9767_v29 = vadd.f32 %v9736_v35, %v9700_v3  ;;  %v9768_v9 = vadd.f32 %v9737_v15, %v9701_v30  ;;  %v9769_v5 = vadd.f32 %v17140_v32, %v9702_v55  ;;  %v9770_v27 = vadd.f32 %v17144_v63, %v9703_v22 }
0x422d   :  { %9787 = vst.msk [vmem:[#allocation3 + $0x18] sm:$0xff] %vm7383_vm13, %v9756_v41  ;;  %v17201_v7 = vld [vmem:[%s17397_s7 + $0xf] ss:$0 sm:$0xff]  ;;  %v9712_v25 = vld [vmem:[#allocation3 + $0xd0] sm:$0xff]  ;;  %v9713_v44 = vld [vmem:[#allocation3 + $0xd8] sm:$0xff]  ;;  %v9771_v14 = vadd.f32 %v17148_v13, %v9704_v49  ;;  %v9772_v6 = vadd.f32 %v9741_v34, %v9705_v20  ;;  %v9773_v1 = vadd.f32 %v17154_v26, %v9706_v52  ;;  %v9774_v2 = vadd.f32 %v17158_v39, %v9707_v31 }
0x422e   :  { %v9711_v23 = vld [vmem:[#allocation3 + $0xc8] sm:$0xff]  ;;  %9788 = vst.msk [vmem:[#allocation3 + $0x20] sm:$0xff] %vm7383_vm13, %v9757_v24  ;;  %v9714_v60 = vld [vmem:[#allocation3 + $0xe0] sm:$0xff]  ;;  %v9716_v19 = vld [vmem:[#allocation3 + $0xf0] sm:$0xff]  ;;  %v9775_v28 = vadd.f32 %v17162_v42, %v9708_v37  ;;  %v9776_v55 = vadd.f32 %v9745_v59, %v9709_v12  ;;  %v9777_v20 = vadd.f32 %v17168_v57, %v9710_v46  ;;  %v9779_v49 = vadd.f32 %v17176_v18, %v9712_v25 }
0x422f   :  { %v9715_v48 = vld [vmem:[#allocation3 + $0xe8] sm:$0xff]  ;;  %9792 = vst.msk [vmem:[#allocation3 + $0x40] sm:$0xff] %vm7383_vm13, %v9761_v62  ;;  %9793 = vst.msk [vmem:[#allocation3 + $0x48] sm:$0xff] %vm7383_vm13, %v9762_v10  ;;  %v17976_v22 = vld [vmem:[#allocation22_spill] sm:$0xff] }
0x4230   :  { %9794 = vst.msk [vmem:[#allocation3 + $0x50] sm:$0xff] %vm7383_vm13, %v9763_v56  ;;  %9795 = vst.msk [vmem:[#allocation3 + $0x58] sm:$0xff] %vm7383_vm13, %v9764_v36  ;;  %v9778_v56 = vadd.f32 %v17172_v45, %v9711_v23  ;;  %v9882_v54 = vmul.f32 %v17201_v7, %v17976_v22  ;;  %v17977_v46 = vld [vmem:[#allocation23_spill] sm:$0xff]  ;;  %v17978_v62 = vld [vmem:[#allocation24_spill] sm:$0xff] }
0x4231   :  { %9796 = vst.msk [vmem:[#allocation3 + $0x60] sm:$0xff] %vm7383_vm13, %v9765_v33  ;;  %9797 = vst.msk [vmem:[#allocation3 + $0x68] sm:$0xff] %vm7383_vm13, %v9766_v43  ;;  %v17975_v38 = vld [vmem:[#allocation32_spill] sm:$0xff]  ;;  %v9883_v61 = vmul.f32 %v17201_v7, %v17977_v46  ;;  %v9884_v4 = vmul.f32 %v17201_v7, %v17978_v62  ;;  %v17979_v35 = vld [vmem:[#allocation25_spill] sm:$0xff] }
0x4232   :  { %9798 = vst.msk [vmem:[#allocation3 + $0x70] sm:$0xff] %vm7383_vm13, %v9767_v29  ;;  %9799 = vst.msk [vmem:[#allocation3 + $0x78] sm:$0xff] %vm7383_vm13, %v9768_v9  ;;  %v17972_v52 = vld [vmem:[#allocation19_spill] sm:$0xff]  ;;  %v17974_v31 = vld [vmem:[#allocation21_spill] sm:$0xff]  ;;  %v9783_v17 = vadd.f32 %v17975_v38, %v9716_v19  ;;  %v9885_v47 = vmul.f32 %v17201_v7, %v17979_v35 }
0x4233   :  { %v9780_v16 = vadd.f32 %v17972_v52, %v9713_v44  ;;  %9800 = vst.msk [vmem:[#allocation3 + $0x80] sm:$0xff] %vm7383_vm13, %v9769_v5  ;;  %9801 = vst.msk [vmem:[#allocation3 + $0x88] sm:$0xff] %vm7383_vm13, %v9770_v27  ;;  %v17973_v37 = vld [vmem:[#allocation20_spill] sm:$0xff]  ;;  %v9782_v11 = vadd.f32 %v17974_v31, %v9715_v48  ;;  %v17980_v50 = vld [vmem:[#allocation26_spill] sm:$0xff] }
0x4234   :  { %9802 = vst.msk [vmem:[#allocation3 + $0x90] sm:$0xff] %vm7383_vm13, %v9771_v14  ;;  %9803 = vst.msk [vmem:[#allocation3 + $0x98] sm:$0xff] %vm7383_vm13, %v9772_v6  ;;  %v9781_v12 = vadd.f32 %v17973_v37, %v9714_v60  ;;  %v9886_v0 = vmul.f32 %v17201_v7, %v17980_v50  ;;  %v9833_v30 = vld [vmem:[%s17391_s1 + $0x108] sm:$0xff]  ;;  %v17981_v32 = vld [vmem:[#allocation27_spill] sm:$0xff] }
0x4235   :  { %9804 = vst.msk [vmem:[#allocation3 + $0xa0] sm:$0xff] %vm7383_vm13, %v9773_v1  ;;  %9805 = vst.msk [vmem:[#allocation3 + $0xa8] sm:$0xff] %vm7383_vm13, %v9774_v2  ;;  %v9837_v15 = vld [vmem:[%s17391_s1 + $0x128] sm:$0xff]  ;;  %v9887_v45 = vmul.f32 %v17201_v7, %v17981_v32  ;;  %v17983_v58 = vld [vmem:[#allocation29_spill] sm:$0xff]  ;;  %v17292_v2 = vmul.f32 %v17201_v7, %v9833_v30 }
0x4236   :  { %9806 = vst.msk [vmem:[#allocation3 + $0xb0] sm:$0xff] %vm7383_vm13, %v9775_v28  ;;  %9807 = vst.msk [vmem:[#allocation3 + $0xb8] sm:$0xff] %vm7383_vm13, %v9776_v55  ;;  %v9841_v3 = vld [vmem:[%s17391_s1 + $0x148] sm:$0xff]  ;;  %v9889_v51 = vmul.f32 %v17201_v7, %v17983_v58  ;;  %v17984_v53 = vld [vmem:[#allocation30_spill] sm:$0xff]  ;;  %v17305_v31 = vmul.f32 %v17201_v7, %v9837_v15 }
0x4237   :  { %9808 = vst.msk [vmem:[#allocation3 + $0xc0] sm:$0xff] %vm7383_vm13, %v9777_v20  ;;  %9809 = vst.msk [vmem:[#allocation3 + $0xc8] sm:$0xff] %vm7383_vm13, %v9778_v56  ;;  %v17982_v63 = vld [vmem:[#allocation28_spill] sm:$0xff]  ;;  %v9890_v34 = vmul.f32 %v17201_v7, %v17984_v53  ;;  %v9846_v26 = vld [vmem:[#allocation3] sm:$0xff]  ;;  %v17318_v32 = vmul.f32 %v17201_v7, %v9841_v3 }
0x4238   :  { %9810 = vst.msk [vmem:[#allocation3 + $0xd0] sm:$0xff] %vm7383_vm13, %v9779_v49  ;;  %9811 = vst.msk [vmem:[#allocation3 + $0xd8] sm:$0xff] %vm7383_vm13, %v9780_v16  ;;  %v9888_v13 = vmul.f32 %v17201_v7, %v17982_v63  ;;  %v9845_v36 = vld [vmem:[%s17391_s1 + $0x168] sm:$0xff]  ;;  %v17985_v39 = vld [vmem:[#allocation31_spill] sm:$0xff]  ;;  %s13194_s1 = smov [#allocation4]  }
0x4239   :  { %9812 = vst.msk [vmem:[#allocation3 + $0xe0] sm:$0xff] %vm7383_vm13, %v9781_v12  ;;  %9813 = vst.msk [vmem:[#allocation3 + $0xe8] sm:$0xff] %vm7383_vm13, %v9782_v11  ;;  %v9847_v18 = vld [vmem:[#allocation3 + $0x8] sm:$0xff]  ;;  %v9891_v42 = vmul.f32 %v17201_v7, %v17985_v39  ;;  %v17986_v40 = vld [vmem:[#allocation33_spill] sm:$0xff]  ;;  %s10045_s25 = sshll.u32 %s13194_s1, 4  ;;  %s10046_s25 = int_to_ptr.vmem [resolvable:$true] %s10045_s25 }
0x423a   :  { %9814 = vst.msk [vmem:[#allocation3 + $0xf0] sm:$0xff] %vm7383_vm13, %v9783_v17  ;;  %v9892_v21 = vmul.f32 %v17201_v7, %v17986_v40  ;;  %v17987_v8 = vld [vmem:[#allocation34_spill] sm:$0xff]  ;;  %v17988_v57 = vld [vmem:[#allocation35_spill] sm:$0xff]  ;;  %v9848_v41 = vld [vmem:[#allocation3 + $0x10] sm:$0xff]  ;;  %v9914_v3 = vadd.f32 %v9883_v61, %v9847_v18  ;;  %s13166_s26 = scalar_lea.vmem %s10046_s25, 128  ;;  %p13171_p1 = scmp.lt.s32.totalorder %s10046_s25, %s10046_s25 }
0x423b   :  { %v9893_v59 = vmul.f32 %v17201_v7, %v17987_v8  ;;  %v9894_v24 = vmul.f32 %v17201_v7, %v17988_v57  ;;  %v9849_v10 = vld [vmem:[#allocation3 + $0x18] sm:$0xff]  ;;  %v9850_v23 = vld [vmem:[#allocation3 + $0x20] sm:$0xff]  ;;  %v9851_v25 = vld [vmem:[#allocation3 + $0x28] sm:$0xff]  ;;  %18001 = vst [vmem:[#allocation39_spill] sm:$0xff] %v17318_v32  ;;  %p13167_p0 = scmp.ne.s32.totalorder %s10046_s25, %s13166_s26  ;;  %p13172_p2 = scmp.lt.s32.totalorder %s13166_s26, %s13166_s26 }
0x423c   :  { %v17989_v44 = vld [vmem:[#allocation10_spill] sm:$0xff]  ;;  %v17990_v43 = vld [vmem:[#allocation11_spill] sm:$0xff]  ;;  %v17991_v9 = vld [vmem:[#allocation12_spill] sm:$0xff]  ;;  %9945 = vst.msk [vmem:[#allocation3 + $0x8] sm:$0xff] %vm7383_vm13, %v9914_v3 }
0x423d   :  { %v9895_v33 = vmul.f32 %v17201_v7, %v17989_v44  ;;  %v9896_v29 = vmul.f32 %v17201_v7, %v17990_v43  ;;  %v9897_v60 = vmul.f32 %v17201_v7, %v17991_v9  ;;  %v17992_v48 = vld [vmem:[#allocation14_spill] sm:$0xff]  ;;  %v9852_v5 = vld [vmem:[#allocation3 + $0x30] sm:$0xff]  ;;  %v9854_v14 = vld [vmem:[#allocation3 + $0x40] sm:$0xff]  ;;  %v17331_v43 = vmul.f32 %v17201_v7, %v9845_v36  ;;  %p13173_p3 = por %p13172_p2, %p13171_p1 }
0x423e   :  { %v9898_v19 = vmul.f32 %v17201_v7, %v17992_v48  ;;  %v9853_v27 = vld [vmem:[#allocation3 + $0x38] sm:$0xff]  ;;  %v17994_v28 = vld [vmem:[#allocation13_spill] sm:$0xff]  ;;  %v17995_v20 = vld [vmem:[#allocation36_spill] sm:$0xff]  ;;  %v9913_v9 = vadd.f32 %v9882_v54, %v9846_v26  ;;  %v9921_v32 = vadd.f32 %v9890_v34, %v9854_v14 }
0x423f   :  { %v17993_v6 = vld [vmem:[#allocation38_spill] sm:$0xff]  ;;  %v17296_v55 = vmul.f32 %v17201_v7, %v17994_v28  ;;  %v17300_v56 = vmul.f32 %v17201_v7, %v17995_v20  ;;  %v9855_v49 = vld [vmem:[#allocation3 + $0x48] sm:$0xff]  ;;  %v9856_v52 = vld [vmem:[#allocation3 + $0x50] sm:$0xff]  ;;  %v9915_v20 = vadd.f32 %v9884_v4, %v9848_v41  ;;  %p13174_p4 = pnand %p13173_p3, %p13167_p0 }
0x4240   :  { %v9899_v1 = vmul.f32 %v17201_v7, %v17993_v6  ;;  %v9857_v16 = vld [vmem:[#allocation3 + $0x58] sm:$0xff]  ;;  %v17996_v37 = vld [vmem:[#allocation15_spill] sm:$0xff]  ;;  %v17997_v11 = vld [vmem:[#allocation16_spill] sm:$0xff]  ;;  %9944 = vst.msk [vmem:[#allocation3] sm:$0xff] %vm7383_vm13, %v9913_v9  ;;  %v9923_v36 = vadd.f32 %v9892_v21, %v9856_v52 }
0x4241   :  { %v9903_v12 = vmul.f32 %v17201_v7, %v17996_v37  ;;  %v17309_v38 = vmul.f32 %v17201_v7, %v17997_v11  ;;  %v17998_v17 = vld [vmem:[#allocation37_spill] sm:$0xff]  ;;  %v9858_v46 = vld [vmem:[#allocation3 + $0x60] sm:$0xff]  ;;  %v9859_v62 = vld [vmem:[#allocation3 + $0x68] sm:$0xff]  ;;  %v9916_v37 = vadd.f32 %v9885_v47, %v9849_v10  ;;  %v9917_v11 = vadd.f32 %v9886_v0, %v9850_v23  ;;  %9946 = vst.msk [vmem:[#allocation3 + $0x10] sm:$0xff] %vm7383_vm13, %v9915_v20 }
0x4242   :  { %v17313_v22 = vmul.f32 %v17201_v7, %v17998_v17  ;;  %v9860_v35 = vld [vmem:[#allocation3 + $0x70] sm:$0xff]  ;;  %v18002_v63 = vld [vmem:[#allocation7_spill] sm:$0xff]  ;;  %v9861_v39 = vld [vmem:[#allocation3 + $0x78] sm:$0xff]  ;;  %v9918_v17 = vadd.f32 %v9887_v45, %v9851_v25  ;;  %v9924_v26 = vadd.f32 %v9893_v59, %v9857_v16  ;;  %v9925_v4 = vadd.f32 %v9894_v24, %v9858_v46  ;;  %9952 = vst.msk [vmem:[#allocation3 + $0x40] sm:$0xff] %vm7383_vm13, %v9921_v32 }
0x4243   :  { %v18000_v50 = vld [vmem:[#allocation9_spill] sm:$0xff]  ;;  %v17322_v15 = vmul.f32 %v17201_v7, %v18002_v63  ;;  %v9862_v40 = vld [vmem:[#allocation3 + $0x80] sm:$0xff]  ;;  %v9863_v8 = vld [vmem:[#allocation3 + $0x88] sm:$0xff]  ;;  %v9926_v47 = vadd.f32 %v9895_v33, %v9859_v62  ;;  %9947 = vst.msk [vmem:[#allocation3 + $0x18] sm:$0xff] %vm7383_vm13, %v9916_v37  ;;  %v9928_v34 = vadd.f32 %v9897_v60, %v9861_v39 }
0x4244   :  { %17999 = vst [vmem:[#allocation8_spill] sm:$0xff] %v17313_v22  ;;  %v9907_v30 = vmul.f32 %v17201_v7, %v18000_v50  ;;  %v18004_v58 = vld [vmem:[#allocation17_spill] sm:$0xff]  ;;  %v18006_v57 = vld [vmem:[#allocation18_spill] sm:$0xff]  ;;  %v9866_v28 = vld [vmem:[#allocation3 + $0xa0] sm:$0xff]  ;;  %v9922_v22 = vadd.f32 %v9891_v42, %v9855_v49  ;;  %v9929_v18 = vadd.f32 %v9898_v19, %v9862_v40  ;;  %v9930_v42 = vadd.f32 %v9899_v1, %v9863_v8 }
0x4245   :  { %18003 = vst [vmem:[#allocation19_spill] sm:$0xff] %v17322_v15  ;;  %v17326_v53 = vmul.f32 %v17201_v7, %v18004_v58  ;;  %v9911_v44 = vmul.f32 %v17201_v7, %v18006_v57  ;;  %v9864_v48 = vld [vmem:[#allocation3 + $0x90] sm:$0xff]  ;;  %v9865_v6 = vld [vmem:[#allocation3 + $0x98] sm:$0xff]  ;;  %v9867_v50 = vld [vmem:[#allocation3 + $0xa8] sm:$0xff]  ;;  %v9920_v15 = vadd.f32 %v9889_v51, %v9853_v27  ;;  %v9927_v51 = vadd.f32 %v9896_v29, %v9860_v35 }
0x4246   :  { %v9868_v63 = vld [vmem:[#allocation3 + $0xb0] sm:$0xff]  ;;  %v9869_v58 = vld [vmem:[#allocation3 + $0xb8] sm:$0xff]  ;;  %v9870_v7 = vld [vmem:[#allocation3 + $0xc0] sm:$0xff]  ;;  %9948 = vst.msk [vmem:[#allocation3 + $0x20] sm:$0xff] %vm7383_vm13, %v9917_v11  ;;  %v9931_v59 = vadd.f32 %v17292_v2, %v9864_v48  ;;  %v9932_v24 = vadd.f32 %v17296_v55, %v9865_v6  ;;  %v9933_v41 = vadd.f32 %v17300_v56, %v9866_v28  ;;  %v9934_v10 = vadd.f32 %v9903_v12, %v9867_v50 }
0x4247   :  { %18005 = vst [vmem:[#allocation20_spill] sm:$0xff] %v17326_v53  ;;  %v9919_v53 = vadd.f32 %v9888_v13, %v9852_v5  ;;  %v9871_v54 = vld [vmem:[#allocation3 + $0xc8] sm:$0xff]  ;;  %v9872_v61 = vld [vmem:[#allocation3 + $0xd0] sm:$0xff]  ;;  %9949 = vst.msk [vmem:[#allocation3 + $0x28] sm:$0xff] %vm7383_vm13, %v9918_v17  ;;  %v9935_v23 = vadd.f32 %v17305_v31, %v9868_v63  ;;  %v9936_v25 = vadd.f32 %v17309_v38, %v9869_v58 }
0x4248   :  { %v9873_v0 = vld [vmem:[#allocation3 + $0xd8] sm:$0xff]  ;;  %v9874_v45 = vld [vmem:[#allocation3 + $0xe0] sm:$0xff]  ;;  %v9875_v13 = vld [vmem:[#allocation3 + $0xe8] sm:$0xff]  ;;  %9951 = vst.msk [vmem:[#allocation3 + $0x38] sm:$0xff] %vm7383_vm13, %v9920_v15  ;;  %v9938_v60 = vadd.f32 %v9907_v30, %v9871_v54 }
0x4249   :  { %9950 = vst.msk [vmem:[#allocation3 + $0x30] sm:$0xff] %vm7383_vm13, %v9919_v53  ;;  %9953 = vst.msk [vmem:[#allocation3 + $0x48] sm:$0xff] %vm7383_vm13, %v9922_v22  ;;  %v9876_v21 = vld [vmem:[#allocation3 + $0xf0] sm:$0xff]  ;;  %v18008_v19 = vld [vmem:[#allocation39_spill] sm:$0xff]  ;;  %v9942_v55 = vadd.f32 %v9911_v44, %v9875_v13 }
0x424a   :  { %9954 = vst.msk [vmem:[#allocation3 + $0x50] sm:$0xff] %vm7383_vm13, %v9923_v36  ;;  %9955 = vst.msk [vmem:[#allocation3 + $0x58] sm:$0xff] %vm7383_vm13, %v9924_v26  ;;  %v9939_v5 = vadd.f32 %v18008_v19, %v9872_v61  ;;  %v9943_v56 = vadd.f32 %v17331_v43, %v9876_v21  ;;  %v9975_v49 = vld [vmem:[#allocation3] sm:$0xff]  ;;  %v9976_v52 = vld [vmem:[#allocation3 + $0x8] sm:$0xff] }
0x424b   :  { %9956 = vst.msk [vmem:[#allocation3 + $0x60] sm:$0xff] %vm7383_vm13, %v9925_v4  ;;  %9957 = vst.msk [vmem:[#allocation3 + $0x68] sm:$0xff] %vm7383_vm13, %v9926_v47  ;;  %v18007_v33 = vld [vmem:[#allocation8_spill] sm:$0xff]  ;;  %v9977_v16 = vmax.f32 %v9975_v49, %v9976_v52  ;;  %v9978_v12 = vld [vmem:[#allocation3 + $0x10] sm:$0xff] }
0x424c   :  { %v9937_v29 = vadd.f32 %v18007_v33, %v9870_v7  ;;  %9958 = vst.msk [vmem:[#allocation3 + $0x70] sm:$0xff] %vm7383_vm13, %v9927_v51  ;;  %9959 = vst.msk [vmem:[#allocation3 + $0x78] sm:$0xff] %vm7383_vm13, %v9928_v34  ;;  %v18009_v27 = vld [vmem:[#allocation19_spill] sm:$0xff]  ;;  %v9980_v31 = vld [vmem:[#allocation3 + $0x18] sm:$0xff] }
0x424d   :  { %9960 = vst.msk [vmem:[#allocation3 + $0x80] sm:$0xff] %vm7383_vm13, %v9929_v18  ;;  %9961 = vst.msk [vmem:[#allocation3 + $0x88] sm:$0xff] %vm7383_vm13, %v9930_v42  ;;  %v9940_v14 = vadd.f32 %v18009_v27, %v9873_v0  ;;  %v9979_v38 = vmax.f32 %v9977_v16, %v9978_v12  ;;  %v9982_v22 = vld [vmem:[#allocation3 + $0x20] sm:$0xff] }
0x424e   :  { %v18010_v1 = vld [vmem:[#allocation20_spill] sm:$0xff]  ;;  %9962 = vst.msk [vmem:[#allocation3 + $0x90] sm:$0xff] %vm7383_vm13, %v9931_v59  ;;  %9963 = vst.msk [vmem:[#allocation3 + $0x98] sm:$0xff] %vm7383_vm13, %v9932_v24  ;;  %v9990_v39 = vld [vmem:[#allocation3 + $0x40] sm:$0xff] }
0x424f   :  { %v9941_v2 = vadd.f32 %v18010_v1, %v9874_v45  ;;  %9964 = vst.msk [vmem:[#allocation3 + $0xa0] sm:$0xff] %vm7383_vm13, %v9933_v41  ;;  %9965 = vst.msk [vmem:[#allocation3 + $0xa8] sm:$0xff] %vm7383_vm13, %v9934_v10  ;;  %v9981_v46 = vmax.f32 %v9979_v38, %v9980_v31  ;;  %v9984_v62 = vld [vmem:[#allocation3 + $0x28] sm:$0xff]  ;;  %v9988_v15 = vld [vmem:[#allocation3 + $0x38] sm:$0xff] }
0x4250   :  { %9966 = vst.msk [vmem:[#allocation3 + $0xb0] sm:$0xff] %vm7383_vm13, %v9935_v23  ;;  %9967 = vst.msk [vmem:[#allocation3 + $0xb8] sm:$0xff] %vm7383_vm13, %v9936_v25  ;;  %v9986_v30 = vld [vmem:[#allocation3 + $0x30] sm:$0xff]  ;;  %v9992_v8 = vld [vmem:[#allocation3 + $0x48] sm:$0xff] }
0x4251   :  { %9968 = vst.msk [vmem:[#allocation3 + $0xc0] sm:$0xff] %vm7383_vm13, %v9937_v29  ;;  %9969 = vst.msk [vmem:[#allocation3 + $0xc8] sm:$0xff] %vm7383_vm13, %v9938_v60  ;;  %v9983_v35 = vmax.f32 %v9981_v46, %v9982_v22  ;;  %v9994_v44 = vld [vmem:[#allocation3 + $0x50] sm:$0xff]  ;;  %v9996_v9 = vld [vmem:[#allocation3 + $0x58] sm:$0xff] }
0x4252   :  { %9970 = vst.msk [vmem:[#allocation3 + $0xd0] sm:$0xff] %vm7383_vm13, %v9939_v5  ;;  %9971 = vst.msk [vmem:[#allocation3 + $0xd8] sm:$0xff] %vm7383_vm13, %v9940_v14  ;;  %v9998_v48 = vld [vmem:[#allocation3 + $0x60] sm:$0xff]  ;;  %v10000_v28 = vld [vmem:[#allocation3 + $0x68] sm:$0xff] }
0x4253   :  { %9972 = vst.msk [vmem:[#allocation3 + $0xe0] sm:$0xff] %vm7383_vm13, %v9941_v2  ;;  %9973 = vst.msk [vmem:[#allocation3 + $0xe8] sm:$0xff] %vm7383_vm13, %v9942_v55  ;;  %v9985_v32 = vmax.f32 %v9983_v35, %v9984_v62  ;;  %v10002_v37 = vld [vmem:[#allocation3 + $0x70] sm:$0xff]  ;;  %v10004_v17 = vld [vmem:[#allocation3 + $0x78] sm:$0xff] }
0x4254   :  { %9974 = vst.msk [vmem:[#allocation3 + $0xf0] sm:$0xff] %vm7383_vm13, %v9943_v56  ;;  %v10006_v63 = vld [vmem:[#allocation3 + $0x80] sm:$0xff]  ;;  %v10008_v7 = vld [vmem:[#allocation3 + $0x88] sm:$0xff] }
0x4255   :  { %v9987_v53 = vmax.f32 %v9985_v32, %v9986_v30  ;;  %v10010_v61 = vld [vmem:[#allocation3 + $0x90] sm:$0xff]  ;;  %v10012_v26 = vld [vmem:[#allocation3 + $0x98] sm:$0xff] }
0x4256   :  { %v10014_v47 = vld [vmem:[#allocation3 + $0xa0] sm:$0xff]  ;;  %v10016_v45 = vld [vmem:[#allocation3 + $0xa8] sm:$0xff] }
0x4257   :  { %v9989_v40 = vmax.f32 %v9987_v53, %v9988_v15  ;;  %v10018_v51 = vld [vmem:[#allocation3 + $0xb0] sm:$0xff]  ;;  %v10020_v18 = vld [vmem:[#allocation3 + $0xb8] sm:$0xff] }
0x4258   :  { %v10022_v21 = vld [vmem:[#allocation3 + $0xc0] sm:$0xff]  ;;  %v10024_v24 = vld [vmem:[#allocation3 + $0xc8] sm:$0xff] }
0x4259   :  { %v9991_v57 = vmax.f32 %v9989_v40, %v9990_v39  ;;  %v10026_v10 = vld [vmem:[#allocation3 + $0xd0] sm:$0xff]  ;;  %v10028_v25 = vld [vmem:[#allocation3 + $0xd8] sm:$0xff] }
0x425a   :  { %v10030_v29 = vld [vmem:[#allocation3 + $0xe0] sm:$0xff]  ;;  %v10032_v19 = vld [vmem:[#allocation3 + $0xe8] sm:$0xff] }
0x425b   :  { %v9993_v43 = vmax.f32 %v9991_v57, %v9992_v8  ;;  %v10034_v27 = vld [vmem:[#allocation3 + $0xf0] sm:$0xff] }
0x425d   :  { %v9995_v3 = vmax.f32 %v9993_v43, %v9994_v44 }
0x425f   :  { %v9997_v6 = vmax.f32 %v9995_v3, %v9996_v9 }
0x4261   :  { %v9999_v20 = vmax.f32 %v9997_v6, %v9998_v48 }
0x4263   :  { %v10001_v11 = vmax.f32 %v9999_v20, %v10000_v28 }
0x4265   :  { %v10003_v50 = vmax.f32 %v10001_v11, %v10002_v37 }
0x4267   :  { %v10005_v58 = vmax.f32 %v10003_v50, %v10004_v17 }
0x4269   :  { %v10007_v54 = vmax.f32 %v10005_v58, %v10006_v63 }
0x426b   :  { %v10009_v36 = vmax.f32 %v10007_v54, %v10008_v7 }
0x426d   :  { %v10011_v4 = vmax.f32 %v10009_v36, %v10010_v61 }
0x426f   :  { %v10013_v0 = vmax.f32 %v10011_v4, %v10012_v26 }
0x4271   :  { %v10015_v13 = vmax.f32 %v10013_v0, %v10014_v47 }
0x4273   :  { %v10017_v34 = vmax.f32 %v10015_v13, %v10016_v45 }
0x4275   :  { %v10019_v42 = vmax.f32 %v10017_v34, %v10018_v51 }
0x4277   :  { %v10021_v59 = vmax.f32 %v10019_v42, %v10020_v18 }
0x4279   :  { %v10023_v41 = vmax.f32 %v10021_v59, %v10022_v21 }
0x427b   :  { %v10025_v23 = vmax.f32 %v10023_v41, %v10024_v24 }
0x427d   :  { %v10027_v33 = vmax.f32 %v10025_v23, %v10026_v10 }
0x427f   :  { %v10029_v60 = vmax.f32 %v10027_v33, %v10028_v25 }
0x4281   :  { %v10031_v5 = vmax.f32 %v10029_v60, %v10030_v29 }
0x4283   :  { %v10033_v14 = vmax.f32 %v10031_v5, %v10032_v19 }
0x4285   :  { %v10035_v1 = vmax.f32 %v10033_v14, %v10034_v27 }
0x4287   :  { %10036 = vst.msk [vmem:[#allocation4] sm:$0xff] %vm7383_vm13, %v10035_v1 }
0x4288   :  { %13177 = shalt.err (!%p13174_p4)
}
0x4289   :  { %s13178_s27 = scalar_lea.hbm %s17399_s9, 128 }
0x428a   :  { %p13179_p5 = scmp.ne.s32.totalorder %s17399_s9, %s13178_s27  ;;  %p13182_p6 = scmp.lt.u32.totalorder %s13178_s27, %s17399_s9 }
0x428c   :  { %p13184_p7 = pnand %p13182_p6, %p13179_p5 }
0x428e   :  { %13187 = shalt.err (!%p13184_p7)
}
0x428f   :  { %10048 = dma.vmem_to_hbm [thread:$0]  %s10046_s25, 128, %s17399_s9, [#allocation5]   ;;  %v7374_v2 = vpop.f32.mrb[94].mxu1  ;;  %vm7381_vm14 = vcmask 23552  }
0x4290   :  { %v7378_v55 = vmax.f32 %v7374_v2, 1e-30  ;;  %v12304_v56 = vpop.f32.mrb[95].mxu1 }
0x4292   :  { %13156 = vlog2.f32 %v7378_v55 }
0x429c   :  { %v13157_v49 = vpop.eup %13156 }
0x429d   :  { %v7380_v52 = vmul.f32 0.6931472, %v13157_v49 }
0x429f   :  { %7382 = vst.msk [vmem:[%s17398_s8] sm:$0xff] %vm7381_vm14, %v7380_v52 }
0x42a0   :  { %13188 = dma.done.wait [#allocation5], 128  }
0x42a1   :  { %13189 = vsyncadd [#allocation5], 4294967168 }
0x42a2   :  { %10054 = vsyncpa [#allocation5], 1 }

</bundles_post_ra>
